<compile_context>
chip_gen: v7x
topology: tpu7x:2x2x1
jax: 0.10.0
libtpu: 0.0.40
codegen_flags: <defaults>
</compile_context>

<pallas_src>
import functools

import jax
import jax.numpy as jnp
from jax.experimental import pallas as pl
from jax.experimental.pallas import tpu as pltpu

HEADS = 2
PATCH = 2
LN_EPS = 1e-5


def _parallel(naxes=1):
    return pltpu.CompilerParams(dimension_semantics=("parallel",) * naxes)


def _num_tensorcores():
    """Best-effort TensorCore count (2 on v7x-style megacore, 1 on v5e/v6e)."""
    try:
        info = pltpu.get_tpu_info()
        for name in ("num_cores", "core_count", "num_tensorcores", "tensorcore_count"):
            v = getattr(info, name, None)
            if isinstance(v, int) and v > 0:
                return v
    except Exception:
        pass
    return 1


# ----------------------------------------------------------------------------
# Kernel 1: generic (x @ w + b) with optional SiLU   (stem conv via im2col)
# ----------------------------------------------------------------------------

def _mm_bias_act_kernel(x_ref, w_ref, b_ref, o_ref, *, act):
    xb = x_ref[...].astype(jnp.bfloat16)                        # bf16 MXU operands
    acc = jnp.dot(xb, w_ref[...], preferred_element_type=jnp.float32)
    acc = acc + b_ref[...]
    if act == "silu":
        acc = acc * jax.nn.sigmoid(acc)
    o_ref[...] = acc.astype(o_ref.dtype)


def matmul_bias_act(x, w, b, act=None, nblocks=1):
    M, K = x.shape
    Kw, N = w.shape
    assert K == Kw
    nblocks = max(1, int(nblocks))
    while nblocks > 1 and (M % nblocks or (M // nblocks) % 8):
        nblocks -= 1                                            # keep exact, 8-aligned rows
    tm = M // nblocks
    return pl.pallas_call(
        functools.partial(_mm_bias_act_kernel, act=act),
        out_shape=jax.ShapeDtypeStruct((M, N), jnp.float32),
        grid=(nblocks,),
        in_specs=[
            pl.BlockSpec((tm, K), lambda i: (i, 0)),
            pl.BlockSpec((K, N), lambda i: (0, 0)),
            pl.BlockSpec((1, N), lambda i: (0, 0)),
        ],
        out_specs=pl.BlockSpec((tm, N), lambda i: (i, 0)),
        compiler_params=_parallel(1),
    )(x, w, b.reshape(1, N))


# ----------------------------------------------------------------------------
# Kernel 2: fused 3x3 stride-1 conv (+BN+SiLU), optional fused 1x1 conv.
#           Multiple input refs are concatenated along channels in VMEM
#           (replaces the XLA concat before the fuse conv), and the 9 taps are
#           merged into ONE (Bb*H*W, 9*Cin) im2col slab -> single deep matmul.
# ----------------------------------------------------------------------------

def _conv3x3_kernel(*refs, H, W, n_in, fuse_pw):
    x_refs = refs[:n_in]
    if fuse_pw:
        w_ref, b_ref, w2_ref, b2_ref, o_ref = refs[n_in:]
    else:
        w_ref, b_ref, o_ref = refs[n_in:]

    xs = [r[...] for r in x_refs]                               # (Bb, H+2, W+2, Cin_i) f32
    x = xs[0] if n_in == 1 else jnp.concatenate(xs, axis=-1)
    bb = x.shape[0]
    cin = x.shape[-1]

    cols = []
    for i in range(3):
        for j in range(3):
            cols.append(x[:, i:i + H, j:j + W, :])              # shifted windows (VMEM)
    slab = jnp.concatenate(cols, axis=-1)                       # (Bb, H, W, 9*Cin)
    slab = slab.reshape(bb * H * W, 9 * cin).astype(jnp.bfloat16)

    acc = jnp.dot(slab, w_ref[...], preferred_element_type=jnp.float32) + b_ref[...]
    acc = acc * jax.nn.sigmoid(acc)                             # ConvNormAct: SiLU
    if fuse_pw:                                                 # fused 1x1 conv (no act)
        acc = jnp.dot(acc.astype(jnp.bfloat16), w2_ref[...],
                      preferred_element_type=jnp.float32) + b2_ref[...]
    o_ref[...] = acc.reshape(bb, H * W, acc.shape[-1]).astype(o_ref.dtype)


def conv3x3_silu(xs, w_flat, b_vec, pw_w=None, pw_b=None, ncores=1):
    """xs: list of NHWC inputs (concatenated along channels inside the kernel)."""
    B, H, W, _ = xs[0].shape
    # TODO(synk): halo padding stays XLA-side; in-kernel border masking would remove it.
    xps = [jnp.pad(x, ((0, 0), (1, 1), (1, 1), (0, 0))) for x in xs]
    fuse_pw = pw_w is not None
    cout = pw_w.shape[-1] if fuse_pw else w_flat.shape[-1]

    bb = B if ncores <= 1 else max(1, B // ncores)              # 1-TC: one grid step
    while B % bb:
        bb -= 1

    in_specs, args = [], []
    for xp, x in zip(xps, xs):
        in_specs.append(pl.BlockSpec((bb, H + 2, W + 2, x.shape[-1]),
                                     lambda i: (i, 0, 0, 0)))
        args.append(xp)
    in_specs += [pl.BlockSpec(w_flat.shape, lambda i: (0, 0)),
                 pl.BlockSpec((1, w_flat.shape[-1]), lambda i: (0, 0))]
    args += [w_flat, b_vec.reshape(1, -1)]
    if fuse_pw:
        in_specs += [pl.BlockSpec(pw_w.shape, lambda i: (0, 0)),
                     pl.BlockSpec((1, pw_w.shape[-1]), lambda i: (0, 0))]
        args += [pw_w, pw_b.reshape(1, -1)]

    out = pl.pallas_call(
        functools.partial(_conv3x3_kernel, H=H, W=W, n_in=len(xs), fuse_pw=fuse_pw),
        out_shape=jax.ShapeDtypeStruct((B, H * W, cout), jnp.float32),
        grid=(B // bb,),
        in_specs=in_specs,
        out_specs=pl.BlockSpec((bb, H * W, cout), lambda i: (i, 0, 0)),
        compiler_params=_parallel(1),
    )(*args)
    return out.reshape(B, H, W, cout)


# ----------------------------------------------------------------------------
# Kernel 3: fused transformer stack (DEPTH pre-LN layers + final LN + 1x1 proj conv)
# ----------------------------------------------------------------------------

def _transformer_kernel(seq_ref, lng_ref, lnb_ref, wqkv_ref, bqkv_ref,
                        wpr_ref, bpr_ref, w1_ref, b1_ref, w2_ref, b2_ref,
                        flg_ref, flb_ref, pw_ref, pb_ref, o_ref,
                        *, depth, heads, n_tok):
    x = seq_ref[...].astype(jnp.float32)                        # (mb, d)
    mb, d = x.shape
    bp = mb // n_tok
    hd = d // heads

    def ln(v, g, b):
        mu = jnp.mean(v, axis=-1, keepdims=True)
        var = jnp.mean(jnp.square(v - mu), axis=-1, keepdims=True)
        return (v - mu) * jax.lax.rsqrt(var + LN_EPS) * g + b

    # TODO(synk): switch to lax.fori_loop over stacked refs[l] at real depth (vreg pressure).
    for l in range(depth):
        # ---- MHSA (pre-LN): one fused QKV matmul, heads batched in the einsum dim ----
        h = ln(x, lng_ref[l, 0], lnb_ref[l, 0]).astype(jnp.bfloat16)
        qkv = jnp.dot(h, wqkv_ref[l], preferred_element_type=jnp.float32) + bqkv_ref[l]
        # columns ordered (q|k|v, heads, hd); 1/sqrt(hd) folded into the q columns at init
        def head_stack(base):
            parts = [qkv[:, base + hh * hd: base + (hh + 1) * hd].reshape(bp, n_tok, hd)
                     for hh in range(heads)]
            return jnp.concatenate(parts, axis=0).astype(jnp.bfloat16)  # (heads*bp, N, hd)
        qb, kb, vb = head_stack(0), head_stack(d), head_stack(2 * d)

        s = jnp.einsum("bqd,bkd->bqk", qb, kb, preferred_element_type=jnp.float32)
        m = jnp.max(s, axis=-1, keepdims=True)
        p = jnp.exp(s - m)
        p = p * pl.reciprocal(jnp.sum(p, axis=-1, keepdims=True), approx=True)
        o = jnp.einsum("bqk,bkd->bqd", p.astype(jnp.bfloat16), vb,
                       preferred_element_type=jnp.float32)       # (heads*bp, N, hd)
        o_cat = jnp.concatenate(
            [o[hh * bp:(hh + 1) * bp].reshape(mb, hd) for hh in range(heads)], axis=-1)
        x = x + jnp.dot(o_cat.astype(jnp.bfloat16), wpr_ref[l],
                        preferred_element_type=jnp.float32) + bpr_ref[l]

        # ---- FFN (pre-LN), residual fused ----
        h = ln(x, lng_ref[l, 1], lnb_ref[l, 1]).astype(jnp.bfloat16)
        h1 = jnp.dot(h, w1_ref[l], preferred_element_type=jnp.float32) + b1_ref[l]
        h1 = h1 * jax.nn.sigmoid(h1)
        x = x + jnp.dot(h1.astype(jnp.bfloat16), w2_ref[l],
                        preferred_element_type=jnp.float32) + b2_ref[l]

    # ---- final LN + fused 1x1 projection conv (d -> C) + BN + SiLU epilogue ----
    x = ln(x, flg_ref[...], flb_ref[...])
    y = jnp.dot(x.astype(jnp.bfloat16), pw_ref[...],
                preferred_element_type=jnp.float32) + pb_ref[...]
    y = y * jax.nn.sigmoid(y)
    o_ref[...] = y.astype(o_ref.dtype)


def transformer_stack(seq, tp, proj_w, proj_b, n_tok, heads, ncores):
    M, d = seq.shape
    BP = M // n_tok
    split = ncores if (ncores > 1 and BP % ncores == 0) else 1   # 1 on v5e/v6e
    mb = (BP // split) * n_tok
    C = proj_w.shape[-1]

    arrs = [seq, tp["ln_g"], tp["ln_b"], tp["wqkv"], tp["bqkv"], tp["wproj"],
            tp["bproj"], tp["fc1_w"], tp["fc1_b"], tp["fc2_w"], tp["fc2_b"],
            tp["fln_g"], tp["fln_b"], proj_w, proj_b.reshape(1, -1)]
    in_specs = [pl.BlockSpec((mb, d), lambda i: (i, 0))]
    for a in arrs[1:]:
        in_specs.append(pl.BlockSpec(a.shape, lambda i, _r=a.ndim: (0,) * _r))

    depth = tp["wqkv"].shape[0]
    mlp = tp["fc1_w"].shape[-1]
    flops = M * (depth * (6 * d * d + 4 * n_tok * d + 2 * d * d + 4 * d * mlp)
                 + 2 * d * C)
    trans = depth * M * (n_tok + mlp) + M * C
    bytes_acc = sum(int(a.size) * a.dtype.itemsize for a in arrs) + M * C * 4

    return pl.pallas_call(
        functools.partial(_transformer_kernel, depth=depth, heads=heads, n_tok=n_tok),
        out_shape=jax.ShapeDtypeStruct((M, C), jnp.float32),
        grid=(split,),
        in_specs=in_specs,
        out_specs=pl.BlockSpec((mb, C), lambda i: (i, 0)),
        compiler_params=_parallel(1),
        cost_estimate=pl.CostEstimate(flops=int(flops), transcendentals=int(trans),
                                      bytes_accessed=int(bytes_acc)),
    )(*arrs)


# ----------------------------------------------------------------------------
# XLA glue: stride-2 im2col (stem only), unfold/fold, full forward
# ----------------------------------------------------------------------------

def im2col(x_nhwc, kh, kw, stride, pad):
    x = jnp.pad(x_nhwc, ((0, 0), (pad, pad), (pad, pad), (0, 0)))
    B, H, W, C = x.shape
    oh = (H - kh) // stride + 1
    ow = (W - kw) // stride + 1
    cols = []
    for i in range(kh):
        for j in range(kw):
            cols.append(x[:, i:i + (oh - 1) * stride + 1:stride,
                             j:j + (ow - 1) * stride + 1:stride, :])
    patches = jnp.concatenate(cols, axis=-1)                    # (B, oh, ow, kh*kw*C)
    return patches.reshape(B * oh * ow, kh * kw * C), oh, ow


def forward(params, x_nchw):
    B = x_nchw.shape[0]
    ncores = _num_tensorcores()
    x = jnp.transpose(x_nchw, (0, 2, 3, 1)).astype(jnp.float32)          # NCHW -> NHWC

    # ---- stem: modified ConvNormAct (in=4), conv3x3 s2 p1 + BN + SiLU ----
    cols, oh, ow = im2col(x, 3, 3, 2, 1)
    x = matmul_bias_act(cols, params["stem_w"], params["stem_b"], act="silu",
                        nblocks=ncores).reshape(B, oh, ow, -1)

    # ---- MobileViT block ----
    shortcut = x
    # local rep: 3x3 conv + BN + SiLU fused with the 1x1 conv (-> d) in one kernel
    x = conv3x3_silu([x], params["kxk_w"], params["kxk_b"],
                     pw_w=params["p1_w"], pw_b=params["p1_b"], ncores=ncores)
    _, H, W, d = x.shape

    # unfold into (B*patch_area, num_patches, d)  -- XLA glue transposes
    nph, npw = H // PATCH, W // PATCH
    xp = x.reshape(B, nph, PATCH, npw, PATCH, d)
    xp = jnp.transpose(xp, (0, 2, 4, 1, 3, 5)).reshape(B * PATCH * PATCH, nph * npw, d)
    BP, N = xp.shape[0], xp.shape[1]
    seq = xp.reshape(BP * N, d)

    # fused transformer stack + final LN + 1x1 projection conv (d -> C, SiLU)
    seq = transformer_stack(seq, params["transformer"], params["proj_w"],
                            params["proj_b"], N, HEADS, ncores)
    C = seq.shape[-1]

    # fold back to (B, H, W, C)
    x = seq.reshape(B, PATCH, PATCH, nph, npw, C)
    x = jnp.transpose(x, (0, 3, 1, 4, 2, 5)).reshape(B, H, W, C)

    # fusion: conv3x3(concat([shortcut, x])) + BN + SiLU, channel-concat done in VMEM
    x = conv3x3_silu([shortcut, x], params["fuse_w"], params["fuse_b"], ncores=ncores)

    # features_last.flatten(start_dim=1) in torch NCHW order
    x = jnp.transpose(x, (0, 3, 1, 2))
    return x.reshape(B, -1)


# ----------------------------------------------------------------------------
# Deterministic parameter init (fresh-init BatchNorms folded; weights stored bf16)
# ----------------------------------------------------------------------------

def make_params(seed=0):
    key = jax.random.PRNGKey(seed)
    keys = iter(jax.random.split(key, 64))
    bn_scale = 1.0 / jnp.sqrt(1.0 + 1e-5)   # gamma=1, beta=0, mean=0, var=1

    def conv_fold(k, kh, kw, cin, cout):
        fan_in = kh * kw * cin
        w = jax.random.normal(k, (kh * kw, cin, cout), jnp.float32) * (2.0 / fan_in) ** 0.5
        w = (w * bn_scale).reshape(kh * kw * cin, cout)          # im2col / slab layout
        return w.astype(jnp.bfloat16), jnp.zeros((cout,), jnp.float32)

    def linear(k, cin, cout):
        kw_, kb_ = jax.random.split(k)
        bound = 1.0 / (cin ** 0.5)
        w = jax.random.uniform(kw_, (cin, cout), jnp.float32, -bound, bound)
        b = jax.random.uniform(kb_, (cout,), jnp.float32, -bound, bound)
        return w, b

    C_IN, STEM, C, D, DEPTH, MLP = 4, 16, 16, 32, 2, 64
    HD = D // HEADS
    scale = 1.0 / (HD ** 0.5)

    p = {}
    p["stem_w"], p["stem_b"] = conv_fold(next(keys), 3, 3, C_IN, STEM)      # (36, 16)
    p["kxk_w"], p["kxk_b"] = conv_fold(next(keys), 3, 3, STEM, C)           # (144, 16)
    p["p1_w"], p["p1_b"] = conv_fold(next(keys), 1, 1, C, D)                # (16, 32)

    wqkv, bqkv, wproj, bproj = [], [], [], []
    fc1w, fc1b, fc2w, fc2b = [], [], [], []
    for _ in range(DEPTH):
        w, b = linear(next(keys), D, 3 * D)                     # columns = (q|k|v, heads, hd)
        w = w.at[:, :D].multiply(scale)                         # fold 1/sqrt(hd) into Q
        b = b.at[:D].multiply(scale)
        wqkv.append(w); bqkv.append(b.reshape(1, 3 * D))
        w, b = linear(next(keys), D, D)
        wproj.append(w); bproj.append(b.reshape(1, D))
        w, b = linear(next(keys), D, MLP)
        fc1w.append(w); fc1b.append(b.reshape(1, MLP))
        w, b = linear(next(keys), MLP, D)
        fc2w.append(w); fc2b.append(b.reshape(1, D))
    p["transformer"] = {
        "ln_g": jnp.ones((DEPTH, 2, 1, D), jnp.float32),
        "ln_b": jnp.zeros((DEPTH, 2, 1, D), jnp.float32),
        "wqkv": jnp.stack(wqkv).astype(jnp.bfloat16),           # (DEPTH, D, 3D)
        "bqkv": jnp.stack(bqkv),                                # (DEPTH, 1, 3D)
        "wproj": jnp.stack(wproj).astype(jnp.bfloat16),         # (DEPTH, D, D)
        "bproj": jnp.stack(bproj),                              # (DEPTH, 1, D)
        "fc1_w": jnp.stack(fc1w).astype(jnp.bfloat16),
        "fc1_b": jnp.stack(fc1b),
        "fc2_w": jnp.stack(fc2w).astype(jnp.bfloat16),
        "fc2_b": jnp.stack(fc2b),
        "fln_g": jnp.ones((1, D), jnp.float32),
        "fln_b": jnp.zeros((1, D), jnp.float32),
    }
    p["proj_w"], p["proj_b"] = conv_fold(next(keys), 1, 1, D, C)            # (32, 16)
    p["fuse_w"], p["fuse_b"] = conv_fold(next(keys), 3, 3, STEM + C, C)     # (288, 16)
    return p


if __name__ == "__main__":
    x = jax.random.normal(jax.random.PRNGKey(0), (2, 4, 16, 16), jnp.float32)  # NCHW
    params = make_params(seed=0)
    feats = jax.jit(forward)(params, x)
    feats = jax.block_until_ready(feats)
    assert feats.shape == (2, 16 * 8 * 8), feats.shape     # (B, C*H*W) flatten
    assert bool(jnp.all(jnp.isfinite(feats)))
    print("KERNEL_OK")
</pallas_src>

<mosaic_0001>
module attributes {stable_mosaic.version = 11 : i64} {
  func.func @_mm_bias_act_kernel(%arg0: i32, %arg1: memref<128x36xf32, #tpu.memory_space<vmem>>, %arg2: memref<36x16xbf16, #tpu.memory_space<vmem>>, %arg3: memref<1x16xf32, #tpu.memory_space<vmem>>, %arg4: memref<128x16xf32, #tpu.memory_space<vmem>>) attributes {dimension_semantics = [#tpu.dimension_semantics<parallel>], iteration_bounds = array<i64: 1>, scalar_prefetch = 0 : i64, scratch_operands = 0 : i64, tpu.core_type = #tpu.core_type<tc>, window_params = [{transform_indices = @transform_0, window_bounds = array<i64: 128, 36>}, {pipeline_mode = #tpu.pipeline_mode<synchronous>, transform_indices = @transform_1, window_bounds = array<i64: 36, 16>}, {pipeline_mode = #tpu.pipeline_mode<synchronous>, transform_indices = @transform_2, window_bounds = array<i64: 1, 16>}, {transform_indices = @transform_3, window_bounds = array<i64: 128, 16>}]} {
    %c0 = arith.constant 0 : index
    %c0_0 = arith.constant 0 : index
    %0 = vector.load %arg1[%c0, %c0_0] : memref<128x36xf32, #tpu.memory_space<vmem>>, vector<128x36xf32>
    %1 = arith.truncf %0 : vector<128x36xf32> to vector<128x36xbf16>
    %c0_1 = arith.constant 0 : index
    %c0_2 = arith.constant 0 : index
    %2 = vector.load %arg2[%c0_1, %c0_2] : memref<36x16xbf16, #tpu.memory_space<vmem>>, vector<36x16xbf16>
    %cst = arith.constant dense<0.000000e+00> : vector<128x16xf32>
    %3 = tpu.matmul %1, %2, %cst {dimension_numbers = #tpu.dot_dimension_numbers<[1], [0], [0], [1], [0, 0, 1, 1], [], []>} : vector<128x36xbf16>, vector<36x16xbf16>, vector<128x16xf32> -> vector<128x16xf32>
    %c0_3 = arith.constant 0 : index
    %c0_4 = arith.constant 0 : index
    %4 = vector.load %arg3[%c0_3, %c0_4] : memref<1x16xf32, #tpu.memory_space<vmem>>, vector<1x16xf32>
    %5 = vector.broadcast %4 : vector<1x16xf32> to vector<128x16xf32>
    %6 = arith.addf %3, %5 : vector<128x16xf32>
    %7 = arith.negf %6 : vector<128x16xf32>
    %8 = math.exp %7 : vector<128x16xf32>
    %cst_5 = arith.constant 1.000000e+00 : f32
    %9 = vector.broadcast %cst_5 : f32 to vector<128x16xf32>
    %10 = arith.addf %9, %8 : vector<128x16xf32>
    %11 = arith.divf %9, %10 : vector<128x16xf32>
    %12 = arith.mulf %6, %11 : vector<128x16xf32>
    %c0_6 = arith.constant 0 : index
    %c0_7 = arith.constant 0 : index
    %13 = vector.load %arg4[%c0_6, %c0_7] : memref<128x16xf32, #tpu.memory_space<vmem>>, vector<128x16xf32>
    tpu.vector_store %arg4[%c0_6, %c0_7], %12 {strides = array<i32>} : memref<128x16xf32, #tpu.memory_space<vmem>>, vector<128x16xf32>,
    return
  }
  func.func @transform_0(%arg0: i32) -> (i32, i32) {
    %c0_i32 = arith.constant 0 : i32
    %c0_i32_0 = arith.constant 0 : i32
    return %arg0, %c0_i32 : i32, i32
  }
  func.func @transform_1(%arg0: i32) -> (i32, i32) {
    %c0_i32 = arith.constant 0 : i32
    %c0_i32_0 = arith.constant 0 : i32
    %c0_i32_1 = arith.constant 0 : i32
    return %c0_i32, %c0_i32_0 : i32, i32
  }
  func.func @transform_2(%arg0: i32) -> (i32, i32) {
    %c0_i32 = arith.constant 0 : i32
    %c0_i32_0 = arith.constant 0 : i32
    %c0_i32_1 = arith.constant 0 : i32
    return %c0_i32, %c0_i32_0 : i32, i32
  }
  func.func @transform_3(%arg0: i32) -> (i32, i32) {
    %c0_i32 = arith.constant 0 : i32
    %c0_i32_0 = arith.constant 0 : i32
    return %arg0, %c0_i32 : i32, i32
  }
}

module attributes {stable_mosaic.version = 11 : i64} {
  func.func @_conv3x3_kernel(%arg0: i32, %arg1: memref<2x10x10x16xf32, #tpu.memory_space<vmem>>, %arg2: memref<144x16xbf16, #tpu.memory_space<vmem>>, %arg3: memref<1x16xf32, #tpu.memory_space<vmem>>, %arg4: memref<16x32xbf16, #tpu.memory_space<vmem>>, %arg5: memref<1x32xf32, #tpu.memory_space<vmem>>, %arg6: memref<2x64x32xf32, #tpu.memory_space<vmem>>) attributes {dimension_semantics = [#tpu.dimension_semantics<parallel>], iteration_bounds = array<i64: 1>, scalar_prefetch = 0 : i64, scratch_operands = 0 : i64, tpu.core_type = #tpu.core_type<tc>, window_params = [{transform_indices = @transform_0, window_bounds = array<i64: 2, 10, 10, 16>}, {pipeline_mode = #tpu.pipeline_mode<synchronous>, transform_indices = @transform_1, window_bounds = array<i64: 144, 16>}, {pipeline_mode = #tpu.pipeline_mode<synchronous>, transform_indices = @transform_2, window_bounds = array<i64: 1, 16>}, {pipeline_mode = #tpu.pipeline_mode<synchronous>, transform_indices = @transform_3, window_bounds = array<i64: 16, 32>}, {pipeline_mode = #tpu.pipeline_mode<synchronous>, transform_indices = @transform_4, window_bounds = array<i64: 1, 32>}, {transform_indices = @transform_5, window_bounds = array<i64: 2, 64, 32>}]} {
    %c0 = arith.constant 0 : index
    %c0_0 = arith.constant 0 : index
    %c0_1 = arith.constant 0 : index
    %c0_2 = arith.constant 0 : index
    %0 = vector.load %arg1[%c0, %c0_0, %c0_1, %c0_2] : memref<2x10x10x16xf32, #tpu.memory_space<vmem>>, vector<2x10x10x16xf32>
    %1 = vector.extract_strided_slice %0 {offsets = [0, 0, 0, 0], sizes = [2, 8, 8, 16], strides = [1, 1, 1, 1]} : vector<2x10x10x16xf32> to vector<2x8x8x16xf32>
    %2 = vector.extract_strided_slice %0 {offsets = [0, 0, 1, 0], sizes = [2, 8, 8, 16], strides = [1, 1, 1, 1]} : vector<2x10x10x16xf32> to vector<2x8x8x16xf32>
    %3 = vector.extract_strided_slice %0 {offsets = [0, 0, 2, 0], sizes = [2, 8, 8, 16], strides = [1, 1, 1, 1]} : vector<2x10x10x16xf32> to vector<2x8x8x16xf32>
    %4 = vector.extract_strided_slice %0 {offsets = [0, 1, 0, 0], sizes = [2, 8, 8, 16], strides = [1, 1, 1, 1]} : vector<2x10x10x16xf32> to vector<2x8x8x16xf32>
    %5 = vector.extract_strided_slice %0 {offsets = [0, 1, 1, 0], sizes = [2, 8, 8, 16], strides = [1, 1, 1, 1]} : vector<2x10x10x16xf32> to vector<2x8x8x16xf32>
    %6 = vector.extract_strided_slice %0 {offsets = [0, 1, 2, 0], sizes = [2, 8, 8, 16], strides = [1, 1, 1, 1]} : vector<2x10x10x16xf32> to vector<2x8x8x16xf32>
    %7 = vector.extract_strided_slice %0 {offsets = [0, 2, 0, 0], sizes = [2, 8, 8, 16], strides = [1, 1, 1, 1]} : vector<2x10x10x16xf32> to vector<2x8x8x16xf32>
    %8 = vector.extract_strided_slice %0 {offsets = [0, 2, 1, 0], sizes = [2, 8, 8, 16], strides = [1, 1, 1, 1]} : vector<2x10x10x16xf32> to vector<2x8x8x16xf32>
    %9 = vector.extract_strided_slice %0 {offsets = [0, 2, 2, 0], sizes = [2, 8, 8, 16], strides = [1, 1, 1, 1]} : vector<2x10x10x16xf32> to vector<2x8x8x16xf32>
    %10 = tpu.concatenate %1, %2, %3, %4, %5, %6, %7, %8, %9 in 3 : vector<2x8x8x16xf32>, vector<2x8x8x16xf32>, vector<2x8x8x16xf32>, vector<2x8x8x16xf32>, vector<2x8x8x16xf32>, vector<2x8x8x16xf32>, vector<2x8x8x16xf32>, vector<2x8x8x16xf32>, vector<2x8x8x16xf32> -> vector<2x8x8x144xf32>
    %11 = vector.shape_cast %10 : vector<2x8x8x144xf32> to vector<128x144xf32>
    %12 = arith.truncf %11 : vector<128x144xf32> to vector<128x144xbf16>
    %c0_3 = arith.constant 0 : index
    %c0_4 = arith.constant 0 : index
    %13 = vector.load %arg2[%c0_3, %c0_4] : memref<144x16xbf16, #tpu.memory_space<vmem>>, vector<144x16xbf16>
    %cst = arith.constant dense<0.000000e+00> : vector<128x16xf32>
    %14 = tpu.matmul %12, %13, %cst {dimension_numbers = #tpu.dot_dimension_numbers<[1], [0], [0], [1], [0, 0, 1, 1], [], []>} : vector<128x144xbf16>, vector<144x16xbf16>, vector<128x16xf32> -> vector<128x16xf32>
    %c0_5 = arith.constant 0 : index
    %c0_6 = arith.constant 0 : index
    %15 = vector.load %arg3[%c0_5, %c0_6] : memref<1x16xf32, #tpu.memory_space<vmem>>, vector<1x16xf32>
    %16 = vector.broadcast %15 : vector<1x16xf32> to vector<128x16xf32>
    %17 = arith.addf %14, %16 : vector<128x16xf32>
    %18 = arith.negf %17 : vector<128x16xf32>
    %19 = math.exp %18 : vector<128x16xf32>
    %cst_7 = arith.constant 1.000000e+00 : f32
    %20 = vector.broadcast %cst_7 : f32 to vector<128x16xf32>
    %21 = arith.addf %20, %19 : vector<128x16xf32>
    %22 = arith.divf %20, %21 : vector<128x16xf32>
    %23 = arith.mulf %17, %22 : vector<128x16xf32>
    %24 = arith.truncf %23 : vector<128x16xf32> to vector<128x16xbf16>
    %c0_8 = arith.constant 0 : index
    %c0_9 = arith.constant 0 : index
    %25 = vector.load %arg4[%c0_8, %c0_9] : memref<16x32xbf16, #tpu.memory_space<vmem>>, vector<16x32xbf16>
    %cst_10 = arith.constant dense<0.000000e+00> : vector<128x32xf32>
    %26 = tpu.matmul %24, %25, %cst_10 {dimension_numbers = #tpu.dot_dimension_numbers<[1], [0], [0], [1], [0, 0, 1, 1], [], []>} : vector<128x16xbf16>, vector<16x32xbf16>, vector<128x32xf32> -> vector<128x32xf32>
    %c0_11 = arith.constant 0 : index
    %c0_12 = arith.constant 0 : index
    %27 = vector.load %arg5[%c0_11, %c0_12] : memref<1x32xf32, #tpu.memory_space<vmem>>, vector<1x32xf32>
    %28 = vector.broadcast %27 : vector<1x32xf32> to vector<128x32xf32>
    %29 = arith.addf %26, %28 : vector<128x32xf32>
    %30 = vector.shape_cast %29 : vector<128x32xf32> to vector<2x64x32xf32>
    %c0_13 = arith.constant 0 : index
    %c0_14 = arith.constant 0 : index
    %c0_15 = arith.constant 0 : index
    %31 = vector.load %arg6[%c0_13, %c0_14, %c0_15] : memref<2x64x32xf32, #tpu.memory_space<vmem>>, vector<2x64x32xf32>
    tpu.vector_store %arg6[%c0_13, %c0_14, %c0_15], %30 {strides = array<i32>} : memref<2x64x32xf32, #tpu.memory_space<vmem>>, vector<2x64x32xf32>,
    return
  }
  func.func @transform_0(%arg0: i32) -> (i32, i32, i32, i32) {
    %c0_i32 = arith.constant 0 : i32
    %c0_i32_0 = arith.constant 0 : i32
    %c0_i32_1 = arith.constant 0 : i32
    %c0_i32_2 = arith.constant 0 : i32
    return %arg0, %c0_i32, %c0_i32_0, %c0_i32_1 : i32, i32, i32, i32
  }
  func.func @transform_1(%arg0: i32) -> (i32, i32) {
    %c0_i32 = arith.constant 0 : i32
    %c0_i32_0 = arith.constant 0 : i32
    %c0_i32_1 = arith.constant 0 : i32
    return %c0_i32, %c0_i32_0 : i32, i32
  }
  func.func @transform_2(%arg0: i32) -> (i32, i32) {
    %c0_i32 = arith.constant 0 : i32
    %c0_i32_0 = arith.constant 0 : i32
    %c0_i32_1 = arith.constant 0 : i32
    return %c0_i32, %c0_i32_0 : i32, i32
  }
  func.func @transform_3(%arg0: i32) -> (i32, i32) {
    %c0_i32 = arith.constant 0 : i32
    %c0_i32_0 = arith.constant 0 : i32
    %c0_i32_1 = arith.constant 0 : i32
    return %c0_i32, %c0_i32_0 : i32, i32
  }
  func.func @transform_4(%arg0: i32) -> (i32, i32) {
    %c0_i32 = arith.constant 0 : i32
    %c0_i32_0 = arith.constant 0 : i32
    %c0_i32_1 = arith.constant 0 : i32
    return %c0_i32, %c0_i32_0 : i32, i32
  }
  func.func @transform_5(%arg0: i32) -> (i32, i32, i32) {
    %c0_i32 = arith.constant 0 : i32
    %c0_i32_0 = arith.constant 0 : i32
    %c0_i32_1 = arith.constant 0 : i32
    return %arg0, %c0_i32, %c0_i32_0 : i32, i32, i32
  }
}

module attributes {stable_mosaic.version = 11 : i64} {
  func.func @_transformer_kernel(%arg0: i32, %arg1: memref<128x32xf32, #tpu.memory_space<vmem>>, %arg2: memref<2x2x1x32xf32, #tpu.memory_space<vmem>>, %arg3: memref<2x2x1x32xf32, #tpu.memory_space<vmem>>, %arg4: memref<2x32x96xbf16, #tpu.memory_space<vmem>>, %arg5: memref<2x1x96xf32, #tpu.memory_space<vmem>>, %arg6: memref<2x32x32xbf16, #tpu.memory_space<vmem>>, %arg7: memref<2x1x32xf32, #tpu.memory_space<vmem>>, %arg8: memref<2x32x64xbf16, #tpu.memory_space<vmem>>, %arg9: memref<2x1x64xf32, #tpu.memory_space<vmem>>, %arg10: memref<2x64x32xbf16, #tpu.memory_space<vmem>>, %arg11: memref<2x1x32xf32, #tpu.memory_space<vmem>>, %arg12: memref<1x32xf32, #tpu.memory_space<vmem>>, %arg13: memref<1x32xf32, #tpu.memory_space<vmem>>, %arg14: memref<32x16xbf16, #tpu.memory_space<vmem>>, %arg15: memref<1x16xf32, #tpu.memory_space<vmem>>, %arg16: memref<128x16xf32, #tpu.memory_space<vmem>>) attributes {dimension_semantics = [#tpu.dimension_semantics<parallel>], iteration_bounds = array<i64: 1>, scalar_prefetch = 0 : i64, scratch_operands = 0 : i64, tpu.core_type = #tpu.core_type<tc>, window_params = [{transform_indices = @transform_0, window_bounds = array<i64: 128, 32>}, {pipeline_mode = #tpu.pipeline_mode<synchronous>, transform_indices = @transform_1, window_bounds = array<i64: 2, 2, 1, 32>}, {pipeline_mode = #tpu.pipeline_mode<synchronous>, transform_indices = @transform_2, window_bounds = array<i64: 2, 2, 1, 32>}, {pipeline_mode = #tpu.pipeline_mode<synchronous>, transform_indices = @transform_3, window_bounds = array<i64: 2, 32, 96>}, {pipeline_mode = #tpu.pipeline_mode<synchronous>, transform_indices = @transform_4, window_bounds = array<i64: 2, 1, 96>}, {pipeline_mode = #tpu.pipeline_mode<synchronous>, transform_indices = @transform_5, window_bounds = array<i64: 2, 32, 32>}, {pipeline_mode = #tpu.pipeline_mode<synchronous>, transform_indices = @transform_6, window_bounds = array<i64: 2, 1, 32>}, {pipeline_mode = #tpu.pipeline_mode<synchronous>, transform_indices = @transform_7, window_bounds = array<i64: 2, 32, 64>}, {pipeline_mode = #tpu.pipeline_mode<synchronous>, transform_indices = @transform_8, window_bounds = array<i64: 2, 1, 64>}, {pipeline_mode = #tpu.pipeline_mode<synchronous>, transform_indices = @transform_9, window_bounds = array<i64: 2, 64, 32>}, {pipeline_mode = #tpu.pipeline_mode<synchronous>, transform_indices = @transform_10, window_bounds = array<i64: 2, 1, 32>}, {pipeline_mode = #tpu.pipeline_mode<synchronous>, transform_indices = @transform_11, window_bounds = array<i64: 1, 32>}, {pipeline_mode = #tpu.pipeline_mode<synchronous>, transform_indices = @transform_12, window_bounds = array<i64: 1, 32>}, {pipeline_mode = #tpu.pipeline_mode<synchronous>, transform_indices = @transform_13, window_bounds = array<i64: 32, 16>}, {pipeline_mode = #tpu.pipeline_mode<synchronous>, transform_indices = @transform_14, window_bounds = array<i64: 1, 16>}, {transform_indices = @transform_15, window_bounds = array<i64: 128, 16>}]} {
    %c0 = arith.constant 0 : index
    %c0_0 = arith.constant 0 : index
    %0 = vector.load %arg1[%c0, %c0_0] : memref<128x32xf32, #tpu.memory_space<vmem>>, vector<128x32xf32>
    %c0_1 = arith.constant 0 : index
    %c0_2 = arith.constant 0 : index
    %c0_3 = arith.constant 0 : index
    %c0_4 = arith.constant 0 : index
    %1 = vector.load %arg2[%c0_1, %c0_2, %c0_3, %c0_4] : memref<2x2x1x32xf32, #tpu.memory_space<vmem>>, vector<1x1x1x32xf32>
    %2 = vector.shape_cast %1 : vector<1x1x1x32xf32> to vector<1x32xf32>
    %c0_5 = arith.constant 0 : index
    %c0_6 = arith.constant 0 : index
    %c0_7 = arith.constant 0 : index
    %c0_8 = arith.constant 0 : index
    %3 = vector.load %arg3[%c0_5, %c0_6, %c0_7, %c0_8] : memref<2x2x1x32xf32, #tpu.memory_space<vmem>>, vector<1x1x1x32xf32>
    %4 = vector.shape_cast %3 : vector<1x1x1x32xf32> to vector<1x32xf32>
    %cst = arith.constant dense<0.000000e+00> : vector<128xf32>
    %5 = vector.multi_reduction <add>, %0, %cst [1] : vector<128x32xf32> to vector<128xf32>
    %6 = vector.shape_cast %5 : vector<128xf32> to vector<128x1xf32>
    %cst_9 = arith.constant 3.200000e+01 : f32
    %7 = vector.broadcast %cst_9 : f32 to vector<128x1xf32>
    %8 = arith.divf %6, %7 : vector<128x1xf32>
    %9 = vector.broadcast %8 : vector<128x1xf32> to vector<128x32xf32>
    %10 = arith.subf %0, %9 : vector<128x32xf32>
    %11 = arith.mulf %10, %10 : vector<128x32xf32>
    %cst_10 = arith.constant dense<0.000000e+00> : vector<128xf32>
    %12 = vector.multi_reduction <add>, %11, %cst_10 [1] : vector<128x32xf32> to vector<128xf32>
    %13 = vector.shape_cast %12 : vector<128xf32> to vector<128x1xf32>
    %cst_11 = arith.constant 3.200000e+01 : f32
    %14 = vector.broadcast %cst_11 : f32 to vector<128x1xf32>
    %15 = arith.divf %13, %14 : vector<128x1xf32>
    %16 = vector.broadcast %8 : vector<128x1xf32> to vector<128x32xf32>
    %17 = arith.subf %0, %16 : vector<128x32xf32>
    %cst_12 = arith.constant 9.99999974E-6 : f32
    %18 = vector.broadcast %cst_12 : f32 to vector<128x1xf32>
    %19 = arith.addf %15, %18 : vector<128x1xf32>
    %20 = math.rsqrt %19 : vector<128x1xf32>
    %21 = vector.broadcast %20 : vector<128x1xf32> to vector<128x32xf32>
    %22 = arith.mulf %17, %21 : vector<128x32xf32>
    %23 = vector.broadcast %2 : vector<1x32xf32> to vector<128x32xf32>
    %24 = arith.mulf %22, %23 : vector<128x32xf32>
    %25 = vector.broadcast %4 : vector<1x32xf32> to vector<128x32xf32>
    %26 = arith.addf %24, %25 : vector<128x32xf32>
    %27 = arith.truncf %26 : vector<128x32xf32> to vector<128x32xbf16>
    %c0_13 = arith.constant 0 : index
    %c0_14 = arith.constant 0 : index
    %c0_15 = arith.constant 0 : index
    %28 = vector.load %arg4[%c0_13, %c0_14, %c0_15] : memref<2x32x96xbf16, #tpu.memory_space<vmem>>, vector<1x32x96xbf16>
    %29 = vector.shape_cast %28 : vector<1x32x96xbf16> to vector<32x96xbf16>
    %cst_16 = arith.constant dense<0.000000e+00> : vector<128x96xf32>
    %30 = tpu.matmul %27, %29, %cst_16 {dimension_numbers = #tpu.dot_dimension_numbers<[1], [0], [0], [1], [0, 0, 1, 1], [], []>} : vector<128x32xbf16>, vector<32x96xbf16>, vector<128x96xf32> -> vector<128x96xf32>
    %c0_17 = arith.constant 0 : index
    %c0_18 = arith.constant 0 : index
    %c0_19 = arith.constant 0 : index
    %31 = vector.load %arg5[%c0_17, %c0_18, %c0_19] : memref<2x1x96xf32, #tpu.memory_space<vmem>>, vector<1x1x96xf32>
    %32 = vector.shape_cast %31 : vector<1x1x96xf32> to vector<1x96xf32>
    %33 = vector.broadcast %32 : vector<1x96xf32> to vector<128x96xf32>
    %34 = arith.addf %30, %33 : vector<128x96xf32>
    %35 = vector.extract_strided_slice %34 {offsets = [0, 0], sizes = [128, 16], strides = [1, 1]} : vector<128x96xf32> to vector<128x16xf32>
    %36 = vector.shape_cast %35 : vector<128x16xf32> to vector<8x16x16xf32>
    %37 = vector.extract_strided_slice %34 {offsets = [0, 16], sizes = [128, 16], strides = [1, 1]} : vector<128x96xf32> to vector<128x16xf32>
    %38 = vector.shape_cast %37 : vector<128x16xf32> to vector<8x16x16xf32>
    %39 = tpu.concatenate %36, %38 in 0 : vector<8x16x16xf32>, vector<8x16x16xf32> -> vector<16x16x16xf32>
    %40 = arith.truncf %39 : vector<16x16x16xf32> to vector<16x16x16xbf16>
    %41 = vector.extract_strided_slice %34 {offsets = [0, 32], sizes = [128, 16], strides = [1, 1]} : vector<128x96xf32> to vector<128x16xf32>
    %42 = vector.shape_cast %41 : vector<128x16xf32> to vector<8x16x16xf32>
    %43 = vector.extract_strided_slice %34 {offsets = [0, 48], sizes = [128, 16], strides = [1, 1]} : vector<128x96xf32> to vector<128x16xf32>
    %44 = vector.shape_cast %43 : vector<128x16xf32> to vector<8x16x16xf32>
    %45 = tpu.concatenate %42, %44 in 0 : vector<8x16x16xf32>, vector<8x16x16xf32> -> vector<16x16x16xf32>
    %46 = arith.truncf %45 : vector<16x16x16xf32> to vector<16x16x16xbf16>
    %47 = vector.extract_strided_slice %34 {offsets = [0, 64], sizes = [128, 16], strides = [1, 1]} : vector<128x96xf32> to vector<128x16xf32>
    %48 = vector.shape_cast %47 : vector<128x16xf32> to vector<8x16x16xf32>
    %49 = vector.extract_strided_slice %34 {offsets = [0, 80], sizes = [128, 16], strides = [1, 1]} : vector<128x96xf32> to vector<128x16xf32>
    %50 = vector.shape_cast %49 : vector<128x16xf32> to vector<8x16x16xf32>
    %51 = tpu.concatenate %48, %50 in 0 : vector<8x16x16xf32>, vector<8x16x16xf32> -> vector<16x16x16xf32>
    %52 = arith.truncf %51 : vector<16x16x16xf32> to vector<16x16x16xbf16>
    "tpu.trace_start"() <{level = 10 : i32, message = "bqd,bkd->bqk"}> : () -> ()
    %cst_20 = arith.constant dense<0.000000e+00> : vector<16x16x16xf32>
    %53 = tpu.matmul %40, %46, %cst_20 {dimension_numbers = #tpu.dot_dimension_numbers<[2], [2], [1], [1], [0, 0, 0, 1, 1, 1], [0], [0]>} : vector<16x16x16xbf16>, vector<16x16x16xbf16>, vector<16x16x16xf32> -> vector<16x16x16xf32>
    "tpu.trace_stop"() : () -> ()
    %cst_21 = arith.constant dense<0xFF800000> : vector<16x16xf32>
    %54 = vector.multi_reduction <maximumf>, %53, %cst_21 [2] : vector<16x16x16xf32> to vector<16x16xf32>
    %55 = vector.shape_cast %54 : vector<16x16xf32> to vector<16x16x1xf32>
    %56 = vector.broadcast %55 : vector<16x16x1xf32> to vector<16x16x16xf32>
    %57 = arith.subf %53, %56 : vector<16x16x16xf32>
    %58 = math.exp %57 : vector<16x16x16xf32>
    %cst_22 = arith.constant dense<0.000000e+00> : vector<16x16xf32>
    %59 = vector.multi_reduction <add>, %58, %cst_22 [2] : vector<16x16x16xf32> to vector<16x16xf32>
    %60 = vector.shape_cast %59 : vector<16x16xf32> to vector<16x16x1xf32>
    %61 = tpu.reciprocal %60 {approx = true} : vector<16x16x1xf32> -> vector<16x16x1xf32>
    %62 = vector.broadcast %61 : vector<16x16x1xf32> to vector<16x16x16xf32>
    %63 = arith.mulf %58, %62 : vector<16x16x16xf32>
    %64 = arith.truncf %63 : vector<16x16x16xf32> to vector<16x16x16xbf16>
    "tpu.trace_start"() <{level = 10 : i32, message = "bqk,bkd->bqd"}> : () -> ()
    %cst_23 = arith.constant dense<0.000000e+00> : vector<16x16x16xf32>
    %65 = tpu.matmul %64, %52, %cst_23 {dimension_numbers = #tpu.dot_dimension_numbers<[2], [1], [1], [2], [0, 0, 0, 1, 1, 2], [0], [0]>} : vector<16x16x16xbf16>, vector<16x16x16xbf16>, vector<16x16x16xf32> -> vector<16x16x16xf32>
    "tpu.trace_stop"() : () -> ()
    %66 = vector.extract_strided_slice %65 {offsets = [0, 0, 0], sizes = [8, 16, 16], strides = [1, 1, 1]} : vector<16x16x16xf32> to vector<8x16x16xf32>
    %67 = vector.shape_cast %66 : vector<8x16x16xf32> to vector<128x16xf32>
    %68 = vector.extract_strided_slice %65 {offsets = [8, 0, 0], sizes = [8, 16, 16], strides = [1, 1, 1]} : vector<16x16x16xf32> to vector<8x16x16xf32>
    %69 = vector.shape_cast %68 : vector<8x16x16xf32> to vector<128x16xf32>
    %70 = tpu.concatenate %67, %69 in 1 : vector<128x16xf32>, vector<128x16xf32> -> vector<128x32xf32>
    %71 = arith.truncf %70 : vector<128x32xf32> to vector<128x32xbf16>
    %c0_24 = arith.constant 0 : index
    %c0_25 = arith.constant 0 : index
    %c0_26 = arith.constant 0 : index
    %72 = vector.load %arg6[%c0_24, %c0_25, %c0_26] : memref<2x32x32xbf16, #tpu.memory_space<vmem>>, vector<1x32x32xbf16>
    %73 = vector.shape_cast %72 : vector<1x32x32xbf16> to vector<32x32xbf16>
    %cst_27 = arith.constant dense<0.000000e+00> : vector<128x32xf32>
    %74 = tpu.matmul %71, %73, %cst_27 {dimension_numbers = #tpu.dot_dimension_numbers<[1], [0], [0], [1], [0, 0, 1, 1], [], []>} : vector<128x32xbf16>, vector<32x32xbf16>, vector<128x32xf32> -> vector<128x32xf32>
    %75 = arith.addf %0, %74 : vector<128x32xf32>
    %c0_28 = arith.constant 0 : index
    %c0_29 = arith.constant 0 : index
    %c0_30 = arith.constant 0 : index
    %76 = vector.load %arg7[%c0_28, %c0_29, %c0_30] : memref<2x1x32xf32, #tpu.memory_space<vmem>>, vector<1x1x32xf32>
    %77 = vector.shape_cast %76 : vector<1x1x32xf32> to vector<1x32xf32>
    %78 = vector.broadcast %77 : vector<1x32xf32> to vector<128x32xf32>
    %79 = arith.addf %75, %78 : vector<128x32xf32>
    %c0_31 = arith.constant 0 : index
    %c1 = arith.constant 1 : index
    %c0_32 = arith.constant 0 : index
    %c0_33 = arith.constant 0 : index
    %80 = vector.load %arg2[%c0_31, %c1, %c0_32, %c0_33] : memref<2x2x1x32xf32, #tpu.memory_space<vmem>>, vector<1x1x1x32xf32>
    %81 = vector.shape_cast %80 : vector<1x1x1x32xf32> to vector<1x32xf32>
    %c0_34 = arith.constant 0 : index
    %c1_35 = arith.constant 1 : index
    %c0_36 = arith.constant 0 : index
    %c0_37 = arith.constant 0 : index
    %82 = vector.load %arg3[%c0_34, %c1_35, %c0_36, %c0_37] : memref<2x2x1x32xf32, #tpu.memory_space<vmem>>, vector<1x1x1x32xf32>
    %83 = vector.shape_cast %82 : vector<1x1x1x32xf32> to vector<1x32xf32>
    %cst_38 = arith.constant dense<0.000000e+00> : vector<128xf32>
    %84 = vector.multi_reduction <add>, %79, %cst_38 [1] : vector<128x32xf32> to vector<128xf32>
    %85 = vector.shape_cast %84 : vector<128xf32> to vector<128x1xf32>
    %cst_39 = arith.constant 3.200000e+01 : f32
    %86 = vector.broadcast %cst_39 : f32 to vector<128x1xf32>
    %87 = arith.divf %85, %86 : vector<128x1xf32>
    %88 = vector.broadcast %87 : vector<128x1xf32> to vector<128x32xf32>
    %89 = arith.subf %79, %88 : vector<128x32xf32>
    %90 = arith.mulf %89, %89 : vector<128x32xf32>
    %cst_40 = arith.constant dense<0.000000e+00> : vector<128xf32>
    %91 = vector.multi_reduction <add>, %90, %cst_40 [1] : vector<128x32xf32> to vector<128xf32>
    %92 = vector.shape_cast %91 : vector<128xf32> to vector<128x1xf32>
    %cst_41 = arith.constant 3.200000e+01 : f32
    %93 = vector.broadcast %cst_41 : f32 to vector<128x1xf32>
    %94 = arith.divf %92, %93 : vector<128x1xf32>
    %95 = vector.broadcast %87 : vector<128x1xf32> to vector<128x32xf32>
    %96 = arith.subf %79, %95 : vector<128x32xf32>
    %cst_42 = arith.constant 9.99999974E-6 : f32
    %97 = vector.broadcast %cst_42 : f32 to vector<128x1xf32>
    %98 = arith.addf %94, %97 : vector<128x1xf32>
    %99 = math.rsqrt %98 : vector<128x1xf32>
    %100 = vector.broadcast %99 : vector<128x1xf32> to vector<128x32xf32>
    %101 = arith.mulf %96, %100 : vector<128x32xf32>
    %102 = vector.broadcast %81 : vector<1x32xf32> to vector<128x32xf32>
    %103 = arith.mulf %101, %102 : vector<128x32xf32>
    %104 = vector.broadcast %83 : vector<1x32xf32> to vector<128x32xf32>
    %105 = arith.addf %103, %104 : vector<128x32xf32>
    %106 = arith.truncf %105 : vector<128x32xf32> to vector<128x32xbf16>
    %c0_43 = arith.constant 0 : index
    %c0_44 = arith.constant 0 : index
    %c0_45 = arith.constant 0 : index
    %107 = vector.load %arg8[%c0_43, %c0_44, %c0_45] : memref<2x32x64xbf16, #tpu.memory_space<vmem>>, vector<1x32x64xbf16>
    %108 = vector.shape_cast %107 : vector<1x32x64xbf16> to vector<32x64xbf16>
    %cst_46 = arith.constant dense<0.000000e+00> : vector<128x64xf32>
    %109 = tpu.matmul %106, %108, %cst_46 {dimension_numbers = #tpu.dot_dimension_numbers<[1], [0], [0], [1], [0, 0, 1, 1], [], []>} : vector<128x32xbf16>, vector<32x64xbf16>, vector<128x64xf32> -> vector<128x64xf32>
    %c0_47 = arith.constant 0 : index
    %c0_48 = arith.constant 0 : index
    %c0_49 = arith.constant 0 : index
    %110 = vector.load %arg9[%c0_47, %c0_48, %c0_49] : memref<2x1x64xf32, #tpu.memory_space<vmem>>, vector<1x1x64xf32>
    %111 = vector.shape_cast %110 : vector<1x1x64xf32> to vector<1x64xf32>
    %112 = vector.broadcast %111 : vector<1x64xf32> to vector<128x64xf32>
    %113 = arith.addf %109, %112 : vector<128x64xf32>
    %114 = arith.negf %113 : vector<128x64xf32>
    %115 = math.exp %114 : vector<128x64xf32>
    %cst_50 = arith.constant 1.000000e+00 : f32
    %116 = vector.broadcast %cst_50 : f32 to vector<128x64xf32>
    %117 = arith.addf %116, %115 : vector<128x64xf32>
    %118 = arith.divf %116, %117 : vector<128x64xf32>
    %119 = arith.mulf %113, %118 : vector<128x64xf32>
    %120 = arith.truncf %119 : vector<128x64xf32> to vector<128x64xbf16>
    %c0_51 = arith.constant 0 : index
    %c0_52 = arith.constant 0 : index
    %c0_53 = arith.constant 0 : index
    %121 = vector.load %arg10[%c0_51, %c0_52, %c0_53] : memref<2x64x32xbf16, #tpu.memory_space<vmem>>, vector<1x64x32xbf16>
    %122 = vector.shape_cast %121 : vector<1x64x32xbf16> to vector<64x32xbf16>
    %cst_54 = arith.constant dense<0.000000e+00> : vector<128x32xf32>
    %123 = tpu.matmul %120, %122, %cst_54 {dimension_numbers = #tpu.dot_dimension_numbers<[1], [0], [0], [1], [0, 0, 1, 1], [], []>} : vector<128x64xbf16>, vector<64x32xbf16>, vector<128x32xf32> -> vector<128x32xf32>
    %124 = arith.addf %79, %123 : vector<128x32xf32>
    %c0_55 = arith.constant 0 : index
    %c0_56 = arith.constant 0 : index
    %c0_57 = arith.constant 0 : index
    %125 = vector.load %arg11[%c0_55, %c0_56, %c0_57] : memref<2x1x32xf32, #tpu.memory_space<vmem>>, vector<1x1x32xf32>
    %126 = vector.shape_cast %125 : vector<1x1x32xf32> to vector<1x32xf32>
    %127 = vector.broadcast %126 : vector<1x32xf32> to vector<128x32xf32>
    %128 = arith.addf %124, %127 : vector<128x32xf32>
    %c1_58 = arith.constant 1 : index
    %c0_59 = arith.constant 0 : index
    %c0_60 = arith.constant 0 : index
    %c0_61 = arith.constant 0 : index
    %129 = vector.load %arg2[%c1_58, %c0_59, %c0_60, %c0_61] : memref<2x2x1x32xf32, #tpu.memory_space<vmem>>, vector<1x1x1x32xf32>
    %130 = vector.shape_cast %129 : vector<1x1x1x32xf32> to vector<1x32xf32>
    %c1_62 = arith.constant 1 : index
    %c0_63 = arith.constant 0 : index
    %c0_64 = arith.constant 0 : index
    %c0_65 = arith.constant 0 : index
    %131 = vector.load %arg3[%c1_62, %c0_63, %c0_64, %c0_65] : memref<2x2x1x32xf32, #tpu.memory_space<vmem>>, vector<1x1x1x32xf32>
    %132 = vector.shape_cast %131 : vector<1x1x1x32xf32> to vector<1x32xf32>
    %cst_66 = arith.constant dense<0.000000e+00> : vector<128xf32>
    %133 = vector.multi_reduction <add>, %128, %cst_66 [1] : vector<128x32xf32> to vector<128xf32>
    %134 = vector.shape_cast %133 : vector<128xf32> to vector<128x1xf32>
    %cst_67 = arith.constant 3.200000e+01 : f32
    %135 = vector.broadcast %cst_67 : f32 to vector<128x1xf32>
    %136 = arith.divf %134, %135 : vector<128x1xf32>
    %137 = vector.broadcast %136 : vector<128x1xf32> to vector<128x32xf32>
    %138 = arith.subf %128, %137 : vector<128x32xf32>
    %139 = arith.mulf %138, %138 : vector<128x32xf32>
    %cst_68 = arith.constant dense<0.000000e+00> : vector<128xf32>
    %140 = vector.multi_reduction <add>, %139, %cst_68 [1] : vector<128x32xf32> to vector<128xf32>
    %141 = vector.shape_cast %140 : vector<128xf32> to vector<128x1xf32>
    %cst_69 = arith.constant 3.200000e+01 : f32
    %142 = vector.broadcast %cst_69 : f32 to vector<128x1xf32>
    %143 = arith.divf %141, %142 : vector<128x1xf32>
    %144 = vector.broadcast %136 : vector<128x1xf32> to vector<128x32xf32>
    %145 = arith.subf %128, %144 : vector<128x32xf32>
    %cst_70 = arith.constant 9.99999974E-6 : f32
    %146 = vector.broadcast %cst_70 : f32 to vector<128x1xf32>
    %147 = arith.addf %143, %146 : vector<128x1xf32>
    %148 = math.rsqrt %147 : vector<128x1xf32>
    %149 = vector.broadcast %148 : vector<128x1xf32> to vector<128x32xf32>
    %150 = arith.mulf %145, %149 : vector<128x32xf32>
    %151 = vector.broadcast %130 : vector<1x32xf32> to vector<128x32xf32>
    %152 = arith.mulf %150, %151 : vector<128x32xf32>
    %153 = vector.broadcast %132 : vector<1x32xf32> to vector<128x32xf32>
    %154 = arith.addf %152, %153 : vector<128x32xf32>
    %155 = arith.truncf %154 : vector<128x32xf32> to vector<128x32xbf16>
    %c1_71 = arith.constant 1 : index
    %c0_72 = arith.constant 0 : index
    %c0_73 = arith.constant 0 : index
    %156 = vector.load %arg4[%c1_71, %c0_72, %c0_73] : memref<2x32x96xbf16, #tpu.memory_space<vmem>>, vector<1x32x96xbf16>
    %157 = vector.shape_cast %156 : vector<1x32x96xbf16> to vector<32x96xbf16>
    %cst_74 = arith.constant dense<0.000000e+00> : vector<128x96xf32>
    %158 = tpu.matmul %155, %157, %cst_74 {dimension_numbers = #tpu.dot_dimension_numbers<[1], [0], [0], [1], [0, 0, 1, 1], [], []>} : vector<128x32xbf16>, vector<32x96xbf16>, vector<128x96xf32> -> vector<128x96xf32>
    %c1_75 = arith.constant 1 : index
    %c0_76 = arith.constant 0 : index
    %c0_77 = arith.constant 0 : index
    %159 = vector.load %arg5[%c1_75, %c0_76, %c0_77] : memref<2x1x96xf32, #tpu.memory_space<vmem>>, vector<1x1x96xf32>
    %160 = vector.shape_cast %159 : vector<1x1x96xf32> to vector<1x96xf32>
    %161 = vector.broadcast %160 : vector<1x96xf32> to vector<128x96xf32>
    %162 = arith.addf %158, %161 : vector<128x96xf32>
    %163 = vector.extract_strided_slice %162 {offsets = [0, 0], sizes = [128, 16], strides = [1, 1]} : vector<128x96xf32> to vector<128x16xf32>
    %164 = vector.shape_cast %163 : vector<128x16xf32> to vector<8x16x16xf32>
    %165 = vector.extract_strided_slice %162 {offsets = [0, 16], sizes = [128, 16], strides = [1, 1]} : vector<128x96xf32> to vector<128x16xf32>
    %166 = vector.shape_cast %165 : vector<128x16xf32> to vector<8x16x16xf32>
    %167 = tpu.concatenate %164, %166 in 0 : vector<8x16x16xf32>, vector<8x16x16xf32> -> vector<16x16x16xf32>
    %168 = arith.truncf %167 : vector<16x16x16xf32> to vector<16x16x16xbf16>
    %169 = vector.extract_strided_slice %162 {offsets = [0, 32], sizes = [128, 16], strides = [1, 1]} : vector<128x96xf32> to vector<128x16xf32>
    %170 = vector.shape_cast %169 : vector<128x16xf32> to vector<8x16x16xf32>
    %171 = vector.extract_strided_slice %162 {offsets = [0, 48], sizes = [128, 16], strides = [1, 1]} : vector<128x96xf32> to vector<128x16xf32>
    %172 = vector.shape_cast %171 : vector<128x16xf32> to vector<8x16x16xf32>
    %173 = tpu.concatenate %170, %172 in 0 : vector<8x16x16xf32>, vector<8x16x16xf32> -> vector<16x16x16xf32>
    %174 = arith.truncf %173 : vector<16x16x16xf32> to vector<16x16x16xbf16>
    %175 = vector.extract_strided_slice %162 {offsets = [0, 64], sizes = [128, 16], strides = [1, 1]} : vector<128x96xf32> to vector<128x16xf32>
    %176 = vector.shape_cast %175 : vector<128x16xf32> to vector<8x16x16xf32>
    %177 = vector.extract_strided_slice %162 {offsets = [0, 80], sizes = [128, 16], strides = [1, 1]} : vector<128x96xf32> to vector<128x16xf32>
    %178 = vector.shape_cast %177 : vector<128x16xf32> to vector<8x16x16xf32>
    %179 = tpu.concatenate %176, %178 in 0 : vector<8x16x16xf32>, vector<8x16x16xf32> -> vector<16x16x16xf32>
    %180 = arith.truncf %179 : vector<16x16x16xf32> to vector<16x16x16xbf16>
    "tpu.trace_start"() <{level = 10 : i32, message = "bqd,bkd->bqk"}> : () -> ()
    %cst_78 = arith.constant dense<0.000000e+00> : vector<16x16x16xf32>
    %181 = tpu.matmul %168, %174, %cst_78 {dimension_numbers = #tpu.dot_dimension_numbers<[2], [2], [1], [1], [0, 0, 0, 1, 1, 1], [0], [0]>} : vector<16x16x16xbf16>, vector<16x16x16xbf16>, vector<16x16x16xf32> -> vector<16x16x16xf32>
    "tpu.trace_stop"() : () -> ()
    %cst_79 = arith.constant dense<0xFF800000> : vector<16x16xf32>
    %182 = vector.multi_reduction <maximumf>, %181, %cst_79 [2] : vector<16x16x16xf32> to vector<16x16xf32>
    %183 = vector.shape_cast %182 : vector<16x16xf32> to vector<16x16x1xf32>
    %184 = vector.broadcast %183 : vector<16x16x1xf32> to vector<16x16x16xf32>
    %185 = arith.subf %181, %184 : vector<16x16x16xf32>
    %186 = math.exp %185 : vector<16x16x16xf32>
    %cst_80 = arith.constant dense<0.000000e+00> : vector<16x16xf32>
    %187 = vector.multi_reduction <add>, %186, %cst_80 [2] : vector<16x16x16xf32> to vector<16x16xf32>
    %188 = vector.shape_cast %187 : vector<16x16xf32> to vector<16x16x1xf32>
    %189 = tpu.reciprocal %188 {approx = true} : vector<16x16x1xf32> -> vector<16x16x1xf32>
    %190 = vector.broadcast %189 : vector<16x16x1xf32> to vector<16x16x16xf32>
    %191 = arith.mulf %186, %190 : vector<16x16x16xf32>
    %192 = arith.truncf %191 : vector<16x16x16xf32> to vector<16x16x16xbf16>
    "tpu.trace_start"() <{level = 10 : i32, message = "bqk,bkd->bqd"}> : () -> ()
    %cst_81 = arith.constant dense<0.000000e+00> : vector<16x16x16xf32>
    %193 = tpu.matmul %192, %180, %cst_81 {dimension_numbers = #tpu.dot_dimension_numbers<[2], [1], [1], [2], [0, 0, 0, 1, 1, 2], [0], [0]>} : vector<16x16x16xbf16>, vector<16x16x16xbf16>, vector<16x16x16xf32> -> vector<16x16x16xf32>
    "tpu.trace_stop"() : () -> ()
    %194 = vector.extract_strided_slice %193 {offsets = [0, 0, 0], sizes = [8, 16, 16], strides = [1, 1, 1]} : vector<16x16x16xf32> to vector<8x16x16xf32>
    %195 = vector.shape_cast %194 : vector<8x16x16xf32> to vector<128x16xf32>
    %196 = vector.extract_strided_slice %193 {offsets = [8, 0, 0], sizes = [8, 16, 16], strides = [1, 1, 1]} : vector<16x16x16xf32> to vector<8x16x16xf32>
    %197 = vector.shape_cast %196 : vector<8x16x16xf32> to vector<128x16xf32>
    %198 = tpu.concatenate %195, %197 in 1 : vector<128x16xf32>, vector<128x16xf32> -> vector<128x32xf32>
    %199 = arith.truncf %198 : vector<128x32xf32> to vector<128x32xbf16>
    %c1_82 = arith.constant 1 : index
    %c0_83 = arith.constant 0 : index
    %c0_84 = arith.constant 0 : index
    %200 = vector.load %arg6[%c1_82, %c0_83, %c0_84] : memref<2x32x32xbf16, #tpu.memory_space<vmem>>, vector<1x32x32xbf16>
    %201 = vector.shape_cast %200 : vector<1x32x32xbf16> to vector<32x32xbf16>
    %cst_85 = arith.constant dense<0.000000e+00> : vector<128x32xf32>
    %202 = tpu.matmul %199, %201, %cst_85 {dimension_numbers = #tpu.dot_dimension_numbers<[1], [0], [0], [1], [0, 0, 1, 1], [], []>} : vector<128x32xbf16>, vector<32x32xbf16>, vector<128x32xf32> -> vector<128x32xf32>
    %203 = arith.addf %128, %202 : vector<128x32xf32>
    %c1_86 = arith.constant 1 : index
    %c0_87 = arith.constant 0 : index
    %c0_88 = arith.constant 0 : index
    %204 = vector.load %arg7[%c1_86, %c0_87, %c0_88] : memref<2x1x32xf32, #tpu.memory_space<vmem>>, vector<1x1x32xf32>
    %205 = vector.shape_cast %204 : vector<1x1x32xf32> to vector<1x32xf32>
    %206 = vector.broadcast %205 : vector<1x32xf32> to vector<128x32xf32>
    %207 = arith.addf %203, %206 : vector<128x32xf32>
    %c1_89 = arith.constant 1 : index
    %c1_90 = arith.constant 1 : index
    %c0_91 = arith.constant 0 : index
    %c0_92 = arith.constant 0 : index
    %208 = vector.load %arg2[%c1_89, %c1_90, %c0_91, %c0_92] : memref<2x2x1x32xf32, #tpu.memory_space<vmem>>, vector<1x1x1x32xf32>
    %209 = vector.shape_cast %208 : vector<1x1x1x32xf32> to vector<1x32xf32>
    %c1_93 = arith.constant 1 : index
    %c1_94 = arith.constant 1 : index
    %c0_95 = arith.constant 0 : index
    %c0_96 = arith.constant 0 : index
    %210 = vector.load %arg3[%c1_93, %c1_94, %c0_95, %c0_96] : memref<2x2x1x32xf32, #tpu.memory_space<vmem>>, vector<1x1x1x32xf32>
    %211 = vector.shape_cast %210 : vector<1x1x1x32xf32> to vector<1x32xf32>
    %cst_97 = arith.constant dense<0.000000e+00> : vector<128xf32>
    %212 = vector.multi_reduction <add>, %207, %cst_97 [1] : vector<128x32xf32> to vector<128xf32>
    %213 = vector.shape_cast %212 : vector<128xf32> to vector<128x1xf32>
    %cst_98 = arith.constant 3.200000e+01 : f32
    %214 = vector.broadcast %cst_98 : f32 to vector<128x1xf32>
    %215 = arith.divf %213, %214 : vector<128x1xf32>
    %216 = vector.broadcast %215 : vector<128x1xf32> to vector<128x32xf32>
    %217 = arith.subf %207, %216 : vector<128x32xf32>
    %218 = arith.mulf %217, %217 : vector<128x32xf32>
    %cst_99 = arith.constant dense<0.000000e+00> : vector<128xf32>
    %219 = vector.multi_reduction <add>, %218, %cst_99 [1] : vector<128x32xf32> to vector<128xf32>
    %220 = vector.shape_cast %219 : vector<128xf32> to vector<128x1xf32>
    %cst_100 = arith.constant 3.200000e+01 : f32
    %221 = vector.broadcast %cst_100 : f32 to vector<128x1xf32>
    %222 = arith.divf %220, %221 : vector<128x1xf32>
    %223 = vector.broadcast %215 : vector<128x1xf32> to vector<128x32xf32>
    %224 = arith.subf %207, %223 : vector<128x32xf32>
    %cst_101 = arith.constant 9.99999974E-6 : f32
    %225 = vector.broadcast %cst_101 : f32 to vector<128x1xf32>
    %226 = arith.addf %222, %225 : vector<128x1xf32>
    %227 = math.rsqrt %226 : vector<128x1xf32>
    %228 = vector.broadcast %227 : vector<128x1xf32> to vector<128x32xf32>
    %229 = arith.mulf %224, %228 : vector<128x32xf32>
    %230 = vector.broadcast %209 : vector<1x32xf32> to vector<128x32xf32>
    %231 = arith.mulf %229, %230 : vector<128x32xf32>
    %232 = vector.broadcast %211 : vector<1x32xf32> to vector<128x32xf32>
    %233 = arith.addf %231, %232 : vector<128x32xf32>
    %234 = arith.truncf %233 : vector<128x32xf32> to vector<128x32xbf16>
    %c1_102 = arith.constant 1 : index
    %c0_103 = arith.constant 0 : index
    %c0_104 = arith.constant 0 : index
    %235 = vector.load %arg8[%c1_102, %c0_103, %c0_104] : memref<2x32x64xbf16, #tpu.memory_space<vmem>>, vector<1x32x64xbf16>
    %236 = vector.shape_cast %235 : vector<1x32x64xbf16> to vector<32x64xbf16>
    %cst_105 = arith.constant dense<0.000000e+00> : vector<128x64xf32>
    %237 = tpu.matmul %234, %236, %cst_105 {dimension_numbers = #tpu.dot_dimension_numbers<[1], [0], [0], [1], [0, 0, 1, 1], [], []>} : vector<128x32xbf16>, vector<32x64xbf16>, vector<128x64xf32> -> vector<128x64xf32>
    %c1_106 = arith.constant 1 : index
    %c0_107 = arith.constant 0 : index
    %c0_108 = arith.constant 0 : index
    %238 = vector.load %arg9[%c1_106, %c0_107, %c0_108] : memref<2x1x64xf32, #tpu.memory_space<vmem>>, vector<1x1x64xf32>
    %239 = vector.shape_cast %238 : vector<1x1x64xf32> to vector<1x64xf32>
    %240 = vector.broadcast %239 : vector<1x64xf32> to vector<128x64xf32>
    %241 = arith.addf %237, %240 : vector<128x64xf32>
    %242 = arith.negf %241 : vector<128x64xf32>
    %243 = math.exp %242 : vector<128x64xf32>
    %cst_109 = arith.constant 1.000000e+00 : f32
    %244 = vector.broadcast %cst_109 : f32 to vector<128x64xf32>
    %245 = arith.addf %244, %243 : vector<128x64xf32>
    %246 = arith.divf %244, %245 : vector<128x64xf32>
    %247 = arith.mulf %241, %246 : vector<128x64xf32>
    %248 = arith.truncf %247 : vector<128x64xf32> to vector<128x64xbf16>
    %c1_110 = arith.constant 1 : index
    %c0_111 = arith.constant 0 : index
    %c0_112 = arith.constant 0 : index
    %249 = vector.load %arg10[%c1_110, %c0_111, %c0_112] : memref<2x64x32xbf16, #tpu.memory_space<vmem>>, vector<1x64x32xbf16>
    %250 = vector.shape_cast %249 : vector<1x64x32xbf16> to vector<64x32xbf16>
    %cst_113 = arith.constant dense<0.000000e+00> : vector<128x32xf32>
    %251 = tpu.matmul %248, %250, %cst_113 {dimension_numbers = #tpu.dot_dimension_numbers<[1], [0], [0], [1], [0, 0, 1, 1], [], []>} : vector<128x64xbf16>, vector<64x32xbf16>, vector<128x32xf32> -> vector<128x32xf32>
    %252 = arith.addf %207, %251 : vector<128x32xf32>
    %c1_114 = arith.constant 1 : index
    %c0_115 = arith.constant 0 : index
    %c0_116 = arith.constant 0 : index
    %253 = vector.load %arg11[%c1_114, %c0_115, %c0_116] : memref<2x1x32xf32, #tpu.memory_space<vmem>>, vector<1x1x32xf32>
    %254 = vector.shape_cast %253 : vector<1x1x32xf32> to vector<1x32xf32>
    %255 = vector.broadcast %254 : vector<1x32xf32> to vector<128x32xf32>
    %256 = arith.addf %252, %255 : vector<128x32xf32>
    %c0_117 = arith.constant 0 : index
    %c0_118 = arith.constant 0 : index
    %257 = vector.load %arg12[%c0_117, %c0_118] : memref<1x32xf32, #tpu.memory_space<vmem>>, vector<1x32xf32>
    %c0_119 = arith.constant 0 : index
    %c0_120 = arith.constant 0 : index
    %258 = vector.load %arg13[%c0_119, %c0_120] : memref<1x32xf32, #tpu.memory_space<vmem>>, vector<1x32xf32>
    %cst_121 = arith.constant dense<0.000000e+00> : vector<128xf32>
    %259 = vector.multi_reduction <add>, %256, %cst_121 [1] : vector<128x32xf32> to vector<128xf32>
    %260 = vector.shape_cast %259 : vector<128xf32> to vector<128x1xf32>
    %cst_122 = arith.constant 3.200000e+01 : f32
    %261 = vector.broadcast %cst_122 : f32 to vector<128x1xf32>
    %262 = arith.divf %260, %261 : vector<128x1xf32>
    %263 = vector.broadcast %262 : vector<128x1xf32> to vector<128x32xf32>
    %264 = arith.subf %256, %263 : vector<128x32xf32>
    %265 = arith.mulf %264, %264 : vector<128x32xf32>
    %cst_123 = arith.constant dense<0.000000e+00> : vector<128xf32>
    %266 = vector.multi_reduction <add>, %265, %cst_123 [1] : vector<128x32xf32> to vector<128xf32>
    %267 = vector.shape_cast %266 : vector<128xf32> to vector<128x1xf32>
    %cst_124 = arith.constant 3.200000e+01 : f32
    %268 = vector.broadcast %cst_124 : f32 to vector<128x1xf32>
    %269 = arith.divf %267, %268 : vector<128x1xf32>
    %270 = vector.broadcast %262 : vector<128x1xf32> to vector<128x32xf32>
    %271 = arith.subf %256, %270 : vector<128x32xf32>
    %cst_125 = arith.constant 9.99999974E-6 : f32
    %272 = vector.broadcast %cst_125 : f32 to vector<128x1xf32>
    %273 = arith.addf %269, %272 : vector<128x1xf32>
    %274 = math.rsqrt %273 : vector<128x1xf32>
    %275 = vector.broadcast %274 : vector<128x1xf32> to vector<128x32xf32>
    %276 = arith.mulf %271, %275 : vector<128x32xf32>
    %277 = vector.broadcast %257 : vector<1x32xf32> to vector<128x32xf32>
    %278 = arith.mulf %276, %277 : vector<128x32xf32>
    %279 = vector.broadcast %258 : vector<1x32xf32> to vector<128x32xf32>
    %280 = arith.addf %278, %279 : vector<128x32xf32>
    %281 = arith.truncf %280 : vector<128x32xf32> to vector<128x32xbf16>
    %c0_126 = arith.constant 0 : index
    %c0_127 = arith.constant 0 : index
    %282 = vector.load %arg14[%c0_126, %c0_127] : memref<32x16xbf16, #tpu.memory_space<vmem>>, vector<32x16xbf16>
    %cst_128 = arith.constant dense<0.000000e+00> : vector<128x16xf32>
    %283 = tpu.matmul %281, %282, %cst_128 {dimension_numbers = #tpu.dot_dimension_numbers<[1], [0], [0], [1], [0, 0, 1, 1], [], []>} : vector<128x32xbf16>, vector<32x16xbf16>, vector<128x16xf32> -> vector<128x16xf32>
    %c0_129 = arith.constant 0 : index
    %c0_130 = arith.constant 0 : index
    %284 = vector.load %arg15[%c0_129, %c0_130] : memref<1x16xf32, #tpu.memory_space<vmem>>, vector<1x16xf32>
    %285 = vector.broadcast %284 : vector<1x16xf32> to vector<128x16xf32>
    %286 = arith.addf %283, %285 : vector<128x16xf32>
    %287 = arith.negf %286 : vector<128x16xf32>
    %288 = math.exp %287 : vector<128x16xf32>
    %cst_131 = arith.constant 1.000000e+00 : f32
    %289 = vector.broadcast %cst_131 : f32 to vector<128x16xf32>
    %290 = arith.addf %289, %288 : vector<128x16xf32>
    %291 = arith.divf %289, %290 : vector<128x16xf32>
    %292 = arith.mulf %286, %291 : vector<128x16xf32>
    %c0_132 = arith.constant 0 : index
    %c0_133 = arith.constant 0 : index
    %293 = vector.load %arg16[%c0_132, %c0_133] : memref<128x16xf32, #tpu.memory_space<vmem>>, vector<128x16xf32>
    tpu.vector_store %arg16[%c0_132, %c0_133], %292 {strides = array<i32>} : memref<128x16xf32, #tpu.memory_space<vmem>>, vector<128x16xf32>,
    return
  }
  func.func @transform_0(%arg0: i32) -> (i32, i32) {
    %c0_i32 = arith.constant 0 : i32
    %c0_i32_0 = arith.constant 0 : i32
    return %arg0, %c0_i32 : i32, i32
  }
  func.func @transform_1(%arg0: i32) -> (i32, i32, i32, i32) {
    %c0_i32 = arith.constant 0 : i32
    %c0_i32_0 = arith.constant 0 : i32
    %c0_i32_1 = arith.constant 0 : i32
    %c0_i32_2 = arith.constant 0 : i32
    %c0_i32_3 = arith.constant 0 : i32
    return %c0_i32, %c0_i32_0, %c0_i32_1, %c0_i32_2 : i32, i32, i32, i32
  }
  func.func @transform_2(%arg0: i32) -> (i32, i32, i32, i32) {
    %c0_i32 = arith.constant 0 : i32
    %c0_i32_0 = arith.constant 0 : i32
    %c0_i32_1 = arith.constant 0 : i32
    %c0_i32_2 = arith.constant 0 : i32
    %c0_i32_3 = arith.constant 0 : i32
    return %c0_i32, %c0_i32_0, %c0_i32_1, %c0_i32_2 : i32, i32, i32, i32
  }
  func.func @transform_3(%arg0: i32) -> (i32, i32, i32) {
    %c0_i32 = arith.constant 0 : i32
    %c0_i32_0 = arith.constant 0 : i32
    %c0_i32_1 = arith.constant 0 : i32
    %c0_i32_2 = arith.constant 0 : i32
    return %c0_i32, %c0_i32_0, %c0_i32_1 : i32, i32, i32
  }
  func.func @transform_4(%arg0: i32) -> (i32, i32, i32) {
    %c0_i32 = arith.constant 0 : i32
    %c0_i32_0 = arith.constant 0 : i32
    %c0_i32_1 = arith.constant 0 : i32
    %c0_i32_2 = arith.constant 0 : i32
    return %c0_i32, %c0_i32_0, %c0_i32_1 : i32, i32, i32
  }
  func.func @transform_5(%arg0: i32) -> (i32, i32, i32) {
    %c0_i32 = arith.constant 0 : i32
    %c0_i32_0 = arith.constant 0 : i32
    %c0_i32_1 = arith.constant 0 : i32
    %c0_i32_2 = arith.constant 0 : i32
    return %c0_i32, %c0_i32_0, %c0_i32_1 : i32, i32, i32
  }
  func.func @transform_6(%arg0: i32) -> (i32, i32, i32) {
    %c0_i32 = arith.constant 0 : i32
    %c0_i32_0 = arith.constant 0 : i32
    %c0_i32_1 = arith.constant 0 : i32
    %c0_i32_2 = arith.constant 0 : i32
    return %c0_i32, %c0_i32_0, %c0_i32_1 : i32, i32, i32
  }
  func.func @transform_7(%arg0: i32) -> (i32, i32, i32) {
    %c0_i32 = arith.constant 0 : i32
    %c0_i32_0 = arith.constant 0 : i32
    %c0_i32_1 = arith.constant 0 : i32
    %c0_i32_2 = arith.constant 0 : i32
    return %c0_i32, %c0_i32_0, %c0_i32_1 : i32, i32, i32
  }
  func.func @transform_8(%arg0: i32) -> (i32, i32, i32) {
    %c0_i32 = arith.constant 0 : i32
    %c0_i32_0 = arith.constant 0 : i32
    %c0_i32_1 = arith.constant 0 : i32
    %c0_i32_2 = arith.constant 0 : i32
    return %c0_i32, %c0_i32_0, %c0_i32_1 : i32, i32, i32
  }
  func.func @transform_9(%arg0: i32) -> (i32, i32, i32) {
    %c0_i32 = arith.constant 0 : i32
    %c0_i32_0 = arith.constant 0 : i32
    %c0_i32_1 = arith.constant 0 : i32
    %c0_i32_2 = arith.constant 0 : i32
    return %c0_i32, %c0_i32_0, %c0_i32_1 : i32, i32, i32
  }
  func.func @transform_10(%arg0: i32) -> (i32, i32, i32) {
    %c0_i32 = arith.constant 0 : i32
    %c0_i32_0 = arith.constant 0 : i32
    %c0_i32_1 = arith.constant 0 : i32
    %c0_i32_2 = arith.constant 0 : i32
    return %c0_i32, %c0_i32_0, %c0_i32_1 : i32, i32, i32
  }
  func.func @transform_11(%arg0: i32) -> (i32, i32) {
    %c0_i32 = arith.constant 0 : i32
    %c0_i32_0 = arith.constant 0 : i32
    %c0_i32_1 = arith.constant 0 : i32
    return %c0_i32, %c0_i32_0 : i32, i32
  }
  func.func @transform_12(%arg0: i32) -> (i32, i32) {
    %c0_i32 = arith.constant 0 : i32
    %c0_i32_0 = arith.constant 0 : i32
    %c0_i32_1 = arith.constant 0 : i32
    return %c0_i32, %c0_i32_0 : i32, i32
  }
  func.func @transform_13(%arg0: i32) -> (i32, i32) {
    %c0_i32 = arith.constant 0 : i32
    %c0_i32_0 = arith.constant 0 : i32
    %c0_i32_1 = arith.constant 0 : i32
    return %c0_i32, %c0_i32_0 : i32, i32
  }
  func.func @transform_14(%arg0: i32) -> (i32, i32) {
    %c0_i32 = arith.constant 0 : i32
    %c0_i32_0 = arith.constant 0 : i32
    %c0_i32_1 = arith.constant 0 : i32
    return %c0_i32, %c0_i32_0 : i32, i32
  }
  func.func @transform_15(%arg0: i32) -> (i32, i32) {
    %c0_i32 = arith.constant 0 : i32
    %c0_i32_0 = arith.constant 0 : i32
    return %arg0, %c0_i32 : i32, i32
  }
}

module attributes {stable_mosaic.version = 11 : i64} {
  func.func @_conv3x3_kernel(%arg0: i32, %arg1: memref<2x10x10x16xf32, #tpu.memory_space<vmem>>, %arg2: memref<2x10x10x16xf32, #tpu.memory_space<vmem>>, %arg3: memref<288x16xbf16, #tpu.memory_space<vmem>>, %arg4: memref<1x16xf32, #tpu.memory_space<vmem>>, %arg5: memref<2x64x16xf32, #tpu.memory_space<vmem>>) attributes {dimension_semantics = [#tpu.dimension_semantics<parallel>], iteration_bounds = array<i64: 1>, scalar_prefetch = 0 : i64, scratch_operands = 0 : i64, tpu.core_type = #tpu.core_type<tc>, window_params = [{transform_indices = @transform_0, window_bounds = array<i64: 2, 10, 10, 16>}, {transform_indices = @transform_1, window_bounds = array<i64: 2, 10, 10, 16>}, {pipeline_mode = #tpu.pipeline_mode<synchronous>, transform_indices = @transform_2, window_bounds = array<i64: 288, 16>}, {pipeline_mode = #tpu.pipeline_mode<synchronous>, transform_indices = @transform_3, window_bounds = array<i64: 1, 16>}, {transform_indices = @transform_4, window_bounds = array<i64: 2, 64, 16>}]} {
    %c0 = arith.constant 0 : index
    %c0_0 = arith.constant 0 : index
    %c0_1 = arith.constant 0 : index
    %c0_2 = arith.constant 0 : index
    %0 = vector.load %arg1[%c0, %c0_0, %c0_1, %c0_2] : memref<2x10x10x16xf32, #tpu.memory_space<vmem>>, vector<2x10x10x16xf32>
    %c0_3 = arith.constant 0 : index
    %c0_4 = arith.constant 0 : index
    %c0_5 = arith.constant 0 : index
    %c0_6 = arith.constant 0 : index
    %1 = vector.load %arg2[%c0_3, %c0_4, %c0_5, %c0_6] : memref<2x10x10x16xf32, #tpu.memory_space<vmem>>, vector<2x10x10x16xf32>
    %2 = tpu.concatenate %0, %1 in 3 : vector<2x10x10x16xf32>, vector<2x10x10x16xf32> -> vector<2x10x10x32xf32>
    %3 = vector.extract_strided_slice %2 {offsets = [0, 0, 0, 0], sizes = [2, 8, 8, 32], strides = [1, 1, 1, 1]} : vector<2x10x10x32xf32> to vector<2x8x8x32xf32>
    %4 = vector.extract_strided_slice %2 {offsets = [0, 0, 1, 0], sizes = [2, 8, 8, 32], strides = [1, 1, 1, 1]} : vector<2x10x10x32xf32> to vector<2x8x8x32xf32>
    %5 = vector.extract_strided_slice %2 {offsets = [0, 0, 2, 0], sizes = [2, 8, 8, 32], strides = [1, 1, 1, 1]} : vector<2x10x10x32xf32> to vector<2x8x8x32xf32>
    %6 = vector.extract_strided_slice %2 {offsets = [0, 1, 0, 0], sizes = [2, 8, 8, 32], strides = [1, 1, 1, 1]} : vector<2x10x10x32xf32> to vector<2x8x8x32xf32>
    %7 = vector.extract_strided_slice %2 {offsets = [0, 1, 1, 0], sizes = [2, 8, 8, 32], strides = [1, 1, 1, 1]} : vector<2x10x10x32xf32> to vector<2x8x8x32xf32>
    %8 = vector.extract_strided_slice %2 {offsets = [0, 1, 2, 0], sizes = [2, 8, 8, 32], strides = [1, 1, 1, 1]} : vector<2x10x10x32xf32> to vector<2x8x8x32xf32>
    %9 = vector.extract_strided_slice %2 {offsets = [0, 2, 0, 0], sizes = [2, 8, 8, 32], strides = [1, 1, 1, 1]} : vector<2x10x10x32xf32> to vector<2x8x8x32xf32>
    %10 = vector.extract_strided_slice %2 {offsets = [0, 2, 1, 0], sizes = [2, 8, 8, 32], strides = [1, 1, 1, 1]} : vector<2x10x10x32xf32> to vector<2x8x8x32xf32>
    %11 = vector.extract_strided_slice %2 {offsets = [0, 2, 2, 0], sizes = [2, 8, 8, 32], strides = [1, 1, 1, 1]} : vector<2x10x10x32xf32> to vector<2x8x8x32xf32>
    %12 = tpu.concatenate %3, %4, %5, %6, %7, %8, %9, %10, %11 in 3 : vector<2x8x8x32xf32>, vector<2x8x8x32xf32>, vector<2x8x8x32xf32>, vector<2x8x8x32xf32>, vector<2x8x8x32xf32>, vector<2x8x8x32xf32>, vector<2x8x8x32xf32>, vector<2x8x8x32xf32>, vector<2x8x8x32xf32> -> vector<2x8x8x288xf32>
    %13 = vector.shape_cast %12 : vector<2x8x8x288xf32> to vector<128x288xf32>
    %14 = arith.truncf %13 : vector<128x288xf32> to vector<128x288xbf16>
    %c0_7 = arith.constant 0 : index
    %c0_8 = arith.constant 0 : index
    %15 = vector.load %arg3[%c0_7, %c0_8] : memref<288x16xbf16, #tpu.memory_space<vmem>>, vector<288x16xbf16>
    %cst = arith.constant dense<0.000000e+00> : vector<128x16xf32>
    %16 = tpu.matmul %14, %15, %cst {dimension_numbers = #tpu.dot_dimension_numbers<[1], [0], [0], [1], [0, 0, 1, 1], [], []>} : vector<128x288xbf16>, vector<288x16xbf16>, vector<128x16xf32> -> vector<128x16xf32>
    %c0_9 = arith.constant 0 : index
    %c0_10 = arith.constant 0 : index
    %17 = vector.load %arg4[%c0_9, %c0_10] : memref<1x16xf32, #tpu.memory_space<vmem>>, vector<1x16xf32>
    %18 = vector.broadcast %17 : vector<1x16xf32> to vector<128x16xf32>
    %19 = arith.addf %16, %18 : vector<128x16xf32>
    %20 = arith.negf %19 : vector<128x16xf32>
    %21 = math.exp %20 : vector<128x16xf32>
    %cst_11 = arith.constant 1.000000e+00 : f32
    %22 = vector.broadcast %cst_11 : f32 to vector<128x16xf32>
    %23 = arith.addf %22, %21 : vector<128x16xf32>
    %24 = arith.divf %22, %23 : vector<128x16xf32>
    %25 = arith.mulf %19, %24 : vector<128x16xf32>
    %26 = vector.shape_cast %25 : vector<128x16xf32> to vector<2x64x16xf32>
    %c0_12 = arith.constant 0 : index
    %c0_13 = arith.constant 0 : index
    %c0_14 = arith.constant 0 : index
    %27 = vector.load %arg5[%c0_12, %c0_13, %c0_14] : memref<2x64x16xf32, #tpu.memory_space<vmem>>, vector<2x64x16xf32>
    tpu.vector_store %arg5[%c0_12, %c0_13, %c0_14], %26 {strides = array<i32>} : memref<2x64x16xf32, #tpu.memory_space<vmem>>, vector<2x64x16xf32>,
    return
  }
  func.func @transform_0(%arg0: i32) -> (i32, i32, i32, i32) {
    %c0_i32 = arith.constant 0 : i32
    %c0_i32_0 = arith.constant 0 : i32
    %c0_i32_1 = arith.constant 0 : i32
    %c0_i32_2 = arith.constant 0 : i32
    return %arg0, %c0_i32, %c0_i32_0, %c0_i32_1 : i32, i32, i32, i32
  }
  func.func @transform_1(%arg0: i32) -> (i32, i32, i32, i32) {
    %c0_i32 = arith.constant 0 : i32
    %c0_i32_0 = arith.constant 0 : i32
    %c0_i32_1 = arith.constant 0 : i32
    %c0_i32_2 = arith.constant 0 : i32
    return %arg0, %c0_i32, %c0_i32_0, %c0_i32_1 : i32, i32, i32, i32
  }
  func.func @transform_2(%arg0: i32) -> (i32, i32) {
    %c0_i32 = arith.constant 0 : i32
    %c0_i32_0 = arith.constant 0 : i32
    %c0_i32_1 = arith.constant 0 : i32
    return %c0_i32, %c0_i32_0 : i32, i32
  }
  func.func @transform_3(%arg0: i32) -> (i32, i32) {
    %c0_i32 = arith.constant 0 : i32
    %c0_i32_0 = arith.constant 0 : i32
    %c0_i32_1 = arith.constant 0 : i32
    return %c0_i32, %c0_i32_0 : i32, i32
  }
  func.func @transform_4(%arg0: i32) -> (i32, i32, i32) {
    %c0_i32 = arith.constant 0 : i32
    %c0_i32_0 = arith.constant 0 : i32
    %c0_i32_1 = arith.constant 0 : i32
    return %arg0, %c0_i32, %c0_i32_0 : i32, i32, i32
  }
}

</mosaic_0001>

<bundles_post_ra>
// kernel: forward.4
= control target key start
LH: loop header
LB: loop body
LE: loop exit
PB: predicated region body
PF: predicated region fallthrough
CT: control target
= control target key end

     0   :  { %vm66_vm0 = vcmask 293888   ;;  %vm91_vm1 = vcmask 1041408   ;;  %vm304_vm2 = vcmask 130048   ;;  %s695_s1 = inlined_call_operand.vmem [shape: bf16[36,16], index: 1, kind: input, shape index: {}]   ;;  %s696_s0 = inlined_call_operand.vmem [shape: f32[128,36], index: 0, kind: input, shape index: {}]   ;;  %s697_s2 = inlined_call_operand.vmem [shape: f32[1,16], index: 2, kind: input, shape index: {}]   ;;  %s698_s3 = inlined_call_operand.vmem [shape: f32[128,16], index: 3, kind: output, shape index: {}]  }
   0x1   :  { %v394_v0 = vld [vmem:[%s695_s1] sm:$0xff]   ;;  %v395_v1 = vld [vmem:[%s695_s1 + $0x8] sm:$0xff]   ;;  %v396_v6 = vld [vmem:[%s695_s1 + $0x10] ss:$0 sps:$4 sm:$0x33]  }
   0x2   :  { %364 = vmatprep.subr.bf16.mxu0 %v394_v0  ;;  %386 = vmatprep.subr.bf16.mxu1 %v394_v0  ;;  %v15_v2 = vld [vmem:[%s696_s0] sm:$0xff]  ;;  %v16_v3 = vld [vmem:[%s696_s0 + $0x8] sm:$0xff]  ;;  %v17_v9 = vld [vmem:[%s696_s0 + $0x10] sm:$0xff]  ;;  %v93_v14 = vsel %vm91_vm1, %v396_v6, 0 }
   0x3   :  { %365 = vmatpush3.bf16.msra.mxu0 %v394_v0  ;;  %389 = vmatpush3.bf16.msra.mxu1 %v394_v0  ;;  %v23_v4 = vld [vmem:[%s696_s0 + $0x40] sm:$0xff]  ;;  %v24_v5 = vld [vmem:[%s696_s0 + $0x48] sm:$0xff]  ;;  %v31_v7 = vpack.c.bf16 %v16_v3, %v15_v2  ;;  %v18_v10 = vld [vmem:[%s696_s0 + $0x18] sm:$0xff] }
   0x4   :  { %366 = vmatprep.subr.bf16.mxu0 %v395_v1  ;;  %387 = vmatprep.subr.bf16.mxu1 %v395_v1  ;;  %v35_v8 = vpack.c.bf16 %v24_v5, %v23_v4  ;;  %v25_v11 = vld [vmem:[%s696_s0 + $0x50] sm:$0xff]  ;;  %v26_v12 = vld [vmem:[%s696_s0 + $0x58] sm:$0xff]  ;;  %v19_v13 = vld [vmem:[%s696_s0 + $0x20] sm:$0xff]  ;;  %v32_v18 = vpack.c.bf16 %v18_v10, %v17_v9 }
   0x5   :  { %370 = vmatprep.mubr.msk.bf16.mxu0 %vm66_vm0, %v31_v7  ;;  %v20_v15 = vld [vmem:[%s696_s0 + $0x28] sm:$0xff]  ;;  %v27_v16 = vld [vmem:[%s696_s0 + $0x60] sm:$0xff]  ;;  %v36_v19 = vpack.c.bf16 %v26_v12, %v25_v11  ;;  %v21_v22 = vld [vmem:[%s696_s0 + $0x30] sm:$0xff] }
   0x6   :  { %378 = vmatprep.mubr.msk.bf16.mxu1 %vm66_vm0, %v35_v8  ;;  %v28_v17 = vld [vmem:[%s696_s0 + $0x68] sm:$0xff]  ;;  %v33_v20 = vpack.c.bf16 %v20_v15, %v19_v13  ;;  %v22_v23 = vld [vmem:[%s696_s0 + $0x38] sm:$0xff]  ;;  %v29_v24 = vld [vmem:[%s696_s0 + $0x70] sm:$0xff] }
   0x7   :  { %367 = vmatpush3.bf16.msra.mxu0 %v395_v1  ;;  %390 = vmatpush3.bf16.msra.mxu1 %v395_v1  ;;  %v37_v21 = vpack.c.bf16 %v28_v17, %v27_v16  ;;  %v30_v25 = vld [vmem:[%s696_s0 + $0x78] sm:$0xff]  ;;  %v34_v26 = vpack.c.bf16 %v22_v23, %v21_v22  ;;  %v549_v28 = vld [vmem:[%s697_s2] ss:$0 sm:$0xff] }
   0x8   :  { %392 = vmatprep.subr.msk.bf16.mxu0 %vm91_vm1, %v396_v6  ;;  %393 = vmatprep.subr.msk.bf16.mxu1 %vm91_vm1, %v396_v6  ;;  %v38_v27 = vpack.c.bf16 %v30_v25, %v29_v24 }
   0xb   :  { %369 = vmatpush3.bf16.msra.mxu0 %v93_v14  ;;  %391 = vmatpush3.bf16.msra.mxu1 %v93_v14 }
   0xe   :  { %371 = vmatmul.mubr.msk.bf16.vlgmr.msra.gmra.mrb[0].mxu0 %vm66_vm0, %v32_v18  ;;  %379 = vmatmul.mubr.msk.bf16.vlgmr.msra.gmra.mrb[0].mxu1 %vm66_vm0, %v36_v19 }
   0xf   :  { %374 = vmatprep.mubr.msk.bf16.mxu0 %vm66_vm0, %v33_v20  ;;  %382 = vmatprep.mubr.msk.bf16.mxu1 %vm66_vm0, %v37_v21 }
  0x16   :  { %375 = vmatmul.mubr.msk.bf16.gmra.mrb[4].mxu0 %vm66_vm0, %v34_v26  ;;  %383 = vmatmul.mubr.msk.bf16.gmra.mrb[4].mxu1 %vm66_vm0, %v38_v27 }
  0xe1   :  { %v372_v29 = vpop.f32.mrb[0].mxu0  ;;  %v380_v30 = vpop.f32.mrb[0].mxu1 }
  0xe2   :  { %v552_v31 = vadd.f32 %v372_v29, %v549_v28  ;;  %v555_v32 = vadd.f32 %v380_v30, %v549_v28  ;;  %v129_v33 = vpop.f32.mrb[1].mxu0  ;;  %v161_v34 = vpop.f32.mrb[1].mxu1 }
  0xe3   :  { %v558_v35 = vadd.f32 %v549_v28, %v129_v33  ;;  %v561_v36 = vadd.f32 %v549_v28, %v161_v34  ;;  %v373_v37 = vpop.f32.mrb[2].mxu0  ;;  %v381_v38 = vpop.f32.mrb[2].mxu1 }
  0xe4   :  { %v339_v39 = vmul.f32 -1.442695, %v552_v31  ;;  %v347_v40 = vmul.f32 -1.442695, %v555_v32  ;;  %v566_v41 = vadd.f32 %v373_v37, %v549_v28  ;;  %v569_v42 = vadd.f32 %v381_v38, %v549_v28  ;;  %v132_v43 = vpop.f32.mrb[3].mxu0  ;;  %v164_v44 = vpop.f32.mrb[3].mxu1 }
  0xe5   :  { %v337_v45 = vmul.f32 -1.442695, %v558_v35  ;;  %v345_v46 = vmul.f32 -1.442695, %v561_v36  ;;  %v574_v47 = vadd.f32 %v549_v28, %v132_v43  ;;  %v577_v48 = vadd.f32 %v549_v28, %v164_v44 }
  0xe6   :  { %397 = vpow2.f32 %v339_v39  ;;  %v340_v49 = vmul.f32 -1.442695, %v566_v41  ;;  %v348_v50 = vmul.f32 -1.442695, %v569_v42 }
  0xe7   :  { %399 = vpow2.f32 %v347_v40  ;;  %v338_v51 = vmul.f32 -1.442695, %v574_v47  ;;  %v346_v52 = vmul.f32 -1.442695, %v577_v48 }
  0xe8   :  { %401 = vpow2.f32 %v337_v45 }
  0xe9   :  { %403 = vpow2.f32 %v345_v46  ;;  %v376_v53 = vpop.f32.mrb[4].mxu0  ;;  %v384_v54 = vpop.f32.mrb[4].mxu1 }
  0xea   :  { %405 = vpow2.f32 %v340_v49  ;;  %v584_v55 = vadd.f32 %v376_v53, %v549_v28  ;;  %v587_v56 = vadd.f32 %v384_v54, %v549_v28  ;;  %v145_v57 = vpop.f32.mrb[5].mxu0  ;;  %v177_v58 = vpop.f32.mrb[5].mxu1 }
  0xeb   :  { %407 = vpow2.f32 %v348_v50  ;;  %v590_v59 = vadd.f32 %v549_v28, %v145_v57  ;;  %v593_v60 = vadd.f32 %v549_v28, %v177_v58  ;;  %v377_v61 = vpop.f32.mrb[6].mxu0  ;;  %v385_v62 = vpop.f32.mrb[6].mxu1 }
  0xec   :  { %409 = vpow2.f32 %v338_v51  ;;  %v343_v63 = vmul.f32 -1.442695, %v584_v55  ;;  %v351_v0 = vmul.f32 -1.442695, %v587_v56  ;;  %v598_v1 = vadd.f32 %v377_v61, %v549_v28  ;;  %v148_v2 = vpop.f32.mrb[7].mxu0  ;;  %v180_v3 = vpop.f32.mrb[7].mxu1 }
  0xed   :  { %411 = vpow2.f32 %v346_v52  ;;  %v341_v4 = vmul.f32 -1.442695, %v590_v59  ;;  %v349_v5 = vmul.f32 -1.442695, %v593_v60  ;;  %v604_v24 = vadd.f32 %v385_v62, %v549_v28 }
  0xee   :  { %413 = vpow2.f32 %v343_v63  ;;  %v344_v6 = vmul.f32 -1.442695, %v598_v1  ;;  %v607_v27 = vadd.f32 %v549_v28, %v148_v2  ;;  %v610_v33 = vadd.f32 %v549_v28, %v180_v3 }
  0xef   :  { %415 = vpow2.f32 %v351_v0  ;;  %v352_v40 = vmul.f32 -1.442695, %v604_v24 }
  0xf0   :  { %v398_v7 = vpop.eup %397  ;;  %417 = vpow2.f32 %v341_v4  ;;  %v342_v45 = vmul.f32 -1.442695, %v607_v27  ;;  %v350_v28 = vmul.f32 -1.442695, %v610_v33 }
  0xf1   :  { %v400_v8 = vpop.eup %399  ;;  %v242_v9 = vadd.f32 1.0, %v398_v7  ;;  %419 = vpow2.f32 %v349_v5 }
  0xf2   :  { %v402_v10 = vpop.eup %401  ;;  %v250_v11 = vadd.f32 1.0, %v400_v8  ;;  %421 = vpow2.f32 %v344_v6 }
  0xf3   :  { %v404_v12 = vpop.eup %403  ;;  %423 = vrcp.f32 %v242_v9  ;;  %v240_v13 = vadd.f32 1.0, %v402_v10 }
  0xf4   :  { %v406_v14 = vpop.eup %405  ;;  %425 = vrcp.f32 %v250_v11  ;;  %v248_v15 = vadd.f32 1.0, %v404_v12 }
  0xf5   :  { %v408_v16 = vpop.eup %407  ;;  %427 = vrcp.f32 %v240_v13  ;;  %v243_v17 = vadd.f32 1.0, %v406_v14 }
  0xf6   :  { %v410_v18 = vpop.eup %409  ;;  %429 = vrcp.f32 %v248_v15  ;;  %v251_v19 = vadd.f32 1.0, %v408_v16 }
  0xf7   :  { %v412_v20 = vpop.eup %411  ;;  %431 = vrcp.f32 %v243_v17  ;;  %v241_v21 = vadd.f32 1.0, %v410_v18 }
  0xf8   :  { %v414_v22 = vpop.eup %413  ;;  %433 = vrcp.f32 %v251_v19  ;;  %v249_v23 = vadd.f32 1.0, %v412_v20 }
  0xf9   :  { %v416_v25 = vpop.eup %415  ;;  %435 = vrcp.f32 %v241_v21  ;;  %v246_v26 = vadd.f32 1.0, %v414_v22 }
  0xfa   :  { %v418_v29 = vpop.eup %417  ;;  %437 = vrcp.f32 %v249_v23  ;;  %v254_v30 = vadd.f32 1.0, %v416_v25 }
  0xfb   :  { %v420_v34 = vpop.eup %419  ;;  %439 = vrcp.f32 %v246_v26  ;;  %v244_v37 = vadd.f32 1.0, %v418_v29 }
  0xfc   :  { %v422_v38 = vpop.eup %421  ;;  %441 = vrcp.f32 %v254_v30  ;;  %v252_v39 = vadd.f32 1.0, %v420_v34 }
  0xfd   :  { %v424_v43 = vpop.eup %423  ;;  %443 = vrcp.f32 %v244_v37  ;;  %v247_v44 = vadd.f32 1.0, %v422_v38 }
  0xfe   :  { %v426_v46 = vpop.eup %425  ;;  %v290_v49 = vmul.f32 %v424_v43, %v552_v31  ;;  %445 = vrcp.f32 %v252_v39 }
  0xff   :  { %v428_v50 = vpop.eup %427  ;;  %v298_v51 = vmul.f32 %v426_v46, %v555_v32  ;;  %447 = vrcp.f32 %v247_v44 }
 0x100   :  { %v430_v52 = vpop.eup %429  ;;  %307 = vst.msk [vmem:[%s698_s3 + $0x10] sm:$0xff] %vm304_vm2, %v290_v49  ;;  %v288_v53 = vmul.f32 %v428_v50, %v558_v35  ;;  %449 = vpow2.f32 %v352_v40 }
 0x101   :  { %v432_v54 = vpop.eup %431  ;;  %315 = vst.msk [vmem:[%s698_s3 + $0x50] sm:$0xff] %vm304_vm2, %v298_v51  ;;  %v296_v31 = vmul.f32 %v430_v52, %v561_v36  ;;  %451 = vpow2.f32 %v342_v45 }
 0x102   :  { %v434_v32 = vpop.eup %433  ;;  %305 = vst.msk [vmem:[%s698_s3] sm:$0xff] %vm304_vm2, %v288_v53  ;;  %v291_v57 = vmul.f32 %v432_v54, %v566_v41  ;;  %453 = vpow2.f32 %v350_v28 }
 0x103   :  { %v436_v35 = vpop.eup %435  ;;  %313 = vst.msk [vmem:[%s698_s3 + $0x40] sm:$0xff] %vm304_vm2, %v296_v31  ;;  %v299_v58 = vmul.f32 %v434_v32, %v569_v42 }
 0x104   :  { %v438_v61 = vpop.eup %437  ;;  %308 = vst.msk [vmem:[%s698_s3 + $0x18] sm:$0xff] %vm304_vm2, %v291_v57  ;;  %v289_v36 = vmul.f32 %v436_v35, %v574_v47 }
 0x105   :  { %v440_v62 = vpop.eup %439  ;;  %316 = vst.msk [vmem:[%s698_s3 + $0x58] sm:$0xff] %vm304_vm2, %v299_v58  ;;  %v297_v41 = vmul.f32 %v438_v61, %v577_v48 }
 0x106   :  { %v442_v63 = vpop.eup %441  ;;  %306 = vst.msk [vmem:[%s698_s3 + $0x8] sm:$0xff] %vm304_vm2, %v289_v36  ;;  %v294_v42 = vmul.f32 %v440_v62, %v584_v55 }
 0x107   :  { %v444_v0 = vpop.eup %443  ;;  %314 = vst.msk [vmem:[%s698_s3 + $0x48] sm:$0xff] %vm304_vm2, %v297_v41  ;;  %v302_v47 = vmul.f32 %v442_v63, %v587_v56 }
 0x108   :  { %v446_v2 = vpop.eup %445  ;;  %311 = vst.msk [vmem:[%s698_s3 + $0x30] sm:$0xff] %vm304_vm2, %v294_v42  ;;  %v292_v48 = vmul.f32 %v444_v0, %v590_v59 }
 0x109   :  { %v448_v3 = vpop.eup %447  ;;  %319 = vst.msk [vmem:[%s698_s3 + $0x70] sm:$0xff] %vm304_vm2, %v302_v47  ;;  %v300_v55 = vmul.f32 %v446_v2, %v593_v60 }
 0x10a   :  { %v450_v4 = vpop.eup %449  ;;  %309 = vst.msk [vmem:[%s698_s3 + $0x20] sm:$0xff] %vm304_vm2, %v292_v48  ;;  %v295_v56 = vmul.f32 %v448_v3, %v598_v1 }
 0x10b   :  { %v452_v5 = vpop.eup %451  ;;  %317 = vst.msk [vmem:[%s698_s3 + $0x60] sm:$0xff] %vm304_vm2, %v300_v55  ;;  %v255_v59 = vadd.f32 1.0, %v450_v4 }
 0x10c   :  { %v454_v6 = vpop.eup %453  ;;  %312 = vst.msk [vmem:[%s698_s3 + $0x38] sm:$0xff] %vm304_vm2, %v295_v56  ;;  %v245_v60 = vadd.f32 1.0, %v452_v5 }
 0x10d   :  { %455 = vrcp.f32 %v255_v59  ;;  %v253_v7 = vadd.f32 1.0, %v454_v6 }
 0x10e   :  { %457 = vrcp.f32 %v245_v60 }
 0x10f   :  { %459 = vrcp.f32 %v253_v7 }
 0x117   :  { %v456_v8 = vpop.eup %455 }
 0x118   :  { %v458_v1 = vpop.eup %457  ;;  %v303_v9 = vmul.f32 %v456_v8, %v604_v24 }
 0x119   :  { %v460_v10 = vpop.eup %459  ;;  %v293_v11 = vmul.f32 %v458_v1, %v607_v27 }
 0x11a   :  { %320 = vst.msk [vmem:[%s698_s3 + $0x78] sm:$0xff] %vm304_vm2, %v303_v9  ;;  %v301_v12 = vmul.f32 %v460_v10, %v610_v33 }
 0x11b   :  { %310 = vst.msk [vmem:[%s698_s3 + $0x28] sm:$0xff] %vm304_vm2, %v293_v11 }
 0x11c   :  { %318 = vst.msk [vmem:[%s698_s3 + $0x68] sm:$0xff] %vm304_vm2, %v301_v12 }

// kernel: forward.5
= control target key start
LH: loop header
LB: loop body
LE: loop exit
PB: predicated region body
PF: predicated region fallthrough
CT: control target
= control target key end

     0   :  { %vm93_vm0 = vcmask 1046528   ;;  %vm190_vm1 = vcmask 1045504   ;;  %v1637_v3 = vmov 0   ;;  %s1638_s30 = smov 48   ;;  %s1639_s10 = smov 64   ;;  %vm575_vm2 = vcmask 130048   ;;  %s2483_s0 = inlined_call_operand.vmem [shape: f32[2,10,10,16], index: 0, kind: input, shape index: {}]   ;;  %s2484_s1 = inlined_call_operand.vmem [shape: bf16[144,16], index: 1, kind: input, shape index: {}]   ;;  %s2485_s3 = inlined_call_operand.vmem [shape: bf16[16,32], index: 3, kind: input, shape index: {}]   ;;  %s2486_s2 = inlined_call_operand.vmem [shape: f32[1,16], index: 2, kind: input, shape index: {}]   ;;  %s2487_s4 = inlined_call_operand.vmem [shape: f32[1,32], index: 4, kind: input, shape index: {}]   ;;  %s2488_s5 = inlined_call_operand.vmem [shape: f32[2,64,32], index: 5, kind: output, shape index: {}]  }
   0x1   :  { %v1678_v0 = vld [vmem:[%s2483_s0 + $0x10] sm:$0xff]  ;;  %v1683_v1 = vld [vmem:[%s2483_s0 + $0x20] sm:$0xff]  ;;  %v24_v2 = vld [vmem:[%s2483_s0 + $0x18] sm:$0x3]  ;;  %813 = vmatprep.subr.bf16.mxu0 %v1637_v3  ;;  %1257 = vmatprep.subr.bf16.mxu1 %v1637_v3  ;;  %s1640_s11 = smov 16   ;;  %s1641_s16 = smov 96  }
   0x2   :  { %v1283_v4 = vpack.i.bf16 %v1683_v1, %v1678_v0  ;;  %v26_v5 = vld [vmem:[%s2483_s0 + $0x28] sm:$0x3]  ;;  %v97_v6 = vrot.slane %v1678_v0, 1  ;;  %v98_v7 = vrot.slane %v24_v2, 1  ;;  %v100_v8 = vrot.slane %v1683_v1, 1  ;;  %v1700_v9 = vld [vmem:[%s2483_s0] sm:$0xff] }
   0x3   :  { %v101_v10 = vrot.slane %v26_v5, 1  ;;  %v195_v11 = vrot.slane %v24_v2, 2  ;;  %v22_v12 = vld [vmem:[%s2483_s0 + $0x8] sm:$0x3]  ;;  %v94_v13 = vrot.slane %v1700_v9, 1  ;;  %v191_v14 = vrot.slane %v1700_v9, 2 }
   0x4   :  { %1284 = vrot.lane.b32.xlu1 %v1283_v4, %s1638_s30  ;;  %v99_v15 = vsel %vm93_vm0, %v97_v6, %v98_v7  ;;  %v95_v16 = vrot.slane %v22_v12, 1  ;;  %v192_v17 = vrot.slane %v22_v12, 2  ;;  %v194_v18 = vrot.slane %v1678_v0, 2  ;;  %v1713_v19 = vld [vmem:[%s2483_s0 + $0x30] sm:$0xff]  ;;  %v28_v23 = vld [vmem:[%s2483_s0 + $0x38] sm:$0x3] }
   0x5   :  { %v102_v20 = vsel %vm93_vm0, %v100_v8, %v101_v10  ;;  %v197_v21 = vrot.slane %v1683_v1, 2  ;;  %v198_v22 = vrot.slane %v26_v5, 2  ;;  %v103_v29 = vrot.slane %v1713_v19, 1  ;;  %v1737_v35 = vld [vmem:[%s2483_s0 + $0x40] sm:$0xff]  ;;  %v30_v36 = vld [vmem:[%s2483_s0 + $0x48] sm:$0x3] }
   0x6   :  { %v1298_v24 = vpack.i.bf16 %v102_v20, %v99_v15  ;;  %v96_v25 = vsel %vm93_vm0, %v94_v13, %v95_v16  ;;  %v193_v26 = vsel %vm190_vm1, %v191_v14, %v192_v17  ;;  %v196_v27 = vsel %vm190_vm1, %v194_v18, %v195_v11  ;;  %s1642_s17 = smov 32   ;;  %v1751_v43 = vld [vmem:[%s2483_s0 + $0x50] sm:$0xff]  ;;  %v32_v44 = vld [vmem:[%s2483_s0 + $0x58] sm:$0x3]  ;;  %v1760_v46 = vld [vmem:[%s2483_s0 + $0x80] sm:$0xff]  ;;  %s1643_s26 = smov 80  }
   0x7   :  { %v1288_v28 = vpack.i.bf16 %v99_v15, %v96_v25  ;;  %v1308_v30 = vpack.i.bf16 %v1713_v19, %v1683_v1  ;;  %v104_v31 = vrot.slane %v28_v23, 1  ;;  %v1293_v32 = vpack.i.bf16 %v196_v27, %v193_v26  ;;  %v1769_v50 = vld [vmem:[%s2483_s0 + $0x88] sm:$0x3]  ;;  %v1563_v54 = vld [vmem:[%s2484_s1] sm:$0xff]   ;;  %v1789_v56 = vld [vmem:[%s2483_s0 + $0x98] sm:$0x3] }
   0x8   :  { %1299 = vrot.lane.b32.xlu1 %v1298_v24, %s1639_s10  ;;  %v1729_v33 = vsel %vm190_vm1, %v197_v21, %v198_v22  ;;  %v200_v39 = vrot.slane %v1713_v19, 2  ;;  %v201_v40 = vrot.slane %v28_v23, 2  ;;  %v203_v41 = vrot.slane %v1737_v35, 2  ;;  %v1784_v55 = vld [vmem:[%s2483_s0 + $0x60] sm:$0xff]  ;;  %v1794_v57 = vld [vmem:[%s2483_s0 + $0x90] sm:$0xff]  ;;  %814 = vmatpush1.bf16.msra.mxu0 %v1563_v54  ;;  %v1564_v60 = vld [vmem:[%s2484_s1 + $0x8] sm:$0xff]  }
   0x9   :  { %1289 = vrot.lane.b32.xlu0 %v1288_v28, %s1640_s11  ;;  %v1732_v34 = vsel %vm93_vm0, %v103_v29, %v104_v31  ;;  %v1303_v37 = vpack.i.bf16 %v1729_v33, %v196_v27  ;;  %v204_v42 = vrot.slane %v30_v36, 2  ;;  %v106_v45 = vrot.slane %v1737_v35, 1  ;;  %1266 = vmatpush1.bf16.msra.mxu1 %v1563_v54  ;;  %v34_v63 = vld [vmem:[%s2483_s0 + $0x68] sm:$0x3]  ;;  %s1644_s19 = smov 112   ;;  %v1828_v12 = vld [vmem:[%s2483_s0 + $0x70] sm:$0xff] }
   0xa   :  { %v1318_v38 = vpack.i.bf16 %v1732_v34, %v102_v20  ;;  %v1328_v47 = vpack.i.bf16 %v1737_v35, %v1713_v19  ;;  %v107_v48 = vrot.slane %v30_v36, 1  ;;  %v109_v49 = vrot.slane %v1751_v43, 1  ;;  %815 = vmatprep.subr.bf16.mxu0 %v1637_v3  ;;  %v1821_v10 = vld [vmem:[%s2483_s0 + $0x78] sm:$0x3]  ;;  %1258 = vmatprep.subr.bf16.mxu1 %v1637_v3  ;;  %v1565_v17 = vld [vmem:[%s2484_s1 + $0x10] sm:$0xff]   ;;  %v1866_v28 = vld [vmem:[%s2483_s0 + $0xe0] sm:$0xff] }
   0xb   :  { %v1773_v51 = vsel %vm190_vm1, %v200_v39, %v201_v40  ;;  %v1776_v52 = vsel %vm190_vm1, %v203_v41, %v204_v42  ;;  %v110_v53 = vrot.slane %v32_v44, 1  ;;  %v393_v58 = vrot.slane %v1760_v46, 2  ;;  %v48_v24 = vld [vmem:[%s2483_s0 + $0xd8] sm:$0x3]  ;;  %v1861_v27 = vld [vmem:[%s2483_s0 + $0xd0] sm:$0xff] }
   0xc   :  { %1309 = vrot.lane.b32.xlu1 %v1308_v30, %s1641_s16  ;;  %v394_v59 = vrot.slane %v1769_v50, 2  ;;  %v1323_v61 = vpack.i.bf16 %v1773_v51, %v1729_v33  ;;  %v1338_v62 = vpack.i.bf16 %v1776_v52, %v1773_v51  ;;  %v553_v2 = vrot.slane %v1794_v57, 2  ;;  %816 = vmatpush1.bf16.msra.mxu0 %v1564_v60  ;;  %v1566_v31 = vld [vmem:[%s2484_s1 + $0x18] sm:$0xff]   ;;  %v50_v36 = vld [vmem:[%s2483_s0 + $0xe8] sm:$0x3]  ;;  %v1894_v41 = vld [vmem:[%s2483_s0 + $0xf0] sm:$0xff] }
   0xd   :  { %1294 = vrot.lane.b32.xlu0 %v1293_v32, %s1642_s17  ;;  %v554_v4 = vrot.slane %v1789_v56, 2  ;;  %v108_v5 = vsel %vm93_vm0, %v106_v45, %v107_v48  ;;  %v1815_v6 = vsel %vm93_vm0, %v109_v49, %v110_v53  ;;  %v206_v7 = vrot.slane %v1751_v43, 2  ;;  %1267 = vmatpush1.bf16.msra.mxu1 %v1564_v60  ;;  %v52_v48 = vld [vmem:[%s2483_s0 + $0xf8] sm:$0x3]  ;;  %v42_v16 = vld [vmem:[%s2483_s0 + $0xa8] sm:$0x3] }
   0xe   :  { %v207_v8 = vrot.slane %v32_v44, 2  ;;  %v112_v11 = vrot.slane %v1784_v55, 1  ;;  %v1831_v13 = vsel %vm190_vm1, %v393_v58, %v394_v59  ;;  %v113_v15 = vrot.slane %v34_v63, 1  ;;  %817 = vmatprep.subr.bf16.mxu0 %v1637_v3  ;;  %1259 = vmatprep.subr.bf16.mxu1 %v1637_v3  ;;  %v1567_v59 = vld [vmem:[%s2484_s1 + $0x20] sm:$0xff]  }
   0xf   :  { %v1834_v14 = vsel %vm190_vm1, %v553_v2, %v554_v4  ;;  %v1843_v18 = vpack.i.bf16 %v1815_v6, %v108_v5  ;;  %v1333_v20 = vpack.i.bf16 %v108_v5, %v1732_v34  ;;  %v209_v22 = vrot.slane %v1784_v55, 2  ;;  %v1923_v2 = vld [vmem:[%s2483_s0 + $0x100] sm:$0xff] }
  0x10   :  { %1319 = vrot.lane.b32.xlu1 %v1318_v38, %s1640_s11  ;;  %v1849_v21 = vsel %vm190_vm1, %v206_v7, %v207_v8  ;;  %v210_v23 = vrot.slane %v34_v63, 2  ;;  %v115_v25 = vrot.slane %v1828_v12, 1  ;;  %v116_v26 = vrot.slane %v1821_v10, 1  ;;  %818 = vmatpush1.bf16.msra.mxu0 %v1565_v17  ;;  %v54_v7 = vld [vmem:[%s2483_s0 + $0x108] sm:$0x3] }
  0x11   :  { %1304 = vrot.lane.b32.xlu0 %v1303_v37, %s1643_s26  ;;  %v1343_v29 = vpack.i.bf16 %v1751_v43, %v1737_v35  ;;  %v114_v30 = vsel %vm93_vm0, %v112_v11, %v113_v15  ;;  %1268 = vmatpush1.bf16.msra.mxu1 %v1565_v17  ;;  %v1358_v32 = vpack.i.bf16 %v1849_v21, %v1776_v52  ;;  %v127_v39 = vrot.slane %v1861_v27, 1 }
  0x12   :  { %v1363_v34 = vpack.i.bf16 %v1784_v55, %v1751_v43  ;;  %819 = vmatprep.subr.bf16.mxu0 %v1637_v3  ;;  %v1378_v37 = vpack.i.bf16 %v1828_v12, %v1784_v55  ;;  %v128_v40 = vrot.slane %v48_v24, 1  ;;  %1260 = vmatprep.subr.bf16.mxu1 %v1637_v3  ;;  %v1368_v42 = vpack.i.bf16 %v114_v30, %v1815_v6 }
  0x13   :  { %v1899_v44 = vsel %vm93_vm0, %v115_v25, %v116_v26  ;;  %v1398_v45 = vpack.i.bf16 %v1760_v46, %v1828_v12  ;;  %v225_v53 = vrot.slane %v48_v24, 2  ;;  %v130_v54 = vrot.slane %v1866_v28, 1  ;;  %v1568_v24 = vld [vmem:[%s2484_s1 + $0x28] sm:$0xff]  }
  0x14   :  { %1329 = vrot.lane.b32.xlu1 %v1328_v47, %s1638_s30  ;;  %v224_v47 = vrot.slane %v1861_v27, 2  ;;  %v1908_v49 = vsel %vm93_vm0, %v127_v39, %v128_v40  ;;  %v131_v58 = vrot.slane %v50_v36, 1  ;;  %820 = vmatpush1.bf16.msra.mxu0 %v1566_v31  ;;  %v133_v63 = vrot.slane %v1894_v41, 1 }
  0x15   :  { %1314 = vrot.lane.b32.xlu0 %v1318_v38, %s1644_s19  ;;  %v1888_v38 = vsel %vm190_vm1, %v209_v22, %v210_v23  ;;  %1269 = vmatpush1.bf16.msra.mxu1 %v1566_v31  ;;  %v1928_v4 = vpack.i.bf16 %v1899_v44, %v114_v30  ;;  %v134_v6 = vrot.slane %v52_v48, 1  ;;  %v227_v8 = vrot.slane %v1866_v28, 2  ;;  %v1965_v31 = vld [vmem:[%s2483_s0 + $0x110] sm:$0xff] }
  0x16   :  { %v1373_v60 = vpack.i.bf16 %v1888_v38, %v1849_v21  ;;  %821 = vmatprep.subr.bf16.mxu0 %v1637_v3  ;;  %v1931_v5 = vsel %vm93_vm0, %v130_v54, %v131_v58  ;;  %1261 = vmatprep.subr.bf16.mxu1 %v1637_v3  ;;  %v230_v11 = vrot.slane %v1894_v41, 2  ;;  %v231_v15 = vrot.slane %v52_v48, 2  ;;  %v58_v54 = vld [vmem:[%s2483_s0 + $0x128] sm:$0x3]  ;;  %v44_v58 = vld [vmem:[%s2483_s0 + $0xb8] sm:$0x3] }
  0x17   :  { %v1940_v17 = vsel %vm190_vm1, %v224_v47, %v225_v53  ;;  %v136_v23 = vrot.slane %v1923_v2, 1  ;;  %v137_v30 = vrot.slane %v54_v7, 1  ;;  %v1984_v47 = vld [vmem:[%s2483_s0 + $0x120] sm:$0xff]  ;;  %v234_v53 = vrot.slane %v54_v7, 2 }
  0x18   :  { %1339 = vrot.lane.b32.xlu1 %v1338_v62, %s1643_s26  ;;  %v213_v62 = vrot.slane %v1821_v10, 2  ;;  %v228_v10 = vrot.slane %v50_v36, 2  ;;  %822 = vmatpush1.bf16.msra.mxu0 %v1567_v59  ;;  %v216_v39 = vrot.slane %v42_v16, 2  ;;  %vm592_vm3 = vcmask 261120  }
  0x19   :  { %1324 = vrot.lane.b32.xlu0 %v1323_v61, %s1642_s17  ;;  %v212_v61 = vrot.slane %v1828_v12, 2  ;;  %1270 = vmatpush1.bf16.msra.mxu1 %v1567_v59  ;;  %v1989_v48 = vsel %vm93_vm0, %v136_v23, %v137_v30  ;;  %v139_v59 = vrot.slane %v1965_v31, 1  ;;  %v396_v23 = vrot.slane %v1984_v47, 2  ;;  %v60_v30 = vld [vmem:[%s2483_s0 + $0x138] sm:$0x3] }
  0x1a   :  { %v1957_v26 = vsel %vm190_vm1, %v227_v8, %v228_v10  ;;  %823 = vmatprep.subr.bf16.mxu0 %v1637_v3  ;;  %1262 = vmatprep.subr.bf16.mxu1 %v1637_v3  ;;  %v342_v10 = vrot.slane %v1984_v47, 1  ;;  %vm609_vm4 = vcmask 392192   ;;  %vm626_vm5 = vcmask 523264  }
  0x1b   :  { %v1974_v36 = vsel %vm190_vm1, %v212_v61, %v213_v62  ;;  %v236_v62 = vrot.slane %v1965_v31, 2  ;;  %vm643_vm6 = vcmask 654336   ;;  %vm660_vm7 = vcmask 785408  }
  0x1c   :  { %1349 = vrot.lane.b32.xlu1 %v1843_v18, %s1644_s19  ;;  %824 = vmatpush1.bf16.msra.mxu0 %v1568_v24  ;;  %v1408_v40 = vpack.i.bf16 %v1831_v13, %v1974_v36  ;;  %vm677_vm8 = vcmask 916480  }
  0x1d   :  { %1334 = vrot.lane.b32.xlu0 %v1333_v20, %s1639_s10  ;;  %v1943_v20 = vsel %vm93_vm0, %v133_v63, %v134_v6  ;;  %v1569_v63 = vld [vmem:[%s2484_s1 + $0x30] sm:$0xff]   ;;  %1271 = vmatpush1.bf16.msra.mxu1 %v1568_v24  ;;  %v340_v6 = vrot.slane %v1769_v50, 1  ;;  %v343_v50 = vrot.slane %v58_v54, 1 }
  0x1e   :  { %v1954_v25 = vpack.i.bf16 %v1943_v20, %v1931_v5  ;;  %825 = vmatprep.subr.bf16.mxu0 %v1637_v3  ;;  %1263 = vmatprep.subr.bf16.mxu1 %v1637_v3 }
  0x20   :  { %1359 = vrot.lane.b32.xlu1 %v1358_v32, %s1642_s17  ;;  %v56_v32 = vld [vmem:[%s2483_s0 + $0x118] sm:$0x3]  ;;  %826 = vmatpush1.bf16.msra.mxu0 %v1569_v63 }
  0x21   :  { %1344 = vrot.lane.b32.xlu0 %v1343_v29, %s1641_s16  ;;  %v1960_v29 = vsel %vm190_vm1, %v230_v11, %v231_v15  ;;  %v140_v61 = vrot.slane %v56_v32, 1  ;;  %v237_v8 = vrot.slane %v56_v32, 2  ;;  %v2023_v15 = vld [vmem:[%s2483_s0 + $0x130] sm:$0xff]  ;;  %v397_v32 = vrot.slane %v58_v54, 2  ;;  %1272 = vmatpush1.bf16.msra.mxu1 %v1569_v63 }
  0x22   :  { %v499_v54 = vrot.slane %v1794_v57, 1  ;;  %v502_v63 = vrot.slane %v2023_v15, 1  ;;  %827 = vmatprep.subr.bf16.mxu0 %v1637_v3  ;;  %v500_v11 = vrot.slane %v1789_v56, 1  ;;  %1264 = vmatprep.subr.bf16.mxu1 %v1637_v3  ;;  %v219_v56 = vrot.slane %v44_v58, 2 }
  0x24   :  { %1369 = vrot.lane.b32.xlu1 %v1368_v42, %s1639_s10  ;;  %v233_v42 = vrot.slane %v1923_v2, 2 }
  0x25   :  { %1354 = vrot.lane.b32.xlu0 %v1843_v18, %s1640_s11  ;;  %v339_v18 = vrot.slane %v1760_v46, 1 }
  0x26   :  { %v2007_v7 = vsel %vm190_vm1, %v233_v42, %v234_v53  ;;  %v2040_v42 = vld [vmem:[%s2483_s0 + $0xa0] sm:$0xff]  ;;  %v2065_v53 = vsel %vm190_vm1, %v396_v23, %v397_v32  ;;  %v503_v32 = vrot.slane %v60_v30, 1 }
  0x28   :  { %1379 = vrot.lane.b32.xlu1 %v1378_v37, %s1641_s16  ;;  %v2018_v37 = vsel %vm93_vm0, %v139_v59, %v140_v61  ;;  %v2045_v59 = vsel %vm93_vm0, %v342_v10, %v343_v50  ;;  %v556_v61 = vrot.slane %v2023_v15, 2  ;;  %v2060_v10 = vld [vmem:[%s2483_s0 + $0xb0] sm:$0xff] }
  0x29   :  { %1364 = vrot.lane.b32.xlu0 %v1363_v34, %s1638_s30  ;;  %v2029_v24 = vpack.i.bf16 %v2018_v37, %v1989_v48  ;;  %v2032_v34 = vsel %vm190_vm1, %v236_v62, %v237_v8  ;;  %v557_v62 = vrot.slane %v60_v30, 2  ;;  %v1570_v8 = vld [vmem:[%s2484_s1 + $0x38] sm:$0xff]   ;;  %v218_v22 = vrot.slane %v2060_v10, 2  ;;  %v1571_v30 = vld [vmem:[%s2484_s1 + $0x40] sm:$0xff]  }
  0x2a   :  { %828 = vmatpush1.bf16.msra.mxu0 %v1570_v8  ;;  %1273 = vmatpush1.bf16.msra.mxu1 %v1570_v8  ;;  %v2120_v8 = vld [vmem:[%s2483_s0 + $0xc0] sm:$0xff] }
  0x2b   :  { %v2078_v50 = vsel %vm190_vm1, %v556_v61, %v557_v62  ;;  %v2090_v61 = vsel %vm93_vm0, %v502_v63, %v503_v32  ;;  %v695_v62 = vpack.c.bf16 %v1773_v51, %v1729_v33  ;;  %829 = vmatprep.subr.bf16.mxu0 %v1637_v3  ;;  %v1393_v33 = vpack.i.bf16 %v1974_v36, %v1888_v38 }
  0x2c   :  { %1389 = vrot.lane.b32.xlu1 %v1928_v4, %s1640_s11  ;;  %v341_v51 = vsel %vm93_vm0, %v339_v18, %v340_v6  ;;  %1265 = vmatprep.subr.bf16.mxu1 %v1637_v3  ;;  %v122_v32 = vrot.slane %v44_v58, 1  ;;  %v124_v63 = vrot.slane %v2120_v8, 1  ;;  %v118_v3 = vrot.slane %v2040_v42, 1 }
  0x2d   :  { %1374 = vrot.lane.b32.xlu0 %v1373_v60, %s1643_s26  ;;  %v215_v60 = vrot.slane %v2040_v42, 2  ;;  %1196 = vmatprep.mubr.msk.bf16.mxu0 %vm575_vm2, %v695_v62  ;;  %v1403_v18 = vpack.i.bf16 %v341_v51, %v1899_v44  ;;  %v121_v62 = vrot.slane %v2060_v10, 1  ;;  %v1413_v44 = vpack.i.bf16 %v1794_v57, %v1760_v46 }
  0x2e   :  { %830 = vmatpush1.bf16.msra.mxu0 %v1571_v30  ;;  %1274 = vmatpush1.bf16.msra.mxu1 %v1571_v30  ;;  %v119_v30 = vrot.slane %v42_v16, 1  ;;  %v1448_v46 = vpack.i.bf16 %v1861_v27, %v2120_v8  ;;  %v1433_v57 = vpack.i.bf16 %v2120_v8, %v2060_v10 }
  0x30   :  { %1399 = vrot.lane.b32.xlu1 %v1398_v45, %s1638_s30  ;;  %v501_v45 = vsel %vm93_vm0, %v499_v54, %v500_v11  ;;  %v217_v11 = vsel %vm190_vm1, %v215_v60, %v216_v39  ;;  %v220_v54 = vsel %vm190_vm1, %v218_v22, %v219_v56  ;;  %v123_v22 = vsel %vm93_vm0, %v121_v62, %v122_v32 }
  0x31   :  { %1384 = vrot.lane.b32.xlu0 %v1928_v4, %s1644_s19  ;;  %v46_v4 = vld [vmem:[%s2483_s0 + $0xc8] sm:$0x3]  ;;  %v1418_v6 = vpack.i.bf16 %v501_v45, %v341_v51  ;;  %v120_v58 = vsel %vm93_vm0, %v118_v3, %v119_v30  ;;  %v221_v56 = vrot.slane %v2120_v8, 2  ;;  %v2491_v62 = vpack.i.bf16 %v1957_v26, %v1940_v17 }
  0x32   :  { %v125_v23 = vrot.slane %v46_v4, 1  ;;  %v1423_v16 = vpack.i.bf16 %v123_v22, %v120_v58  ;;  %v707_v3 = vpack.c.bf16 %v2032_v34, %v2007_v7  ;;  %v2493_v30 = vpack.i.bf16 %v2007_v7, %v1960_v29 }
  0x34   :  { %1409 = vrot.lane.b32.xlu1 %v1408_v40, %s1643_s26  ;;  %v1428_v40 = vpack.i.bf16 %v220_v54, %v217_v11  ;;  %v126_v39 = vsel %vm93_vm0, %v124_v63, %v125_v23  ;;  %v1483_v11 = vpack.i.bf16 %v1923_v2, %v1894_v41  ;;  %1202 = vmatprep.mubr.msk.bf16.mxu1 %vm575_vm2, %v707_v3 }
  0x35   :  { %1394 = vrot.lane.b32.xlu0 %v1393_v33, %s1642_s17  ;;  %v1438_v60 = vpack.i.bf16 %v126_v39, %v123_v22  ;;  %v222_v33 = vrot.slane %v46_v4, 2  ;;  %v1458_v32 = vpack.i.bf16 %v1908_v49, %v126_v39  ;;  %v1478_v4 = vpack.i.bf16 %v1866_v28, %v1861_v27 }
  0x36   :  { %v2497_v22 = vpack.i.bf16 %v2045_v59, %v2018_v37 }
  0x37   :  { %v2151_v23 = vsel %vm190_vm1, %v221_v56, %v222_v33 }
  0x38   :  { %1419 = vrot.lane.b32.xlu1 %v1418_v6, %s1644_s19  ;;  %v703_v63 = vpack.c.bf16 %v1940_v17, %v2151_v23  ;;  %v1443_v51 = vpack.i.bf16 %v2151_v23, %v220_v54  ;;  %v1468_v45 = vpack.i.bf16 %v1940_v17, %v2151_v23  ;;  %v2490_v6 = vpack.i.bf16 %v1960_v29, %v1957_v26 }
  0x39   :  { %1404 = vrot.lane.b32.xlu0 %v1403_v18, %s1639_s10  ;;  %v2489_v18 = vpack.i.bf16 %v1931_v5, %v1908_v49  ;;  %v705_v54 = vpack.c.bf16 %v1960_v29, %v1957_v26  ;;  %v1508_v49 = vpack.i.bf16 %v1894_v41, %v1866_v28  ;;  %v2492_v5 = vpack.i.bf16 %v1989_v48, %v1943_v20 }
  0x3a   :  { %v1538_v20 = vpack.i.bf16 %v1984_v47, %v1965_v31  ;;  %v2495_v48 = vpack.i.bf16 %v2032_v34, %v2007_v7 }
  0x3c   :  { %1429 = vrot.lane.b32.xlu1 %v1428_v40, %s1642_s17  ;;  %v1513_v40 = vpack.i.bf16 %v1965_v31, %v1923_v2 }
  0x3d   :  { %1414 = vrot.lane.b32.xlu0 %v1413_v44, %s1641_s16  ;;  %v2496_v44 = vpack.i.bf16 %v2090_v61, %v2045_v59 }
  0x40   :  { %1439 = vrot.lane.b32.xlu1 %v1438_v60, %s1639_s10 }
  0x41   :  { %1424 = vrot.lane.b32.xlu0 %v1423_v16, %s1640_s11 }
  0x44   :  { %1449 = vrot.lane.b32.xlu1 %v1448_v46, %s1641_s16 }
  0x45   :  { %1434 = vrot.lane.b32.xlu0 %v1433_v57, %s1638_s30 }
  0x48   :  { %1459 = vrot.lane.b32.xlu1 %v1458_v32, %s1640_s11 }
  0x49   :  { %1444 = vrot.lane.b32.xlu0 %v1443_v51, %s1643_s26 }
  0x4c   :  { %1469 = vrot.lane.b32.xlu1 %v1468_v45, %s1642_s17 }
  0x4d   :  { %1454 = vrot.lane.b32.xlu0 %v1458_v32, %s1644_s19 }
  0x50   :  { %1479 = vrot.lane.b32.xlu1 %v1478_v4, %s1638_s30 }
  0x51   :  { %1464 = vrot.lane.b32.xlu0 %v1954_v25, %s1640_s11 }
  0x54   :  { %1489 = vrot.lane.b32.xlu1 %v2489_v18, %s1639_s10 }
  0x55   :  { %1474 = vrot.lane.b32.xlu0 %v2490_v6, %s1642_s17 }
  0x58   :  { %1499 = vrot.lane.b32.xlu1 %v2491_v62, %s1643_s26 }
  0x59   :  { %1484 = vrot.lane.b32.xlu0 %v1483_v11, %s1638_s30 }
  0x5c   :  { %1509 = vrot.lane.b32.xlu1 %v1508_v49, %s1641_s16 }
  0x5d   :  { %1494 = vrot.lane.b32.xlu0 %v2492_v5, %s1639_s10 }
  0x60   :  { %1519 = vrot.lane.b32.xlu1 %v1954_v25, %s1644_s19  ;;  %v2494_v25 = vpack.i.bf16 %v2065_v53, %v2032_v34 }
  0x61   :  { %1504 = vrot.lane.b32.xlu0 %v2493_v30, %s1643_s26 }
  0x64   :  { %1529 = vrot.lane.b32.xlu1 %v2029_v24, %s1640_s11 }
  0x65   :  { %1514 = vrot.lane.b32.xlu0 %v1513_v40, %s1641_s16 }
  0x68   :  { %1539 = vrot.lane.b32.xlu1 %v1538_v20, %s1638_s30 }
  0x69   :  { %1524 = vrot.lane.b32.xlu0 %v2029_v24, %s1644_s19  ;;  %v1553_v24 = vpack.i.bf16 %v2023_v15, %v1984_v47 }
  0x6c   :  { %1549 = vrot.lane.b32.xlu1 %v2494_v25, %s1643_s26 }
  0x6d   :  { %1534 = vrot.lane.b32.xlu0 %v2495_v48, %s1642_s17 }
  0x70   :  { %1559 = vrot.lane.b32.xlu1 %v2496_v44, %s1644_s19 }
  0x71   :  { %1544 = vrot.lane.b32.xlu0 %v2497_v22, %s1639_s10 }
  0x75   :  { %1554 = vrot.lane.b32.xlu0 %v1553_v24, %s1641_s16 }
  0x76   :  { %v1285_v39 = vpop.permute.xlu1 %1284 }
  0x77   :  { %v1287_v59 = vunpack.i.h.bf16 %v1285_v39  ;;  %v1286_v57 = vunpack.i.l.bf16 %v1285_v39 }
  0x7a   :  { %v1300_v58 = vpop.permute.xlu1 %1299 }
  0x7b   :  { %v1290_v60 = vpop.permute.xlu0 %1289  ;;  %v1302_v56 = vunpack.i.h.bf16 %v1300_v58  ;;  %v1301_v33 = vunpack.i.l.bf16 %v1300_v58 }
  0x7c   :  { %v1292_v7 = vunpack.i.h.bf16 %v1290_v60  ;;  %v1291_v34 = vunpack.i.l.bf16 %v1290_v60 }
  0x7e   :  { %v1310_v16 = vpop.permute.xlu1 %1309  ;;  %v577_v47 = vsel %vm575_vm2, %v1678_v0, %v1292_v7  ;;  %v576_v15 = vsel %vm575_vm2, %v1700_v9, %v1291_v34 }
  0x7f   :  { %v1295_v61 = vpop.permute.xlu0 %1294  ;;  %v1312_v5 = vunpack.i.h.bf16 %v1310_v16  ;;  %v1311_v3 = vunpack.i.l.bf16 %v1310_v16 }
  0x80   :  { %v1297_v46 = vunpack.i.h.bf16 %v1295_v61  ;;  %v1296_v37 = vunpack.i.l.bf16 %v1295_v61 }
  0x82   :  { %v593_v32 = vsel %vm592_vm3, %v576_v15, %v1296_v37  ;;  %v594_v51 = vsel %vm592_vm3, %v577_v47, %v1297_v46  ;;  %v1320_v45 = vpop.permute.xlu1 %1319 }
  0x83   :  { %v610_v4 = vsel %vm609_vm4, %v593_v32, %v1286_v57  ;;  %v611_v18 = vsel %vm609_vm4, %v594_v51, %v1287_v59  ;;  %v1305_v6 = vpop.permute.xlu0 %1304  ;;  %v1322_v44 = vunpack.i.h.bf16 %v1320_v45  ;;  %v1321_v22 = vunpack.i.l.bf16 %v1320_v45 }
  0x84   :  { %v1307_v11 = vunpack.i.h.bf16 %v1305_v6  ;;  %v1306_v62 = vunpack.i.l.bf16 %v1305_v6  ;;  %v627_v49 = vsel %vm626_vm5, %v610_v4, %v1301_v33  ;;  %v628_v0 = vsel %vm626_vm5, %v611_v18, %v1302_v56 }
  0x85   :  { %v579_v33 = vsel %vm575_vm2, %v1713_v19, %v1322_v44  ;;  %v578_v46 = vsel %vm575_vm2, %v1683_v1, %v1321_v22  ;;  %v2498_v32 = vpack.c.bf16 %v1849_v21, %v1776_v52 }
  0x86   :  { %v644_v9 = vsel %vm643_vm6, %v627_v49, %v1306_v62  ;;  %v645_v30 = vsel %vm643_vm6, %v628_v0, %v1307_v11  ;;  %v1330_v40 = vpop.permute.xlu1 %1329 }
  0x87   :  { %v1315_v20 = vpop.permute.xlu0 %1314  ;;  %v661_v24 = vsel %vm660_vm7, %v644_v9, %v1311_v3  ;;  %v662_v39 = vsel %vm660_vm7, %v645_v30, %v1312_v5  ;;  %v1332_v37 = vunpack.i.h.bf16 %v1330_v40  ;;  %v1331_v59 = vunpack.i.l.bf16 %v1330_v40 }
  0x88   :  { %v1317_v25 = vunpack.i.h.bf16 %v1315_v20  ;;  %v1316_v48 = vunpack.i.l.bf16 %v1315_v20 }
  0x8a   :  { %v1340_v58 = vpop.permute.xlu1 %1339  ;;  %v678_v60 = vsel %vm677_vm8, %v661_v24, %v1316_v48  ;;  %v679_v7 = vsel %vm677_vm8, %v662_v39, %v1317_v25 }
  0x8b   :  { %v1325_v34 = vpop.permute.xlu0 %1324  ;;  %v694_v16 = vpack.c.bf16 %v679_v7, %v678_v60  ;;  %v1342_v19 = vunpack.i.h.bf16 %v1340_v58  ;;  %v1341_v18 = vunpack.i.l.bf16 %v1340_v58 }
  0x8c   :  { %v1327_v61 = vunpack.i.h.bf16 %v1325_v34  ;;  %v1326_v56 = vunpack.i.l.bf16 %v1325_v34 }
  0x8d   :  { %846 = vmatmul.mubr.bf16.vlgmr.msra.gmra.mrb[0].mxu0 %v694_v16 }
  0x8e   :  { %v596_v57 = vsel %vm592_vm3, %v579_v33, %v1327_v61  ;;  %v595_v47 = vsel %vm592_vm3, %v578_v46, %v1326_v56  ;;  %v1350_v15 = vpop.permute.xlu1 %1349  ;;  %1197 = vmatprep.mubr.msk.bf16.mxu0 %vm575_vm2, %v2498_v32  ;;  %v2499_v33 = vpack.c.bf16 %v1974_v36, %v1888_v38 }
  0x8f   :  { %v1335_v51 = vpop.permute.xlu0 %1334  ;;  %v612_v1 = vsel %vm609_vm4, %v595_v47, %v1331_v59  ;;  %v613_v6 = vsel %vm609_vm4, %v596_v57, %v1332_v37  ;;  %v1352_v0 = vunpack.i.h.bf16 %v1350_v15  ;;  %v1351_v5 = vunpack.i.l.bf16 %v1350_v15 }
  0x90   :  { %v1337_v45 = vunpack.i.h.bf16 %v1335_v51  ;;  %v1336_v4 = vunpack.i.l.bf16 %v1335_v51 }
  0x92   :  { %v629_v11 = vsel %vm626_vm5, %v612_v1, %v1336_v4  ;;  %v630_v62 = vsel %vm626_vm5, %v613_v6, %v1337_v45  ;;  %v1360_v49 = vpop.permute.xlu1 %1359 }
  0x93   :  { %v1345_v3 = vpop.permute.xlu0 %1344  ;;  %v646_v9 = vsel %vm643_vm6, %v629_v11, %v1341_v18  ;;  %v647_v30 = vsel %vm643_vm6, %v630_v62, %v1342_v19  ;;  %v1362_v60 = vunpack.i.h.bf16 %v1360_v49  ;;  %v1361_v7 = vunpack.i.l.bf16 %v1360_v49 }
  0x94   :  { %v1347_v52 = vunpack.i.h.bf16 %v1345_v3  ;;  %v1346_v21 = vunpack.i.l.bf16 %v1345_v3 }
  0x96   :  { %v663_v40 = vsel %vm660_vm7, %v646_v9, %v1346_v21  ;;  %v664_v20 = vsel %vm660_vm7, %v647_v30, %v1347_v52  ;;  %v1370_v25 = vpop.permute.xlu1 %1369 }
  0x97   :  { %v1355_v48 = vpop.permute.xlu0 %1354  ;;  %v680_v44 = vsel %vm677_vm8, %v663_v40, %v1351_v5  ;;  %v681_v22 = vsel %vm677_vm8, %v664_v20, %v1352_v0  ;;  %v1372_v59 = vunpack.i.h.bf16 %v1370_v25  ;;  %v1371_v57 = vunpack.i.l.bf16 %v1370_v25 }
  0x98   :  { %v1357_v24 = vunpack.i.h.bf16 %v1355_v48  ;;  %v1356_v39 = vunpack.i.l.bf16 %v1355_v48  ;;  %v696_v58 = vpack.c.bf16 %v681_v22, %v680_v44 }
  0x9a   :  { %v581_v34 = vsel %vm575_vm2, %v1751_v43, %v1357_v24  ;;  %v580_v16 = vsel %vm575_vm2, %v1737_v35, %v1356_v39  ;;  %854 = vmatmul.mubr.bf16.gmra.mrb[4].mxu0 %v696_v58  ;;  %v1380_v61 = vpop.permute.xlu1 %1379 }
  0x9b   :  { %v1365_v56 = vpop.permute.xlu0 %1364  ;;  %1198 = vmatprep.mubr.msk.bf16.mxu0 %vm575_vm2, %v2499_v33  ;;  %v597_v47 = vsel %vm592_vm3, %v580_v16, %v1361_v7  ;;  %v598_v15 = vsel %vm592_vm3, %v581_v34, %v1362_v60  ;;  %v1382_v19 = vunpack.i.h.bf16 %v1380_v61  ;;  %v1381_v38 = vunpack.i.l.bf16 %v1380_v61 }
  0x9c   :  { %v1367_v46 = vunpack.i.h.bf16 %v1365_v56  ;;  %v1366_v37 = vunpack.i.l.bf16 %v1365_v56  ;;  %v2500_v16 = vpack.c.bf16 %v1834_v14, %v1831_v13 }
  0x9e   :  { %v614_v43 = vsel %vm609_vm4, %v597_v47, %v1366_v37  ;;  %v615_v35 = vsel %vm609_vm4, %v598_v15, %v1367_v46  ;;  %v1390_v32 = vpop.permute.xlu1 %1389 }
  0x9f   :  { %v1375_v51 = vpop.permute.xlu0 %1374  ;;  %v631_v36 = vsel %vm626_vm5, %v614_v43, %v1371_v57  ;;  %v632_v18 = vsel %vm626_vm5, %v615_v35, %v1372_v59  ;;  %v1392_v5 = vunpack.i.h.bf16 %v1390_v32  ;;  %v1391_v3 = vunpack.i.l.bf16 %v1390_v32 }
  0xa0   :  { %v1377_v45 = vunpack.i.h.bf16 %v1375_v51  ;;  %v1376_v4 = vunpack.i.l.bf16 %v1375_v51 }
  0xa1   :  { %v583_v22 = vsel %vm575_vm2, %v1828_v12, %v1392_v5  ;;  %v582_v24 = vsel %vm575_vm2, %v1784_v55, %v1391_v3 }
  0xa2   :  { %v648_v1 = vsel %vm643_vm6, %v631_v36, %v1376_v4  ;;  %v649_v6 = vsel %vm643_vm6, %v632_v18, %v1377_v45  ;;  %v1400_v11 = vpop.permute.xlu1 %1399 }
  0xa3   :  { %v1385_v62 = vpop.permute.xlu0 %1384  ;;  %v665_v52 = vsel %vm660_vm7, %v648_v1, %v1381_v38  ;;  %v666_v21 = vsel %vm660_vm7, %v649_v6, %v1382_v19  ;;  %v1402_v39 = vunpack.i.h.bf16 %v1400_v11  ;;  %v1401_v58 = vunpack.i.l.bf16 %v1400_v11 }
  0xa4   :  { %v1387_v49 = vunpack.i.h.bf16 %v1385_v62  ;;  %v1386_v0 = vunpack.i.l.bf16 %v1385_v62 }
  0xa6   :  { %v1410_v9 = vpop.permute.xlu1 %1409  ;;  %v682_v30 = vsel %vm677_vm8, %v665_v52, %v1386_v0  ;;  %v683_v40 = vsel %vm677_vm8, %v666_v21, %v1387_v49 }
  0xa7   :  { %v1395_v20 = vpop.permute.xlu0 %1394  ;;  %v698_v25 = vpack.c.bf16 %v683_v40, %v682_v30  ;;  %v1412_v12 = vunpack.i.h.bf16 %v1410_v9  ;;  %v1411_v46 = vunpack.i.l.bf16 %v1410_v9 }
  0xa8   :  { %v1397_v48 = vunpack.i.h.bf16 %v1395_v20  ;;  %v1396_v44 = vunpack.i.l.bf16 %v1395_v20 }
  0xa9   :  { %862 = vmatmul.mubr.bf16.gmra.mrb[8].mxu0 %v698_v25 }
  0xaa   :  { %v600_v60 = vsel %vm592_vm3, %v583_v22, %v1397_v48  ;;  %v599_v7 = vsel %vm592_vm3, %v582_v24, %v1396_v44  ;;  %v1420_v34 = vpop.permute.xlu1 %1419  ;;  %1199 = vmatprep.mubr.msk.bf16.mxu0 %vm575_vm2, %v2500_v16 }
  0xab   :  { %v1405_v61 = vpop.permute.xlu0 %1404  ;;  %v616_v55 = vsel %vm609_vm4, %v599_v7, %v1401_v58  ;;  %v617_v37 = vsel %vm609_vm4, %v600_v60, %v1402_v39  ;;  %v1422_v15 = vunpack.i.h.bf16 %v1420_v34  ;;  %v1421_v43 = vunpack.i.l.bf16 %v1420_v34 }
  0xac   :  { %v1407_v56 = vunpack.i.h.bf16 %v1405_v61  ;;  %v1406_v33 = vunpack.i.l.bf16 %v1405_v61 }
  0xae   :  { %v633_v59 = vsel %vm626_vm5, %v616_v55, %v1406_v33  ;;  %v634_v57 = vsel %vm626_vm5, %v617_v37, %v1407_v56  ;;  %v1430_v47 = vpop.permute.xlu1 %1429 }
  0xaf   :  { %v1415_v35 = vpop.permute.xlu0 %1414  ;;  %v650_v32 = vsel %vm643_vm6, %v633_v59, %v1411_v46  ;;  %v651_v51 = vsel %vm643_vm6, %v634_v57, %v1412_v12  ;;  %v1432_v62 = vunpack.i.h.bf16 %v1430_v47  ;;  %v1431_v49 = vunpack.i.l.bf16 %v1430_v47 }
  0xb0   :  { %v1417_v13 = vunpack.i.h.bf16 %v1415_v35  ;;  %v1416_v14 = vunpack.i.l.bf16 %v1415_v35 }
  0xb2   :  { %v667_v45 = vsel %vm660_vm7, %v650_v32, %v1416_v14  ;;  %v668_v4 = vsel %vm660_vm7, %v651_v51, %v1417_v13  ;;  %v1440_v19 = vpop.permute.xlu1 %1439 }
  0xb3   :  { %v1425_v38 = vpop.permute.xlu0 %1424  ;;  %v684_v36 = vsel %vm677_vm8, %v667_v45, %v1421_v43  ;;  %v685_v18 = vsel %vm677_vm8, %v668_v4, %v1422_v15  ;;  %v1442_v30 = vunpack.i.h.bf16 %v1440_v19  ;;  %v1441_v40 = vunpack.i.l.bf16 %v1440_v19 }
  0xb4   :  { %v1427_v1 = vunpack.i.h.bf16 %v1425_v38  ;;  %v1426_v6 = vunpack.i.l.bf16 %v1425_v38  ;;  %v700_v11 = vpack.c.bf16 %v685_v18, %v684_v36 }
  0xb6   :  { %v585_v0 = vsel %vm575_vm2, %v2060_v10, %v1427_v1  ;;  %v584_v5 = vsel %vm575_vm2, %v2040_v42, %v1426_v6  ;;  %870 = vmatmul.mubr.bf16.gmra.mrb[12].mxu0 %v700_v11  ;;  %v1450_v3 = vpop.permute.xlu1 %1449 }
  0xb7   :  { %v1435_v52 = vpop.permute.xlu0 %1434  ;;  %1200 = vmatprep.mubr.msk.bf16.mxu0 %vm575_vm2, %v703_v63  ;;  %v601_v20 = vsel %vm592_vm3, %v584_v5, %v1431_v49  ;;  %v602_v25 = vsel %vm592_vm3, %v585_v0, %v1432_v62  ;;  %v1452_v39 = vunpack.i.h.bf16 %v1450_v3  ;;  %v1451_v17 = vunpack.i.l.bf16 %v1450_v3 }
  0xb8   :  { %v1437_v21 = vunpack.i.h.bf16 %v1435_v52  ;;  %v1436_v9 = vunpack.i.l.bf16 %v1435_v52 }
  0xba   :  { %v618_v10 = vsel %vm609_vm4, %v601_v20, %v1436_v9  ;;  %v619_v42 = vsel %vm609_vm4, %v602_v25, %v1437_v21  ;;  %v1460_v48 = vpop.permute.xlu1 %1459 }
  0xbb   :  { %v1445_v44 = vpop.permute.xlu0 %1444  ;;  %v635_v23 = vsel %vm626_vm5, %v618_v10, %v1441_v40  ;;  %v636_v63 = vsel %vm626_vm5, %v619_v42, %v1442_v30  ;;  %v1462_v15 = vunpack.i.h.bf16 %v1460_v48  ;;  %v1461_v43 = vunpack.i.l.bf16 %v1460_v48 }
  0xbc   :  { %v1447_v22 = vunpack.i.h.bf16 %v1445_v44  ;;  %v1446_v24 = vunpack.i.l.bf16 %v1445_v44 }
  0xbd   :  { %v587_v51 = vsel %vm575_vm2, %v1861_v27, %v1462_v15  ;;  %v586_v45 = vsel %vm575_vm2, %v2120_v8, %v1461_v43 }
  0xbe   :  { %v652_v58 = vsel %vm643_vm6, %v635_v23, %v1446_v24  ;;  %v653_v60 = vsel %vm643_vm6, %v636_v63, %v1447_v22  ;;  %v1470_v7 = vpop.permute.xlu1 %1469 }
  0xbf   :  { %v1455_v34 = vpop.permute.xlu0 %1454  ;;  %v669_v56 = vsel %vm660_vm7, %v652_v58, %v1451_v17  ;;  %v670_v33 = vsel %vm660_vm7, %v653_v60, %v1452_v39  ;;  %v1472_v14 = vunpack.i.h.bf16 %v1470_v7  ;;  %v1471_v32 = vunpack.i.l.bf16 %v1470_v7 }
  0xc0   :  { %v1457_v16 = vunpack.i.h.bf16 %v1455_v34  ;;  %v1456_v61 = vunpack.i.l.bf16 %v1455_v34 }
  0xc1   :  { %v603_v1 = vsel %vm592_vm3, %v586_v45, %v1471_v32  ;;  %v604_v6 = vsel %vm592_vm3, %v587_v51, %v1472_v14 }
  0xc2   :  { %v1480_v12 = vpop.permute.xlu1 %1479  ;;  %v686_v46 = vsel %vm677_vm8, %v669_v56, %v1456_v61  ;;  %v687_v55 = vsel %vm677_vm8, %v670_v33, %v1457_v16 }
  0xc3   :  { %v1465_v37 = vpop.permute.xlu0 %1464  ;;  %v702_v59 = vpack.c.bf16 %v687_v55, %v686_v46  ;;  %v1482_v4 = vunpack.i.h.bf16 %v1480_v12  ;;  %v1481_v19 = vunpack.i.l.bf16 %v1480_v12 }
  0xc4   :  { %v1467_v40 = vunpack.i.h.bf16 %v1465_v37  ;;  %v1466_v20 = vunpack.i.l.bf16 %v1465_v37 }
  0xc5   :  { %878 = vmatmul.mubr.bf16.gmra.mrb[16].mxu0 %v702_v59  ;;  %v620_v49 = vsel %vm609_vm4, %v603_v1, %v1481_v19  ;;  %v621_v27 = vsel %vm609_vm4, %v604_v6, %v1482_v4 }
  0xc6   :  { %v1490_v57 = vpop.permute.xlu1 %1489  ;;  %1201 = vmatprep.mubr.msk.bf16.mxu0 %vm575_vm2, %v705_v54  ;;  %v589_v7 = vsel %vm575_vm2, %v1894_v41, %v1467_v40  ;;  %v588_v34 = vsel %vm575_vm2, %v1866_v28, %v1466_v20 }
  0xc7   :  { %v1475_v47 = vpop.permute.xlu0 %1474  ;;  %v1492_v38 = vunpack.i.h.bf16 %v1490_v57  ;;  %v1491_v36 = vunpack.i.l.bf16 %v1490_v57 }
  0xc8   :  { %v1477_v42 = vunpack.i.h.bf16 %v1475_v47  ;;  %v1476_v48 = vunpack.i.l.bf16 %v1475_v47 }
  0xc9   :  { %v637_v8 = vsel %vm626_vm5, %v620_v49, %v1491_v36  ;;  %v638_v0 = vsel %vm626_vm5, %v621_v27, %v1492_v38  ;;  %v2501_v49 = vpack.c.bf16 %v2078_v50, %v2065_v53 }
  0xca   :  { %v1500_v35 = vpop.permute.xlu1 %1499  ;;  %v605_v56 = vsel %vm592_vm3, %v588_v34, %v1476_v48  ;;  %v606_v33 = vsel %vm592_vm3, %v589_v7, %v1477_v42 }
  0xcb   :  { %v1485_v13 = vpop.permute.xlu0 %1484  ;;  %v1502_v29 = vunpack.i.h.bf16 %v1500_v35  ;;  %v1501_v54 = vunpack.i.l.bf16 %v1500_v35 }
  0xcc   :  { %v1487_v24 = vunpack.i.h.bf16 %v1485_v13  ;;  %v1486_v39 = vunpack.i.l.bf16 %v1485_v13 }
  0xcd   :  { %v654_v3 = vsel %vm643_vm6, %v637_v8, %v1501_v54  ;;  %v655_v52 = vsel %vm643_vm6, %v638_v0, %v1502_v29 }
  0xce   :  { %v1510_v26 = vpop.permute.xlu1 %1509  ;;  %v622_v55 = vsel %vm609_vm4, %v605_v56, %v1486_v39  ;;  %v623_v37 = vsel %vm609_vm4, %v606_v33, %v1487_v24  ;;  %v1572_v39 = vld [vmem:[%s2485_s3] sm:$0xff]  }
  0xcf   :  { %v1495_v18 = vpop.permute.xlu0 %1494  ;;  %v1512_v11 = vunpack.i.h.bf16 %v1510_v26  ;;  %v1511_v62 = vunpack.i.l.bf16 %v1510_v26  ;;  %1239 = vmatprep.subr.bf16.mxu1 %v1572_v39 }
  0xd0   :  { %v1497_v63 = vunpack.i.h.bf16 %v1495_v18  ;;  %v1496_v58 = vunpack.i.l.bf16 %v1495_v18 }
  0xd1   :  { %v671_v25 = vsel %vm660_vm7, %v654_v3, %v1511_v62  ;;  %v672_v10 = vsel %vm660_vm7, %v655_v52, %v1512_v11 }
  0xd2   :  { %v1520_v5 = vpop.permute.xlu1 %1519  ;;  %v639_v57 = vsel %vm626_vm5, %v622_v55, %v1496_v58  ;;  %v640_v41 = vsel %vm626_vm5, %v623_v37, %v1497_v63 }
  0xd3   :  { %v1505_v21 = vpop.permute.xlu0 %1504  ;;  %v1522_v9 = vunpack.i.h.bf16 %v1520_v5  ;;  %v1521_v30 = vunpack.i.l.bf16 %v1520_v5 }
  0xd4   :  { %v1507_v16 = vunpack.i.h.bf16 %v1505_v21  ;;  %v1506_v61 = vunpack.i.l.bf16 %v1505_v21 }
  0xd5   :  { %v688_v44 = vsel %vm677_vm8, %v671_v25, %v1521_v30  ;;  %v689_v22 = vsel %vm677_vm8, %v672_v10, %v1522_v9 }
  0xd6   :  { %v704_v17 = vpack.c.bf16 %v689_v22, %v688_v44  ;;  %v1530_v23 = vpop.permute.xlu1 %1529  ;;  %v656_v28 = vsel %vm643_vm6, %v639_v57, %v1506_v61  ;;  %v657_v15 = vsel %vm643_vm6, %v640_v41, %v1507_v16 }
  0xd7   :  { %v1515_v60 = vpop.permute.xlu0 %1514  ;;  %v1532_v32 = vunpack.i.h.bf16 %v1530_v23  ;;  %v1531_v51 = vunpack.i.l.bf16 %v1530_v23 }
  0xd8   :  { %886 = vmatmul.mubr.bf16.gmra.mrb[20].mxu0 %v704_v17  ;;  %v1517_v12 = vunpack.i.h.bf16 %v1515_v60  ;;  %v1516_v46 = vunpack.i.l.bf16 %v1515_v60  ;;  %v2390_v17 = vld [vmem:[%s2486_s2] ss:$0 sm:$0xff] }
  0xd9   :  { %v591_v54 = vsel %vm575_vm2, %v1965_v31, %v1532_v32  ;;  %v590_v18 = vsel %vm575_vm2, %v1923_v2, %v1531_v51 }
  0xda   :  { %v1540_v59 = vpop.permute.xlu1 %1539  ;;  %v673_v13 = vsel %vm660_vm7, %v656_v28, %v1516_v46  ;;  %v674_v14 = vsel %vm660_vm7, %v657_v15, %v1517_v12 }
  0xdb   :  { %v1525_v47 = vpop.permute.xlu0 %1524  ;;  %v1542_v1 = vunpack.i.h.bf16 %v1540_v59  ;;  %v1541_v6 = vunpack.i.l.bf16 %v1540_v59 }
  0xdc   :  { %v1527_v43 = vunpack.i.h.bf16 %v1525_v47  ;;  %v1526_v35 = vunpack.i.l.bf16 %v1525_v47 }
  0xde   :  { %v690_v45 = vsel %vm677_vm8, %v673_v13, %v1526_v35  ;;  %v691_v4 = vsel %vm677_vm8, %v674_v14, %v1527_v43  ;;  %v1550_v19 = vpop.permute.xlu1 %1549 }
  0xdf   :  { %v1535_v38 = vpop.permute.xlu0 %1534  ;;  %v706_v36 = vpack.c.bf16 %v691_v4, %v690_v45  ;;  %v1552_v3 = vunpack.i.h.bf16 %v1550_v19  ;;  %v1551_v52 = vunpack.i.l.bf16 %v1550_v19 }
  0xe0   :  { %v1537_v26 = vunpack.i.h.bf16 %v1535_v38  ;;  %v1536_v29 = vunpack.i.l.bf16 %v1535_v38 }
  0xe1   :  { %894 = vmatmul.mubr.bf16.vlgmr.msra.gmra.mrb[0].mxu1 %v706_v36 }
  0xe2   :  { %v608_v11 = vsel %vm592_vm3, %v591_v54, %v1537_v26  ;;  %v607_v62 = vsel %vm592_vm3, %v590_v18, %v1536_v29  ;;  %1203 = vmatprep.mubr.msk.bf16.mxu1 %vm575_vm2, %v2501_v49  ;;  %v1560_v5 = vpop.permute.xlu1 %1559  ;;  %1240 = vmatpush3.bf16.msra.mxu1 %v1572_v39 }
  0xe3   :  { %v1545_v27 = vpop.permute.xlu0 %1544  ;;  %v624_v31 = vsel %vm609_vm4, %v607_v62, %v1541_v6  ;;  %v625_v2 = vsel %vm609_vm4, %v608_v11, %v1542_v1  ;;  %v1562_v40 = vunpack.i.h.bf16 %v1560_v5  ;;  %v1561_v20 = vunpack.i.l.bf16 %v1560_v5 }
  0xe4   :  { %v1547_v8 = vunpack.i.h.bf16 %v1545_v27  ;;  %v1546_v0 = vunpack.i.l.bf16 %v1545_v27 }
  0xe6   :  { %v641_v21 = vsel %vm626_vm5, %v624_v31, %v1546_v0  ;;  %v642_v9 = vsel %vm626_vm5, %v625_v2, %v1547_v8 }
  0xe7   :  { %v1555_v30 = vpop.permute.xlu0 %1554  ;;  %v658_v25 = vsel %vm643_vm6, %v641_v21, %v1551_v52  ;;  %v659_v10 = vsel %vm643_vm6, %v642_v9, %v1552_v3 }
  0xe8   :  { %v1557_v53 = vunpack.i.h.bf16 %v1555_v30  ;;  %v1556_v50 = vunpack.i.l.bf16 %v1555_v30 }
  0xea   :  { %v675_v42 = vsel %vm660_vm7, %v658_v25, %v1556_v50  ;;  %v676_v48 = vsel %vm660_vm7, %v659_v10, %v1557_v53 }
  0xeb   :  { %v692_v44 = vsel %vm677_vm8, %v675_v42, %v1561_v20  ;;  %v693_v22 = vsel %vm677_vm8, %v676_v48, %v1562_v40 }
  0xec   :  { %v708_v24 = vpack.c.bf16 %v693_v22, %v692_v44 }
  0xee   :  { %902 = vmatmul.mubr.bf16.gmra.mrb[4].mxu1 %v708_v24 }
 0x160   :  { %v847_v23 = vpop.f32.mrb[0].mxu0 }
 0x161   :  { %v848_v63 = vadd.f32 %v2390_v17, %v847_v23  ;;  %v849_v58 = vpop.f32.mrb[1].mxu0 }
 0x162   :  { %v850_v60 = vpop.f32.mrb[2].mxu0 }
 0x163   :  { %v1204_v7 = vmul.f32 -1.442695, %v848_v63  ;;  %v851_v34 = vadd.f32 %v2390_v17, %v850_v60  ;;  %v852_v16 = vpop.f32.mrb[3].mxu0 }
 0x165   :  { %1573 = vpow2.f32 %v1204_v7  ;;  %v1205_v61 = vmul.f32 -1.442695, %v851_v34 }
 0x167   :  { %1575 = vpow2.f32 %v1205_v61 }
 0x16d   :  { %v855_v56 = vpop.f32.mrb[4].mxu0 }
 0x16e   :  { %v856_v33 = vadd.f32 %v2390_v17, %v855_v56  ;;  %v857_v12 = vpop.f32.mrb[5].mxu0 }
 0x16f   :  { %v1574_v46 = vpop.eup %1573  ;;  %v858_v55 = vpop.f32.mrb[6].mxu0 }
 0x170   :  { %v958_v37 = vadd.f32 1.0, %v1574_v46  ;;  %v1206_v59 = vmul.f32 -1.442695, %v856_v33  ;;  %v859_v57 = vadd.f32 %v2390_v17, %v858_v55  ;;  %v860_v41 = vpop.f32.mrb[7].mxu0 }
 0x171   :  { %v1576_v47 = vpop.eup %1575 }
 0x172   :  { %1577 = vrcp.f32 %v958_v37  ;;  %v959_v28 = vadd.f32 1.0, %v1576_v47  ;;  %v1207_v15 = vmul.f32 -1.442695, %v859_v57 }
 0x173   :  { %1579 = vpow2.f32 %v1206_v59 }
 0x174   :  { %1581 = vrcp.f32 %v959_v28 }
 0x175   :  { %1583 = vpow2.f32 %v1207_v15 }
 0x17c   :  { %v1578_v43 = vpop.eup %1577  ;;  %v863_v35 = vpop.f32.mrb[8].mxu0 }
 0x17d   :  { %v1580_v13 = vpop.eup %1579  ;;  %v864_v14 = vadd.f32 %v2390_v17, %v863_v35  ;;  %v865_v32 = vpop.f32.mrb[9].mxu0  ;;  %v1006_v38 = vmul.f32 %v1578_v43, %v848_v63 }
 0x17e   :  { %v1582_v51 = vpop.eup %1581  ;;  %v960_v45 = vadd.f32 1.0, %v1580_v13  ;;  %v866_v4 = vpop.f32.mrb[10].mxu0 }
 0x17f   :  { %v1584_v19 = vpop.eup %1583  ;;  %v1007_v36 = vmul.f32 %v1582_v51, %v851_v34  ;;  %v1208_v26 = vmul.f32 -1.442695, %v864_v14  ;;  %v867_v29 = vadd.f32 %v2390_v17, %v866_v4  ;;  %v868_v54 = vpop.f32.mrb[11].mxu0 }
 0x180   :  { %1585 = vrcp.f32 %v960_v45  ;;  %v961_v18 = vadd.f32 1.0, %v1584_v19 }
 0x181   :  { %v1022_v1 = vpack.c.bf16 %v1007_v36, %v1006_v38  ;;  %1587 = vpow2.f32 %v1208_v26  ;;  %v1209_v6 = vmul.f32 -1.442695, %v867_v29 }
 0x182   :  { %1589 = vrcp.f32 %v961_v18 }
 0x183   :  { %1591 = vpow2.f32 %v1209_v6  ;;  %1241 = vmatprep.mubr.msk.bf16.mxu1 %vm575_vm2, %v1022_v1 }
 0x189   :  { %v871_v11 = vpop.f32.mrb[12].mxu0 }
 0x18a   :  { %v1586_v62 = vpop.eup %1585  ;;  %v872_v49 = vadd.f32 %v2390_v17, %v871_v11  ;;  %v873_v27 = vpop.f32.mrb[13].mxu0 }
 0x18b   :  { %v1588_v8 = vpop.eup %1587  ;;  %v874_v0 = vpop.f32.mrb[14].mxu0  ;;  %v1008_v9 = vmul.f32 %v1586_v62, %v856_v33 }
 0x18c   :  { %v1590_v5 = vpop.eup %1589  ;;  %v962_v31 = vadd.f32 1.0, %v1588_v8  ;;  %v1210_v2 = vmul.f32 -1.442695, %v872_v49  ;;  %v875_v3 = vadd.f32 %v2390_v17, %v874_v0  ;;  %v876_v52 = vpop.f32.mrb[15].mxu0 }
 0x18d   :  { %v1592_v21 = vpop.eup %1591  ;;  %v1009_v30 = vmul.f32 %v1590_v5, %v859_v57 }
 0x18e   :  { %1593 = vrcp.f32 %v962_v31  ;;  %v963_v40 = vadd.f32 1.0, %v1592_v21  ;;  %v1211_v20 = vmul.f32 -1.442695, %v875_v3 }
 0x18f   :  { %v1023_v53 = vpack.c.bf16 %v1009_v30, %v1008_v9  ;;  %1595 = vpow2.f32 %v1210_v2 }
 0x190   :  { %1597 = vrcp.f32 %v963_v40 }
 0x191   :  { %1599 = vpow2.f32 %v1211_v20  ;;  %1242 = vmatmul.mubr.msk.bf16.vlgmr.msra.gmra.mrb[8].mxu1 %vm575_vm2, %v1023_v53 }
 0x198   :  { %v1594_v50 = vpop.eup %1593  ;;  %v879_v25 = vpop.f32.mrb[16].mxu0 }
 0x199   :  { %v1596_v10 = vpop.eup %1595  ;;  %v880_v42 = vadd.f32 %v2390_v17, %v879_v25  ;;  %v881_v48 = vpop.f32.mrb[17].mxu0  ;;  %v1010_v23 = vmul.f32 %v1594_v50, %v864_v14 }
 0x19a   :  { %v1598_v44 = vpop.eup %1597  ;;  %v964_v22 = vadd.f32 1.0, %v1596_v10  ;;  %v882_v24 = vpop.f32.mrb[18].mxu0 }
 0x19b   :  { %v1600_v39 = vpop.eup %1599  ;;  %v1011_v63 = vmul.f32 %v1598_v44, %v867_v29  ;;  %v1212_v58 = vmul.f32 -1.442695, %v880_v42  ;;  %v883_v60 = vadd.f32 %v2390_v17, %v882_v24  ;;  %v884_v7 = vpop.f32.mrb[19].mxu0 }
 0x19c   :  { %1601 = vrcp.f32 %v964_v22  ;;  %v965_v34 = vadd.f32 1.0, %v1600_v39 }
 0x19d   :  { %v1024_v16 = vpack.c.bf16 %v1011_v63, %v1010_v23  ;;  %1603 = vpow2.f32 %v1212_v58  ;;  %v1213_v61 = vmul.f32 -1.442695, %v883_v60 }
 0x19e   :  { %1605 = vrcp.f32 %v965_v34 }
 0x19f   :  { %1607 = vpow2.f32 %v1213_v61  ;;  %1245 = vmatprep.mubr.msk.bf16.mxu1 %vm575_vm2, %v1024_v16 }
 0x1a6   :  { %v1602_v56 = vpop.eup %1601 }
 0x1a7   :  { %v1604_v33 = vpop.eup %1603  ;;  %v1012_v37 = vmul.f32 %v1602_v56, %v872_v49 }
 0x1a8   :  { %v1606_v12 = vpop.eup %1605  ;;  %v966_v46 = vadd.f32 1.0, %v1604_v33  ;;  %v1220_v33 = vld [vmem:[%s2487_s4] ss:$0 sm:$0xff] }
 0x1a9   :  { %v1608_v55 = vpop.eup %1607  ;;  %v1013_v59 = vmul.f32 %v1606_v12, %v875_v3 }
 0x1aa   :  { %1609 = vrcp.f32 %v966_v46  ;;  %v967_v57 = vadd.f32 1.0, %v1608_v55 }
 0x1ab   :  { %v1025_v41 = vpack.c.bf16 %v1013_v59, %v1012_v37  ;;  %v887_v47 = vpop.f32.mrb[20].mxu0 }
 0x1ac   :  { %1611 = vrcp.f32 %v967_v57  ;;  %v888_v28 = vadd.f32 %v2390_v17, %v887_v47  ;;  %v889_v15 = vpop.f32.mrb[21].mxu0 }
 0x1ad   :  { %1246 = vmatmul.mubr.msk.bf16.gmra.mrb[12].mxu1 %vm575_vm2, %v1025_v41  ;;  %v890_v43 = vpop.f32.mrb[22].mxu0 }
 0x1ae   :  { %v1214_v35 = vmul.f32 -1.442695, %v888_v28  ;;  %v891_v13 = vadd.f32 %v2390_v17, %v890_v43  ;;  %v892_v14 = vpop.f32.mrb[23].mxu0 }
 0x1b0   :  { %1613 = vpow2.f32 %v1214_v35  ;;  %v1215_v32 = vmul.f32 -1.442695, %v891_v13 }
 0x1b2   :  { %1615 = vpow2.f32 %v1215_v32 }
 0x1b4   :  { %v1610_v51 = vpop.eup %1609  ;;  %v895_v45 = vpop.f32.mrb[0].mxu1 }
 0x1b5   :  { %v896_v4 = vadd.f32 %v2390_v17, %v895_v45  ;;  %v897_v19 = vpop.f32.mrb[1].mxu1  ;;  %v1014_v26 = vmul.f32 %v1610_v51, %v880_v42 }
 0x1b6   :  { %v1612_v38 = vpop.eup %1611  ;;  %v898_v36 = vpop.f32.mrb[2].mxu1 }
 0x1b7   :  { %v1015_v29 = vmul.f32 %v1612_v38, %v883_v60  ;;  %v1216_v54 = vmul.f32 -1.442695, %v896_v4  ;;  %v899_v18 = vadd.f32 %v2390_v17, %v898_v36  ;;  %v900_v1 = vpop.f32.mrb[3].mxu1 }
 0x1b9   :  { %v1026_v6 = vpack.c.bf16 %v1015_v29, %v1014_v26  ;;  %1617 = vpow2.f32 %v1216_v54  ;;  %v1217_v11 = vmul.f32 -1.442695, %v899_v18 }
 0x1ba   :  { %v1614_v62 = vpop.eup %1613 }
 0x1bb   :  { %v968_v49 = vadd.f32 1.0, %v1614_v62  ;;  %1619 = vpow2.f32 %v1217_v11  ;;  %1249 = vmatprep.mubr.msk.bf16.mxu1 %vm575_vm2, %v1026_v6 }
 0x1bc   :  { %v1616_v27 = vpop.eup %1615 }
 0x1bd   :  { %1621 = vrcp.f32 %v968_v49  ;;  %v969_v8 = vadd.f32 1.0, %v1616_v27 }
 0x1bf   :  { %1623 = vrcp.f32 %v969_v8 }
 0x1c1   :  { %v903_v0 = vpop.f32.mrb[4].mxu1 }
 0x1c2   :  { %v904_v5 = vadd.f32 %v2390_v17, %v903_v0  ;;  %v905_v31 = vpop.f32.mrb[5].mxu1 }
 0x1c3   :  { %v1618_v2 = vpop.eup %1617  ;;  %v906_v3 = vpop.f32.mrb[6].mxu1 }
 0x1c4   :  { %v970_v52 = vadd.f32 1.0, %v1618_v2  ;;  %v1218_v21 = vmul.f32 -1.442695, %v904_v5  ;;  %v907_v9 = vadd.f32 %v2390_v17, %v906_v3  ;;  %v908_v30 = vpop.f32.mrb[7].mxu1 }
 0x1c5   :  { %v1620_v40 = vpop.eup %1619 }
 0x1c6   :  { %1625 = vrcp.f32 %v970_v52  ;;  %v971_v20 = vadd.f32 1.0, %v1620_v40  ;;  %v1219_v53 = vmul.f32 -1.442695, %v907_v9 }
 0x1c7   :  { %v1622_v50 = vpop.eup %1621  ;;  %1627 = vpow2.f32 %v1218_v21 }
 0x1c8   :  { %1629 = vrcp.f32 %v971_v20  ;;  %v1016_v10 = vmul.f32 %v1622_v50, %v888_v28 }
 0x1c9   :  { %v1624_v25 = vpop.eup %1623  ;;  %1631 = vpow2.f32 %v1219_v53 }
 0x1ca   :  { %v1017_v42 = vmul.f32 %v1624_v25, %v891_v13 }
 0x1cc   :  { %v1027_v48 = vpack.c.bf16 %v1017_v42, %v1016_v10 }
 0x1ce   :  { %1250 = vmatmul.mubr.msk.bf16.gmra.mrb[16].mxu1 %vm575_vm2, %v1027_v48 }
 0x1d0   :  { %v1626_v44 = vpop.eup %1625 }
 0x1d1   :  { %v1628_v22 = vpop.eup %1627  ;;  %v1018_v23 = vmul.f32 %v1626_v44, %v896_v4 }
 0x1d2   :  { %v1630_v24 = vpop.eup %1629  ;;  %v972_v39 = vadd.f32 1.0, %v1628_v22 }
 0x1d3   :  { %v1632_v17 = vpop.eup %1631  ;;  %v1019_v63 = vmul.f32 %v1630_v24, %v899_v18 }
 0x1d4   :  { %1633 = vrcp.f32 %v972_v39  ;;  %v973_v58 = vadd.f32 1.0, %v1632_v17 }
 0x1d5   :  { %v1028_v60 = vpack.c.bf16 %v1019_v63, %v1018_v23 }
 0x1d6   :  { %1635 = vrcp.f32 %v973_v58 }
 0x1d7   :  { %1253 = vmatprep.mubr.msk.bf16.mxu1 %vm575_vm2, %v1028_v60 }
 0x1de   :  { %v1634_v7 = vpop.eup %1633 }
 0x1df   :  { %v1020_v16 = vmul.f32 %v1634_v7, %v904_v5 }
 0x1e0   :  { %v1636_v34 = vpop.eup %1635 }
 0x1e1   :  { %v1021_v61 = vmul.f32 %v1636_v34, %v907_v9 }
 0x1e3   :  { %v1029_v56 = vpack.c.bf16 %v1021_v61, %v1020_v16 }
 0x1e5   :  { %1254 = vmatmul.mubr.msk.bf16.gmra.mrb[20].mxu1 %vm575_vm2, %v1029_v56 }
 0x264   :  { %v1243_v12 = vpop.f32.mrb[8].mxu1 }
 0x265   :  { %v1112_v46 = vadd.f32 %v1243_v12, %v1220_v33  ;;  %v1103_v55 = vpop.f32.mrb[9].mxu1 }
 0x266   :  { %v1104_v37 = vadd.f32 %v1220_v33, %v1103_v55  ;;  %v1244_v59 = vpop.f32.mrb[10].mxu1 }
 0x267   :  { %1168 = vst.msk [vmem:[%s2488_s5 + $0x10] sm:$0xff] %vm592_vm3, %v1112_v46  ;;  %v1115_v57 = vadd.f32 %v1244_v59, %v1220_v33  ;;  %v1106_v41 = vpop.f32.mrb[11].mxu1 }
 0x268   :  { %1166 = vst.msk [vmem:[%s2488_s5] sm:$0xff] %vm592_vm3, %v1104_v37  ;;  %v1107_v47 = vadd.f32 %v1220_v33, %v1106_v41 }
 0x269   :  { %1169 = vst.msk [vmem:[%s2488_s5 + $0x18] sm:$0xff] %vm592_vm3, %v1115_v57 }
 0x26a   :  { %1167 = vst.msk [vmem:[%s2488_s5 + $0x8] sm:$0xff] %vm592_vm3, %v1107_v47 }
 0x280   :  { %v1247_v28 = vpop.f32.mrb[12].mxu1 }
 0x281   :  { %v1128_v15 = vadd.f32 %v1247_v28, %v1220_v33  ;;  %v1119_v43 = vpop.f32.mrb[13].mxu1 }
 0x282   :  { %v1120_v35 = vadd.f32 %v1220_v33, %v1119_v43  ;;  %v1248_v13 = vpop.f32.mrb[14].mxu1 }
 0x283   :  { %1172 = vst.msk [vmem:[%s2488_s5 + $0x30] sm:$0xff] %vm592_vm3, %v1128_v15  ;;  %v1131_v14 = vadd.f32 %v1248_v13, %v1220_v33  ;;  %v1122_v32 = vpop.f32.mrb[15].mxu1 }
 0x284   :  { %1170 = vst.msk [vmem:[%s2488_s5 + $0x20] sm:$0xff] %vm592_vm3, %v1120_v35  ;;  %v1123_v51 = vadd.f32 %v1220_v33, %v1122_v32 }
 0x285   :  { %1173 = vst.msk [vmem:[%s2488_s5 + $0x38] sm:$0xff] %vm592_vm3, %v1131_v14 }
 0x286   :  { %1171 = vst.msk [vmem:[%s2488_s5 + $0x28] sm:$0xff] %vm592_vm3, %v1123_v51 }
 0x2a1   :  { %v1251_v45 = vpop.f32.mrb[16].mxu1 }
 0x2a2   :  { %v1144_v4 = vadd.f32 %v1251_v45, %v1220_v33  ;;  %v1135_v19 = vpop.f32.mrb[17].mxu1 }
 0x2a3   :  { %v1136_v38 = vadd.f32 %v1220_v33, %v1135_v19  ;;  %v1252_v36 = vpop.f32.mrb[18].mxu1 }
 0x2a4   :  { %1176 = vst.msk [vmem:[%s2488_s5 + $0x50] sm:$0xff] %vm592_vm3, %v1144_v4  ;;  %v1147_v26 = vadd.f32 %v1252_v36, %v1220_v33  ;;  %v1138_v29 = vpop.f32.mrb[19].mxu1 }
 0x2a5   :  { %1174 = vst.msk [vmem:[%s2488_s5 + $0x40] sm:$0xff] %vm592_vm3, %v1136_v38  ;;  %v1139_v54 = vadd.f32 %v1220_v33, %v1138_v29 }
 0x2a6   :  { %1177 = vst.msk [vmem:[%s2488_s5 + $0x58] sm:$0xff] %vm592_vm3, %v1147_v26 }
 0x2a7   :  { %1175 = vst.msk [vmem:[%s2488_s5 + $0x48] sm:$0xff] %vm592_vm3, %v1139_v54 }
 0x2b8   :  { %v1255_v18 = vpop.f32.mrb[20].mxu1 }
 0x2b9   :  { %v1160_v1 = vadd.f32 %v1255_v18, %v1220_v33  ;;  %v1151_v6 = vpop.f32.mrb[21].mxu1 }
 0x2ba   :  { %v1152_v11 = vadd.f32 %v1220_v33, %v1151_v6  ;;  %v1256_v62 = vpop.f32.mrb[22].mxu1 }
 0x2bb   :  { %1180 = vst.msk [vmem:[%s2488_s5 + $0x70] sm:$0xff] %vm592_vm3, %v1160_v1  ;;  %v1163_v49 = vadd.f32 %v1256_v62, %v1220_v33  ;;  %v1154_v27 = vpop.f32.mrb[23].mxu1 }
 0x2bc   :  { %1178 = vst.msk [vmem:[%s2488_s5 + $0x60] sm:$0xff] %vm592_vm3, %v1152_v11  ;;  %v1155_v8 = vadd.f32 %v1220_v33, %v1154_v27 }
 0x2bd   :  { %1181 = vst.msk [vmem:[%s2488_s5 + $0x78] sm:$0xff] %vm592_vm3, %v1163_v49 }
 0x2be   :  { %1179 = vst.msk [vmem:[%s2488_s5 + $0x68] sm:$0xff] %vm592_vm3, %v1155_v8 }

// kernel: forward.7
= control target key start
LH: loop header
LB: loop body
LE: loop exit
PB: predicated region body
PF: predicated region fallthrough
CT: control target
= control target key end

     0   :  { %s1984_s5 = smov 16   ;;  %vm258_vm0 = vcmask 130048   ;;  %s1985_s28 = smov 64   ;;  %vm331_vm1 = vcmask 1046528   ;;  %vm428_vm2 = vcmask 1045504   ;;  %vm781_vm3 = vcmask 261120   ;;  %s3242_s1 = inlined_call_operand.vmem [shape: f32[2,10,10,16], index: 1, kind: input, shape index: {}]   ;;  %s3243_s0 = inlined_call_operand.vmem [shape: f32[2,10,10,16], index: 0, kind: input, shape index: {}]   ;;  %s3244_s2 = inlined_call_operand.vmem [shape: bf16[288,16], index: 2, kind: input, shape index: {}]   ;;  %s3245_s3 = inlined_call_operand.vmem [shape: f32[1,16], index: 3, kind: input, shape index: {}]   ;;  %s3246_s4 = inlined_call_operand.vmem [shape: f32[2,64,16], index: 4, kind: output, shape index: {}]  }
   0x1   :  { %v60_v0 = vld [vmem:[%s3242_s1 + $0x10] sm:$0xff]  ;;  %v61_v1 = vld [vmem:[%s3242_s1 + $0x18] sm:$0x3]  ;;  %v58_v2 = vld [vmem:[%s3242_s1] sm:$0xff]  ;;  %s1986_s29 = smov 96   ;;  %s1987_s18 = smov 32  }
   0x2   :  { %v1562_v3 = vpack.i.bf16 %v61_v1, %v60_v0  ;;  %v59_v4 = vld [vmem:[%s3242_s1 + $0x8] sm:$0x3]  ;;  %v62_v5 = vld [vmem:[%s3242_s1 + $0x20] sm:$0xff]  ;;  %v64_v8 = vld [vmem:[%s3242_s1 + $0x30] sm:$0xff]  ;;  %vm798_vm4 = vcmask 523264   ;;  %vm815_vm5 = vcmask 785408  }
   0x3   :  { %v63_v6 = vld [vmem:[%s3242_s1 + $0x28] sm:$0x3]  ;;  %v1572_v7 = vpack.i.bf16 %v59_v4, %v58_v2  ;;  %v65_v9 = vld [vmem:[%s3242_s1 + $0x38] sm:$0x3]  ;;  %v88_v12 = vld [vmem:[%s3242_s1 + $0xf0] sm:$0xff] }
   0x4   :  { %1563 = vrot.lane.b32.xlu0 %v1562_v3, %s1984_s5  ;;  %v1567_v10 = vpack.i.bf16 %v63_v6, %v62_v5  ;;  %v1577_v11 = vpack.i.bf16 %v65_v9, %v64_v8  ;;  %v89_v13 = vld [vmem:[%s3242_s1 + $0xf8] sm:$0x3]  ;;  %v90_v14 = vld [vmem:[%s3242_s1 + $0x100] sm:$0xff]  ;;  %v91_v15 = vld [vmem:[%s3242_s1 + $0x108] sm:$0x3] }
   0x5   :  { %1573 = vrot.lane.b32.xlu1 %v1572_v7, %s1984_s5  ;;  %v1582_v16 = vpack.i.bf16 %v89_v13, %v88_v12  ;;  %v1587_v17 = vpack.i.bf16 %v91_v15, %v90_v14  ;;  %v86_v18 = vld [vmem:[%s3242_s1 + $0xe0] sm:$0xff]  ;;  %v87_v19 = vld [vmem:[%s3242_s1 + $0xe8] sm:$0x3]  ;;  %v92_v20 = vld [vmem:[%s3242_s1 + $0x110] sm:$0xff] }
   0x6   :  { %v93_v21 = vld [vmem:[%s3242_s1 + $0x118] sm:$0x3]  ;;  %v1592_v22 = vpack.i.bf16 %v87_v19, %v86_v18  ;;  %v66_v24 = vld [vmem:[%s3242_s1 + $0x40] sm:$0xff]  ;;  %v67_v25 = vld [vmem:[%s3242_s1 + $0x48] sm:$0x3] }
   0x7   :  { %v1597_v23 = vpack.i.bf16 %v93_v21, %v92_v20  ;;  %v68_v26 = vld [vmem:[%s3242_s1 + $0x50] sm:$0xff]  ;;  %v69_v27 = vld [vmem:[%s3242_s1 + $0x58] sm:$0x3]  ;;  %v1602_v28 = vpack.i.bf16 %v67_v25, %v66_v24  ;;  %v94_v30 = vld [vmem:[%s3242_s1 + $0x120] sm:$0xff] }
   0x8   :  { %1568 = vrot.lane.b32.xlu0 %v1567_v10, %s1984_s5  ;;  %v1607_v29 = vpack.i.bf16 %v69_v27, %v68_v26  ;;  %v95_v31 = vld [vmem:[%s3242_s1 + $0x128] sm:$0x3]  ;;  %v96_v32 = vld [vmem:[%s3242_s1 + $0x130] sm:$0xff]  ;;  %v97_v33 = vld [vmem:[%s3242_s1 + $0x138] sm:$0x3] }
   0x9   :  { %1578 = vrot.lane.b32.xlu1 %v1577_v11, %s1984_s5  ;;  %v1612_v34 = vpack.i.bf16 %v95_v31, %v94_v30  ;;  %v1617_v35 = vpack.i.bf16 %v97_v33, %v96_v32  ;;  %v70_v36 = vld [vmem:[%s3242_s1 + $0x60] sm:$0xff]  ;;  %v71_v37 = vld [vmem:[%s3242_s1 + $0x68] sm:$0x3]  ;;  %v72_v38 = vld [vmem:[%s3242_s1 + $0x70] sm:$0xff] }
   0xa   :  { %v73_v39 = vld [vmem:[%s3242_s1 + $0x78] sm:$0x3]  ;;  %v1622_v40 = vpack.i.bf16 %v71_v37, %v70_v36  ;;  %v74_v42 = vld [vmem:[%s3242_s1 + $0x80] sm:$0xff]  ;;  %v75_v43 = vld [vmem:[%s3242_s1 + $0x88] sm:$0x3] }
   0xb   :  { %v1627_v41 = vpack.i.bf16 %v73_v39, %v72_v38  ;;  %v76_v44 = vld [vmem:[%s3242_s1 + $0x90] sm:$0xff]  ;;  %v77_v45 = vld [vmem:[%s3242_s1 + $0x98] sm:$0x3]  ;;  %v1632_v46 = vpack.i.bf16 %v75_v43, %v74_v42  ;;  %v82_v50 = vld [vmem:[%s3242_s1 + $0xc0] sm:$0xff] }
   0xc   :  { %1583 = vrot.lane.b32.xlu0 %v1582_v16, %s1984_s5  ;;  %v1637_v47 = vpack.i.bf16 %v77_v45, %v76_v44  ;;  %v80_v48 = vld [vmem:[%s3242_s1 + $0xb0] sm:$0xff]  ;;  %v81_v49 = vld [vmem:[%s3242_s1 + $0xb8] sm:$0x3]  ;;  %v83_v51 = vld [vmem:[%s3242_s1 + $0xc8] sm:$0x3] }
   0xd   :  { %1588 = vrot.lane.b32.xlu1 %v1587_v17, %s1984_s5  ;;  %v1642_v52 = vpack.i.bf16 %v81_v49, %v80_v48  ;;  %v1647_v53 = vpack.i.bf16 %v83_v51, %v82_v50  ;;  %v78_v54 = vld [vmem:[%s3242_s1 + $0xa0] sm:$0xff]  ;;  %v79_v55 = vld [vmem:[%s3242_s1 + $0xa8] sm:$0x3]  ;;  %v84_v56 = vld [vmem:[%s3242_s1 + $0xd0] sm:$0xff] }
   0xe   :  { %v85_v57 = vld [vmem:[%s3242_s1 + $0xd8] sm:$0x3]  ;;  %v1652_v58 = vpack.i.bf16 %v79_v55, %v78_v54  ;;  %v22_v63 = vld [vmem:[%s3243_s0 + $0x20] sm:$0xff]  ;;  %v24_v1 = vld [vmem:[%s3243_s0 + $0x30] sm:$0xff] }
   0xf   :  { %v1657_v59 = vpack.i.bf16 %v85_v57, %v84_v56  ;;  %v20_v5 = vld [vmem:[%s3243_s0 + $0x10] sm:$0xff]  ;;  %v50_v11 = vld [vmem:[%s3243_s0 + $0x100] sm:$0xff]  ;;  %v21_v26 = vld [vmem:[%s3243_s0 + $0x18] sm:$0x3] }
  0x10   :  { %1593 = vrot.lane.b32.xlu0 %v1592_v22, %s1984_s5  ;;  %v48_v9 = vld [vmem:[%s3243_s0 + $0xf0] sm:$0xff]  ;;  %v1903_v25 = vld [vmem:[%s3244_s2] sm:$0xff]   ;;  %v1905_v39 = vld [vmem:[%s3244_s2 + $0x8] sm:$0xff]  }
  0x11   :  { %1598 = vrot.lane.b32.xlu1 %v1597_v23, %s1984_s5  ;;  %v52_v21 = vld [vmem:[%s3243_s0 + $0x110] sm:$0xff]  ;;  %v1902_v23 = vld [vmem:[%s3244_s2 + $0x40] sm:$0xff]   ;;  %v23_v55 = vld [vmem:[%s3243_s0 + $0x28] sm:$0x3] }
  0x12   :  { %1448 = vmatprep.subr.bf16.mxu0 %v1902_v23  ;;  %v18_v31 = vld [vmem:[%s3243_s0] sm:$0xff]  ;;  %1542 = vmatprep.subr.bf16.mxu1 %v1902_v23  ;;  %v56_v49 = vld [vmem:[%s3243_s0 + $0x130] sm:$0xff] }
  0x13   :  { %v26_v32 = vld [vmem:[%s3243_s0 + $0x40] sm:$0xff]  ;;  %1449 = vmatpush3.bf16.msra.mxu0 %v1903_v25  ;;  %1550 = vmatpush3.bf16.msra.mxu1 %v1903_v25  ;;  %v1907_v50 = vld [vmem:[%s3244_s2 + $0x10] sm:$0xff]  }
  0x14   :  { %1603 = vrot.lane.b32.xlu0 %v1602_v28, %s1984_s5  ;;  %v54_v45 = vld [vmem:[%s3243_s0 + $0x120] sm:$0xff] }
  0x15   :  { %1608 = vrot.lane.b32.xlu1 %v1607_v29, %s1984_s5  ;;  %v1904_v29 = vld [vmem:[%s3244_s2 + $0x48] sm:$0xff]   ;;  %v34_v23 = vld [vmem:[%s3243_s0 + $0x80] sm:$0xff] }
  0x16   :  { %1450 = vmatprep.subr.bf16.mxu0 %v1904_v29  ;;  %1543 = vmatprep.subr.bf16.mxu1 %v1904_v29 }
  0x17   :  { %1451 = vmatpush3.bf16.msra.mxu0 %v1905_v39  ;;  %1551 = vmatpush3.bf16.msra.mxu1 %v1905_v39 }
  0x18   :  { %1613 = vrot.lane.b32.xlu0 %v1612_v34, %s1984_s5  ;;  %v28_v34 = vld [vmem:[%s3243_s0 + $0x50] sm:$0xff] }
  0x19   :  { %1618 = vrot.lane.b32.xlu1 %v1617_v35, %s1984_s5 }
  0x1c   :  { %1623 = vrot.lane.b32.xlu0 %v1622_v40, %s1984_s5  ;;  %v19_v40 = vld [vmem:[%s3243_s0 + $0x8] sm:$0x3] }
  0x1d   :  { %1628 = vrot.lane.b32.xlu1 %v1627_v41, %s1984_s5 }
  0x20   :  { %1633 = vrot.lane.b32.xlu0 %v1632_v46, %s1984_s5  ;;  %v1906_v46 = vld [vmem:[%s3244_s2 + $0x50] sm:$0xff]  }
  0x21   :  { %1638 = vrot.lane.b32.xlu1 %v1637_v47, %s1984_s5  ;;  %1452 = vmatprep.subr.bf16.mxu0 %v1906_v46 }
  0x22   :  { %1544 = vmatprep.subr.bf16.mxu1 %v1906_v46  ;;  %1453 = vmatpush3.bf16.msra.mxu0 %v1907_v50 }
  0x23   :  { %1552 = vmatpush3.bf16.msra.mxu1 %v1907_v50 }
  0x24   :  { %1643 = vrot.lane.b32.xlu0 %v1642_v52, %s1984_s5 }
  0x25   :  { %1648 = vrot.lane.b32.xlu1 %v1647_v53, %s1984_s5 }
  0x28   :  { %1653 = vrot.lane.b32.xlu0 %v1652_v58, %s1984_s5  ;;  %v30_v58 = vld [vmem:[%s3243_s0 + $0x60] sm:$0xff] }
  0x29   :  { %1658 = vrot.lane.b32.xlu1 %v1657_v59, %s1984_s5 }
  0x76   :  { %v2153_v60 = vpop.permute.xlu0 %1563 }
  0x77   :  { %v2155_v61 = vpop.permute.xlu1 %1573  ;;  %v1565_v2 = vunpack.i.l.bf16 %v2153_v60  ;;  %v1566_v30 = vunpack.i.h.bf16 %v2153_v60  ;;  %v25_v60 = vld [vmem:[%s3243_s0 + $0x38] sm:$0x3] }
  0x78   :  { %v1576_v35 = vunpack.i.h.bf16 %v2155_v61  ;;  %v1575_v36 = vunpack.i.l.bf16 %v2155_v61 }
  0x79   :  { %v2190_v12 = vsel %vm258_vm0, %v20_v5, %v1565_v2  ;;  %v2273_v47 = vsel %vm258_vm0, %v21_v26, %v1566_v30 }
  0x7a   :  { %v2157_v62 = vpop.permute.xlu0 %1568  ;;  %v2285_v51 = vsel %vm258_vm0, %v18_v31, %v1575_v36  ;;  %v2288_v52 = vsel %vm258_vm0, %v19_v40, %v1576_v35  ;;  %v36_v31 = vld [vmem:[%s3243_s0 + $0x90] sm:$0xff]  ;;  %v49_v35 = vld [vmem:[%s3243_s0 + $0xf8] sm:$0x3]  ;;  %v51_v36 = vld [vmem:[%s3243_s0 + $0x108] sm:$0x3]  ;;  %v335_v39 = vrot.slane %v2190_v12, 1 }
  0x7b   :  { %v2162_v0 = vpop.permute.xlu1 %1578  ;;  %v1570_v3 = vunpack.i.l.bf16 %v2157_v62  ;;  %v1571_v59 = vunpack.i.h.bf16 %v2157_v62  ;;  %v1908_v62 = vld [vmem:[%s3244_s2 + $0x58] sm:$0xff]   ;;  %v333_v5 = vrot.slane %v2288_v52, 1  ;;  %v432_v40 = vrot.slane %v2190_v12, 2 }
  0x7c   :  { %v1580_v4 = vunpack.i.l.bf16 %v2162_v0  ;;  %1454 = vmatprep.subr.bf16.mxu0 %v1908_v62  ;;  %1545 = vmatprep.subr.bf16.mxu1 %v1908_v62  ;;  %v42_v62 = vld [vmem:[%s3243_s0 + $0xc0] sm:$0xff] }
  0x7d   :  { %v2174_v6 = vsel %vm258_vm0, %v22_v63, %v1570_v3  ;;  %v336_v3 = vrot.slane %v2273_v47, 1  ;;  %v2344_v25 = vsel %vm258_vm0, %v23_v55, %v1571_v59 }
  0x7e   :  { %3265 = vst [vmem:[#allocation2_spill] sm:$0xff] %v2174_v6  ;;  %v2177_v7 = vsel %vm258_vm0, %v24_v1, %v1580_v4  ;;  %v2179_v8 = vpop.permute.xlu0 %1583  ;;  %v1667_v16 = vpack.i.bf16 %v2174_v6, %v2190_v12  ;;  %v32_v1 = vld [vmem:[%s3243_s0 + $0x70] sm:$0xff]  ;;  %v332_v4 = vrot.slane %v2285_v51, 1  ;;  %v339_v50 = vrot.slane %v2344_v25, 1 }
  0x7f   :  { %v2184_v10 = vpop.permute.xlu1 %1588  ;;  %v1585_v13 = vunpack.i.l.bf16 %v2179_v8  ;;  %v1662_v15 = vpack.i.bf16 %v2177_v7, %v2174_v6 }
  0x80   :  { %v1590_v14 = vunpack.i.l.bf16 %v2184_v10  ;;  %1668 = vrot.lane.b32.xlu1 %v1667_v16, %s1986_s29  ;;  %v429_v16 = vrot.slane %v2285_v51, 2  ;;  %v1591_v46 = vunpack.i.h.bf16 %v2184_v10 }
  0x81   :  { %v2199_v17 = vsel %vm258_vm0, %v48_v9, %v1585_v13  ;;  %1663 = vrot.lane.b32.xlu0 %v1662_v15, %s1985_s28  ;;  %v1581_v9 = vunpack.i.h.bf16 %v2162_v0  ;;  %v1909_v13 = vld [vmem:[%s3244_s2 + $0x18] sm:$0xff]  }
  0x82   :  { %v2202_v18 = vsel %vm258_vm0, %v50_v11, %v1590_v14  ;;  %v2204_v19 = vpop.permute.xlu0 %1593  ;;  %1455 = vmatpush3.bf16.msra.mxu0 %v1909_v13  ;;  %1553 = vmatpush3.bf16.msra.mxu1 %v1909_v13  ;;  %v2425_v13 = vsel %vm258_vm0, %v51_v36, %v1591_v46 }
  0x83   :  { %v2208_v20 = vpop.permute.xlu1 %1598  ;;  %v1677_v24 = vpack.i.bf16 %v2202_v18, %v2199_v17  ;;  %v1596_v59 = vunpack.i.h.bf16 %v2204_v19 }
  0x84   :  { %v1600_v22 = vunpack.i.l.bf16 %v2208_v20 }
  0x85   :  { %1678 = vrot.lane.b32.xlu1 %v1677_v24, %s1986_s29  ;;  %v433_v24 = vrot.slane %v2273_v47, 2 }
  0x86   :  { %v2226_v27 = vsel %vm258_vm0, %v52_v21, %v1600_v22  ;;  %v2228_v28 = vpop.permute.xlu0 %1603  ;;  %v430_v21 = vrot.slane %v2288_v52, 2 }
  0x87   :  { %v2241_v33 = vpop.permute.xlu1 %1608  ;;  %v1605_v37 = vunpack.i.l.bf16 %v2228_v28  ;;  %v1672_v41 = vpack.i.bf16 %v2226_v27, %v2202_v18 }
  0x88   :  { %v1610_v38 = vunpack.i.l.bf16 %v2241_v33  ;;  %v1611_v46 = vunpack.i.h.bf16 %v2241_v33 }
  0x89   :  { %v2259_v42 = vsel %vm258_vm0, %v26_v32, %v1605_v37  ;;  %1673 = vrot.lane.b32.xlu0 %v1672_v41, %s1985_s28  ;;  %v1910_v32 = vld [vmem:[%s3244_s2 + $0x60] sm:$0xff]  }
  0x8a   :  { %v2262_v43 = vsel %vm258_vm0, %v28_v34, %v1610_v38  ;;  %v2264_v44 = vpop.permute.xlu0 %1613  ;;  %v1687_v57 = vpack.i.bf16 %v2259_v42, %v2177_v7  ;;  %v2361_v34 = vsel %vm258_vm0, %v25_v60, %v1581_v9  ;;  %v2374_v38 = vsel %vm331_vm1, %v332_v4, %v333_v5  ;;  %v1911_v41 = vld [vmem:[%s3244_s2 + $0x20] sm:$0xff]   ;;  %1456 = vmatprep.subr.bf16.mxu0 %v1910_v32  ;;  %v40_v60 = vld [vmem:[%s3243_s0 + $0xb0] sm:$0xff] }
  0x8b   :  { %v2276_v48 = vpop.permute.xlu1 %1618  ;;  %v1615_v53 = vunpack.i.l.bf16 %v2264_v44  ;;  %v1682_v56 = vpack.i.bf16 %v2262_v43, %v2259_v42  ;;  %v342_v10 = vrot.slane %v2361_v34, 1  ;;  %1546 = vmatprep.subr.bf16.mxu1 %v1910_v32  ;;  %v2416_v4 = vsel %vm331_vm1, %v335_v39, %v336_v3  ;;  %1457 = vmatpush3.bf16.msra.mxu0 %v1911_v41  ;;  %v1912_v3 = vld [vmem:[%s3244_s2 + $0x68] sm:$0xff]  }
  0x8c   :  { %v1620_v54 = vunpack.i.l.bf16 %v2276_v48  ;;  %1688 = vrot.lane.b32.xlu1 %v1687_v57, %s1986_s29  ;;  %v2419_v5 = vsel %vm428_vm2, %v432_v40, %v433_v24  ;;  %1554 = vmatpush3.bf16.msra.mxu1 %v1911_v41  ;;  %v1601_v32 = vunpack.i.h.bf16 %v2208_v20  ;;  %v435_v39 = vrot.slane %v2174_v6, 2 }
  0x8d   :  { %v2307_v61 = vsel %vm258_vm0, %v54_v45, %v1615_v53  ;;  %1683 = vrot.lane.b32.xlu0 %v1682_v56, %s1985_s28  ;;  %v1586_v45 = vunpack.i.h.bf16 %v2179_v8  ;;  %v436_v8 = vrot.slane %v2344_v25, 2  ;;  %1458 = vmatprep.subr.bf16.mxu0 %v1912_v3  ;;  %v1606_v20 = vunpack.i.h.bf16 %v2228_v28 }
  0x8e   :  { %v2309_v63 = vpop.permute.xlu0 %1623  ;;  %v2315_v2 = vsel %vm258_vm0, %v56_v49, %v1620_v54  ;;  %v1697_v22 = vpack.i.bf16 %v2307_v61, %v2226_v27  ;;  %v2391_v54 = vsel %vm428_vm2, %v429_v16, %v430_v21  ;;  %v1913_v21 = vld [vmem:[%s3244_s2 + $0x28] sm:$0xff]   ;;  %v1621_v33 = vunpack.i.h.bf16 %v2276_v48  ;;  %1547 = vmatprep.subr.bf16.mxu1 %v1912_v3  ;;  %v57_v48 = vld [vmem:[%s3243_s0 + $0x138] sm:$0x3] }
  0x8f   :  { %v2326_v11 = vpop.permute.xlu1 %1628  ;;  %v1625_v14 = vunpack.i.l.bf16 %v2309_v63  ;;  %v1692_v0 = vpack.i.bf16 %v2315_v2, %v2307_v61  ;;  %v2422_v9 = vsel %vm258_vm0, %v49_v35, %v1586_v45  ;;  %v53_v35 = vld [vmem:[%s3243_s0 + $0x118] sm:$0x3]  ;;  %v27_v45 = vld [vmem:[%s3243_s0 + $0x48] sm:$0x3]  ;;  %1459 = vmatpush3.bf16.msra.mxu0 %v1913_v21 }
  0x90   :  { %v1630_v15 = vunpack.i.l.bf16 %v2326_v11  ;;  %1698 = vrot.lane.b32.xlu1 %v1697_v22, %s1986_s29  ;;  %v1595_v22 = vunpack.i.l.bf16 %v2204_v19  ;;  %v469_v40 = vrot.slane %v2422_v9, 2  ;;  %1555 = vmatpush3.bf16.msra.mxu1 %v1913_v21  ;;  %v2500_v3 = vsel %vm258_vm0, %v53_v35, %v1601_v32 }
  0x91   :  { %v2347_v26 = vsel %vm258_vm0, %v30_v58, %v1625_v14  ;;  %1693 = vrot.lane.b32.xlu0 %v1692_v0, %s1985_s28  ;;  %v47_v14 = vld [vmem:[%s3243_s0 + $0xe8] sm:$0x3]  ;;  %v372_v0 = vrot.slane %v2422_v9, 1  ;;  %v338_v32 = vrot.slane %v2174_v6, 1  ;;  %v341_v35 = vrot.slane %v2177_v7, 1 }
  0x92   :  { %v2350_v29 = vsel %vm258_vm0, %v32_v1, %v1630_v15  ;;  %v2352_v30 = vpop.permute.xlu0 %1633  ;;  %v1707_v53 = vpack.i.bf16 %v2347_v26, %v2262_v43  ;;  %v2460_v41 = vsel %vm258_vm0, %v47_v14, %v1596_v59 }
  0x93   :  { %v2371_v37 = vpop.permute.xlu1 %1638  ;;  %v1635_v47 = vunpack.i.l.bf16 %v2352_v30  ;;  %v1702_v52 = vpack.i.bf16 %v2350_v29, %v2347_v26  ;;  %v2570_v28 = vsel %vm331_vm1, %v341_v35, %v342_v10  ;;  %v1631_v10 = vunpack.i.h.bf16 %v2326_v11 }
  0x94   :  { %v1640_v49 = vunpack.i.l.bf16 %v2371_v37  ;;  %1708 = vrot.lane.b32.xlu1 %v1707_v53, %s1986_s29  ;;  %v29_v53 = vld [vmem:[%s3243_s0 + $0x58] sm:$0x3]  ;;  %3268 = vst [vmem:[#allocation5_spill] sm:$0xff] %v2570_v28 }
  0x95   :  { %v2396_v55 = vsel %vm258_vm0, %v34_v23, %v1635_v47  ;;  %1703 = vrot.lane.b32.xlu0 %v1702_v52, %s1985_s28  ;;  %v2517_v21 = vsel %vm258_vm0, %v29_v53, %v1611_v46  ;;  %v1917_v46 = vld [vmem:[%s3244_s2 + $0x38] sm:$0xff]   ;;  %v466_v53 = vrot.slane %v2460_v41, 2 }
  0x96   :  { %v2398_v56 = vpop.permute.xlu0 %1643  ;;  %v2401_v57 = vsel %vm258_vm0, %v36_v31, %v1640_v49  ;;  %v1717_v24 = vpack.i.bf16 %v2396_v55, %v2350_v29  ;;  %v46_v31 = vld [vmem:[%s3243_s0 + $0xe0] sm:$0xff]  ;;  %v44_v49 = vld [vmem:[%s3243_s0 + $0xd0] sm:$0xff]  ;;  %v445_v58 = vrot.slane %v2517_v21, 2 }
  0x97   :  { %v2410_v1 = vpop.permute.xlu1 %1648  ;;  %v1645_v15 = vunpack.i.l.bf16 %v2398_v56  ;;  %v1712_v23 = vpack.i.bf16 %v2401_v57, %v2396_v55  ;;  %v2488_v14 = vsel %vm258_vm0, %v46_v31, %v1595_v22  ;;  %v2511_v31 = vsel %vm428_vm2, %v435_v39, %v436_v8 }
  0x98   :  { %v1650_v16 = vunpack.i.l.bf16 %v2410_v1  ;;  %1718 = vrot.lane.b32.xlu1 %v1717_v24, %s1986_s29  ;;  %v369_v24 = vrot.slane %v2460_v41, 1  ;;  %v1641_v8 = vunpack.i.h.bf16 %v2371_v37  ;;  %v37_v37 = vld [vmem:[%s3243_s0 + $0x98] sm:$0x3]  ;;  %v1636_v41 = vunpack.i.h.bf16 %v2352_v30 }
  0x99   :  { %v2452_v36 = vsel %vm258_vm0, %v40_v60, %v1645_v15  ;;  %1713 = vrot.lane.b32.xlu0 %v1712_v23, %s1985_s28  ;;  %v1914_v60 = vld [vmem:[%s3244_s2 + $0x70] sm:$0xff]   ;;  %v1616_v15 = vunpack.i.h.bf16 %v2264_v44  ;;  %v1737_v23 = vpack.i.bf16 %v2416_v4, %v2374_v38  ;;  %v55_v44 = vld [vmem:[%s3243_s0 + $0x128] sm:$0x3]  ;;  %v2514_v38 = vsel %vm258_vm0, %v27_v45, %v1606_v20  ;;  %v1916_v45 = vld [vmem:[%s3244_s2 + $0x78] sm:$0xff]  }
  0x9a   :  { %v2455_v19 = vsel %vm258_vm0, %v42_v62, %v1650_v16  ;;  %v1915_v62 = vld [vmem:[%s3244_s2 + $0x30] sm:$0xff]   ;;  %1460 = vmatprep.subr.bf16.mxu0 %v1914_v60  ;;  %1548 = vmatprep.subr.bf16.mxu1 %v1914_v60  ;;  %v368_v20 = vrot.slane %v2488_v14, 1  ;;  %v371_v60 = vrot.slane %v2199_v17, 1  ;;  %v2561_v30 = vsel %vm331_vm1, %v338_v32, %v339_v50 }
  0x9b   :  { %3266 = vst [vmem:[#allocation3_spill] sm:$0xff] %v2455_v19  ;;  %v2469_v47 = vpop.permute.xlu1 %1658  ;;  %v1727_v16 = vpack.i.bf16 %v2455_v19, %v2452_v36  ;;  %1461 = vmatpush3.bf16.msra.mxu0 %v1915_v62  ;;  %1556 = vmatpush3.bf16.msra.mxu1 %v1915_v62  ;;  %v1732_v62 = vpack.i.bf16 %v2511_v31, %v2419_v5  ;;  %v468_v50 = vrot.slane %v2199_v17, 2  ;;  %v441_v32 = vrot.slane %v2259_v42, 2 }
  0x9c   :  { %v1660_v59 = vunpack.i.l.bf16 %v2469_v47  ;;  %1462 = vmatprep.subr.bf16.mxu0 %v1916_v45  ;;  %1549 = vmatprep.subr.bf16.mxu1 %v1916_v45  ;;  %v2565_v52 = vsel %vm258_vm0, %v37_v37, %v1641_v8  ;;  %v2578_v25 = vsel %vm331_vm1, %v371_v60, %v372_v0  ;;  %v1626_v8 = vunpack.i.h.bf16 %v2309_v63  ;;  %v31_v0 = vld [vmem:[%s3243_s0 + $0x68] sm:$0x3] }
  0x9d   :  { %1728 = vrot.lane.b32.xlu1 %v1727_v16, %s1986_s29  ;;  %v442_v16 = vrot.slane %v2514_v38, 2  ;;  %v465_v35 = vrot.slane %v2488_v14, 2  ;;  %v759_v45 = vrot.slane %v2401_v57, 2  ;;  %v602_v63 = vrot.slane %v2307_v61, 2 }
  0x9e   :  { %v2506_v22 = vsel %vm258_vm0, %v44_v49, %v1660_v59  ;;  %v2523_v49 = vsel %vm258_vm0, %v57_v48, %v1621_v33  ;;  %v2537_v33 = vsel %vm258_vm0, %v55_v44, %v1616_v15  ;;  %v1742_v59 = vpack.i.bf16 %v2419_v5, %v2391_v54  ;;  %v35_v54 = vld [vmem:[%s3243_s0 + $0x88] sm:$0x3] }
  0x9f   :  { %3267 = vst [vmem:[#allocation4_spill] sm:$0xff] %v2506_v22  ;;  %v1722_v39 = vpack.i.bf16 %v2506_v22, %v2455_v19  ;;  %v378_v48 = vrot.slane %v2500_v3, 1  ;;  %v763_v15 = vrot.slane %v2523_v49, 2  ;;  %v762_v44 = vrot.slane %v2315_v2, 2  ;;  %1463 = vmatpush3.bf16.msra.mxu0 %v1917_v46  ;;  %1557 = vmatpush3.bf16.msra.mxu1 %v1917_v46 }
  0xa0   :  { %v471_v5 = vrot.slane %v2202_v18, 2  ;;  %v1747_v46 = vpack.i.bf16 %v2570_v28, %v2561_v30  ;;  %v377_v60 = vrot.slane %v2226_v27, 1  ;;  %v2628_v28 = vsel %vm258_vm0, %v31_v0, %v1626_v8 }
  0xa1   :  { %1723 = vrot.lane.b32.xlu0 %v1722_v39, %s1985_s28  ;;  %1738 = vrot.lane.b32.xlu1 %v1737_v23, %s1987_s18  ;;  %v603_v39 = vrot.slane %v2537_v33, 2  ;;  %v2573_v23 = vsel %vm331_vm1, %v368_v20, %v369_v24  ;;  %v2586_v24 = vsel %vm258_vm0, %v35_v54, %v1636_v41  ;;  %v760_v20 = vrot.slane %v2565_v52, 2 }
  0xa2   :  { %3269 = vst [vmem:[#allocation6_spill] sm:$0xff] %v2573_v23  ;;  %v2598_v11 = vsel %vm428_vm2, %v762_v44, %v763_v15  ;;  %v2604_v37 = vpack.i.bf16 %v2578_v25, %v2573_v23  ;;  %v444_v41 = vrot.slane %v2262_v43, 2  ;;  %v2614_v15 = vsel %vm428_vm2, %v468_v50, %v469_v40 }
  0xa3   :  { %3270 = vst [vmem:[#allocation7_spill] sm:$0xff] %v2598_v11  ;;  %3271 = vst [vmem:[#allocation8_spill] sm:$0xff] %v2614_v15  ;;  %v3272_v44 = vrot.slane %v2425_v13, 2  ;;  %v2625_v23 = vsel %vm428_vm2, %v602_v63, %v603_v39  ;;  %v1661_v6 = vunpack.i.h.bf16 %v2469_v47  ;;  %v2633_v9 = vsel %vm428_vm2, %v465_v35, %v466_v53  ;;  %v45_v39 = vld [vmem:[%s3243_s0 + $0xd8] sm:$0x3] }
  0xa4   :  { %3274 = vst [vmem:[#allocation10_spill] sm:$0xff] %v2625_v23  ;;  %3275 = vst [vmem:[#allocation11_spill] sm:$0xff] %v2633_v9  ;;  %v600_v50 = vrot.slane %v2586_v24, 2  ;;  %v374_v47 = vrot.slane %v2202_v18, 1  ;;  %v345_v53 = vrot.slane %v2514_v38, 1  ;;  %v1762_v0 = vpack.i.bf16 %v2614_v15, %v2633_v9 }
  0xa5   :  { %1733 = vrot.lane.b32.xlu0 %v1732_v62, %s1987_s18  ;;  %1743 = vrot.lane.b32.xlu1 %v1742_v59, %s1985_s28  ;;  %v33_v59 = vld [vmem:[%s3243_s0 + $0x78] sm:$0x3]  ;;  %v2619_v54 = vsel %vm428_vm2, %v471_v5, %v3272_v44  ;;  %v2622_v62 = vsel %vm428_vm2, %v441_v32, %v442_v16  ;;  %v1651_v16 = vunpack.i.h.bf16 %v2410_v1  ;;  %v2646_v5 = vsel %vm428_vm2, %v444_v41, %v445_v58  ;;  %v43_v1 = vld [vmem:[%s3243_s0 + $0xc8] sm:$0x3] }
  0xa6   :  { %3273 = vst [vmem:[#allocation9_spill] sm:$0xff] %v2619_v54  ;;  %v2650_v32 = vsel %vm258_vm0, %v33_v59, %v1631_v10  ;;  %v1752_v8 = vpack.i.bf16 %v2619_v54, %v2614_v15  ;;  %v2662_v58 = vsel %vm331_vm1, %v377_v60, %v378_v48  ;;  %v599_v38 = vrot.slane %v2396_v55, 2 }
  0xa7   :  { %v2666_v10 = vsel %vm428_vm2, %v759_v45, %v760_v20  ;;  %v348_v63 = vrot.slane %v2517_v21, 1  ;;  %v448_v41 = vrot.slane %v2628_v28, 2  ;;  %v2671_v59 = vsel %vm258_vm0, %v45_v39, %v1661_v6 }
  0xa8   :  { %3276 = vst [vmem:[#allocation12_spill] sm:$0xff] %v2666_v10  ;;  %v438_v44 = vrot.slane %v2177_v7, 2  ;;  %v451_v40 = vrot.slane %v2650_v32, 2  ;;  %v2677_v48 = vsel %vm258_vm0, %v43_v1, %v1651_v16  ;;  %v3277_v20 = vrot.slane %v2425_v13, 1 }
  0xa9   :  { %1748 = vrot.lane.b32.xlu0 %v1747_v46, %s1986_s29  ;;  %1758 = vrot.lane.b32.xlu1 %v2604_v37, %s1987_s18  ;;  %v2686_v45 = vsel %vm428_vm2, %v599_v38, %v600_v50  ;;  %v344_v60 = vrot.slane %v2259_v42, 1  ;;  %v347_v39 = vrot.slane %v2262_v43, 1  ;;  %v463_v1 = vrot.slane %v2671_v59, 2 }
  0xaa   :  { %v2683_v21 = vsel %vm331_vm1, %v374_v47, %v3277_v20  ;;  %3278 = vst [vmem:[#allocation13_spill] sm:$0xff] %v2686_v45  ;;  %v447_v13 = vrot.slane %v2347_v26, 2  ;;  %v450_v47 = vrot.slane %v2350_v29, 2  ;;  %v3279_v50 = vrot.slane %v2361_v34, 2 }
  0xab   :  { %v1767_v6 = vpack.i.bf16 %v2662_v58, %v2683_v21  ;;  %v474_v38 = vrot.slane %v2226_v27, 2  ;;  %v460_v20 = vrot.slane %v2677_v48, 2  ;;  %v459_v16 = vrot.slane %v2455_v19, 2 }
  0xac   :  { %v462_v35 = vrot.slane %v2506_v22, 2  ;;  %v2712_v11 = vsel %vm331_vm1, %v344_v60, %v345_v53  ;;  %v2715_v34 = vsel %vm331_vm1, %v347_v39, %v348_v63  ;;  %v581_v63 = vrot.slane %v2537_v33, 1 }
  0xad   :  { %1753 = vrot.lane.b32.xlu0 %v1752_v8, %s1987_s18  ;;  %1763 = vrot.lane.b32.xlu1 %v1762_v0, %s1985_s28  ;;  %v475_v8 = vrot.slane %v2500_v3, 2  ;;  %v2702_v0 = vsel %vm428_vm2, %v438_v44, %v3279_v50  ;;  %v2720_v50 = vsel %vm428_vm2, %v447_v13, %v448_v41  ;;  %v709_v60 = vrot.slane %v2523_v49, 1 }
  0xae   :  { %v1772_v3 = vpack.i.bf16 %v2622_v62, %v2702_v0  ;;  %v1782_v44 = vpack.i.bf16 %v2702_v0, %v2511_v31  ;;  %v2726_v10 = vsel %vm428_vm2, %v462_v35, %v463_v1  ;;  %v1787_v41 = vpack.i.bf16 %v2715_v34, %v2712_v11 }
  0xaf   :  { %3280 = vst [vmem:[#allocation14_spill] sm:$0xff] %v2726_v10  ;;  %v2730_v53 = vsel %vm428_vm2, %v474_v38, %v475_v8  ;;  %v708_v33 = vrot.slane %v2315_v2, 1  ;;  %v580_v13 = vrot.slane %v2307_v61, 1  ;;  %v2759_v8 = vld [vmem:[%s3244_s2 + $0x80] sm:$0xff]   ;;  %v578_v49 = vrot.slane %v2586_v24, 1 }
  0xb0   :  { %3281 = vst [vmem:[#allocation15_spill] sm:$0xff] %v2730_v53  ;;  %v1802_v2 = vpack.i.bf16 %v2730_v53, %v2619_v54  ;;  %1522 = vmatprep.subr.bf16.mxu1 %v2759_v8 }
  0xb1   :  { %1768 = vrot.lane.b32.xlu0 %v1767_v6, %s1986_s29  ;;  %1778 = vrot.lane.b32.xlu1 %v1747_v46, %s1987_s18  ;;  %v2723_v46 = vsel %vm428_vm2, %v450_v47, %v451_v40  ;;  %v2738_v40 = vsel %vm428_vm2, %v459_v16, %v460_v20  ;;  %v1792_v47 = vpack.i.bf16 %v2625_v23, %v2730_v53  ;;  %v1654_v20 = vpop.permute.xlu0 %1653  ;;  %v350_v16 = vrot.slane %v2347_v26, 1 }
  0xb2   :  { %3282 = vst [vmem:[#allocation16_spill] sm:$0xff] %v2738_v40  ;;  %v2764_v61 = vsel %vm331_vm1, %v580_v13, %v581_v63  ;;  %v710_v38 = vsel %vm331_vm1, %v708_v33, %v709_v60  ;;  %v353_v63 = vrot.slane %v2350_v29, 1  ;;  %v1656_v60 = vunpack.i.h.bf16 %v1654_v20  ;;  %v38_v13 = vld [vmem:[%s3243_s0 + $0xa0] sm:$0xff] }
  0xb3   :  { %v1655_v33 = vunpack.i.l.bf16 %v1654_v20  ;;  %v41_v20 = vld [vmem:[%s3243_s0 + $0xb8] sm:$0x3]  ;;  %v1832_v24 = vpack.i.bf16 %v2686_v45, %v2723_v46 }
  0xb5   :  { %1773 = vrot.lane.b32.xlu0 %v1772_v3, %s1987_s18  ;;  %1783 = vrot.lane.b32.xlu1 %v1782_v44, %s1985_s28  ;;  %v1807_v3 = vpack.i.bf16 %v710_v38, %v2764_v61  ;;  %v354_v44 = vrot.slane %v2650_v32, 1  ;;  %v1812_v32 = vpack.i.bf16 %v2720_v50, %v2646_v5 }
  0xb9   :  { %1788 = vrot.lane.b32.xlu0 %v1787_v41, %s1986_s29  ;;  %1798 = vrot.lane.b32.xlu1 %v1767_v6, %s1987_s18  ;;  %v351_v6 = vrot.slane %v2628_v28, 1  ;;  %v39_v28 = vld [vmem:[%s3243_s0 + $0xa8] sm:$0x3] }
  0xbb   :  { %v2789_v38 = vsel %vm331_vm1, %v350_v16, %v351_v6  ;;  %v706_v16 = vrot.slane %v2565_v52, 1 }
  0xbd   :  { %1793 = vrot.lane.b32.xlu0 %v1792_v47, %s1987_s18  ;;  %1803 = vrot.lane.b32.xlu1 %v1802_v2, %s1985_s28  ;;  %v1646_v47 = vunpack.i.h.bf16 %v2398_v56  ;;  %v1822_v2 = vpack.i.bf16 %v2646_v5, %v2622_v62  ;;  %v280_v56 = vsel %vm258_vm0, %v39_v28, %v1656_v60  ;;  %v359_v60 = vrot.slane %v2452_v36, 1 }
  0xbe   :  { %v1842_v28 = vpack.i.bf16 %v2723_v46, %v2720_v50 }
  0xc1   :  { %1808 = vrot.lane.b32.xlu0 %v1807_v3, %s1986_s29  ;;  %1818 = vrot.lane.b32.xlu1 %v1787_v41, %s1987_s18  ;;  %v2792_v41 = vsel %vm331_vm1, %v353_v63, %v354_v44  ;;  %v2799_v3 = vsel %vm258_vm0, %v38_v13, %v1655_v33  ;;  %v282_v44 = vsel %vm258_vm0, %v41_v20, %v1646_v47  ;;  %v705_v63 = vrot.slane %v2401_v57, 1 }
  0xc2   :  { %v1827_v6 = vpack.i.bf16 %v2792_v41, %v2789_v38  ;;  %v360_v1 = vrot.slane %v282_v44, 1  ;;  %v356_v33 = vrot.slane %v2799_v3, 1  ;;  %v357_v13 = vrot.slane %v280_v56, 1 }
  0xc3   :  { %v457_v52 = vrot.slane %v282_v44, 2  ;;  %v456_v47 = vrot.slane %v2452_v36, 2  ;;  %v454_v20 = vrot.slane %v280_v56, 2 }
  0xc4   :  { %v2827_v44 = vsel %vm331_vm1, %v359_v60, %v360_v1  ;;  %v362_v1 = vrot.slane %v2455_v19, 1 }
  0xc5   :  { %1813 = vrot.lane.b32.xlu0 %v1812_v32, %s1987_s18  ;;  %1823 = vrot.lane.b32.xlu1 %v1822_v2, %s1985_s28  ;;  %v577_v32 = vrot.slane %v2396_v55, 1  ;;  %v707_v55 = vsel %vm331_vm1, %v705_v63, %v706_v16  ;;  %v453_v2 = vrot.slane %v2799_v3, 2  ;;  %3283 = vst [vmem:[#allocation17_spill] sm:$0xff] %v2827_v44  ;;  %v458_v63 = vsel %vm428_vm2, %v456_v47, %v457_v52 }
  0xc6   :  { %v1872_v52 = vpack.i.bf16 %v2633_v9, %v2726_v10 }
  0xc7   :  { %v2819_v57 = vsel %vm331_vm1, %v577_v32, %v578_v49  ;;  %v366_v49 = vrot.slane %v2671_v59, 1  ;;  %v365_v32 = vrot.slane %v2506_v22, 1  ;;  %v455_v56 = vsel %vm428_vm2, %v453_v2, %v454_v20 }
  0xc8   :  { %v1847_v39 = vpack.i.bf16 %v707_v55, %v2819_v57  ;;  %v1862_v60 = vpack.i.bf16 %v458_v63, %v455_v56  ;;  %v1897_v55 = vpack.i.bf16 %v2488_v14, %v2506_v22 }
  0xc9   :  { %1828 = vrot.lane.b32.xlu0 %v1827_v6, %s1986_s29  ;;  %1838 = vrot.lane.b32.xlu1 %v1827_v6, %s1987_s18  ;;  %v358_v6 = vsel %vm331_vm1, %v356_v33, %v357_v13  ;;  %v363_v33 = vrot.slane %v2677_v48, 1  ;;  %v1852_v13 = vpack.i.bf16 %v2738_v40, %v458_v63  ;;  %v2842_v59 = vsel %vm331_vm1, %v365_v32, %v366_v49 }
  0xca   :  { %v1857_v16 = vpack.i.bf16 %v2827_v44, %v358_v6  ;;  %3284 = vst [vmem:[#allocation18_spill] sm:$0xff] %v2842_v59 }
  0xcd   :  { %1833 = vrot.lane.b32.xlu0 %v1832_v24, %s1987_s18  ;;  %1843 = vrot.lane.b32.xlu1 %v1842_v28, %s1985_s28  ;;  %v1887_v24 = vpack.i.bf16 %v2726_v10, %v2738_v40  ;;  %v1882_v28 = vpack.i.bf16 %v2199_v17, %v2488_v14 }
  0xd1   :  { %1848 = vrot.lane.b32.xlu0 %v1847_v39, %s1986_s29  ;;  %1858 = vrot.lane.b32.xlu1 %v1857_v16, %s1987_s18  ;;  %v2847_v39 = vsel %vm331_vm1, %v362_v1, %v363_v33 }
  0xd2   :  { %v1867_v48 = vpack.i.bf16 %v2842_v59, %v2847_v39 }
  0xd5   :  { %1853 = vrot.lane.b32.xlu0 %v1852_v13, %s1987_s18  ;;  %1863 = vrot.lane.b32.xlu1 %v1862_v60, %s1985_s28 }
  0xd9   :  { %1868 = vrot.lane.b32.xlu0 %v1867_v48, %s1986_s29  ;;  %1878 = vrot.lane.b32.xlu1 %v1867_v48, %s1987_s18 }
  0xdd   :  { %1873 = vrot.lane.b32.xlu0 %v1872_v52, %s1987_s18  ;;  %1888 = vrot.lane.b32.xlu1 %v1887_v24, %s1985_s28 }
  0xe1   :  { %1883 = vrot.lane.b32.xlu0 %v1882_v28, %s1985_s28  ;;  %1898 = vrot.lane.b32.xlu1 %v1897_v55, %s1986_s29 }
  0xe5   :  { %1893 = vrot.lane.b32.xlu0 %v2604_v37, %s1986_s29 }
  0xf2   :  { %v1669_v47 = vpop.permute.xlu1 %1668 }
  0xf3   :  { %v1664_v2 = vpop.permute.xlu0 %1663  ;;  %v1670_v40 = vunpack.i.l.bf16 %v1669_v47 }
  0xf4   :  { %v1666_v59 = vunpack.i.h.bf16 %v1664_v2  ;;  %v1665_v19 = vunpack.i.l.bf16 %v1664_v2 }
  0xf7   :  { %v2867_v20 = vpop.permute.xlu1 %1678 }
  0xfb   :  { %v2869_v6 = vpop.permute.xlu0 %1673 }
  0xfe   :  { %v2873_v16 = vpop.permute.xlu1 %1688 }
  0xff   :  { %v2871_v49 = vpop.permute.xlu0 %1683 }
 0x102   :  { %v2877_v32 = vpop.permute.xlu1 %1698 }
 0x103   :  { %v2875_v63 = vpop.permute.xlu0 %1693 }
 0x106   :  { %v2879_v56 = vpop.permute.xlu1 %1708 }
 0x107   :  { %v2881_v33 = vpop.permute.xlu0 %1703 }
 0x10a   :  { %v2883_v1 = vpop.permute.xlu1 %1718 }
 0x10b   :  { %v2885_v37 = vpop.permute.xlu0 %1713 }
 0x10f   :  { %v2887_v13 = vpop.permute.xlu1 %1728 }
 0x113   :  { %v2889_v60 = vpop.permute.xlu0 %1723  ;;  %v1739_v48 = vpop.permute.xlu1 %1738 }
 0x114   :  { %3285 = vst [vmem:[#allocation19_spill] sm:$0xff] %v2889_v60  ;;  %v1741_v52 = vunpack.i.h.bf16 %v1739_v48  ;;  %v1740_v24 = vunpack.i.l.bf16 %v1739_v48 }
 0x116   :  { %v783_v53 = vsel %vm781_vm3, %v2190_v12, %v1741_v52  ;;  %v782_v9 = vsel %vm781_vm3, %v2285_v51, %v1740_v24 }
 0x117   :  { %v1734_v28 = vpop.permute.xlu0 %1733  ;;  %v1744_v23 = vpop.permute.xlu1 %1743 }
 0x118   :  { %v1736_v55 = vunpack.i.h.bf16 %v1734_v28  ;;  %v1735_v35 = vunpack.i.l.bf16 %v1734_v28  ;;  %v1746_v22 = vunpack.i.h.bf16 %v1744_v23  ;;  %v1745_v54 = vunpack.i.l.bf16 %v1744_v23 }
 0x119   :  { %v1671_v28 = vunpack.i.h.bf16 %v1669_v47 }
 0x11a   :  { %v832_v48 = vsel %vm781_vm3, %v2416_v4, %v1735_v35  ;;  %v833_v15 = vsel %vm781_vm3, %v2561_v30, %v1736_v55  ;;  %v799_v10 = vsel %vm798_vm4, %v782_v9, %v1745_v54  ;;  %v800_v2 = vsel %vm798_vm4, %v783_v53, %v1746_v22 }
 0x11b   :  { %v1749_v60 = vpop.permute.xlu0 %1748  ;;  %v1759_v44 = vpop.permute.xlu1 %1758  ;;  %v848_v12 = vsel %vm798_vm4, %v832_v48, %v1665_v19  ;;  %v849_v51 = vsel %vm798_vm4, %v833_v15, %v1666_v59  ;;  %v816_v52 = vsel %vm815_vm5, %v799_v10, %v1670_v40  ;;  %v817_v4 = vsel %vm815_vm5, %v800_v2, %v1671_v28 }
 0x11c   :  { %v1751_v23 = vunpack.i.h.bf16 %v1749_v60  ;;  %v1750_v45 = vunpack.i.l.bf16 %v1749_v60  ;;  %v1761_v35 = vunpack.i.h.bf16 %v1759_v44  ;;  %v1760_v30 = vunpack.i.l.bf16 %v1759_v44 }
 0x11d   :  { %v880_v55 = vpack.c.bf16 %v817_v4, %v816_v52  ;;  %v1681_v19 = vunpack.i.h.bf16 %v2867_v20  ;;  %v1680_v15 = vunpack.i.l.bf16 %v2867_v20  ;;  %v1676_v28 = vunpack.i.h.bf16 %v2869_v6 }
 0x11e   :  { %v864_v47 = vsel %vm815_vm5, %v848_v12, %v1750_v45  ;;  %v865_v54 = vsel %vm815_vm5, %v849_v51, %v1751_v23  ;;  %v795_v40 = vsel %vm781_vm3, %v2199_v17, %v1761_v35  ;;  %v794_v45 = vsel %vm781_vm3, %v2488_v14, %v1760_v30 }
 0x11f   :  { %v1754_v9 = vpop.permute.xlu0 %1753  ;;  %v881_v22 = vpack.c.bf16 %v865_v54, %v864_v47  ;;  %v1764_v60 = vpop.permute.xlu1 %1763  ;;  %v1675_v20 = vunpack.i.l.bf16 %v2869_v6 }
 0x120   :  { %v1756_v53 = vunpack.i.h.bf16 %v1754_v9  ;;  %v1755_v24 = vunpack.i.l.bf16 %v1754_v9  ;;  %v1766_v59 = vunpack.i.h.bf16 %v1764_v60  ;;  %v1765_v10 = vunpack.i.l.bf16 %v1764_v60 }
 0x121   :  { %1111 = vmatprep.mubr.bf16.mxu0 %v881_v22 }
 0x122   :  { %1112 = vmatmul.mubr.bf16.vlgmr.msra.gmra.mrb[0].mxu0 %v880_v55  ;;  %v844_v44 = vsel %vm781_vm3, %v2578_v25, %v1755_v24  ;;  %v845_v48 = vsel %vm781_vm3, %v2683_v21, %v1756_v53  ;;  %v811_v2 = vsel %vm798_vm4, %v794_v45, %v1765_v10  ;;  %v812_v23 = vsel %vm798_vm4, %v795_v40, %v1766_v59  ;;  %v1919_v55 = vld [vmem:[%s3244_s2 + $0x88] sm:$0xff]   ;;  %v3286_v45 = vld [vmem:[#allocation2_spill] sm:$0xff] }
 0x123   :  { %v1769_v12 = vpop.permute.xlu0 %1768  ;;  %v1779_v52 = vpop.permute.xlu1 %1778  ;;  %v860_v14 = vsel %vm798_vm4, %v844_v44, %v1675_v20  ;;  %v861_v4 = vsel %vm798_vm4, %v845_v48, %v1676_v28  ;;  %v828_v25 = vsel %vm815_vm5, %v811_v2, %v1680_v15  ;;  %v829_v21 = vsel %vm815_vm5, %v812_v23, %v1681_v19  ;;  %v3287_v28 = vld [vmem:[#allocation5_spill] sm:$0xff] }
 0x124   :  { %v1771_v17 = vunpack.i.h.bf16 %v1769_v12  ;;  %v1770_v51 = vunpack.i.l.bf16 %v1769_v12  ;;  %v1781_v35 = vunpack.i.h.bf16 %v1779_v52  ;;  %v1780_v30 = vunpack.i.l.bf16 %v1779_v52 }
 0x125   :  { %v898_v60 = vpack.c.bf16 %v829_v21, %v828_v25  ;;  %v1686_v15 = vunpack.i.h.bf16 %v2871_v49  ;;  %v1685_v19 = vunpack.i.l.bf16 %v2871_v49  ;;  %v1691_v2 = vunpack.i.h.bf16 %v2873_v16 }
 0x126   :  { %v876_v6 = vsel %vm815_vm5, %v860_v14, %v1770_v51  ;;  %v877_v47 = vsel %vm815_vm5, %v861_v4, %v1771_v17  ;;  %v785_v40 = vsel %vm781_vm3, %v2177_v7, %v1781_v35  ;;  %v784_v44 = vsel %vm781_vm3, %v3286_v45, %v1780_v30 }
 0x127   :  { %v1774_v54 = vpop.permute.xlu0 %1773  ;;  %v899_v9 = vpack.c.bf16 %v877_v47, %v876_v6  ;;  %v1784_v24 = vpop.permute.xlu1 %1783  ;;  %v1690_v49 = vunpack.i.l.bf16 %v2873_v16 }
 0x128   :  { %v1776_v22 = vunpack.i.h.bf16 %v1774_v54  ;;  %v1775_v53 = vunpack.i.l.bf16 %v1774_v54  ;;  %v1786_v59 = vunpack.i.h.bf16 %v1784_v24  ;;  %v1785_v10 = vunpack.i.l.bf16 %v1784_v24 }
 0x129   :  { %1159 = vmatprep.mubr.bf16.mxu1 %v899_v9  ;;  %v1695_v24 = vunpack.i.l.bf16 %v2875_v63 }
 0x12a   :  { %v835_v48 = vsel %vm781_vm3, %v2712_v11, %v1776_v22  ;;  %v834_v20 = vsel %vm781_vm3, %v3287_v28, %v1775_v53  ;;  %1160 = vmatmul.mubr.bf16.vlgmr.msra.gmra.mrb[0].mxu1 %v898_v60  ;;  %v801_v23 = vsel %vm798_vm4, %v784_v44, %v1785_v10  ;;  %v802_v12 = vsel %vm798_vm4, %v785_v40, %v1786_v59 }
 0x12b   :  { %v1789_v17 = vpop.permute.xlu0 %1788  ;;  %1523 = vmatpush3.bf16.msra.mxu1 %v2759_v8  ;;  %v1799_v52 = vpop.permute.xlu1 %1798  ;;  %v850_v11 = vsel %vm798_vm4, %v834_v20, %v1685_v19  ;;  %v851_v14 = vsel %vm798_vm4, %v835_v48, %v1686_v15  ;;  %v818_v4 = vsel %vm815_vm5, %v801_v23, %v1690_v49  ;;  %v819_v25 = vsel %vm815_vm5, %v802_v12, %v1691_v2 }
 0x12c   :  { %v1791_v7 = vunpack.i.h.bf16 %v1789_v17  ;;  %v1790_v51 = vunpack.i.l.bf16 %v1789_v17  ;;  %1524 = vmatprep.subr.bf16.mxu1 %v1919_v55  ;;  %v1801_v16 = vunpack.i.h.bf16 %v1799_v52  ;;  %v1800_v21 = vunpack.i.l.bf16 %v1799_v52 }
 0x12d   :  { %v883_v22 = vpack.c.bf16 %v819_v25, %v818_v4  ;;  %v1696_v53 = vunpack.i.h.bf16 %v2875_v63  ;;  %v1701_v40 = vunpack.i.h.bf16 %v2877_v32  ;;  %v1700_v63 = vunpack.i.l.bf16 %v2877_v32 }
 0x12e   :  { %v866_v35 = vsel %vm815_vm5, %v850_v11, %v1790_v51  ;;  %v867_v30 = vsel %vm815_vm5, %v851_v14, %v1791_v7  ;;  %v797_v19 = vsel %vm781_vm3, %v2226_v27, %v1801_v16  ;;  %v796_v59 = vsel %vm781_vm3, %v2202_v18, %v1800_v21 }
 0x12f   :  { %v1794_v6 = vpop.permute.xlu0 %1793  ;;  %v884_v8 = vpack.c.bf16 %v867_v30, %v866_v35  ;;  %1525 = vmatpush3.bf16.msra.mxu1 %v1919_v55  ;;  %v1804_v9 = vpop.permute.xlu1 %1803  ;;  %v1706_v4 = vunpack.i.h.bf16 %v2881_v33  ;;  %v1705_v25 = vunpack.i.l.bf16 %v2881_v33  ;;  %v1710_v33 = vunpack.i.l.bf16 %v2879_v56 }
 0x130   :  { %v1796_v47 = vunpack.i.h.bf16 %v1794_v6  ;;  %v1795_v54 = vunpack.i.l.bf16 %v1794_v6  ;;  %v1806_v60 = vunpack.i.h.bf16 %v1804_v9  ;;  %v1805_v15 = vunpack.i.l.bf16 %v1804_v9 }
 0x131   :  { %1119 = vmatprep.mubr.bf16.mxu0 %v884_v8 }
 0x132   :  { %v847_v55 = vsel %vm781_vm3, %v2764_v61, %v1796_v47  ;;  %v846_v10 = vsel %vm781_vm3, %v2662_v58, %v1795_v54  ;;  %1120 = vmatmul.mubr.bf16.gmra.mrb[4].mxu0 %v883_v22  ;;  %v813_v45 = vsel %vm798_vm4, %v796_v59, %v1805_v15  ;;  %v814_v44 = vsel %vm798_vm4, %v797_v19, %v1806_v60 }
 0x133   :  { %v1809_v48 = vpop.permute.xlu0 %1808  ;;  %v1819_v20 = vpop.permute.xlu1 %1818  ;;  %v862_v18 = vsel %vm798_vm4, %v846_v10, %v1695_v24  ;;  %v863_v61 = vsel %vm798_vm4, %v847_v55, %v1696_v53  ;;  %v830_v2 = vsel %vm815_vm5, %v813_v45, %v1700_v63  ;;  %v831_v58 = vsel %vm815_vm5, %v814_v44, %v1701_v40 }
 0x134   :  { %v1811_v27 = vunpack.i.h.bf16 %v1809_v48  ;;  %v1810_v28 = vunpack.i.l.bf16 %v1809_v48  ;;  %v1821_v49 = vunpack.i.h.bf16 %v1819_v20  ;;  %v1820_v23 = vunpack.i.l.bf16 %v1819_v20 }
 0x135   :  { %v901_v14 = vpack.c.bf16 %v831_v58, %v830_v2  ;;  %v1711_v47 = vunpack.i.h.bf16 %v2879_v56  ;;  %v1716_v44 = vunpack.i.h.bf16 %v2885_v37  ;;  %v1715_v20 = vunpack.i.l.bf16 %v2885_v37 }
 0x136   :  { %v878_v32 = vsel %vm815_vm5, %v862_v18, %v1810_v28  ;;  %v879_v12 = vsel %vm815_vm5, %v863_v61, %v1811_v27  ;;  %v787_v35 = vsel %vm781_vm3, %v2262_v43, %v1821_v49  ;;  %v786_v30 = vsel %vm781_vm3, %v2259_v42, %v1820_v23 }
 0x137   :  { %v1814_v17 = vpop.permute.xlu0 %1813  ;;  %v902_v7 = vpack.c.bf16 %v879_v12, %v878_v32  ;;  %v1824_v11 = vpop.permute.xlu1 %1823  ;;  %v3288_v43 = vpack.c.bf16 %v2702_v0, %v2511_v31  ;;  %v3289_v58 = vpack.c.bf16 %v2646_v5, %v2622_v62  ;;  %v1720_v49 = vunpack.i.l.bf16 %v2883_v1 }
 0x138   :  { %v1816_v51 = vunpack.i.h.bf16 %v1814_v17  ;;  %v1815_v52 = vunpack.i.l.bf16 %v1814_v17  ;;  %v1826_v16 = vunpack.i.h.bf16 %v1824_v11  ;;  %v1825_v21 = vunpack.i.l.bf16 %v1824_v11 }
 0x139   :  { %1167 = vmatprep.mubr.bf16.mxu1 %v902_v7 }
 0x13a   :  { %v837_v6 = vsel %vm781_vm3, %v2789_v38, %v1816_v51  ;;  %v836_v8 = vsel %vm781_vm3, %v2715_v34, %v1815_v52  ;;  %1168 = vmatmul.mubr.bf16.gmra.mrb[4].mxu1 %v901_v14  ;;  %v803_v54 = vsel %vm798_vm4, %v786_v30, %v1825_v21  ;;  %v804_v9 = vsel %vm798_vm4, %v787_v35, %v1826_v16 }
 0x13b   :  { %v1829_v22 = vpop.permute.xlu0 %1828  ;;  %1526 = vmatprep.mubr.msk.bf16.mxu1 %vm781_vm3, %v3288_v43  ;;  %v1839_v53 = vpop.permute.xlu1 %1838  ;;  %v852_v34 = vsel %vm798_vm4, %v836_v8, %v1705_v25  ;;  %v853_v60 = vsel %vm798_vm4, %v837_v6, %v1706_v4  ;;  %v820_v56 = vsel %vm815_vm5, %v803_v54, %v1710_v33  ;;  %v821_v15 = vsel %vm815_vm5, %v804_v9, %v1711_v47  ;;  %v3291_v54 = vld [vmem:[#allocation17_spill] sm:$0xff] }
 0x13c   :  { %v1831_v42 = vunpack.i.h.bf16 %v1829_v22  ;;  %v1830_v38 = vunpack.i.l.bf16 %v1829_v22  ;;  %v1841_v24 = vunpack.i.h.bf16 %v1839_v53  ;;  %v1840_v19 = vunpack.i.l.bf16 %v1839_v53  ;;  %v3292_v22 = vld [vmem:[#allocation12_spill] sm:$0xff]  ;;  %v3293_v43 = vld [vmem:[#allocation13_spill] sm:$0xff] }
 0x13d   :  { %v886_v45 = vpack.c.bf16 %v821_v15, %v820_v56  ;;  %v1731_v21 = vunpack.i.h.bf16 %v2887_v13  ;;  %v1730_v8 = vunpack.i.l.bf16 %v2887_v13 }
 0x13e   :  { %v868_v59 = vsel %vm815_vm5, %v852_v34, %v1830_v38  ;;  %v869_v55 = vsel %vm815_vm5, %v853_v60, %v1831_v42  ;;  %v789_v48 = vsel %vm781_vm3, %v2350_v29, %v1841_v24  ;;  %v788_v18 = vsel %vm781_vm3, %v2347_v26, %v1840_v19  ;;  %v3296_v24 = vld [vmem:[#allocation14_spill] sm:$0xff] }
 0x13f   :  { %v1834_v31 = vpop.permute.xlu0 %1833  ;;  %v887_v0 = vpack.c.bf16 %v869_v55, %v868_v59  ;;  %v1844_v63 = vpop.permute.xlu1 %1843  ;;  %v1721_v29 = vunpack.i.h.bf16 %v2883_v1  ;;  %v3294_v42 = vpack.c.bf16 %v3292_v22, %v3293_v43 }
 0x140   :  { %v1836_v10 = vunpack.i.h.bf16 %v1834_v31  ;;  %v1835_v40 = vunpack.i.l.bf16 %v1834_v31  ;;  %v1846_v27 = vunpack.i.h.bf16 %v1844_v63  ;;  %v1845_v28 = vunpack.i.l.bf16 %v1844_v63 }
 0x141   :  { %1127 = vmatprep.mubr.bf16.mxu0 %v887_v0 }
 0x142   :  { %v839_v61 = vsel %vm781_vm3, %v2819_v57, %v1836_v10  ;;  %v838_v2 = vsel %vm781_vm3, %v2792_v41, %v1835_v40  ;;  %1128 = vmatmul.mubr.bf16.gmra.mrb[8].mxu0 %v886_v45  ;;  %1527 = vmatmul.mubr.msk.bf16.vlgmr.msra.gmra.mrb[8].mxu1 %vm781_vm3, %v3289_v58  ;;  %v805_v37 = vsel %vm798_vm4, %v788_v18, %v1845_v28  ;;  %v3300_v28 = vld [vmem:[#allocation11_spill] sm:$0xff] }
 0x143   :  { %v806_v26 = vsel %vm798_vm4, %v789_v48, %v1846_v27  ;;  %v1849_v23 = vpop.permute.xlu0 %1848  ;;  %v3290_v57 = vpack.c.bf16 %v2723_v46, %v2720_v50  ;;  %v1859_v12 = vpop.permute.xlu1 %1858  ;;  %v854_v62 = vsel %vm798_vm4, %v838_v2, %v1715_v20  ;;  %v855_v17 = vsel %vm798_vm4, %v839_v61, %v1716_v44  ;;  %v3299_v27 = vld [vmem:[#allocation8_spill] sm:$0xff] }
 0x144   :  { %v1851_v41 = vunpack.i.h.bf16 %v1849_v23  ;;  %v1850_v32 = vunpack.i.l.bf16 %v1849_v23  ;;  %v1861_v5 = vunpack.i.h.bf16 %v1859_v12  ;;  %v822_v1 = vsel %vm815_vm5, %v805_v37, %v1720_v49  ;;  %v3302_v49 = vld [vmem:[#allocation15_spill] sm:$0xff]  ;;  %v3303_v37 = vld [vmem:[#allocation9_spill] sm:$0xff] }
 0x145   :  { %1530 = vmatprep.mubr.msk.bf16.mxu1 %vm781_vm3, %v3290_v57  ;;  %v823_v7 = vsel %vm815_vm5, %v806_v26, %v1721_v29  ;;  %v1860_v51 = vunpack.i.l.bf16 %v1859_v12  ;;  %v3301_v20 = vpack.c.bf16 %v3299_v27, %v3300_v28  ;;  %v3304_v26 = vpack.c.bf16 %v3302_v49, %v3303_v37 }
 0x146   :  { %v870_v52 = vsel %vm815_vm5, %v854_v62, %v1850_v32  ;;  %v871_v11 = vsel %vm815_vm5, %v855_v17, %v1851_v41  ;;  %v889_v16 = vpack.c.bf16 %v823_v7, %v822_v1  ;;  %v791_v35 = vsel %vm781_vm3, %v2452_v36, %v1861_v5  ;;  %v3295_v36 = vld [vmem:[#allocation19_spill] sm:$0xff]  ;;  %v3305_v17 = vld [vmem:[#allocation4_spill] sm:$0xff] }
 0x147   :  { %v1854_v50 = vpop.permute.xlu0 %1853  ;;  %v890_v46 = vpack.c.bf16 %v871_v11, %v870_v52  ;;  %v1864_v25 = vpop.permute.xlu1 %1863  ;;  %v790_v47 = vsel %vm781_vm3, %v2799_v3, %v1860_v51  ;;  %v1726_v38 = vunpack.i.h.bf16 %v3295_v36  ;;  %v1725_v53 = vunpack.i.l.bf16 %v3295_v36  ;;  %v3306_v7 = vld [vmem:[#allocation3_spill] sm:$0xff]  ;;  %v3307_v52 = vld [vmem:[#allocation6_spill] sm:$0xff] }
 0x148   :  { %v1856_v14 = vunpack.i.h.bf16 %v1854_v50  ;;  %v1855_v4 = vunpack.i.l.bf16 %v1854_v50  ;;  %v1866_v30 = vunpack.i.h.bf16 %v1864_v25  ;;  %v1865_v6 = vunpack.i.l.bf16 %v1864_v25  ;;  %v3308_v50 = vld [vmem:[#allocation18_spill] sm:$0xff] }
 0x149   :  { %1135 = vmatprep.mubr.bf16.mxu0 %v890_v46 }
 0x14a   :  { %v841_v33 = vsel %vm781_vm3, %v2847_v39, %v1856_v14  ;;  %v840_v9 = vsel %vm781_vm3, %v3291_v54, %v1855_v4  ;;  %1136 = vmatmul.mubr.bf16.gmra.mrb[12].mxu0 %v889_v16  ;;  %1531 = vmatmul.mubr.msk.bf16.gmra.mrb[12].mxu1 %vm781_vm3, %v3294_v42  ;;  %v807_v13 = vsel %vm798_vm4, %v790_v47, %v1865_v6  ;;  %v3297_v39 = vld [vmem:[#allocation16_spill] sm:$0xff]  ;;  %v3309_v47 = vld [vmem:[#allocation7_spill] sm:$0xff] }
 0x14b   :  { %v808_v3 = vsel %vm798_vm4, %v791_v35, %v1866_v30  ;;  %v1869_v34 = vpop.permute.xlu0 %1868  ;;  %v3298_v60 = vpack.c.bf16 %v3296_v24, %v3297_v39  ;;  %v1879_v19 = vpop.permute.xlu1 %1878  ;;  %v856_v59 = vsel %vm798_vm4, %v840_v9, %v1725_v53  ;;  %v857_v55 = vsel %vm798_vm4, %v841_v33, %v1726_v38  ;;  %v3310_v33 = vld [vmem:[#allocation10_spill] sm:$0xff] }
 0x14c   :  { %v1871_v56 = vunpack.i.h.bf16 %v1869_v34  ;;  %v1870_v15 = vunpack.i.l.bf16 %v1869_v34  ;;  %v824_v31 = vsel %vm815_vm5, %v807_v13, %v1730_v8  ;;  %v825_v0 = vsel %vm815_vm5, %v808_v3, %v1731_v21 }
 0x14d   :  { %1534 = vmatprep.mubr.msk.bf16.mxu1 %vm781_vm3, %v3298_v60  ;;  %v892_v48 = vpack.c.bf16 %v825_v0, %v824_v31  ;;  %v1881_v18 = vunpack.i.h.bf16 %v1879_v19  ;;  %v1880_v61 = vunpack.i.l.bf16 %v1879_v19  ;;  %v3311_v54 = vpack.c.bf16 %v3309_v47, %v3310_v33 }
 0x14e   :  { %v872_v10 = vsel %vm815_vm5, %v856_v59, %v1870_v15  ;;  %v873_v40 = vsel %vm815_vm5, %v857_v55, %v1871_v56 }
 0x14f   :  { %v1874_v63 = vpop.permute.xlu0 %1873  ;;  %v893_v45 = vpack.c.bf16 %v873_v40, %v872_v10  ;;  %v1889_v44 = vpop.permute.xlu1 %1888  ;;  %v793_v1 = vsel %vm781_vm3, %v3305_v17, %v1881_v18  ;;  %v792_v51 = vsel %vm781_vm3, %v3306_v7, %v1880_v61 }
 0x150   :  { %v1876_v2 = vunpack.i.h.bf16 %v1874_v63  ;;  %v1875_v58 = vunpack.i.l.bf16 %v1874_v63  ;;  %v1891_v23 = vunpack.i.h.bf16 %v1889_v44  ;;  %v1890_v57 = vunpack.i.l.bf16 %v1889_v44 }
 0x151   :  { %1143 = vmatprep.mubr.bf16.mxu0 %v893_v45 }
 0x152   :  { %1144 = vmatmul.mubr.bf16.gmra.mrb[16].mxu0 %v892_v48  ;;  %1535 = vmatmul.mubr.msk.bf16.gmra.mrb[16].mxu1 %vm781_vm3, %v3301_v20  ;;  %v843_v11 = vsel %vm781_vm3, %v3307_v52, %v1876_v2  ;;  %v842_v46 = vsel %vm781_vm3, %v3308_v50, %v1875_v58  ;;  %v809_v4 = vsel %vm798_vm4, %v792_v51, %v1890_v57  ;;  %v3090_v20 = vld [vmem:[%s3245_s3] ss:$0 sm:$0xff] }
 0x153   :  { %v1884_v29 = vpop.permute.xlu0 %1883  ;;  %1538 = vmatprep.mubr.msk.bf16.mxu1 %vm781_vm3, %v3304_v26  ;;  %v1899_v41 = vpop.permute.xlu1 %1898  ;;  %v810_v25 = vsel %vm798_vm4, %v793_v1, %v1891_v23 }
 0x154   :  { %v1886_v32 = vunpack.i.h.bf16 %v1884_v29  ;;  %v1885_v12 = vunpack.i.l.bf16 %v1884_v29  ;;  %v1901_v62 = vunpack.i.h.bf16 %v1899_v41  ;;  %v1900_v5 = vunpack.i.l.bf16 %v1899_v41 }
 0x156   :  { %v858_v35 = vsel %vm798_vm4, %v842_v46, %v1885_v12  ;;  %v859_v30 = vsel %vm798_vm4, %v843_v11, %v1886_v32  ;;  %v826_v6 = vsel %vm815_vm5, %v809_v4, %v1900_v5  ;;  %v827_v8 = vsel %vm815_vm5, %v810_v25, %v1901_v62 }
 0x157   :  { %v1894_v14 = vpop.permute.xlu0 %1893  ;;  %v895_v42 = vpack.c.bf16 %v827_v8, %v826_v6 }
 0x158   :  { %v1896_v16 = vunpack.i.h.bf16 %v1894_v14  ;;  %v1895_v21 = vunpack.i.l.bf16 %v1894_v14 }
 0x15a   :  { %1539 = vmatmul.mubr.msk.bf16.gmra.mrb[20].mxu1 %vm781_vm3, %v3311_v54  ;;  %v874_v9 = vsel %vm815_vm5, %v858_v35, %v1895_v21  ;;  %v875_v22 = vsel %vm815_vm5, %v859_v30, %v1896_v16 }
 0x15b   :  { %v896_v43 = vpack.c.bf16 %v875_v22, %v874_v9 }
 0x15d   :  { %1151 = vmatprep.mubr.bf16.mxu0 %v896_v43 }
 0x15e   :  { %1152 = vmatmul.mubr.bf16.gmra.mrb[20].mxu0 %v895_v42 }
 0x1f5   :  { %v1464_v36 = vpop.f32.mrb[0].mxu0 }
 0x1f6   :  { %v1465_v38 = vpop.f32.mrb[1].mxu0 }
 0x1f7   :  { %v1466_v53 = vadd.f32 %v1465_v38, %v1464_v36  ;;  %v1467_v13 = vpop.f32.mrb[2].mxu0 }
 0x1f8   :  { %v1468_v3 = vpop.f32.mrb[3].mxu0 }
 0x1f9   :  { %v1469_v34 = vadd.f32 %v1468_v3, %v1467_v13  ;;  %v1114_v58 = vadd.f32 %v1466_v53, %v3090_v20 }
 0x1fb   :  { %v1117_v12 = vadd.f32 %v1469_v34, %v3090_v20 }
 0x1fd   :  { %v1500_v24 = vpop.f32.mrb[0].mxu1 }
 0x1fe   :  { %v1501_v39 = vpop.f32.mrb[1].mxu1 }
 0x1ff   :  { %v3079_v60 = vadd.f32 %v1501_v39, %v1500_v24  ;;  %v1503_v56 = vpop.f32.mrb[2].mxu1 }
 0x200   :  { %v1504_v15 = vpop.f32.mrb[3].mxu1 }
 0x201   :  { %v3081_v19 = vadd.f32 %v1504_v15, %v1503_v56 }
 0x205   :  { %v1470_v59 = vpop.f32.mrb[4].mxu0 }
 0x206   :  { %v1471_v55 = vpop.f32.mrb[5].mxu0 }
 0x207   :  { %v1472_v31 = vadd.f32 %v1471_v55, %v1470_v59  ;;  %v1473_v0 = vpop.f32.mrb[6].mxu0 }
 0x208   :  { %v1474_v10 = vpop.f32.mrb[7].mxu0 }
 0x209   :  { %v1475_v40 = vadd.f32 %v1474_v10, %v1473_v0  ;;  %v1122_v18 = vadd.f32 %v1472_v31, %v3090_v20 }
 0x20b   :  { %v1125_v26 = vadd.f32 %v1475_v40, %v3090_v20 }
 0x20d   :  { %v1506_v63 = vpop.f32.mrb[4].mxu1 }
 0x20e   :  { %v1507_v45 = vpop.f32.mrb[5].mxu1 }
 0x20f   :  { %v3083_v44 = vadd.f32 %v1507_v45, %v1506_v63  ;;  %v1509_v48 = vpop.f32.mrb[6].mxu1 }
 0x210   :  { %v1510_v27 = vpop.f32.mrb[7].mxu1 }
 0x211   :  { %v3085_v28 = vadd.f32 %v1510_v27, %v1509_v48 }
 0x215   :  { %v1476_v61 = vpop.f32.mrb[8].mxu0  ;;  %v1528_v2 = vpop.f32.mrb[8].mxu1 }
 0x216   :  { %v3094_v29 = vadd.f32 %v1528_v2, %v1122_v18  ;;  %v1477_v49 = vpop.f32.mrb[9].mxu0  ;;  %v1210_v37 = vpop.f32.mrb[9].mxu1 }
 0x217   :  { %v1478_v23 = vadd.f32 %v1477_v49, %v1476_v61  ;;  %v3097_v57 = vadd.f32 %v1210_v37, %v1114_v58  ;;  %v1479_v41 = vpop.f32.mrb[10].mxu0  ;;  %v1529_v32 = vpop.f32.mrb[10].mxu1 }
 0x218   :  { %v1434_v62 = vmul.f32 -1.442695, %v3094_v29  ;;  %v3101_v5 = vadd.f32 %v1529_v32, %v1125_v26  ;;  %v1480_v17 = vpop.f32.mrb[11].mxu0  ;;  %v1213_v1 = vpop.f32.mrb[11].mxu1  ;;  %v1170_v26 = vadd.f32 %v3083_v44, %v3090_v20 }
 0x219   :  { %v1432_v7 = vmul.f32 -1.442695, %v3097_v57  ;;  %v1481_v51 = vadd.f32 %v1480_v17, %v1479_v41  ;;  %v3104_v52 = vadd.f32 %v1213_v1, %v1117_v12  ;;  %v1130_v4 = vadd.f32 %v1478_v23, %v3090_v20 }
 0x21a   :  { %1920 = vpow2.f32 %v1434_v62  ;;  %v1435_v11 = vmul.f32 -1.442695, %v3101_v5  ;;  %v1162_v62 = vadd.f32 %v3079_v60, %v3090_v20 }
 0x21b   :  { %1922 = vpow2.f32 %v1432_v7  ;;  %v1433_v50 = vmul.f32 -1.442695, %v3104_v52  ;;  %v1133_v8 = vadd.f32 %v1481_v51, %v3090_v20  ;;  %v1173_v51 = vadd.f32 %v3085_v28, %v3090_v20 }
 0x21c   :  { %1924 = vpow2.f32 %v1435_v11 }
 0x21d   :  { %1926 = vpow2.f32 %v1433_v50  ;;  %v1482_v46 = vpop.f32.mrb[12].mxu0  ;;  %v1532_v14 = vpop.f32.mrb[12].mxu1 }
 0x21e   :  { %v1483_v25 = vpop.f32.mrb[13].mxu0  ;;  %v1226_v16 = vpop.f32.mrb[13].mxu1 }
 0x21f   :  { %v1484_v21 = vadd.f32 %v1483_v25, %v1482_v46  ;;  %v3109_v35 = vadd.f32 %v1226_v16, %v1130_v4  ;;  %v1485_v30 = vpop.f32.mrb[14].mxu0  ;;  %v1533_v6 = vpop.f32.mrb[14].mxu1 }
 0x220   :  { %v1486_v47 = vpop.f32.mrb[15].mxu0  ;;  %v1229_v33 = vpop.f32.mrb[15].mxu1 }
 0x221   :  { %v1138_v54 = vadd.f32 %v1484_v21, %v3090_v20  ;;  %v1436_v9 = vmul.f32 -1.442695, %v3109_v35  ;;  %v1487_v22 = vadd.f32 %v1486_v47, %v1485_v30  ;;  %v3114_v43 = vadd.f32 %v1229_v33, %v1133_v8 }
 0x223   :  { %v3116_v42 = vadd.f32 %v1532_v14, %v1138_v54  ;;  %1928 = vpow2.f32 %v1436_v9  ;;  %v1141_v36 = vadd.f32 %v1487_v22, %v3090_v20  ;;  %v1437_v38 = vmul.f32 -1.442695, %v3114_v43 }
 0x224   :  { %v1921_v53 = vpop.eup %1920  ;;  %v1165_v14 = vadd.f32 %v3081_v19, %v3090_v20 }
 0x225   :  { %v1923_v13 = vpop.eup %1922  ;;  %v1323_v3 = vadd.f32 1.0, %v1921_v53  ;;  %v3120_v34 = vadd.f32 %v1533_v6, %v1141_v36  ;;  %1930 = vpow2.f32 %v1437_v38  ;;  %v1488_v24 = vpop.f32.mrb[16].mxu0  ;;  %v1438_v10 = vmul.f32 -1.442695, %v3116_v42 }
 0x226   :  { %v3122_v39 = vpop.f32.mrb[16].mxu1  ;;  %v1925_v56 = vpop.eup %1924  ;;  %v1321_v15 = vadd.f32 1.0, %v1923_v13 }
 0x227   :  { %v1489_v59 = vpop.f32.mrb[17].mxu0  ;;  %v1242_v55 = vpop.f32.mrb[17].mxu1  ;;  %1932 = vrcp.f32 %v1323_v3  ;;  %v1324_v0 = vadd.f32 1.0, %v1925_v56  ;;  %v1439_v27 = vmul.f32 -1.442695, %v3120_v34 }
 0x228   :  { %v1927_v31 = vpop.eup %1926  ;;  %v1490_v40 = vadd.f32 %v1489_v59, %v1488_v24  ;;  %v1491_v63 = vpop.f32.mrb[18].mxu0  ;;  %1934 = vrcp.f32 %v1321_v15 }
 0x229   :  { %v3125_v45 = vpop.f32.mrb[18].mxu1  ;;  %v1322_v48 = vadd.f32 1.0, %v1927_v31  ;;  %v1492_v18 = vpop.f32.mrb[19].mxu0  ;;  %1936 = vrcp.f32 %v1324_v0 }
 0x22a   :  { %v1245_v61 = vpop.f32.mrb[19].mxu1  ;;  %v1146_v2 = vadd.f32 %v1490_v40, %v3090_v20  ;;  %v1493_v58 = vadd.f32 %v1492_v18, %v1491_v63 }
 0x22b   :  { %1938 = vrcp.f32 %v1322_v48 }
 0x22c   :  { %1940 = vpow2.f32 %v1438_v10  ;;  %v3129_v49 = vadd.f32 %v1242_v55, %v1146_v2  ;;  %v1149_v37 = vadd.f32 %v1493_v58, %v3090_v20 }
 0x22d   :  { %1942 = vpow2.f32 %v1439_v27  ;;  %v1929_v23 = vpop.eup %1928  ;;  %v1540_v12 = vpop.f32.mrb[20].mxu1 }
 0x22e   :  { %v1440_v41 = vmul.f32 -1.442695, %v3129_v49  ;;  %v3135_v32 = vadd.f32 %v1245_v61, %v1149_v37  ;;  %v1325_v17 = vadd.f32 1.0, %v1929_v23  ;;  %v3139_v1 = vadd.f32 %v1540_v12, %v1170_v26  ;;  %v1258_v7 = vpop.f32.mrb[21].mxu1 }
 0x22f   :  { %v1931_v11 = vpop.eup %1930  ;;  %v3144_v50 = vadd.f32 %v1258_v7, %v1162_v62  ;;  %v1541_v46 = vpop.f32.mrb[22].mxu1 }
 0x230   :  { %1944 = vpow2.f32 %v1440_v41  ;;  %v1441_v44 = vmul.f32 -1.442695, %v3135_v32  ;;  %v1326_v4 = vadd.f32 1.0, %v1931_v11  ;;  %v1446_v60 = vmul.f32 -1.442695, %v3139_v1  ;;  %v1261_v16 = vpop.f32.mrb[23].mxu1 }
 0x231   :  { %1946 = vrcp.f32 %v1325_v17  ;;  %v3149_v25 = vadd.f32 %v1541_v46, %v1173_v51  ;;  %v1933_v21 = vpop.eup %1932  ;;  %v1444_v28 = vmul.f32 -1.442695, %v3144_v50  ;;  %v3152_v30 = vadd.f32 %v1261_v16, %v1165_v14  ;;  %v1494_v6 = vpop.f32.mrb[20].mxu0 }
 0x232   :  { %1948 = vpow2.f32 %v1441_v44  ;;  %v1935_v8 = vpop.eup %1934  ;;  %v1371_v47 = vmul.f32 %v1933_v21, %v3094_v29  ;;  %v1495_v33 = vpop.f32.mrb[21].mxu0 }
 0x233   :  { %1950 = vrcp.f32 %v1326_v4  ;;  %v1447_v19 = vmul.f32 -1.442695, %v3149_v25  ;;  %v1937_v54 = vpop.eup %1936  ;;  %v1369_v9 = vmul.f32 %v1935_v8, %v3097_v57  ;;  %v1445_v22 = vmul.f32 -1.442695, %v3152_v30  ;;  %v1497_v38 = vpop.f32.mrb[22].mxu0 }
 0x234   :  { %1952 = vpow2.f32 %v1446_v60  ;;  %v1496_v36 = vadd.f32 %v1495_v33, %v1494_v6  ;;  %1387 = vst.msk [vmem:[%s3246_s4 + $0x10] sm:$0xff] %vm258_vm0, %v1371_v47  ;;  %v1372_v29 = vmul.f32 %v1937_v54, %v3101_v5  ;;  %v1498_v13 = vpop.f32.mrb[23].mxu0 }
 0x235   :  { %v1939_v53 = vpop.eup %1938  ;;  %1954 = vpow2.f32 %v1444_v28  ;;  %1385 = vst.msk [vmem:[%s3246_s4] sm:$0xff] %vm258_vm0, %v1369_v9  ;;  %v1499_v56 = vadd.f32 %v1498_v13, %v1497_v38 }
 0x236   :  { %v1941_v3 = vpop.eup %1940  ;;  %v1370_v57 = vmul.f32 %v1939_v53, %v3104_v52  ;;  %1956 = vpow2.f32 %v1447_v19  ;;  %v1154_v24 = vadd.f32 %v1496_v36, %v3090_v20  ;;  %1388 = vst.msk [vmem:[%s3246_s4 + $0x18] sm:$0xff] %vm258_vm0, %v1372_v29 }
 0x237   :  { %v1943_v15 = vpop.eup %1942  ;;  %v1327_v5 = vadd.f32 1.0, %v1941_v3  ;;  %1958 = vpow2.f32 %v1445_v22  ;;  %v1157_v55 = vadd.f32 %v1499_v56, %v3090_v20 }
 0x238   :  { %1386 = vst.msk [vmem:[%s3246_s4 + $0x8] sm:$0xff] %vm258_vm0, %v1370_v57  ;;  %v1328_v59 = vadd.f32 1.0, %v1943_v15  ;;  %v3178_v52 = vadd.f32 %v3122_v39, %v1154_v24 }
 0x239   :  { %1960 = vrcp.f32 %v1327_v5  ;;  %v1254_v10 = vadd.f32 %v3125_v45, %v1157_v55 }
 0x23a   :  { %v1945_v31 = vpop.eup %1944  ;;  %1962 = vrcp.f32 %v1328_v59  ;;  %v1442_v0 = vmul.f32 -1.442695, %v3178_v52 }
 0x23b   :  { %v1947_v40 = vpop.eup %1946  ;;  %v1329_v63 = vadd.f32 1.0, %v1945_v31  ;;  %v1443_v18 = vmul.f32 -1.442695, %v1254_v10 }
 0x23c   :  { %v1949_v48 = vpop.eup %1948  ;;  %v1373_v27 = vmul.f32 %v1947_v40, %v3109_v35  ;;  %1964 = vpow2.f32 %v1442_v0 }
 0x23d   :  { %v1951_v61 = vpop.eup %1950  ;;  %1966 = vrcp.f32 %v1329_v63  ;;  %v1330_v39 = vadd.f32 1.0, %v1949_v48 }
 0x23e   :  { %v1953_v2 = vpop.eup %1952  ;;  %1389 = vst.msk [vmem:[%s3246_s4 + $0x20] sm:$0xff] %vm258_vm0, %v1373_v27  ;;  %v1374_v20 = vmul.f32 %v1951_v61, %v3114_v43  ;;  %1968 = vpow2.f32 %v1443_v18 }
 0x23f   :  { %v1955_v45 = vpop.eup %1954  ;;  %1970 = vrcp.f32 %v1330_v39  ;;  %v1335_v58 = vadd.f32 1.0, %v1953_v2 }
 0x240   :  { %v1957_v37 = vpop.eup %1956  ;;  %1390 = vst.msk [vmem:[%s3246_s4 + $0x28] sm:$0xff] %vm258_vm0, %v1374_v20  ;;  %v1333_v35 = vadd.f32 1.0, %v1955_v45 }
 0x241   :  { %v1959_v26 = vpop.eup %1958  ;;  %1972 = vrcp.f32 %v1335_v58  ;;  %v1336_v23 = vadd.f32 1.0, %v1957_v37 }
 0x242   :  { %1974 = vrcp.f32 %v1333_v35  ;;  %v1334_v41 = vadd.f32 1.0, %v1959_v26 }
 0x243   :  { %v1961_v12 = vpop.eup %1960  ;;  %1976 = vrcp.f32 %v1336_v23 }
 0x244   :  { %v1963_v62 = vpop.eup %1962  ;;  %v1375_v43 = vmul.f32 %v1961_v12, %v3116_v42  ;;  %1978 = vrcp.f32 %v1334_v41 }
 0x245   :  { %v1376_v17 = vmul.f32 %v1963_v62, %v3120_v34 }
 0x246   :  { %v1965_v7 = vpop.eup %1964  ;;  %1391 = vst.msk [vmem:[%s3246_s4 + $0x30] sm:$0xff] %vm258_vm0, %v1375_v43 }
 0x247   :  { %v1967_v51 = vpop.eup %1966  ;;  %1392 = vst.msk [vmem:[%s3246_s4 + $0x38] sm:$0xff] %vm258_vm0, %v1376_v17  ;;  %v1331_v11 = vadd.f32 1.0, %v1965_v7 }
 0x248   :  { %v1969_v44 = vpop.eup %1968  ;;  %v1377_v46 = vmul.f32 %v1967_v51, %v3129_v49 }
 0x249   :  { %v1971_v42 = vpop.eup %1970  ;;  %1980 = vrcp.f32 %v1331_v11  ;;  %v1332_v14 = vadd.f32 1.0, %v1969_v44 }
 0x24a   :  { %1393 = vst.msk [vmem:[%s3246_s4 + $0x40] sm:$0xff] %vm258_vm0, %v1377_v46  ;;  %v1378_v34 = vmul.f32 %v1971_v42, %v3135_v32 }
 0x24b   :  { %v1973_v4 = vpop.eup %1972  ;;  %1982 = vrcp.f32 %v1332_v14 }
 0x24c   :  { %v1975_v60 = vpop.eup %1974  ;;  %1394 = vst.msk [vmem:[%s3246_s4 + $0x48] sm:$0xff] %vm258_vm0, %v1378_v34  ;;  %v1383_v49 = vmul.f32 %v1973_v4, %v3139_v1 }
 0x24d   :  { %v1977_v16 = vpop.eup %1976  ;;  %v1381_v21 = vmul.f32 %v1975_v60, %v3144_v50 }
 0x24e   :  { %v1979_v28 = vpop.eup %1978  ;;  %1399 = vst.msk [vmem:[%s3246_s4 + $0x70] sm:$0xff] %vm258_vm0, %v1383_v49  ;;  %v1384_v32 = vmul.f32 %v1977_v16, %v3149_v25 }
 0x24f   :  { %1397 = vst.msk [vmem:[%s3246_s4 + $0x60] sm:$0xff] %vm258_vm0, %v1381_v21  ;;  %v1382_v6 = vmul.f32 %v1979_v28, %v3152_v30 }
 0x250   :  { %1400 = vst.msk [vmem:[%s3246_s4 + $0x78] sm:$0xff] %vm258_vm0, %v1384_v32 }
 0x251   :  { %1398 = vst.msk [vmem:[%s3246_s4 + $0x68] sm:$0xff] %vm258_vm0, %v1382_v6 }
 0x253   :  { %v1981_v1 = vpop.eup %1980 }
 0x254   :  { %v1379_v50 = vmul.f32 %v1981_v1, %v3178_v52 }
 0x255   :  { %v1983_v25 = vpop.eup %1982 }
 0x256   :  { %1395 = vst.msk [vmem:[%s3246_s4 + $0x50] sm:$0xff] %vm258_vm0, %v1379_v50  ;;  %v1380_v30 = vmul.f32 %v1983_v25, %v1254_v10 }
 0x258   :  { %1396 = vst.msk [vmem:[%s3246_s4 + $0x58] sm:$0xff] %vm258_vm0, %v1380_v30 }

// kernel: forward.6
= control target key start
LH: loop header
LB: loop body
LE: loop exit
PB: predicated region body
PF: predicated region fallthrough
CT: control target
= control target key end

     0   :  { %vm69_vm0 = vcmask 261120   ;;  %vm9261_vm1 = vmmov 0   ;;  %s9262_s30 = smov 112   ;;  %s9263_s16 = smov 96   ;;  %vm558_vm2 = vcmask 130048   ;;  %vm3300_vm3 = vcmask 523264   ;;  %s12455_s0 = inlined_call_operand.vmem [shape: f32[128,32], index: 0, kind: input, shape index: {}]   ;;  %s12456_s3 = inlined_call_operand.vmem [shape: bf16[2,32,96], index: 3, kind: input, shape index: {}]   ;;  %s12457_s1 = inlined_call_operand.vmem [shape: f32[2,2,1,32], index: 1, kind: input, shape index: {}]   ;;  %s12458_s2 = inlined_call_operand.vmem [shape: f32[2,2,1,32], index: 2, kind: input, shape index: {}]   ;;  %s12459_s4 = inlined_call_operand.vmem [shape: f32[2,1,96], index: 4, kind: input, shape index: {}]   ;;  %s12460_s5 = inlined_call_operand.vmem [shape: bf16[2,32,32], index: 5, kind: input, shape index: {}]   ;;  %s12461_s6 = inlined_call_operand.vmem [shape: f32[2,1,32], index: 6, kind: input, shape index: {}]   ;;  %s12462_s7 = inlined_call_operand.vmem [shape: bf16[2,32,64], index: 7, kind: input, shape index: {}]   ;;  %s12463_s9 = inlined_call_operand.vmem [shape: bf16[2,64,32], index: 9, kind: input, shape index: {}]   ;;  %s12464_s8 = inlined_call_operand.vmem [shape: f32[2,1,64], index: 8, kind: input, shape index: {}]   ;;  %s12465_s10 = inlined_call_operand.vmem [shape: f32[2,1,32], index: 10, kind: input, shape index: {}]   ;;  %s12466_s13 = inlined_call_operand.vmem [shape: bf16[32,16], index: 13, kind: input, shape index: {}]   ;;  %s12467_s11 = inlined_call_operand.vmem [shape: f32[1,32], index: 11, kind: input, shape index: {}]   ;;  %s12468_s12 = inlined_call_operand.vmem [shape: f32[1,32], index: 12, kind: input, shape index: {}]   ;;  %s12469_s14 = inlined_call_operand.vmem [shape: f32[1,16], index: 14, kind: input, shape index: {}]   ;;  %s12470_s15 = inlined_call_operand.vmem [shape: f32[128,16], index: 15, kind: output, shape index: {}]  }
   0x1   :  { %v51_v0 = vld [vmem:[%s12455_s0] sm:$0xff]  ;;  %v53_v1 = vld [vmem:[%s12455_s0 + $0x10] sm:$0xff]  ;;  %v52_v2 = vld [vmem:[%s12455_s0 + $0x8] sm:$0xff]  ;;  %s9264_s17 = smov 64   ;;  %s9265_s22 = smov 16  }
   0x2   :  { %v70_v3 = vsel %vm69_vm0, %v51_v0, 0.0  ;;  %v76_v4 = vsel %vm69_vm0, %v53_v1, 0.0  ;;  %v54_v5 = vld [vmem:[%s12455_s0 + $0x18] sm:$0xff]  ;;  %v73_v6 = vsel %vm69_vm0, %v52_v2, 0.0  ;;  %v55_v8 = vld [vmem:[%s12455_s0 + $0x20] sm:$0xff]  ;;  %v56_v9 = vld [vmem:[%s12455_s0 + $0x28] sm:$0xff] }
   0x3   :  { %71 = vadd.xlane.f32.xlu0 %v70_v3  ;;  %77 = vadd.xlane.f32.xlu1 %v76_v4  ;;  %v79_v7 = vsel %vm69_vm0, %v54_v5, 0.0  ;;  %v82_v10 = vsel %vm69_vm0, %v55_v8, 0.0  ;;  %v85_v11 = vsel %vm69_vm0, %v56_v9, 0.0  ;;  %v9373_v12 = vld [vmem:[%s12455_s0 + $0x30] sm:$0xff]  ;;  %v9378_v13 = vld [vmem:[%s12455_s0 + $0x38] sm:$0xff]  ;;  %v9387_v16 = vld [vmem:[%s12455_s0 + $0x40] sm:$0xff] }
   0x4   :  { %v88_v14 = vsel %vm69_vm0, %v9373_v12, 0.0  ;;  %v91_v15 = vsel %vm69_vm0, %v9378_v13, 0.0  ;;  %v9392_v17 = vld [vmem:[%s12455_s0 + $0x48] sm:$0xff]  ;;  %v94_v18 = vsel %vm69_vm0, %v9387_v16, 0.0  ;;  %v9401_v20 = vld [vmem:[%s12455_s0 + $0x50] sm:$0xff]  ;;  %v9406_v21 = vld [vmem:[%s12455_s0 + $0x58] sm:$0xff] }
   0x5   :  { %v97_v19 = vsel %vm69_vm0, %v9392_v17, 0.0  ;;  %v100_v22 = vsel %vm69_vm0, %v9401_v20, 0.0  ;;  %v103_v23 = vsel %vm69_vm0, %v9406_v21, 0.0  ;;  %v9415_v24 = vld [vmem:[%s12455_s0 + $0x60] sm:$0xff]  ;;  %v9420_v25 = vld [vmem:[%s12455_s0 + $0x68] sm:$0xff]  ;;  %v9429_v28 = vld [vmem:[%s12455_s0 + $0x70] sm:$0xff] }
   0x6   :  { %v106_v26 = vsel %vm69_vm0, %v9415_v24, 0.0  ;;  %v109_v27 = vsel %vm69_vm0, %v9420_v25, 0.0  ;;  %v9434_v29 = vld [vmem:[%s12455_s0 + $0x78] sm:$0xff]  ;;  %v112_v30 = vsel %vm69_vm0, %v9429_v28, 0.0 }
   0x7   :  { %74 = vadd.xlane.f32.xlu0 %v73_v6  ;;  %80 = vadd.xlane.f32.xlu1 %v79_v7  ;;  %v115_v31 = vsel %vm69_vm0, %v9434_v29, 0.0 }
   0xb   :  { %83 = vadd.xlane.f32.xlu0 %v82_v10  ;;  %86 = vadd.xlane.f32.xlu1 %v85_v11 }
   0xf   :  { %89 = vadd.xlane.f32.xlu0 %v88_v14  ;;  %92 = vadd.xlane.f32.xlu1 %v91_v15 }
  0x13   :  { %95 = vadd.xlane.f32.xlu0 %v94_v18  ;;  %98 = vadd.xlane.f32.xlu1 %v97_v19 }
  0x17   :  { %101 = vadd.xlane.f32.xlu0 %v100_v22  ;;  %104 = vadd.xlane.f32.xlu1 %v103_v23 }
  0x1b   :  { %107 = vadd.xlane.f32.xlu0 %v106_v26  ;;  %110 = vadd.xlane.f32.xlu1 %v109_v27 }
  0x1f   :  { %113 = vadd.xlane.f32.xlu0 %v112_v30  ;;  %116 = vadd.xlane.f32.xlu1 %v115_v31 }
  0x90   :  { %v72_v32 = vpop.xlane.xlu0 %71  ;;  %v78_v33 = vpop.xlane.xlu1 %77 }
  0x91   :  { %v119_v34 = vmul.f32 0.03125, %v72_v32  ;;  %v121_v35 = vmul.f32 0.03125, %v78_v33 }
  0x93   :  { %v9440_v36 = vsub.f32 %v51_v0, %v119_v34  ;;  %v9442_v37 = vsub.f32 %v53_v1, %v121_v35 }
  0x94   :  { %v75_v38 = vpop.xlane.xlu0 %74  ;;  %v81_v39 = vpop.xlane.xlu1 %80 }
  0x95   :  { %v120_v40 = vmul.f32 0.03125, %v75_v38  ;;  %v122_v41 = vmul.f32 0.03125, %v81_v39  ;;  %v151_v42 = vmul.f32 %v9440_v36, %v9440_v36  ;;  %v153_v43 = vmul.f32 %v9442_v37, %v9442_v37 }
  0x97   :  { %v9448_v44 = vsub.f32 %v52_v2, %v120_v40  ;;  %v9450_v45 = vsub.f32 %v54_v5, %v122_v41  ;;  %v167_v46 = vsel %vm69_vm0, %v151_v42, 0.0  ;;  %v173_v49 = vsel %vm69_vm0, %v153_v43, 0.0 }
  0x98   :  { %168 = vadd.xlane.f32.xlu0 %v167_v46  ;;  %v84_v47 = vpop.xlane.xlu0 %83  ;;  %v87_v48 = vpop.xlane.xlu1 %86 }
  0x99   :  { %v123_v50 = vmul.f32 0.03125, %v84_v47  ;;  %v124_v51 = vmul.f32 0.03125, %v87_v48  ;;  %v152_v52 = vmul.f32 %v9448_v44, %v9448_v44  ;;  %v154_v53 = vmul.f32 %v9450_v45, %v9450_v45 }
  0x9b   :  { %v9458_v54 = vsub.f32 %v55_v8, %v123_v50  ;;  %v9460_v55 = vsub.f32 %v56_v9, %v124_v51  ;;  %v170_v56 = vsel %vm69_vm0, %v152_v52, 0.0  ;;  %v176_v59 = vsel %vm69_vm0, %v154_v53, 0.0  ;;  %v8615_v53 = vld [vmem:[%s12456_s3 + $0x8] sm:$0xff]  }
  0x9c   :  { %174 = vadd.xlane.f32.xlu0 %v173_v49  ;;  %171 = vadd.xlane.f32.xlu1 %v170_v56  ;;  %v90_v57 = vpop.xlane.xlu0 %89  ;;  %v93_v58 = vpop.xlane.xlu1 %92 }
  0x9d   :  { %v125_v60 = vmul.f32 0.03125, %v90_v57  ;;  %v126_v61 = vmul.f32 0.03125, %v93_v58  ;;  %v155_v62 = vmul.f32 %v9458_v54, %v9458_v54  ;;  %v156_v63 = vmul.f32 %v9460_v55, %v9460_v55 }
  0x9f   :  { %v9469_v0 = vsub.f32 %v9373_v12, %v125_v60  ;;  %v9472_v1 = vsub.f32 %v9378_v13, %v126_v61  ;;  %v179_v2 = vsel %vm69_vm0, %v155_v62, 0.0  ;;  %v182_v5 = vsel %vm69_vm0, %v156_v63, 0.0 }
  0xa0   :  { %177 = vadd.xlane.f32.xlu1 %v176_v59  ;;  %180 = vadd.xlane.f32.xlu0 %v179_v2  ;;  %v96_v3 = vpop.xlane.xlu0 %95  ;;  %v99_v4 = vpop.xlane.xlu1 %98 }
  0xa1   :  { %v127_v6 = vmul.f32 0.03125, %v96_v3  ;;  %v128_v7 = vmul.f32 0.03125, %v99_v4  ;;  %v157_v8 = vmul.f32 %v9469_v0, %v9469_v0  ;;  %v158_v9 = vmul.f32 %v9472_v1, %v9472_v1 }
  0xa3   :  { %v9481_v10 = vsub.f32 %v9387_v16, %v127_v6  ;;  %v9484_v11 = vsub.f32 %v9392_v17, %v128_v7  ;;  %v185_v12 = vsel %vm69_vm0, %v157_v8, 0.0  ;;  %v188_v15 = vsel %vm69_vm0, %v158_v9, 0.0 }
  0xa4   :  { %183 = vadd.xlane.f32.xlu1 %v182_v5  ;;  %186 = vadd.xlane.f32.xlu0 %v185_v12  ;;  %v102_v13 = vpop.xlane.xlu0 %101  ;;  %v105_v14 = vpop.xlane.xlu1 %104 }
  0xa5   :  { %v129_v18 = vmul.f32 0.03125, %v102_v13  ;;  %v130_v19 = vmul.f32 0.03125, %v105_v14  ;;  %v159_v22 = vmul.f32 %v9481_v10, %v9481_v10  ;;  %v160_v16 = vmul.f32 %v9484_v11, %v9484_v11 }
  0xa7   :  { %v9493_v23 = vsub.f32 %v9401_v20, %v129_v18  ;;  %v9496_v17 = vsub.f32 %v9406_v21, %v130_v19  ;;  %v191_v26 = vsel %vm69_vm0, %v159_v22, 0.0  ;;  %v194_v31 = vsel %vm69_vm0, %v160_v16, 0.0 }
  0xa8   :  { %189 = vadd.xlane.f32.xlu1 %v188_v15  ;;  %192 = vadd.xlane.f32.xlu0 %v191_v26  ;;  %v108_v27 = vpop.xlane.xlu0 %107  ;;  %v111_v30 = vpop.xlane.xlu1 %110 }
  0xa9   :  { %v131_v32 = vmul.f32 0.03125, %v108_v27  ;;  %v132_v33 = vmul.f32 0.03125, %v111_v30  ;;  %v161_v34 = vmul.f32 %v9493_v23, %v9493_v23  ;;  %v162_v20 = vmul.f32 %v9496_v17, %v9496_v17 }
  0xab   :  { %v9505_v35 = vsub.f32 %v9415_v24, %v131_v32  ;;  %v9508_v21 = vsub.f32 %v9420_v25, %v132_v33  ;;  %v197_v38 = vsel %vm69_vm0, %v161_v34, 0.0  ;;  %v200_v41 = vsel %vm69_vm0, %v162_v20, 0.0 }
  0xac   :  { %195 = vadd.xlane.f32.xlu1 %v194_v31  ;;  %198 = vadd.xlane.f32.xlu0 %v197_v38  ;;  %v114_v39 = vpop.xlane.xlu0 %113  ;;  %v117_v40 = vpop.xlane.xlu1 %116  ;;  %v9540_v31 = vld [vmem:[%s12457_s1] ss:$0 sm:$0xff] }
  0xad   :  { %v133_v42 = vmul.f32 0.03125, %v114_v39  ;;  %v134_v43 = vmul.f32 0.03125, %v117_v40  ;;  %v163_v46 = vmul.f32 %v9505_v35, %v9505_v35  ;;  %v164_v24 = vmul.f32 %v9508_v21, %v9508_v21 }
  0xaf   :  { %v9517_v47 = vsub.f32 %v9429_v28, %v133_v42  ;;  %v9520_v25 = vsub.f32 %v9434_v29, %v134_v43  ;;  %v203_v48 = vsel %vm69_vm0, %v163_v46, 0.0  ;;  %v206_v49 = vsel %vm69_vm0, %v164_v24, 0.0  ;;  %v8614_v29 = vld [vmem:[%s12456_s3] sm:$0xff]  }
  0xb0   :  { %201 = vadd.xlane.f32.xlu1 %v200_v41  ;;  %204 = vadd.xlane.f32.xlu0 %v203_v48  ;;  %v9547_v43 = vld [vmem:[%s12458_s2] ss:$0 sm:$0xff] }
  0xb1   :  { %v165_v50 = vmul.f32 %v9517_v47, %v9517_v47  ;;  %v166_v51 = vmul.f32 %v9520_v25, %v9520_v25  ;;  %7876 = vmatprep.subr.bf16.mxu0 %v8614_v29 }
  0xb2   :  { %7877 = vmatpush3.bf16.msra.mxu0 %v8614_v29 }
  0xb3   :  { %v209_v52 = vsel %vm69_vm0, %v165_v50, 0.0  ;;  %v212_v28 = vsel %vm69_vm0, %v166_v51, 0.0  ;;  %7878 = vmatprep.subr.bf16.mxu0 %v8615_v53 }
  0xb4   :  { %207 = vadd.xlane.f32.xlu1 %v206_v49  ;;  %210 = vadd.xlane.f32.xlu0 %v209_v52 }
  0xb6   :  { %7879 = vmatpush3.bf16.msra.mxu0 %v8615_v53 }
  0xb8   :  { %213 = vadd.xlane.f32.xlu1 %v212_v28 }
 0x125   :  { %v169_v56 = vpop.xlane.xlu0 %168 }
 0x126   :  { %v215_v57 = vmul.f32 0.03125, %v169_v56 }
 0x128   :  { %v231_v58 = vadd.f32 1e-05, %v215_v57 }
 0x129   :  { %v172_v59 = vpop.xlane.xlu1 %171  ;;  %v175_v60 = vpop.xlane.xlu0 %174 }
 0x12a   :  { %8636 = vrsqrt.f32 %v231_v58  ;;  %v216_v61 = vmul.f32 0.03125, %v172_v59  ;;  %v217_v62 = vmul.f32 0.03125, %v175_v60 }
 0x12c   :  { %v232_v63 = vadd.f32 1e-05, %v216_v61  ;;  %v233_v2 = vadd.f32 1e-05, %v217_v62 }
 0x12d   :  { %v178_v3 = vpop.xlane.xlu1 %177  ;;  %v181_v4 = vpop.xlane.xlu0 %180 }
 0x12e   :  { %8638 = vrsqrt.f32 %v232_v63  ;;  %v218_v5 = vmul.f32 0.03125, %v178_v3  ;;  %v219_v6 = vmul.f32 0.03125, %v181_v4 }
 0x12f   :  { %8640 = vrsqrt.f32 %v233_v2 }
 0x130   :  { %v234_v7 = vadd.f32 1e-05, %v218_v5  ;;  %v235_v8 = vadd.f32 1e-05, %v219_v6 }
 0x131   :  { %v184_v9 = vpop.xlane.xlu1 %183  ;;  %v187_v12 = vpop.xlane.xlu0 %186 }
 0x132   :  { %8642 = vrsqrt.f32 %v234_v7  ;;  %v220_v13 = vmul.f32 0.03125, %v184_v9  ;;  %v221_v14 = vmul.f32 0.03125, %v187_v12 }
 0x133   :  { %8644 = vrsqrt.f32 %v235_v8 }
 0x134   :  { %v8637_v15 = vpop.eup %8636  ;;  %v236_v18 = vadd.f32 1e-05, %v220_v13  ;;  %v237_v19 = vadd.f32 1e-05, %v221_v14 }
 0x135   :  { %v190_v22 = vpop.xlane.xlu1 %189  ;;  %v193_v16 = vpop.xlane.xlu0 %192  ;;  %v263_v26 = vmul.f32 %v8637_v15, %v9440_v36 }
 0x136   :  { %8646 = vrsqrt.f32 %v236_v18  ;;  %v222_v27 = vmul.f32 0.03125, %v190_v22  ;;  %v223_v30 = vmul.f32 0.03125, %v193_v16 }
 0x137   :  { %8648 = vrsqrt.f32 %v237_v19  ;;  %v285_v41 = vmul.f32 %v9540_v31, %v263_v26 }
 0x138   :  { %v8639_v32 = vpop.eup %8638  ;;  %v238_v33 = vadd.f32 1e-05, %v222_v27  ;;  %v239_v34 = vadd.f32 1e-05, %v223_v30 }
 0x139   :  { %v8641_v20 = vpop.eup %8640  ;;  %v196_v38 = vpop.xlane.xlu1 %195  ;;  %v264_v40 = vmul.f32 %v8639_v32, %v9448_v44  ;;  %v307_v28 = vadd.f32 %v9547_v43, %v285_v41 }
 0x13a   :  { %v199_v39 = vpop.xlane.xlu0 %198  ;;  %8650 = vrsqrt.f32 %v238_v33  ;;  %v224_v36 = vmul.f32 0.03125, %v196_v38  ;;  %v265_v46 = vmul.f32 %v8641_v20, %v9442_v37 }
 0x13b   :  { %v225_v42 = vmul.f32 0.03125, %v199_v39  ;;  %8652 = vrsqrt.f32 %v239_v34  ;;  %v286_v24 = vmul.f32 %v9540_v31, %v264_v40 }
 0x13c   :  { %v8643_v48 = vpop.eup %8642  ;;  %v240_v49 = vadd.f32 1e-05, %v224_v36  ;;  %v287_v56 = vmul.f32 %v9540_v31, %v265_v46 }
 0x13d   :  { %v241_v50 = vadd.f32 1e-05, %v225_v42  ;;  %v8645_v51 = vpop.eup %8644  ;;  %v202_v44 = vpop.xlane.xlu1 %201  ;;  %v308_v29 = vadd.f32 %v9547_v43, %v286_v24  ;;  %v266_v53 = vmul.f32 %v8643_v48, %v9450_v45 }
 0x13e   :  { %v205_v52 = vpop.xlane.xlu0 %204  ;;  %8654 = vrsqrt.f32 %v240_v49  ;;  %v226_v57 = vmul.f32 0.03125, %v202_v44  ;;  %v267_v60 = vmul.f32 %v8645_v51, %v9458_v54  ;;  %v309_v45 = vadd.f32 %v9547_v43, %v287_v56 }
 0x13f   :  { %v227_v37 = vmul.f32 0.03125, %v205_v52  ;;  %8656 = vrsqrt.f32 %v241_v50  ;;  %v323_v58 = vpack.c.bf16 %v308_v29, %v307_v28  ;;  %v288_v59 = vmul.f32 %v9540_v31, %v266_v53 }
 0x140   :  { %v8647_v61 = vpop.eup %8646  ;;  %v242_v62 = vadd.f32 1e-05, %v226_v57  ;;  %v289_v7 = vmul.f32 %v9540_v31, %v267_v60 }
 0x141   :  { %v243_v63 = vadd.f32 1e-05, %v227_v37  ;;  %v8649_v2 = vpop.eup %8648  ;;  %v208_v3 = vpop.xlane.xlu1 %207  ;;  %7880 = vmatprep.mubr.msk.bf16.mxu0 %vm69_vm0, %v323_v58  ;;  %v310_v5 = vadd.f32 %v9547_v43, %v288_v59  ;;  %v268_v6 = vmul.f32 %v8647_v61, %v9460_v55 }
 0x142   :  { %v211_v4 = vpop.xlane.xlu0 %210  ;;  %8658 = vrsqrt.f32 %v242_v62  ;;  %v228_v8 = vmul.f32 0.03125, %v208_v3  ;;  %v269_v54 = vmul.f32 %v8649_v2, %v9469_v0  ;;  %v311_v55 = vadd.f32 %v9547_v43, %v289_v7 }
 0x143   :  { %v229_v9 = vmul.f32 0.03125, %v211_v4  ;;  %8660 = vrsqrt.f32 %v243_v63  ;;  %v324_v12 = vpack.c.bf16 %v310_v5, %v309_v45  ;;  %v290_v13 = vmul.f32 %v9540_v31, %v268_v6  ;;  %v7401_v45 = vld [vmem:[%s12459_s4] ss:$0 sm:$0xff] }
 0x144   :  { %v8651_v14 = vpop.eup %8650  ;;  %v244_v15 = vadd.f32 1e-05, %v228_v8  ;;  %v291_v27 = vmul.f32 %v9540_v31, %v269_v54  ;;  %v12471_v4 = vmov 0.0  }
 0x145   :  { %v245_v18 = vadd.f32 1e-05, %v229_v9  ;;  %v8653_v19 = vpop.eup %8652  ;;  %v214_v22 = vpop.xlane.xlu1 %213  ;;  %7881 = vmatmul.mubr.msk.bf16.vlgmr.msra.gmra.mrb[0].mxu0 %vm69_vm0, %v324_v12  ;;  %v312_v16 = vadd.f32 %v9547_v43, %v290_v13  ;;  %v270_v26 = vmul.f32 %v8651_v14, %v9472_v1  ;;  %7896 = vmatprep.subr.bf16.mxu1 %v12471_v4 }
 0x146   :  { %8662 = vrsqrt.f32 %v244_v15  ;;  %v230_v0 = vmul.f32 0.03125, %v214_v22  ;;  %v271_v30 = vmul.f32 %v8653_v19, %v9481_v10  ;;  %v313_v39 = vadd.f32 %v9547_v43, %v291_v27  ;;  %7920 = vmatprep.subr.bf16.mxu0 %v12471_v4  ;;  %7898 = vmatprep.mubr.msk.bf16.mxu1 %vm9261_vm1, %v12471_v4 }
 0x147   :  { %8664 = vrsqrt.f32 %v245_v18  ;;  %v325_v32 = vpack.c.bf16 %v312_v16, %v311_v55  ;;  %v292_v33 = vmul.f32 %v9540_v31, %v270_v26 }
 0x148   :  { %v8655_v34 = vpop.eup %8654  ;;  %v246_v20 = vadd.f32 1e-05, %v230_v0  ;;  %v293_v41 = vmul.f32 %v9540_v31, %v271_v30 }
 0x149   :  { %v8657_v38 = vpop.eup %8656  ;;  %7884 = vmatprep.mubr.msk.bf16.mxu0 %vm69_vm0, %v325_v32  ;;  %v314_v40 = vadd.f32 %v9547_v43, %v292_v33  ;;  %v272_v1 = vmul.f32 %v8655_v34, %v9484_v11 }
 0x14a   :  { %8666 = vrsqrt.f32 %v246_v20  ;;  %v273_v10 = vmul.f32 %v8657_v38, %v9493_v23  ;;  %v315_v48 = vadd.f32 %v9547_v43, %v293_v41 }
 0x14b   :  { %v326_v36 = vpack.c.bf16 %v314_v40, %v313_v39  ;;  %v294_v42 = vmul.f32 %v9540_v31, %v272_v1 }
 0x14c   :  { %v8659_v46 = vpop.eup %8658  ;;  %v295_v11 = vmul.f32 %v9540_v31, %v273_v10 }
 0x14d   :  { %v8661_v24 = vpop.eup %8660  ;;  %7885 = vmatmul.mubr.msk.bf16.gmra.mrb[4].mxu0 %vm69_vm0, %v326_v36  ;;  %v316_v49 = vadd.f32 %v9547_v43, %v294_v42  ;;  %v274_v50 = vmul.f32 %v8659_v46, %v9496_v17 }
 0x14e   :  { %v275_v51 = vmul.f32 %v8661_v24, %v9505_v35  ;;  %v317_v29 = vadd.f32 %v9547_v43, %v295_v11 }
 0x14f   :  { %v327_v44 = vpack.c.bf16 %v316_v49, %v315_v48  ;;  %v296_v23 = vmul.f32 %v9540_v31, %v274_v50 }
 0x150   :  { %v8663_v52 = vpop.eup %8662  ;;  %v297_v57 = vmul.f32 %v9540_v31, %v275_v51 }
 0x151   :  { %v8665_v28 = vpop.eup %8664  ;;  %7888 = vmatprep.mubr.msk.bf16.mxu0 %vm69_vm0, %v327_v44  ;;  %v318_v53 = vadd.f32 %v9547_v43, %v296_v23  ;;  %v276_v56 = vmul.f32 %v8663_v52, %v9508_v21 }
 0x152   :  { %v277_v17 = vmul.f32 %v8665_v28, %v9517_v47  ;;  %v319_v59 = vadd.f32 %v9547_v43, %v297_v57 }
 0x153   :  { %v328_v37 = vpack.c.bf16 %v318_v53, %v317_v29  ;;  %v298_v35 = vmul.f32 %v9540_v31, %v276_v56 }
 0x154   :  { %v8667_v58 = vpop.eup %8666  ;;  %v299_v62 = vmul.f32 %v9540_v31, %v277_v17 }
 0x155   :  { %7889 = vmatmul.mubr.msk.bf16.gmra.mrb[8].mxu0 %vm69_vm0, %v328_v37  ;;  %v320_v60 = vadd.f32 %v9547_v43, %v298_v35  ;;  %v278_v61 = vmul.f32 %v8667_v58, %v9520_v25 }
 0x156   :  { %v321_v47 = vadd.f32 %v9547_v43, %v299_v62 }
 0x157   :  { %v329_v63 = vpack.c.bf16 %v320_v60, %v319_v59  ;;  %v300_v21 = vmul.f32 %v9540_v31, %v278_v61 }
 0x159   :  { %7892 = vmatprep.mubr.msk.bf16.mxu0 %vm69_vm0, %v329_v63  ;;  %v322_v2 = vadd.f32 %v9547_v43, %v300_v21 }
 0x15b   :  { %v330_v3 = vpack.c.bf16 %v322_v2, %v321_v47 }
 0x15d   :  { %7893 = vmatmul.mubr.msk.bf16.gmra.mrb[12].mxu0 %vm69_vm0, %v330_v3 }
 0x15e   :  { %7922 = vmatprep.mubr.msk.bf16.mxu0 %vm9261_vm1, %v12471_v4 }
 0x218   :  { %v7882_v25 = vpop.f32.mrb[0].mxu0 }
 0x219   :  { %v412_v31 = vpop.f32.mrb[1].mxu0  ;;  %v421_v6 = vadd.f32 %v7882_v25, %v7401_v45 }
 0x21a   :  { %v7883_v5 = vpop.f32.mrb[2].mxu0  ;;  %v413_v9 = vadd.f32 %v7401_v45, %v412_v31 }
 0x21b   :  { %v424_v7 = vadd.f32 %v7883_v5, %v7401_v45  ;;  %v415_v8 = vpop.f32.mrb[3].mxu0 }
 0x21c   :  { %v416_v43 = vadd.f32 %v7401_v45, %v415_v8 }
 0x21d   :  { %v8459_v54 = vpack.i.bf16 %v424_v7, %v421_v6  ;;  %v9611_v12 = vpack.c.bf16 %v424_v7, %v421_v6 }
 0x21e   :  { %v8454_v13 = vpack.i.bf16 %v416_v43, %v413_v9  ;;  %v9613_v14 = vpack.c.bf16 %v416_v43, %v413_v9 }
 0x21f   :  { %8460 = vrot.lane.b32.xlu1 %v8459_v54, %s9262_s30 }
 0x220   :  { %8455 = vrot.lane.b32.xlu0 %v8454_v13, %s9262_s30  ;;  %v7886_v15 = vpop.f32.mrb[4].mxu0 }
 0x221   :  { %v428_v18 = vpop.f32.mrb[5].mxu0  ;;  %v437_v22 = vadd.f32 %v7886_v15, %v7401_v45 }
 0x222   :  { %v7887_v19 = vpop.f32.mrb[6].mxu0  ;;  %v429_v26 = vadd.f32 %v7401_v45, %v428_v18 }
 0x223   :  { %v440_v55 = vadd.f32 %v7887_v19, %v7401_v45  ;;  %v431_v16 = vpop.f32.mrb[7].mxu0 }
 0x224   :  { %v432_v27 = vadd.f32 %v7401_v45, %v431_v16  ;;  %556 = vrot.lane.b32.xlu0 %v9613_v14, %s9263_s16 }
 0x225   :  { %v8469_v0 = vpack.i.bf16 %v440_v55, %v437_v22  ;;  %v9619_v30 = vpack.c.bf16 %v440_v55, %v437_v22 }
 0x226   :  { %v8464_v32 = vpack.i.bf16 %v432_v27, %v429_v26  ;;  %v9621_v33 = vpack.c.bf16 %v432_v27, %v429_v26 }
 0x228   :  { %8465 = vrot.lane.b32.xlu1 %v8464_v32, %s9262_s30  ;;  %v7890_v34 = vpop.f32.mrb[8].mxu0 }
 0x229   :  { %v444_v20 = vpop.f32.mrb[9].mxu0  ;;  %v453_v39 = vadd.f32 %v7890_v34, %v7401_v45 }
 0x22a   :  { %v7891_v38 = vpop.f32.mrb[10].mxu0  ;;  %v445_v41 = vadd.f32 %v7401_v45, %v444_v20 }
 0x22b   :  { %v456_v40 = vadd.f32 %v7891_v38, %v7401_v45  ;;  %v447_v1 = vpop.f32.mrb[11].mxu0 }
 0x22c   :  { %v448_v10 = vadd.f32 %v7401_v45, %v447_v1  ;;  %8470 = vrot.lane.b32.xlu1 %v8469_v0, %s9262_s30 }
 0x22d   :  { %v8479_v36 = vpack.i.bf16 %v456_v40, %v453_v39  ;;  %v9625_v42 = vpack.c.bf16 %v456_v40, %v453_v39 }
 0x22e   :  { %v8474_v46 = vpack.i.bf16 %v448_v10, %v445_v41  ;;  %v9627_v24 = vpack.c.bf16 %v448_v10, %v445_v41 }
 0x22f   :  { %8480 = vrot.lane.b32.xlu0 %v8479_v36, %s9262_s30 }
 0x230   :  { %8475 = vrot.lane.b32.xlu1 %v8474_v46, %s9262_s30  ;;  %v7894_v48 = vpop.f32.mrb[12].mxu0 }
 0x231   :  { %v460_v49 = vpop.f32.mrb[13].mxu0  ;;  %v469_v11 = vadd.f32 %v7894_v48, %v7401_v45 }
 0x232   :  { %v7895_v50 = vpop.f32.mrb[14].mxu0  ;;  %v461_v23 = vadd.f32 %v7401_v45, %v460_v49 }
 0x233   :  { %v472_v51 = vadd.f32 %v7895_v50, %v7401_v45  ;;  %v463_v44 = vpop.f32.mrb[15].mxu0 }
 0x234   :  { %v464_v52 = vadd.f32 %v7401_v45, %v463_v44  ;;  %607 = vrot.lane.b32.xlu1 %v9611_v12, %s9263_s16 }
 0x235   :  { %v8489_v28 = vpack.i.bf16 %v472_v51, %v469_v11  ;;  %v9633_v29 = vpack.c.bf16 %v472_v51, %v469_v11 }
 0x236   :  { %v8484_v53 = vpack.i.bf16 %v464_v52, %v461_v23  ;;  %v9635_v56 = vpack.c.bf16 %v464_v52, %v461_v23 }
 0x238   :  { %8490 = vrot.lane.b32.xlu1 %v8489_v28, %s9262_s30  ;;  %8485 = vrot.lane.b32.xlu0 %v8484_v53, %s9262_s30 }
 0x23c   :  { %707 = vrot.lane.b32.xlu1 %v9619_v30, %s9263_s16  ;;  %657 = vrot.lane.b32.xlu0 %v9621_v33, %s9263_s16 }
 0x240   :  { %807 = vrot.lane.b32.xlu1 %v9625_v42, %s9263_s16  ;;  %757 = vrot.lane.b32.xlu0 %v9627_v24, %s9263_s16 }
 0x244   :  { %907 = vrot.lane.b32.xlu1 %v9633_v29, %s9263_s16  ;;  %857 = vrot.lane.b32.xlu0 %v9635_v56, %s9263_s16 }
 0x291   :  { %v8461_v57 = vpop.permute.xlu1 %8460 }
 0x292   :  { %v8463_v17 = vunpack.i.h.bf16 %v8461_v57  ;;  %v8462_v37 = vunpack.i.l.bf16 %v8461_v57  ;;  %v8456_v35 = vpop.permute.xlu0 %8455 }
 0x293   :  { %v8458_v58 = vunpack.i.h.bf16 %v8456_v35  ;;  %v8457_v59 = vunpack.i.l.bf16 %v8456_v35 }
 0x294   :  { %v9651_v60 = vpack.c.bf16 %v8463_v17, %v8462_v37 }
 0x295   :  { %v9653_v61 = vpack.c.bf16 %v8458_v58, %v8457_v59 }
 0x296   :  { %1007 = vrot.lane.b32.xlu1 %v9651_v60, %s9263_s16  ;;  %v557_v62 = vpop.permute.xlu0 %556 }
 0x297   :  { %957 = vrot.lane.b32.xlu0 %v9653_v61, %s9263_s16  ;;  %v563_v63 = vsel %vm558_vm2, %v557_v62, 0 }
 0x298   :  { %7897 = vmatpush3.bf16.xpose.msra.mxu1 %v563_v63 }
 0x299   :  { %7902 = vmatprep.subr.bf16.mxu1 %v12471_v4 }
 0x29a   :  { %v8466_v21 = vpop.permute.xlu1 %8465 }
 0x29b   :  { %v8468_v47 = vunpack.i.h.bf16 %v8466_v21  ;;  %v8467_v2 = vunpack.i.l.bf16 %v8466_v21 }
 0x29d   :  { %v9661_v3 = vpack.c.bf16 %v8468_v47, %v8467_v2 }
 0x29e   :  { %v8471_v25 = vpop.permute.xlu1 %8470 }
 0x29f   :  { %v8473_v45 = vunpack.i.h.bf16 %v8471_v25  ;;  %v8472_v31 = vunpack.i.l.bf16 %v8471_v25  ;;  %7899 = vmatmul.mubr.msk.bf16.vlgmr.msra.gmra.mrb[0].mxu1 %vm558_vm2, %v9613_v14  ;;  %1057 = vrot.lane.b32.xlu0 %v9661_v3, %s9263_s16 }
 0x2a0   :  { %7904 = vmatprep.mubr.msk.bf16.mxu1 %vm9261_vm1, %v12471_v4 }
 0x2a1   :  { %v8481_v5 = vpop.permute.xlu0 %8480  ;;  %v9669_v6 = vpack.c.bf16 %v8473_v45, %v8472_v31 }
 0x2a2   :  { %v8483_v7 = vunpack.i.h.bf16 %v8481_v5  ;;  %v8482_v8 = vunpack.i.l.bf16 %v8481_v5  ;;  %v8476_v9 = vpop.permute.xlu1 %8475 }
 0x2a3   :  { %v8478_v43 = vunpack.i.h.bf16 %v8476_v9  ;;  %v8477_v54 = vunpack.i.l.bf16 %v8476_v9  ;;  %1107 = vrot.lane.b32.xlu1 %v9669_v6, %s9263_s16 }
 0x2a4   :  { %v9673_v13 = vpack.c.bf16 %v8483_v7, %v8482_v8 }
 0x2a5   :  { %v9675_v15 = vpack.c.bf16 %v8478_v43, %v8477_v54 }
 0x2a6   :  { %v608_v18 = vpop.permute.xlu1 %607 }
 0x2a7   :  { %v613_v19 = vsel %vm558_vm2, %v608_v18, 0  ;;  %1207 = vrot.lane.b32.xlu1 %v9673_v13, %s9263_s16  ;;  %1157 = vrot.lane.b32.xlu0 %v9675_v15, %s9263_s16 }
 0x2a8   :  { %7903 = vmatpush3.bf16.xpose.msra.mxu1 %v613_v19 }
 0x2a9   :  { %7908 = vmatprep.subr.bf16.mxu1 %v12471_v4 }
 0x2aa   :  { %v8491_v22 = vpop.permute.xlu1 %8490  ;;  %v8486_v55 = vpop.permute.xlu0 %8485 }
 0x2ab   :  { %v8493_v16 = vunpack.i.h.bf16 %v8491_v22  ;;  %v8492_v26 = vunpack.i.l.bf16 %v8491_v22  ;;  %v8488_v27 = vunpack.i.h.bf16 %v8486_v55  ;;  %v8487_v0 = vunpack.i.l.bf16 %v8486_v55 }
 0x2ad   :  { %v9683_v32 = vpack.c.bf16 %v8493_v16, %v8492_v26  ;;  %v9685_v34 = vpack.c.bf16 %v8488_v27, %v8487_v0 }
 0x2ae   :  { %v658_v20 = vpop.permute.xlu0 %657  ;;  %v708_v1 = vpop.permute.xlu1 %707 }
 0x2af   :  { %v663_v38 = vsel %vm558_vm2, %v658_v20, 0  ;;  %7905 = vmatmul.mubr.msk.bf16.vlgmr.msra.gmra.mrb[4].mxu1 %vm558_vm2, %v9611_v12  ;;  %1307 = vrot.lane.b32.xlu1 %v9683_v32, %s9263_s16  ;;  %v713_v41 = vsel %vm558_vm2, %v708_v1, 0 }
 0x2b0   :  { %1257 = vrot.lane.b32.xlu0 %v9685_v34, %s9263_s16  ;;  %7909 = vmatpush3.bf16.xpose.msra.mxu1 %v663_v38 }
 0x2b1   :  { %7910 = vmatprep.mubr.msk.bf16.mxu1 %vm9261_vm1, %v12471_v4  ;;  %7914 = vmatprep.subr.bf16.mxu1 %v12471_v4 }
 0x2b2   :  { %v758_v39 = vpop.permute.xlu0 %757 }
 0x2b3   :  { %v763_v40 = vsel %vm558_vm2, %v758_v39, 0  ;;  %1771 = vrot.lane.b32.xlu1 %v9611_v12, %s9264_s17 }
 0x2b4   :  { %1724 = vrot.lane.b32.xlu0 %v9613_v14, %s9264_s17  ;;  %7921 = vmatpush3.bf16.xpose.msra.mxu0 %v763_v40  ;;  %v808_v14 = vpop.permute.xlu1 %807 }
 0x2b5   :  { %7932 = vmatprep.subr.bf16.mxu0 %v12471_v4 }
 0x2b6   :  { %v858_v10 = vpop.permute.xlu0 %857 }
 0x2b7   :  { %7911 = vmatmul.mubr.msk.bf16.vlgmr.msra.gmra.mrb[8].mxu1 %vm558_vm2, %v9621_v33  ;;  %1865 = vrot.lane.b32.xlu1 %v9619_v30, %s9264_s17  ;;  %v863_v12 = vsel %vm558_vm2, %v858_v10, 0 }
 0x2b8   :  { %1818 = vrot.lane.b32.xlu0 %v9621_v33, %s9264_s17  ;;  %7915 = vmatpush3.bf16.xpose.msra.mxu1 %v713_v41  ;;  %v813_v33 = vsel %vm558_vm2, %v808_v14, 0  ;;  %v908_v36 = vpop.permute.xlu1 %907 }
 0x2b9   :  { %7916 = vmatprep.mubr.msk.bf16.mxu1 %vm9261_vm1, %v12471_v4  ;;  %7926 = vmatprep.subr.bf16.mxu1 %v12471_v4 }
 0x2bb   :  { %7923 = vmatmul.mubr.msk.bf16.vlgmr.msra.gmra.mrb[16].mxu0 %vm558_vm2, %v9627_v24  ;;  %1959 = vrot.lane.b32.xlu1 %v9625_v42, %s9264_s17 }
 0x2bc   :  { %1912 = vrot.lane.b32.xlu0 %v9627_v24, %s9264_s17  ;;  %7933 = vmatpush3.bf16.xpose.msra.mxu0 %v863_v12 }
 0x2bd   :  { %7934 = vmatprep.mubr.msk.bf16.mxu0 %vm9261_vm1, %v12471_v4  ;;  %7944 = vmatprep.subr.bf16.mxu0 %v12471_v4 }
 0x2bf   :  { %7917 = vmatmul.mubr.msk.bf16.vlgmr.msra.gmra.mrb[12].mxu1 %vm558_vm2, %v9619_v30  ;;  %2053 = vrot.lane.b32.xlu1 %v9633_v29, %s9264_s17  ;;  %v913_v30 = vsel %vm558_vm2, %v908_v36, 0 }
 0x2c0   :  { %2006 = vrot.lane.b32.xlu0 %v9635_v56, %s9264_s17  ;;  %7927 = vmatpush3.bf16.xpose.msra.mxu1 %v813_v33 }
 0x2c1   :  { %7928 = vmatprep.mubr.msk.bf16.mxu1 %vm9261_vm1, %v12471_v4  ;;  %7938 = vmatprep.subr.bf16.mxu1 %v12471_v4 }
 0x2c3   :  { %7935 = vmatmul.mubr.msk.bf16.vlgmr.msra.gmra.mrb[20].mxu0 %vm558_vm2, %v9635_v56  ;;  %2147 = vrot.lane.b32.xlu1 %v9651_v60, %s9264_s17 }
 0x2c4   :  { %2100 = vrot.lane.b32.xlu0 %v9653_v61, %s9264_s17  ;;  %7946 = vmatprep.mubr.msk.bf16.mxu0 %vm9261_vm1, %v12471_v4 }
 0x2c7   :  { %7929 = vmatmul.mubr.msk.bf16.vlgmr.msra.gmra.mrb[16].mxu1 %vm558_vm2, %v9625_v42  ;;  %2194 = vrot.lane.b32.xlu1 %v9661_v3, %s9264_s17 }
 0x2c8   :  { %7939 = vmatpush3.bf16.xpose.msra.mxu1 %v913_v30  ;;  %7940 = vmatprep.mubr.msk.bf16.mxu1 %vm9261_vm1, %v12471_v4 }
 0x2c9   :  { %7950 = vmatprep.subr.bf16.mxu1 %v12471_v4 }
 0x2cb   :  { %2241 = vrot.lane.b32.xlu1 %v9669_v6, %s9264_s17 }
 0x2cf   :  { %7941 = vmatmul.mubr.msk.bf16.vlgmr.msra.gmra.mrb[20].mxu1 %vm558_vm2, %v9633_v29 }
 0x2d0   :  { %7952 = vmatprep.mubr.msk.bf16.mxu1 %vm9261_vm1, %v12471_v4 }
 0x308   :  { %v1008_v46 = vpop.permute.xlu1 %1007 }
 0x309   :  { %v1013_v42 = vsel %vm558_vm2, %v1008_v46, 0  ;;  %v958_v24 = vpop.permute.xlu0 %957 }
 0x30a   :  { %v963_v48 = vsel %vm558_vm2, %v958_v24, 0  ;;  %7951 = vmatpush3.bf16.xpose.msra.mxu1 %v1013_v42 }
 0x30b   :  { %7945 = vmatpush3.bf16.xpose.msra.mxu0 %v963_v48  ;;  %7962 = vmatprep.subr.bf16.mxu1 %v12471_v4 }
 0x30c   :  { %7956 = vmatprep.subr.bf16.mxu0 %v12471_v4 }
 0x311   :  { %7953 = vmatmul.mubr.msk.bf16.vlgmr.msra.gmra.mrb[24].mxu1 %vm558_vm2, %v9651_v60  ;;  %v1058_v49 = vpop.permute.xlu0 %1057 }
 0x312   :  { %v1063_v50 = vsel %vm558_vm2, %v1058_v49, 0  ;;  %7947 = vmatmul.mubr.msk.bf16.vlgmr.msra.gmra.mrb[24].mxu0 %vm558_vm2, %v9653_v61  ;;  %7964 = vmatprep.mubr.msk.bf16.mxu1 %vm9261_vm1, %v12471_v4 }
 0x313   :  { %7957 = vmatpush3.bf16.xpose.msra.mxu0 %v1063_v50  ;;  %7958 = vmatprep.mubr.msk.bf16.mxu0 %vm9261_vm1, %v12471_v4 }
 0x314   :  { %7968 = vmatprep.subr.bf16.mxu0 %v12471_v4 }
 0x315   :  { %v1108_v11 = vpop.permute.xlu1 %1107 }
 0x316   :  { %v1113_v51 = vsel %vm558_vm2, %v1108_v11, 0 }
 0x317   :  { %7963 = vmatpush3.bf16.xpose.msra.mxu1 %v1113_v51 }
 0x318   :  { %7974 = vmatprep.subr.bf16.mxu1 %v12471_v4 }
 0x319   :  { %v1158_v44 = vpop.permute.xlu0 %1157  ;;  %v1208_v52 = vpop.permute.xlu1 %1207 }
 0x31a   :  { %v1163_v23 = vsel %vm558_vm2, %v1158_v44, 0  ;;  %7959 = vmatmul.mubr.msk.bf16.vlgmr.msra.gmra.mrb[28].mxu0 %vm558_vm2, %v9661_v3  ;;  %v1213_v28 = vsel %vm558_vm2, %v1208_v52, 0 }
 0x31b   :  { %7969 = vmatpush3.bf16.xpose.msra.mxu0 %v1163_v23  ;;  %7970 = vmatprep.mubr.msk.bf16.mxu0 %vm9261_vm1, %v12471_v4 }
 0x31c   :  { %7980 = vmatprep.subr.bf16.mxu0 %v12471_v4 }
 0x31e   :  { %7965 = vmatmul.mubr.msk.bf16.vlgmr.msra.gmra.mrb[28].mxu1 %vm558_vm2, %v9669_v6 }
 0x31f   :  { %7975 = vmatpush3.bf16.xpose.msra.mxu1 %v1213_v28  ;;  %7976 = vmatprep.mubr.msk.bf16.mxu1 %vm9261_vm1, %v12471_v4 }
 0x320   :  { %7986 = vmatprep.subr.bf16.mxu1 %v12471_v4 }
 0x321   :  { %v1308_v53 = vpop.permute.xlu1 %1307 }
 0x322   :  { %v1258_v29 = vpop.permute.xlu0 %1257  ;;  %7971 = vmatmul.mubr.msk.bf16.vlgmr.msra.gmra.mrb[32].mxu0 %vm558_vm2, %v9675_v15  ;;  %v1313_v57 = vsel %vm558_vm2, %v1308_v53, 0 }
 0x323   :  { %v1263_v56 = vsel %vm558_vm2, %v1258_v29, 0  ;;  %7982 = vmatprep.mubr.msk.bf16.mxu0 %vm9261_vm1, %v12471_v4 }
 0x324   :  { %7981 = vmatpush3.bf16.xpose.msra.mxu0 %v1263_v56 }
 0x325   :  { %7992 = vmatprep.subr.bf16.mxu0 %v12471_v4  ;;  %v1772_v37 = vpop.permute.xlu1 %1771 }
 0x326   :  { %7977 = vmatmul.mubr.msk.bf16.vlgmr.msra.gmra.mrb[32].mxu1 %vm558_vm2, %v9673_v13  ;;  %v1725_v17 = vpop.permute.xlu0 %1724 }
 0x327   :  { %7987 = vmatpush3.bf16.xpose.msra.mxu1 %v1313_v57  ;;  %7988 = vmatprep.mubr.msk.bf16.mxu1 %vm9261_vm1, %v12471_v4 }
 0x328   :  { %7998 = vmatprep.subr.bf16.mxu1 %v12471_v4 }
 0x32b   :  { %7983 = vmatmul.mubr.msk.bf16.vlgmr.msra.gmra.mrb[36].mxu0 %vm558_vm2, %v9685_v34 }
 0x32c   :  { %7993 = vmatpush3.bf16.msra.mxu0 %v1725_v17  ;;  %7994 = vmatprep.mubr.msk.bf16.mxu0 %vm9261_vm1, %v12471_v4 }
 0x32d   :  { %8004 = vmatprep.subr.bf16.mxu0 %v12471_v4 }
 0x32e   :  { %7989 = vmatmul.mubr.msk.bf16.vlgmr.msra.gmra.mrb[36].mxu1 %vm558_vm2, %v9683_v32 }
 0x32f   :  { %7999 = vmatpush3.bf16.msra.mxu1 %v1772_v37  ;;  %8000 = vmatprep.mubr.msk.bf16.mxu1 %vm9261_vm1, %v12471_v4 }
 0x330   :  { %8010 = vmatprep.subr.bf16.mxu1 %v12471_v4 }
 0x372   :  { %v9805_v35 = vpop.f32.mrb[0].mxu1 }
 0x373   :  { %v7900_v58 = vpop.f32.mrb[1].mxu1  ;;  %v1356_v59 = vsel %vm558_vm2, %v9805_v35, -inf }
 0x374   :  { %v9809_v60 = vpop.f32.mrb[2].mxu1  ;;  %1357 = vmax.xlane.f32.xlu0 %v1356_v59 }
 0x375   :  { %v7901_v61 = vpop.f32.mrb[3].mxu1  ;;  %v1359_v62 = vsel %vm558_vm2, %v9809_v60, -inf }
 0x376   :  { %1360 = vmax.xlane.f32.xlu1 %v1359_v62 }
 0x382   :  { %v9813_v63 = vpop.f32.mrb[4].mxu1 }
 0x383   :  { %v7906_v21 = vpop.f32.mrb[5].mxu1  ;;  %v1362_v47 = vsel %vm558_vm2, %v9813_v63, -inf }
 0x384   :  { %v9817_v2 = vpop.f32.mrb[6].mxu1  ;;  %1363 = vmax.xlane.f32.xlu0 %v1362_v47 }
 0x385   :  { %v7907_v3 = vpop.f32.mrb[7].mxu1  ;;  %v1365_v25 = vsel %vm558_vm2, %v9817_v2, -inf }
 0x388   :  { %1366 = vmax.xlane.f32.xlu0 %v1365_v25 }
 0x38a   :  { %v9821_v45 = vpop.f32.mrb[8].mxu1 }
 0x38b   :  { %v7912_v31 = vpop.f32.mrb[9].mxu1  ;;  %v1368_v5 = vsel %vm558_vm2, %v9821_v45, -inf }
 0x38c   :  { %v9825_v6 = vpop.f32.mrb[10].mxu1  ;;  %1369 = vmax.xlane.f32.xlu0 %v1368_v5 }
 0x38d   :  { %v7913_v7 = vpop.f32.mrb[11].mxu1  ;;  %v1371_v8 = vsel %vm558_vm2, %v9825_v6, -inf }
 0x38e   :  { %v9829_v9 = vpop.f32.mrb[16].mxu0  ;;  %1372 = vmax.xlane.f32.xlu1 %v1371_v8 }
 0x38f   :  { %v7924_v43 = vpop.f32.mrb[17].mxu0  ;;  %v1380_v54 = vsel %vm558_vm2, %v9829_v9, -inf }
 0x390   :  { %v9833_v18 = vpop.f32.mrb[18].mxu0  ;;  %1381 = vmax.xlane.f32.xlu0 %v1380_v54 }
 0x391   :  { %v7925_v19 = vpop.f32.mrb[19].mxu0  ;;  %v1383_v22 = vsel %vm558_vm2, %v9833_v18, -inf }
 0x392   :  { %v9837_v55 = vpop.f32.mrb[12].mxu1  ;;  %1384 = vmax.xlane.f32.xlu1 %v1383_v22 }
 0x393   :  { %v7918_v16 = vpop.f32.mrb[13].mxu1  ;;  %v1374_v26 = vsel %vm558_vm2, %v9837_v55, -inf }
 0x394   :  { %v9841_v27 = vpop.f32.mrb[14].mxu1  ;;  %1375 = vmax.xlane.f32.xlu0 %v1374_v26 }
 0x395   :  { %v7919_v0 = vpop.f32.mrb[15].mxu1  ;;  %v1377_v20 = vsel %vm558_vm2, %v9841_v27, -inf }
 0x396   :  { %v9845_v38 = vpop.f32.mrb[20].mxu0  ;;  %1378 = vmax.xlane.f32.xlu1 %v1377_v20 }
 0x397   :  { %v7936_v39 = vpop.f32.mrb[21].mxu0  ;;  %v1392_v40 = vsel %vm558_vm2, %v9845_v38, -inf }
 0x398   :  { %v9849_v1 = vpop.f32.mrb[22].mxu0  ;;  %1393 = vmax.xlane.f32.xlu0 %v1392_v40 }
 0x399   :  { %v7937_v41 = vpop.f32.mrb[23].mxu0  ;;  %v1395_v10 = vsel %vm558_vm2, %v9849_v1, -inf }
 0x39a   :  { %v9853_v12 = vpop.f32.mrb[16].mxu1  ;;  %1396 = vmax.xlane.f32.xlu1 %v1395_v10  ;;  %v9913_v10 = vpop.permute.xlu0 %1818 }
 0x39b   :  { %v7930_v14 = vpop.f32.mrb[17].mxu1  ;;  %v1386_v33 = vsel %vm558_vm2, %v9853_v12, -inf }
 0x39c   :  { %v9857_v36 = vpop.f32.mrb[18].mxu1  ;;  %1387 = vmax.xlane.f32.xlu0 %v1386_v33 }
 0x39d   :  { %v7931_v30 = vpop.f32.mrb[19].mxu1  ;;  %v1389_v46 = vsel %vm558_vm2, %v9857_v36, -inf }
 0x39e   :  { %1390 = vmax.xlane.f32.xlu1 %v1389_v46  ;;  %v9919_v30 = vpop.permute.xlu1 %1865 }
 0x3a2   :  { %v9861_v42 = vpop.f32.mrb[20].mxu1 }
 0x3a3   :  { %v7942_v24 = vpop.f32.mrb[21].mxu1  ;;  %v1398_v48 = vsel %vm558_vm2, %v9861_v42, -inf }
 0x3a4   :  { %v9865_v49 = vpop.f32.mrb[22].mxu1  ;;  %1399 = vmax.xlane.f32.xlu0 %v1398_v48 }
 0x3a5   :  { %v7943_v50 = vpop.f32.mrb[23].mxu1  ;;  %v1401_v11 = vsel %vm558_vm2, %v9865_v49, -inf }
 0x3a6   :  { %1402 = vmax.xlane.f32.xlu1 %v1401_v11 }
 0x3e4   :  { %v9869_v51 = vpop.f32.mrb[24].mxu1 }
 0x3e5   :  { %v9871_v44 = vpop.f32.mrb[24].mxu0  ;;  %v7954_v23 = vpop.f32.mrb[25].mxu1  ;;  %v1410_v52 = vsel %vm558_vm2, %v9869_v51, -inf }
 0x3e6   :  { %v9875_v28 = vpop.f32.mrb[26].mxu1  ;;  %1411 = vmax.xlane.f32.xlu0 %v1410_v52  ;;  %v7948_v29 = vpop.f32.mrb[25].mxu0  ;;  %v1404_v37 = vsel %vm558_vm2, %v9871_v44, -inf }
 0x3e7   :  { %v9877_v53 = vpop.f32.mrb[26].mxu0  ;;  %v7955_v56 = vpop.f32.mrb[27].mxu1  ;;  %v1413_v57 = vsel %vm558_vm2, %v9875_v28, -inf }
 0x3e8   :  { %1414 = vmax.xlane.f32.xlu1 %v1413_v57  ;;  %v7949_v17 = vpop.f32.mrb[27].mxu0  ;;  %v1407_v58 = vsel %vm558_vm2, %v9877_v53, -inf  ;;  %v9929_v29 = vpop.permute.xlu0 %1912 }
 0x3ea   :  { %1405 = vmax.xlane.f32.xlu0 %v1404_v37  ;;  %v9935_v37 = vpop.permute.xlu1 %1959 }
 0x3ec   :  { %1408 = vmax.xlane.f32.xlu1 %v1407_v58 }
 0x3ed   :  { %v9885_v59 = vpop.f32.mrb[28].mxu0 }
 0x3ee   :  { %v7960_v61 = vpop.f32.mrb[29].mxu0  ;;  %v1416_v54 = vsel %vm558_vm2, %v9885_v59, -inf }
 0x3ef   :  { %v9887_v62 = vpop.f32.mrb[30].mxu0 }
 0x3f0   :  { %v7961_v21 = vpop.f32.mrb[31].mxu0  ;;  %v1419_v16 = vsel %vm558_vm2, %v9887_v62, -inf }
 0x3f1   :  { %v9889_v47 = vpop.f32.mrb[28].mxu1  ;;  %v9941_v21 = vpop.permute.xlu0 %2006 }
 0x3f2   :  { %v7966_v3 = vpop.f32.mrb[29].mxu1  ;;  %v1422_v25 = vsel %vm558_vm2, %v9889_v47, -inf }
 0x3f3   :  { %v9893_v31 = vpop.f32.mrb[30].mxu1  ;;  %1423 = vmax.xlane.f32.xlu0 %v1422_v25  ;;  %v9943_v3 = vpop.permute.xlu1 %2053 }
 0x3f4   :  { %v7967_v5 = vpop.f32.mrb[31].mxu1  ;;  %v1425_v7 = vsel %vm558_vm2, %v9893_v31, -inf }
 0x3f5   :  { %1426 = vmax.xlane.f32.xlu1 %v1425_v7  ;;  %v9897_v8 = vpop.f32.mrb[32].mxu0  ;;  %v9945_v25 = vpop.permute.xlu0 %2100 }
 0x3f6   :  { %v7972_v43 = vpop.f32.mrb[33].mxu0  ;;  %v1428_v33 = vsel %vm558_vm2, %v9897_v8, -inf }
 0x3f7   :  { %1417 = vmax.xlane.f32.xlu0 %v1416_v54  ;;  %v9901_v19 = vpop.f32.mrb[34].mxu0  ;;  %v9947_v5 = vpop.permute.xlu1 %2147 }
 0x3f8   :  { %v7973_v22 = vpop.f32.mrb[35].mxu0  ;;  %v1431_v48 = vsel %vm558_vm2, %v9901_v19, -inf }
 0x3f9   :  { %v9905_v26 = vpop.f32.mrb[32].mxu1  ;;  %1420 = vmax.xlane.f32.xlu1 %v1419_v16 }
 0x3fa   :  { %v7978_v0 = vpop.f32.mrb[33].mxu1  ;;  %v1434_v20 = vsel %vm558_vm2, %v9905_v26, -inf }
 0x3fb   :  { %v9909_v39 = vpop.f32.mrb[34].mxu1  ;;  %1435 = vmax.xlane.f32.xlu0 %v1434_v20  ;;  %v9949_v43 = vpop.permute.xlu1 %2194 }
 0x3fc   :  { %v7979_v40 = vpop.f32.mrb[35].mxu1  ;;  %v1437_v41 = vsel %vm558_vm2, %v9909_v39, -inf }
 0x3fd   :  { %1438 = vmax.xlane.f32.xlu1 %v1437_v41 }
 0x3fe   :  { %v9915_v14 = vpop.f32.mrb[36].mxu0 }
 0x3ff   :  { %v7984_v46 = vpop.f32.mrb[37].mxu0  ;;  %1429 = vmax.xlane.f32.xlu0 %v1428_v33  ;;  %v1440_v58 = vsel %vm558_vm2, %v9915_v14, -inf  ;;  %v9953_v22 = vpop.permute.xlu1 %2241 }
 0x400   :  { %v9921_v24 = vpop.f32.mrb[38].mxu0 }
 0x401   :  { %v7985_v50 = vpop.f32.mrb[39].mxu0  ;;  %v9925_v11 = vpop.f32.mrb[36].mxu1  ;;  %1432 = vmax.xlane.f32.xlu1 %v1431_v48  ;;  %v1443_v61 = vsel %vm558_vm2, %v9921_v24, -inf }
 0x402   :  { %v7990_v23 = vpop.f32.mrb[37].mxu1  ;;  %v1446_v52 = vsel %vm558_vm2, %v9925_v11, -inf  ;;  %v1358_v7 = vpop.xlane.xlu0 %1357 }
 0x403   :  { %v9931_v56 = vpop.f32.mrb[38].mxu1  ;;  %1447 = vmax.xlane.f32.xlu0 %v1446_v52  ;;  %v1361_v0 = vpop.xlane.xlu1 %1360  ;;  %v1452_v41 = vsub.f32 %v9805_v35, %v1358_v7 }
 0x404   :  { %v7991_v57 = vpop.f32.mrb[39].mxu1  ;;  %v1449_v17 = vsel %vm558_vm2, %v9931_v56, -inf  ;;  %v1453_v33 = vsub.f32 %v9809_v60, %v1361_v0 }
 0x405   :  { %1450 = vmax.xlane.f32.xlu1 %v1449_v17  ;;  %v1484_v48 = vmul.f32 1.442695, %v1452_v41 }
 0x406   :  { %v1486_v52 = vmul.f32 1.442695, %v1453_v33 }
 0x407   :  { %1441 = vmax.xlane.f32.xlu0 %v1440_v58  ;;  %8668 = vpow2.f32 %v1484_v48 }
 0x408   :  { %8670 = vpow2.f32 %v1486_v52 }
 0x409   :  { %1444 = vmax.xlane.f32.xlu1 %v1443_v61 }
 0x411   :  { %v1364_v54 = vpop.xlane.xlu0 %1363 }
 0x412   :  { %v1454_v50 = vsub.f32 %v9813_v63, %v1364_v54 }
 0x414   :  { %v1488_v57 = vmul.f32 1.442695, %v1454_v50 }
 0x415   :  { %v1367_v16 = vpop.xlane.xlu0 %1366 }
 0x416   :  { %8672 = vpow2.f32 %v1488_v57 }
 0x419   :  { %v1370_v20 = vpop.xlane.xlu0 %1369 }
 0x41a   :  { %2335 = vrot.lane.b32.xlu1 %v9673_v13, %s9264_s17  ;;  %v1455_v13 = vsub.f32 %v9817_v2, %v1367_v16  ;;  %v1456_v17 = vsub.f32 %v9821_v45, %v1370_v20  ;;  %v9966_v20 = vpop.eup %8668 }
 0x41b   :  { %v1373_v40 = vpop.xlane.xlu1 %1372 }
 0x41c   :  { %v1490_v58 = vmul.f32 1.442695, %v1455_v13  ;;  %v1457_v61 = vsub.f32 %v9825_v6, %v1373_v40  ;;  %v1492_v60 = vmul.f32 1.442695, %v1456_v17  ;;  %v9969_v40 = vpop.eup %8670 }
 0x41d   :  { %2288 = vrot.lane.b32.xlu0 %v9675_v15, %s9264_s17  ;;  %v1382_v46 = vpop.xlane.xlu0 %1381 }
 0x41e   :  { %v1460_v7 = vsub.f32 %v9829_v9, %v1382_v46  ;;  %8674 = vpow2.f32 %v1490_v58  ;;  %v1494_v63 = vmul.f32 1.442695, %v1457_v61 }
 0x41f   :  { %v1385_v23 = vpop.xlane.xlu1 %1384  ;;  %8676 = vpow2.f32 %v1492_v60 }
 0x420   :  { %v1461_v54 = vsub.f32 %v9833_v18, %v1385_v23  ;;  %v1500_v2 = vmul.f32 1.442695, %v1460_v7  ;;  %8678 = vpow2.f32 %v1494_v63  ;;  %v1548_v18 = vsel %vm558_vm2, %v9966_v20, 0.0  ;;  %v9974_v48 = vpop.eup %8672 }
 0x421   :  { %v1376_v15 = vpop.xlane.xlu0 %1375  ;;  %v1554_v17 = vsel %vm558_vm2, %v9974_v48, 0.0 }
 0x422   :  { %v1458_v16 = vsub.f32 %v9837_v55, %v1376_v15  ;;  %v1502_v41 = vmul.f32 1.442695, %v1461_v54  ;;  %8680 = vpow2.f32 %v1500_v2 }
 0x423   :  { %v1379_v35 = vpop.xlane.xlu1 %1378 }
 0x424   :  { %v1459_v6 = vsub.f32 %v9841_v27, %v1379_v35  ;;  %v1496_v9 = vmul.f32 1.442695, %v1458_v16  ;;  %8682 = vpow2.f32 %v1502_v41  ;;  %v1551_v27 = vsel %vm558_vm2, %v9969_v40, 0.0 }
 0x425   :  { %v1394_v0 = vpop.xlane.xlu0 %1393 }
 0x426   :  { %v1464_v33 = vsub.f32 %v9845_v38, %v1394_v0  ;;  %v1498_v55 = vmul.f32 1.442695, %v1459_v6  ;;  %8684 = vpow2.f32 %v1496_v9 }
 0x427   :  { %v1397_v45 = vpop.xlane.xlu1 %1396 }
 0x428   :  { %v1465_v50 = vsub.f32 %v9849_v1, %v1397_v45  ;;  %v9979_v52 = vpop.eup %8674  ;;  %v1508_v13 = vmul.f32 1.442695, %v1464_v33  ;;  %8686 = vpow2.f32 %v1498_v55 }
 0x429   :  { %v1388_v46 = vpop.xlane.xlu0 %1387  ;;  %v9984_v15 = vpop.eup %8676  ;;  %v1557_v35 = vsel %vm558_vm2, %v9979_v52, 0.0 }
 0x42a   :  { %v1462_v38 = vsub.f32 %v9853_v12, %v1388_v46  ;;  %v1510_v1 = vmul.f32 1.442695, %v1465_v50  ;;  %v9989_v60 = vpop.eup %8678  ;;  %8688 = vpow2.f32 %v1508_v13  ;;  %v1560_v63 = vsel %vm558_vm2, %v9984_v15, 0.0 }
 0x42b   :  { %v1391_v23 = vpop.xlane.xlu1 %1390  ;;  %v1563_v2 = vsel %vm558_vm2, %v9989_v60, 0.0 }
 0x42c   :  { %v1463_v58 = vsub.f32 %v9857_v36, %v1391_v23  ;;  %v1504_v12 = vmul.f32 1.442695, %v1462_v38  ;;  %v9994_v54 = vpop.eup %8680  ;;  %8690 = vpow2.f32 %v1510_v1 }
 0x42e   :  { %v1506_v0 = vmul.f32 1.442695, %v1463_v58  ;;  %v9999_v16 = vpop.eup %8682  ;;  %8692 = vpow2.f32 %v1504_v12 }
 0x430   :  { %v10003_v41 = vpop.eup %8684  ;;  %8694 = vpow2.f32 %v1506_v0 }
 0x431   :  { %v1400_v57 = vpop.xlane.xlu0 %1399  ;;  %v1566_v33 = vsel %vm558_vm2, %v10003_v41, 0.0 }
 0x432   :  { %v1466_v7 = vsub.f32 %v9861_v42, %v1400_v57  ;;  %v1572_v42 = vsel %vm558_vm2, %v9994_v54, 0.0  ;;  %v10007_v9 = vpop.eup %8686 }
 0x433   :  { %v1403_v61 = vpop.xlane.xlu1 %1402 }
 0x434   :  { %v1467_v36 = vsub.f32 %v9865_v49, %v1403_v61  ;;  %v1512_v45 = vmul.f32 1.442695, %v1466_v7  ;;  %v1575_v49 = vsel %vm558_vm2, %v9999_v16, 0.0  ;;  %v10011_v46 = vpop.eup %8688 }
 0x435   :  { %v1584_v50 = vsel %vm558_vm2, %v10011_v46, 0.0 }
 0x436   :  { %v1514_v6 = vmul.f32 1.442695, %v1467_v36  ;;  %8696 = vpow2.f32 %v1512_v45  ;;  %v10015_v55 = vpop.eup %8690 }
 0x438   :  { %8698 = vpow2.f32 %v1514_v6  ;;  %v10019_v23 = vpop.eup %8692 }
 0x439   :  { %v1578_v38 = vsel %vm558_vm2, %v10019_v23, 0.0 }
 0x43a   :  { %v10023_v13 = vpop.eup %8694 }
 0x43c   :  { %1549 = vadd.xlane.f32.xlu0 %v1548_v18  ;;  %v1569_v18 = vsel %vm558_vm2, %v10007_v9, 0.0 }
 0x43e   :  { %1552 = vadd.xlane.f32.xlu1 %v1551_v27  ;;  %v1587_v27 = vsel %vm558_vm2, %v10015_v55, 0.0 }
 0x440   :  { %1555 = vadd.xlane.f32.xlu0 %v1554_v17  ;;  %v10027_v57 = vpop.eup %8696  ;;  %v1581_v17 = vsel %vm558_vm2, %v10023_v13, 0.0 }
 0x441   :  { %v1590_v58 = vsel %vm558_vm2, %v10027_v57, 0.0 }
 0x442   :  { %1558 = vadd.xlane.f32.xlu1 %v1557_v35  ;;  %v10031_v1 = vpop.eup %8698 }
 0x443   :  { %v1593_v61 = vsel %vm558_vm2, %v10031_v1, 0.0 }
 0x444   :  { %1561 = vadd.xlane.f32.xlu0 %v1560_v63 }
 0x446   :  { %1564 = vadd.xlane.f32.xlu1 %v1563_v2 }
 0x448   :  { %1573 = vadd.xlane.f32.xlu0 %v1572_v42 }
 0x44a   :  { %1576 = vadd.xlane.f32.xlu1 %v1575_v49 }
 0x44c   :  { %1567 = vadd.xlane.f32.xlu0 %v1566_v33 }
 0x44e   :  { %1570 = vadd.xlane.f32.xlu1 %v1569_v18 }
 0x450   :  { %1585 = vadd.xlane.f32.xlu0 %v1584_v50 }
 0x452   :  { %1588 = vadd.xlane.f32.xlu1 %v1587_v27 }
 0x454   :  { %1579 = vadd.xlane.f32.xlu0 %v1578_v38 }
 0x456   :  { %1582 = vadd.xlane.f32.xlu1 %v1581_v17 }
 0x458   :  { %1591 = vadd.xlane.f32.xlu0 %v1590_v58 }
 0x45a   :  { %1594 = vadd.xlane.f32.xlu1 %v1593_v61 }
 0x473   :  { %v1412_v35 = vpop.xlane.xlu0 %1411 }
 0x474   :  { %v1470_v12 = vsub.f32 %v9869_v51, %v1412_v35 }
 0x475   :  { %v1415_v7 = vpop.xlane.xlu1 %1414 }
 0x476   :  { %v1520_v63 = vmul.f32 1.442695, %v1470_v12  ;;  %v1471_v0 = vsub.f32 %v9875_v28, %v1415_v7 }
 0x477   :  { %v1406_v36 = vpop.xlane.xlu0 %1405 }
 0x478   :  { %8700 = vpow2.f32 %v1520_v63  ;;  %v1468_v2 = vsub.f32 %v9871_v44, %v1406_v36  ;;  %v1522_v45 = vmul.f32 1.442695, %v1471_v0 }
 0x479   :  { %v1409_v42 = vpop.xlane.xlu1 %1408 }
 0x47a   :  { %v1516_v6 = vmul.f32 1.442695, %v1468_v2  ;;  %v1469_v49 = vsub.f32 %v9877_v53, %v1409_v42 }
 0x47c   :  { %8702 = vpow2.f32 %v1516_v6  ;;  %v1518_v33 = vmul.f32 1.442695, %v1469_v49 }
 0x47d   :  { %8704 = vpow2.f32 %v1522_v45 }
 0x47e   :  { %8706 = vpow2.f32 %v1518_v33 }
 0x480   :  { %v1424_v18 = vpop.xlane.xlu0 %1423 }
 0x481   :  { %v1474_v51 = vsub.f32 %v9889_v47, %v1424_v18 }
 0x482   :  { %v10042_v50 = vpop.eup %8700  ;;  %v1427_v27 = vpop.xlane.xlu1 %1426 }
 0x483   :  { %v1528_v28 = vmul.f32 1.442695, %v1474_v51  ;;  %v1475_v38 = vsub.f32 %v9893_v31, %v1427_v27  ;;  %v1602_v44 = vsel %vm558_vm2, %v10042_v50, 0.0 }
 0x484   :  { %1603 = vadd.xlane.f32.xlu0 %v1602_v44  ;;  %v1418_v17 = vpop.xlane.xlu0 %1417 }
 0x485   :  { %8708 = vpow2.f32 %v1528_v28  ;;  %v1472_v53 = vsub.f32 %v9885_v59, %v1418_v17  ;;  %v1530_v61 = vmul.f32 1.442695, %v1475_v38 }
 0x486   :  { %v10048_v58 = vpop.eup %8702  ;;  %v1421_v35 = vpop.xlane.xlu1 %1420 }
 0x487   :  { %v10050_v12 = vpop.eup %8704  ;;  %v1524_v47 = vmul.f32 1.442695, %v1472_v53  ;;  %v1473_v7 = vsub.f32 %v9887_v62, %v1421_v35  ;;  %v1596_v31 = vsel %vm558_vm2, %v10048_v58, 0.0 }
 0x488   :  { %v10055_v63 = vpop.eup %8706  ;;  %1597 = vadd.xlane.f32.xlu1 %v1596_v31  ;;  %v1436_v0 = vpop.xlane.xlu0 %1435  ;;  %v1605_v6 = vsel %vm558_vm2, %v10050_v12, 0.0 }
 0x489   :  { %8710 = vpow2.f32 %v1524_v47  ;;  %v1526_v36 = vmul.f32 1.442695, %v1473_v7  ;;  %v1478_v59 = vsub.f32 %v9905_v26, %v1436_v0  ;;  %v1599_v2 = vsel %vm558_vm2, %v10055_v63, 0.0 }
 0x48a   :  { %8712 = vpow2.f32 %v1530_v61  ;;  %v1439_v45 = vpop.xlane.xlu1 %1438  ;;  %1600 = vadd.xlane.f32.xlu0 %v1599_v2 }
 0x48b   :  { %8714 = vpow2.f32 %v1526_v36  ;;  %v1536_v42 = vmul.f32 1.442695, %v1478_v59  ;;  %v1479_v62 = vsub.f32 %v9909_v39, %v1439_v45 }
 0x48c   :  { %1606 = vadd.xlane.f32.xlu1 %v1605_v6  ;;  %v1430_v49 = vpop.xlane.xlu0 %1429 }
 0x48d   :  { %8716 = vpow2.f32 %v1536_v42  ;;  %v1476_v33 = vsub.f32 %v9897_v8, %v1430_v49  ;;  %v1538_v18 = vmul.f32 1.442695, %v1479_v62 }
 0x48e   :  { %v1433_v26 = vpop.xlane.xlu1 %1432 }
 0x48f   :  { %v10064_v51 = vpop.eup %8708  ;;  %v1532_v27 = vmul.f32 1.442695, %v1476_v33  ;;  %v1477_v28 = vsub.f32 %v9901_v19, %v1433_v26 }
 0x490   :  { %v1448_v38 = vpop.xlane.xlu0 %1447  ;;  %v1614_v44 = vsel %vm558_vm2, %v10064_v51, 0.0 }
 0x491   :  { %8718 = vpow2.f32 %v1532_v27  ;;  %v1534_v39 = vmul.f32 1.442695, %v1477_v28  ;;  %v1482_v17 = vsub.f32 %v9925_v11, %v1448_v38  ;;  %1615 = vadd.xlane.f32.xlu0 %v1614_v44 }
 0x492   :  { %8720 = vpow2.f32 %v1538_v18  ;;  %v1451_v53 = vpop.xlane.xlu1 %1450 }
 0x493   :  { %v10070_v61 = vpop.eup %8710  ;;  %8722 = vpow2.f32 %v1534_v39  ;;  %v1544_v8 = vmul.f32 1.442695, %v1482_v17  ;;  %v1483_v35 = vsub.f32 %v9931_v56, %v1451_v53 }
 0x494   :  { %v10073_v47 = vpop.eup %8712  ;;  %v1442_v19 = vpop.xlane.xlu0 %1441  ;;  %v1608_v7 = vsel %vm558_vm2, %v10070_v61, 0.0 }
 0x495   :  { %v10077_v31 = vpop.eup %8714  ;;  %8724 = vpow2.f32 %v1544_v8  ;;  %v1480_v11 = vsub.f32 %v9915_v14, %v1442_v19  ;;  %1609 = vadd.xlane.f32.xlu1 %v1608_v7  ;;  %v1546_v0 = vmul.f32 1.442695, %v1483_v35  ;;  %v1617_v42 = vsel %vm558_vm2, %v10073_v47, 0.0 }
 0x496   :  { %v1445_v36 = vpop.xlane.xlu1 %1444  ;;  %v1611_v59 = vsel %vm558_vm2, %v10077_v31, 0.0 }
 0x497   :  { %v10082_v2 = vpop.eup %8716  ;;  %v1540_v56 = vmul.f32 1.442695, %v1480_v11  ;;  %v1481_v45 = vsub.f32 %v9921_v24, %v1445_v36  ;;  %1612 = vadd.xlane.f32.xlu0 %v1611_v59 }
 0x498   :  { %v1626_v14 = vsel %vm558_vm2, %v10082_v2, 0.0  ;;  %v10121_v35 = vpop.permute.xlu0 %2288 }
 0x499   :  { %8726 = vpow2.f32 %v1540_v56  ;;  %v1542_v62 = vmul.f32 1.442695, %v1481_v45  ;;  %1618 = vadd.xlane.f32.xlu1 %v1617_v42 }
 0x49a   :  { %8728 = vpow2.f32 %v1546_v0  ;;  %v10123_v19 = vpop.permute.xlu1 %2335 }
 0x49b   :  { %v10089_v6 = vpop.eup %8718  ;;  %8730 = vpow2.f32 %v1542_v62  ;;  %1627 = vadd.xlane.f32.xlu0 %v1626_v14 }
 0x49c   :  { %v10091_v49 = vpop.eup %8720  ;;  %v1620_v24 = vsel %vm558_vm2, %v10089_v6, 0.0 }
 0x49d   :  { %v10095_v33 = vpop.eup %8722  ;;  %1621 = vadd.xlane.f32.xlu1 %v1620_v24  ;;  %v1629_v27 = vsel %vm558_vm2, %v10091_v49, 0.0 }
 0x49e   :  { %v1623_v18 = vsel %vm558_vm2, %v10095_v33, 0.0 }
 0x49f   :  { %v10099_v26 = vpop.eup %8724  ;;  %1624 = vadd.xlane.f32.xlu0 %v1623_v18 }
 0x4a0   :  { %v1638_v28 = vsel %vm558_vm2, %v10099_v26, 0.0 }
 0x4a1   :  { %1630 = vadd.xlane.f32.xlu1 %v1629_v27 }
 0x4a3   :  { %v10105_v38 = vpop.eup %8726  ;;  %1639 = vadd.xlane.f32.xlu0 %v1638_v28 }
 0x4a4   :  { %v10107_v44 = vpop.eup %8728  ;;  %v1632_v39 = vsel %vm558_vm2, %v10105_v38, 0.0 }
 0x4a5   :  { %v10111_v17 = vpop.eup %8730  ;;  %1633 = vadd.xlane.f32.xlu1 %v1632_v39  ;;  %v1641_v8 = vsel %vm558_vm2, %v10107_v44, 0.0 }
 0x4a6   :  { %v1635_v53 = vsel %vm558_vm2, %v10111_v17, 0.0 }
 0x4a7   :  { %1636 = vadd.xlane.f32.xlu0 %v1635_v53 }
 0x4a9   :  { %1642 = vadd.xlane.f32.xlu1 %v1641_v8 }
 0x4ba   :  { %2429 = vrot.lane.b32.xlu1 %v9683_v32, %s9264_s17 }
 0x4bd   :  { %2382 = vrot.lane.b32.xlu0 %v9685_v34, %s9264_s17 }
 0x4c9   :  { %v1550_v7 = vpop.xlane.xlu0 %1549 }
 0x4ca   :  { %8732 = vrcp.f32 %v1550_v7 }
 0x4cb   :  { %v1553_v11 = vpop.xlane.xlu1 %1552 }
 0x4cc   :  { %8734 = vrcp.f32 %v1553_v11 }
 0x4cd   :  { %v1556_v0 = vpop.xlane.xlu0 %1555 }
 0x4ce   :  { %8736 = vrcp.f32 %v1556_v0 }
 0x4cf   :  { %v1559_v36 = vpop.xlane.xlu1 %1558 }
 0x4d0   :  { %8738 = vrcp.f32 %v1559_v36 }
 0x4d1   :  { %v1562_v59 = vpop.xlane.xlu0 %1561 }
 0x4d2   :  { %8740 = vrcp.f32 %v1562_v59 }
 0x4d3   :  { %v1565_v56 = vpop.xlane.xlu1 %1564 }
 0x4d4   :  { %v8733_v45 = vpop.eup %8732  ;;  %8742 = vrcp.f32 %v1565_v56 }
 0x4d5   :  { %v1574_v32 = vpop.xlane.xlu0 %1573  ;;  %v1676_v34 = vmul.f32 %v8733_v45, %v9966_v20 }
 0x4d6   :  { %v8735_v42 = vpop.eup %8734 }
 0x4d7   :  { %v1677_v62 = vmul.f32 %v8735_v42, %v9969_v40  ;;  %v1577_v14 = vpop.xlane.xlu1 %1576 }
 0x4d8   :  { %v8737_v24 = vpop.eup %8736  ;;  %8744 = vrcp.f32 %v1577_v14 }
 0x4d9   :  { %8746 = vrcp.f32 %v1574_v32  ;;  %v1568_v18 = vpop.xlane.xlu0 %1567  ;;  %v1708_v27 = vpack.c.bf16 %v1677_v62, %v1676_v34  ;;  %v1678_v39 = vmul.f32 %v8737_v24, %v9974_v48 }
 0x4da   :  { %v8739_v28 = vpop.eup %8738  ;;  %8748 = vrcp.f32 %v1568_v18 }
 0x4db   :  { %v1679_v53 = vmul.f32 %v8739_v28, %v9979_v52  ;;  %v1571_v8 = vpop.xlane.xlu1 %1570  ;;  %7995 = vmatmul.mubr.msk.bf16.vlgmr.msra.gmra.mrb[40].mxu0 %vm558_vm2, %v1708_v27 }
 0x4dc   :  { %v8741_v7 = vpop.eup %8740  ;;  %8750 = vrcp.f32 %v1571_v8  ;;  %8005 = vmatpush3.bf16.msra.mxu0 %v9913_v10  ;;  %8006 = vmatprep.mubr.msk.bf16.mxu0 %vm9261_vm1, %v12471_v4 }
 0x4dd   :  { %v1586_v20 = vpop.xlane.xlu0 %1585  ;;  %v1709_v40 = vpack.c.bf16 %v1679_v53, %v1678_v39  ;;  %8016 = vmatprep.subr.bf16.mxu0 %v12471_v4  ;;  %v1680_v0 = vmul.f32 %v8741_v7, %v9984_v15 }
 0x4de   :  { %v8743_v11 = vpop.eup %8742 }
 0x4df   :  { %v1681_v48 = vmul.f32 %v8743_v11, %v9989_v60  ;;  %v1589_v52 = vpop.xlane.xlu1 %1588  ;;  %8001 = vmatmul.mubr.msk.bf16.vlgmr.msra.gmra.mrb[40].mxu1 %vm558_vm2, %v1709_v40 }
 0x4e0   :  { %8752 = vrcp.f32 %v1589_v52  ;;  %8011 = vmatpush3.bf16.msra.mxu1 %v9919_v30  ;;  %8012 = vmatprep.mubr.msk.bf16.mxu1 %vm9261_vm1, %v12471_v4 }
 0x4e1   :  { %8754 = vrcp.f32 %v1586_v20  ;;  %v1580_v10 = vpop.xlane.xlu0 %1579  ;;  %v1710_v36 = vpack.c.bf16 %v1681_v48, %v1680_v0  ;;  %8022 = vmatprep.subr.bf16.mxu1 %v12471_v4 }
 0x4e2   :  { %v8745_v59 = vpop.eup %8744  ;;  %8756 = vrcp.f32 %v1580_v10 }
 0x4e3   :  { %v8747_v56 = vpop.eup %8746  ;;  %v1583_v15 = vpop.xlane.xlu1 %1582  ;;  %8007 = vmatmul.mubr.msk.bf16.vlgmr.msra.gmra.mrb[44].mxu0 %vm558_vm2, %v1710_v36  ;;  %v1685_v30 = vmul.f32 %v8745_v59, %v9999_v16 }
 0x4e4   :  { %v8749_v60 = vpop.eup %8748  ;;  %8758 = vrcp.f32 %v1583_v15  ;;  %8017 = vmatpush3.bf16.msra.mxu0 %v9929_v29  ;;  %8018 = vmatprep.mubr.msk.bf16.mxu0 %vm9261_vm1, %v12471_v4  ;;  %v1684_v32 = vmul.f32 %v8747_v56, %v9994_v54 }
 0x4e5   :  { %8028 = vmatprep.subr.bf16.mxu0 %v12471_v4  ;;  %v1682_v42 = vmul.f32 %v8749_v60, %v10003_v41  ;;  %v1592_v62 = vpop.xlane.xlu0 %1591 }
 0x4e6   :  { %v8751_v45 = vpop.eup %8750  ;;  %v1712_v18 = vpack.c.bf16 %v1685_v30, %v1684_v32 }
 0x4e7   :  { %v1683_v34 = vmul.f32 %v8751_v45, %v10007_v9  ;;  %v1595_v14 = vpop.xlane.xlu1 %1594 }
 0x4e8   :  { %8760 = vrcp.f32 %v1595_v14 }
 0x4e9   :  { %v1711_v24 = vpack.c.bf16 %v1683_v34, %v1682_v42  ;;  %8762 = vrcp.f32 %v1592_v62 }
 0x4ea   :  { %v8753_v29 = vpop.eup %8752 }
 0x4eb   :  { %v8755_v27 = vpop.eup %8754  ;;  %8013 = vmatmul.mubr.msk.bf16.vlgmr.msra.gmra.mrb[44].mxu1 %vm558_vm2, %v1711_v24  ;;  %8019 = vmatmul.mubr.msk.bf16.vlgmr.msra.gmra.mrb[48].mxu0 %vm558_vm2, %v1712_v18  ;;  %v1689_v54 = vmul.f32 %v8753_v29, %v10015_v55 }
 0x4ec   :  { %v8757_v16 = vpop.eup %8756  ;;  %8023 = vmatpush3.bf16.msra.mxu1 %v9935_v37  ;;  %8029 = vmatpush3.bf16.msra.mxu0 %v9941_v21  ;;  %v1688_v9 = vmul.f32 %v8755_v27, %v10011_v46 }
 0x4ed   :  { %8024 = vmatprep.mubr.msk.bf16.mxu1 %vm9261_vm1, %v12471_v4  ;;  %8030 = vmatprep.mubr.msk.bf16.mxu0 %vm9261_vm1, %v12471_v4  ;;  %v1686_v28 = vmul.f32 %v8757_v16, %v10019_v23 }
 0x4ee   :  { %v8759_v41 = vpop.eup %8758  ;;  %8034 = vmatprep.subr.bf16.mxu1 %v12471_v4  ;;  %8040 = vmatprep.subr.bf16.mxu0 %v12471_v4  ;;  %v1714_v39 = vpack.c.bf16 %v1689_v54, %v1688_v9 }
 0x4ef   :  { %v1687_v37 = vmul.f32 %v8759_v41, %v10023_v13 }
 0x4f1   :  { %v1713_v21 = vpack.c.bf16 %v1687_v37, %v1686_v28 }
 0x4f2   :  { %v8761_v55 = vpop.eup %8760 }
 0x4f3   :  { %8025 = vmatmul.mubr.msk.bf16.vlgmr.msra.gmra.mrb[48].mxu1 %vm558_vm2, %v1713_v21  ;;  %8031 = vmatmul.mubr.msk.bf16.vlgmr.msra.gmra.mrb[52].mxu0 %vm558_vm2, %v1714_v39  ;;  %v8763_v53 = vpop.eup %8762  ;;  %v1691_v8 = vmul.f32 %v8761_v55, %v10031_v1 }
 0x4f4   :  { %8035 = vmatpush3.bf16.msra.mxu1 %v9943_v3  ;;  %8041 = vmatpush3.bf16.msra.mxu0 %v9945_v25  ;;  %v1690_v46 = vmul.f32 %v8763_v53, %v10027_v57 }
 0x4f5   :  { %8036 = vmatprep.mubr.msk.bf16.mxu1 %vm9261_vm1, %v12471_v4  ;;  %8046 = vmatprep.subr.bf16.mxu1 %v12471_v4 }
 0x4f6   :  { %8042 = vmatprep.mubr.msk.bf16.mxu0 %vm9261_vm1, %v12471_v4  ;;  %8052 = vmatprep.subr.bf16.mxu0 %v12471_v4  ;;  %v1715_v23 = vpack.c.bf16 %v1691_v8, %v1690_v46 }
 0x4fb   :  { %8037 = vmatmul.mubr.msk.bf16.vlgmr.msra.gmra.mrb[52].mxu1 %vm558_vm2, %v1715_v23  ;;  %v8616_v23 = vld [vmem:[%s12460_s5] sm:$0xff]  }
 0x4fc   :  { %8047 = vmatpush3.bf16.msra.mxu1 %v9947_v5  ;;  %8048 = vmatprep.mubr.msk.bf16.mxu1 %vm9261_vm1, %v12471_v4 }
 0x4fd   :  { %8058 = vmatprep.subr.bf16.mxu1 %v12471_v4 }
 0x511   :  { %v1604_v3 = vpop.xlane.xlu0 %1603 }
 0x515   :  { %v1598_v25 = vpop.xlane.xlu1 %1597 }
 0x516   :  { %8764 = vrcp.f32 %v1598_v25 }
 0x517   :  { %8766 = vrcp.f32 %v1604_v3  ;;  %v1601_v13 = vpop.xlane.xlu0 %1600 }
 0x518   :  { %8768 = vrcp.f32 %v1601_v13 }
 0x519   :  { %v1607_v1 = vpop.xlane.xlu1 %1606 }
 0x51a   :  { %8770 = vrcp.f32 %v1607_v1 }
 0x51e   :  { %v1616_v57 = vpop.xlane.xlu0 %1615 }
 0x520   :  { %v8765_v7 = vpop.eup %8764 }
 0x521   :  { %v8767_v20 = vpop.eup %8766  ;;  %v1692_v5 = vmul.f32 %v8765_v7, %v10048_v58 }
 0x522   :  { %v8769_v40 = vpop.eup %8768  ;;  %v1610_v11 = vpop.xlane.xlu1 %1609  ;;  %v1694_v10 = vmul.f32 %v8767_v20, %v10042_v50 }
 0x523   :  { %v1693_v0 = vmul.f32 %v8769_v40, %v10055_v63  ;;  %8772 = vrcp.f32 %v1610_v11 }
 0x524   :  { %v8771_v48 = vpop.eup %8770  ;;  %8774 = vrcp.f32 %v1616_v57  ;;  %v1613_v52 = vpop.xlane.xlu0 %1612 }
 0x525   :  { %v1695_v36 = vmul.f32 %v8771_v48, %v10050_v12  ;;  %8776 = vrcp.f32 %v1613_v52  ;;  %v1716_v59 = vpack.c.bf16 %v1693_v0, %v1692_v5 }
 0x526   :  { %v1619_v56 = vpop.xlane.xlu1 %1618 }
 0x527   :  { %8778 = vrcp.f32 %v1619_v56  ;;  %8043 = vmatmul.mubr.msk.bf16.vlgmr.msra.gmra.mrb[56].mxu0 %vm558_vm2, %v1716_v59  ;;  %v1717_v15 = vpack.c.bf16 %v1695_v36, %v1694_v10 }
 0x528   :  { %8053 = vmatpush3.bf16.msra.mxu0 %v9949_v43  ;;  %v1628_v58 = vpop.xlane.xlu0 %1627  ;;  %8054 = vmatprep.mubr.msk.bf16.mxu0 %vm9261_vm1, %v12471_v4 }
 0x529   :  { %8049 = vmatmul.mubr.msk.bf16.vlgmr.msra.gmra.mrb[56].mxu1 %vm558_vm2, %v1717_v15  ;;  %8064 = vmatprep.subr.bf16.mxu0 %v12471_v4 }
 0x52a   :  { %8059 = vmatpush3.bf16.msra.mxu1 %v9953_v22  ;;  %v1622_v50 = vpop.xlane.xlu1 %1621  ;;  %8060 = vmatprep.mubr.msk.bf16.mxu1 %vm9261_vm1, %v12471_v4 }
 0x52b   :  { %8780 = vrcp.f32 %v1622_v50  ;;  %8070 = vmatprep.subr.bf16.mxu1 %v12471_v4 }
 0x52c   :  { %8782 = vrcp.f32 %v1628_v58  ;;  %v1625_v12 = vpop.xlane.xlu0 %1624 }
 0x52d   :  { %v8773_v43 = vpop.eup %8772  ;;  %8784 = vrcp.f32 %v1625_v12 }
 0x52e   :  { %v8775_v63 = vpop.eup %8774  ;;  %v1631_v60 = vpop.xlane.xlu1 %1630  ;;  %v1696_v45 = vmul.f32 %v8773_v43, %v10070_v61 }
 0x52f   :  { %v8777_v30 = vpop.eup %8776  ;;  %8786 = vrcp.f32 %v1631_v60  ;;  %v1698_v34 = vmul.f32 %v8775_v63, %v10064_v51 }
 0x530   :  { %v1697_v32 = vmul.f32 %v8777_v30, %v10077_v31  ;;  %v1640_v22 = vpop.xlane.xlu0 %1639 }
 0x531   :  { %v8779_v42 = vpop.eup %8778 }
 0x532   :  { %v1699_v62 = vmul.f32 %v8779_v42, %v10073_v47  ;;  %v1634_v14 = vpop.xlane.xlu1 %1633  ;;  %v1718_v24 = vpack.c.bf16 %v1697_v32, %v1696_v45  ;;  %v8617_v42 = vld [vmem:[%s12460_s5 + $0x8] sm:$0xff]  }
 0x533   :  { %8788 = vrcp.f32 %v1634_v14 }
 0x534   :  { %8790 = vrcp.f32 %v1640_v22  ;;  %8055 = vmatmul.mubr.msk.bf16.vlgmr.msra.gmra.mrb[60].mxu0 %vm558_vm2, %v1718_v24  ;;  %v1637_v18 = vpop.xlane.xlu0 %1636  ;;  %v1719_v29 = vpack.c.bf16 %v1699_v62, %v1698_v34 }
 0x535   :  { %v8781_v27 = vpop.eup %8780  ;;  %8065 = vmatpush3.bf16.msra.mxu0 %v10121_v35  ;;  %8792 = vrcp.f32 %v1637_v18  ;;  %8066 = vmatprep.mubr.msk.bf16.mxu0 %vm9261_vm1, %v12471_v4 }
 0x536   :  { %v8783_v61 = vpop.eup %8782  ;;  %v1643_v31 = vpop.xlane.xlu1 %1642  ;;  %8061 = vmatmul.mubr.msk.bf16.vlgmr.msra.gmra.mrb[60].mxu1 %vm558_vm2, %v1719_v29  ;;  %8076 = vmatprep.subr.bf16.mxu0 %v12471_v4  ;;  %v1700_v47 = vmul.f32 %v8781_v27, %v10089_v6 }
 0x537   :  { %v8785_v51 = vpop.eup %8784  ;;  %8794 = vrcp.f32 %v1643_v31  ;;  %8071 = vmatpush3.bf16.msra.mxu1 %v10123_v19  ;;  %8072 = vmatprep.mubr.msk.bf16.mxu1 %vm9261_vm1, %v12471_v4  ;;  %v1702_v54 = vmul.f32 %v8783_v61, %v10082_v2 }
 0x538   :  { %v1701_v35 = vmul.f32 %v8785_v51, %v10095_v33  ;;  %8082 = vmatprep.subr.bf16.mxu1 %v12471_v4  ;;  %v2383_v28 = vpop.permute.xlu0 %2382 }
 0x539   :  { %v8787_v16 = vpop.eup %8786 }
 0x53a   :  { %v1703_v41 = vmul.f32 %v8787_v16, %v10091_v49  ;;  %v1720_v9 = vpack.c.bf16 %v1701_v35, %v1700_v47  ;;  %v2430_v21 = vpop.permute.xlu1 %2429 }
 0x53c   :  { %8067 = vmatmul.mubr.msk.bf16.vlgmr.msra.gmra.mrb[64].mxu0 %vm558_vm2, %v1720_v9  ;;  %v1721_v37 = vpack.c.bf16 %v1703_v41, %v1702_v54 }
 0x53d   :  { %v8789_v19 = vpop.eup %8788  ;;  %8077 = vmatpush3.bf16.msra.mxu0 %v2383_v28  ;;  %8078 = vmatprep.mubr.msk.bf16.mxu0 %vm9261_vm1, %v12471_v4 }
 0x53e   :  { %v8791_v6 = vpop.eup %8790  ;;  %8073 = vmatmul.mubr.msk.bf16.vlgmr.msra.gmra.mrb[64].mxu1 %vm558_vm2, %v1721_v37  ;;  %v1704_v2 = vmul.f32 %v8789_v19, %v10105_v38  ;;  %8088 = vmatprep.subr.bf16.mxu0 %v8616_v23 }
 0x53f   :  { %v8793_v33 = vpop.eup %8792  ;;  %8083 = vmatpush3.bf16.msra.mxu1 %v2430_v21  ;;  %8084 = vmatprep.mubr.msk.bf16.mxu1 %vm9261_vm1, %v12471_v4  ;;  %v1706_v55 = vmul.f32 %v8791_v6, %v10099_v26 }
 0x540   :  { %v1705_v49 = vmul.f32 %v8793_v33, %v10111_v17 }
 0x541   :  { %v8795_v39 = vpop.eup %8794 }
 0x542   :  { %v1707_v53 = vmul.f32 %v8795_v39, %v10107_v44  ;;  %v1722_v8 = vpack.c.bf16 %v1705_v49, %v1704_v2 }
 0x544   :  { %8079 = vmatmul.mubr.msk.bf16.vlgmr.msra.gmra.mrb[68].mxu0 %vm558_vm2, %v1722_v8  ;;  %v1723_v46 = vpack.c.bf16 %v1707_v53, %v1706_v55 }
 0x545   :  { %8089 = vmatpush3.bf16.msra.mxu0 %v8616_v23 }
 0x546   :  { %8085 = vmatmul.mubr.msk.bf16.vlgmr.msra.gmra.mrb[68].mxu1 %vm558_vm2, %v1723_v46  ;;  %8090 = vmatprep.subr.bf16.mxu0 %v8617_v42 }
 0x549   :  { %8091 = vmatpush3.bf16.msra.mxu0 %v8617_v42 }
 0x5ae   :  { %v10228_v38 = vpop.f32.mrb[40].mxu0 }
 0x5af   :  { %v7996_v17 = vpop.f32.mrb[41].mxu0 }
 0x5b0   :  { %v10230_v3 = vpop.f32.mrb[42].mxu0 }
 0x5b1   :  { %v7997_v26 = vpop.f32.mrb[43].mxu0 }
 0x5b2   :  { %v10232_v25 = vpop.f32.mrb[40].mxu1 }
 0x5b3   :  { %v8002_v44 = vpop.f32.mrb[41].mxu1 }
 0x5b4   :  { %v10234_v13 = vpop.f32.mrb[42].mxu1 }
 0x5b5   :  { %v8003_v1 = vpop.f32.mrb[43].mxu1 }
 0x5b6   :  { %v10236_v7 = vpop.f32.mrb[44].mxu0 }
 0x5b7   :  { %v8008_v57 = vpop.f32.mrb[45].mxu0 }
 0x5b8   :  { %v10238_v20 = vpop.f32.mrb[46].mxu0 }
 0x5b9   :  { %v8009_v40 = vpop.f32.mrb[47].mxu0 }
 0x5be   :  { %v10240_v11 = vpop.f32.mrb[44].mxu1  ;;  %v10242_v5 = vpop.f32.mrb[48].mxu0 }
 0x5bf   :  { %v8014_v0 = vpop.f32.mrb[45].mxu1  ;;  %v8020_v48 = vpop.f32.mrb[49].mxu0 }
 0x5c0   :  { %v10244_v52 = vpop.f32.mrb[46].mxu1  ;;  %v10246_v10 = vpop.f32.mrb[50].mxu0 }
 0x5c1   :  { %v8015_v36 = vpop.f32.mrb[47].mxu1  ;;  %v8021_v59 = vpop.f32.mrb[51].mxu0 }
 0x5c6   :  { %v10248_v56 = vpop.f32.mrb[48].mxu1  ;;  %v10250_v15 = vpop.f32.mrb[52].mxu0 }
 0x5c7   :  { %v8026_v58 = vpop.f32.mrb[49].mxu1  ;;  %v8032_v50 = vpop.f32.mrb[53].mxu0 }
 0x5c8   :  { %v10252_v12 = vpop.f32.mrb[50].mxu1  ;;  %v10254_v43 = vpop.f32.mrb[54].mxu0 }
 0x5c9   :  { %v8027_v63 = vpop.f32.mrb[51].mxu1  ;;  %v8033_v60 = vpop.f32.mrb[55].mxu0 }
 0x5ce   :  { %v10256_v30 = vpop.f32.mrb[52].mxu1 }
 0x5cf   :  { %v8038_v45 = vpop.f32.mrb[53].mxu1 }
 0x5d0   :  { %v10258_v32 = vpop.f32.mrb[54].mxu1 }
 0x5d1   :  { %v8039_v22 = vpop.f32.mrb[55].mxu1 }
 0x5fa   :  { %v2140_v34 = vpop.f32.mrb[56].mxu0 }
 0x5fb   :  { %v8044_v62 = vpop.f32.mrb[57].mxu0 }
 0x5fc   :  { %v2143_v14 = vpop.f32.mrb[58].mxu0  ;;  %v2187_v24 = vpop.f32.mrb[56].mxu1 }
 0x5fd   :  { %v8494_v18 = vpack.i.bf16 %v2143_v14, %v2140_v34  ;;  %v8045_v29 = vpop.f32.mrb[59].mxu0  ;;  %v8050_v27 = vpop.f32.mrb[57].mxu1 }
 0x5fe   :  { %v2190_v61 = vpop.f32.mrb[58].mxu1 }
 0x5ff   :  { %v8499_v31 = vpack.i.bf16 %v2190_v61, %v2187_v24  ;;  %v8051_v51 = vpop.f32.mrb[59].mxu1  ;;  %8495 = vrot.lane.b32.xlu0 %v8494_v18, %s9265_s22 }
 0x601   :  { %8500 = vrot.lane.b32.xlu1 %v8499_v31, %s9265_s22 }
 0x607   :  { %v2234_v47 = vpop.f32.mrb[60].mxu0 }
 0x608   :  { %v8056_v35 = vpop.f32.mrb[61].mxu0 }
 0x609   :  { %v2237_v16 = vpop.f32.mrb[62].mxu0  ;;  %v2281_v54 = vpop.f32.mrb[60].mxu1 }
 0x60a   :  { %v8504_v41 = vpack.i.bf16 %v2237_v16, %v2234_v47  ;;  %v8057_v9 = vpop.f32.mrb[63].mxu0  ;;  %v8062_v28 = vpop.f32.mrb[61].mxu1 }
 0x60b   :  { %v2284_v37 = vpop.f32.mrb[62].mxu1 }
 0x60c   :  { %v8509_v19 = vpack.i.bf16 %v2284_v37, %v2281_v54  ;;  %v8063_v6 = vpop.f32.mrb[63].mxu1  ;;  %8505 = vrot.lane.b32.xlu0 %v8504_v41, %s9265_s22 }
 0x60e   :  { %8510 = vrot.lane.b32.xlu1 %v8509_v19, %s9265_s22 }
 0x60f   :  { %v2328_v21 = vpop.f32.mrb[64].mxu0 }
 0x610   :  { %v8068_v33 = vpop.f32.mrb[65].mxu0 }
 0x611   :  { %v2331_v2 = vpop.f32.mrb[66].mxu0  ;;  %v2375_v49 = vpop.f32.mrb[64].mxu1 }
 0x612   :  { %v8514_v39 = vpack.i.bf16 %v2331_v2, %v2328_v21  ;;  %v8069_v55 = vpop.f32.mrb[67].mxu0  ;;  %v8074_v53 = vpop.f32.mrb[65].mxu1 }
 0x613   :  { %v2378_v8 = vpop.f32.mrb[66].mxu1 }
 0x614   :  { %v8519_v46 = vpack.i.bf16 %v2378_v8, %v2375_v49  ;;  %v8075_v23 = vpop.f32.mrb[67].mxu1  ;;  %8515 = vrot.lane.b32.xlu0 %v8514_v39, %s9265_s22 }
 0x616   :  { %8520 = vrot.lane.b32.xlu1 %v8519_v46, %s9265_s22 }
 0x617   :  { %v2422_v17 = vpop.f32.mrb[68].mxu0 }
 0x618   :  { %v8080_v26 = vpop.f32.mrb[69].mxu0 }
 0x619   :  { %v2425_v44 = vpop.f32.mrb[70].mxu0  ;;  %v2469_v1 = vpop.f32.mrb[68].mxu1 }
 0x61a   :  { %v8524_v57 = vpack.i.bf16 %v2425_v44, %v2422_v17  ;;  %v8081_v40 = vpop.f32.mrb[71].mxu0  ;;  %v8086_v0 = vpop.f32.mrb[69].mxu1  ;;  %v9244_v17 = vld [vmem:[%s12455_s0 + $0x10] sm:$0xff] }
 0x61b   :  { %v2472_v48 = vpop.f32.mrb[70].mxu1  ;;  %v9246_v40 = vld [vmem:[%s12455_s0 + $0x8] sm:$0xff] }
 0x61c   :  { %v8529_v36 = vpack.i.bf16 %v2472_v48, %v2469_v1  ;;  %v8087_v59 = vpop.f32.mrb[71].mxu1  ;;  %8525 = vrot.lane.b32.xlu0 %v8524_v57, %s9265_s22 }
 0x61e   :  { %8530 = vrot.lane.b32.xlu1 %v8529_v36, %s9265_s22  ;;  %v9247_v36 = vld [vmem:[%s12455_s0 + $0x18] sm:$0xff] }
 0x671   :  { %v8496_v58 = vpop.permute.xlu0 %8495 }
 0x672   :  { %v8498_v50 = vunpack.i.h.bf16 %v8496_v58  ;;  %v8497_v63 = vunpack.i.l.bf16 %v8496_v58 }
 0x673   :  { %v8501_v60 = vpop.permute.xlu1 %8500 }
 0x674   :  { %v2541_v45 = vsel %vm558_vm2, %v10230_v3, %v8498_v50  ;;  %v2540_v22 = vsel %vm558_vm2, %v10228_v38, %v8497_v63  ;;  %v8503_v42 = vunpack.i.h.bf16 %v8501_v60  ;;  %v8502_v34 = vunpack.i.l.bf16 %v8501_v60 }
 0x675   :  { %v2556_v62 = vpack.c.bf16 %v2541_v45, %v2540_v22 }
 0x676   :  { %v2543_v14 = vsel %vm558_vm2, %v10234_v13, %v8503_v42  ;;  %v2542_v24 = vsel %vm558_vm2, %v10232_v25, %v8502_v34 }
 0x677   :  { %v2557_v18 = vpack.c.bf16 %v2543_v14, %v2542_v24  ;;  %8092 = vmatprep.mubr.msk.bf16.mxu0 %vm69_vm0, %v2556_v62  ;;  %v9248_v62 = vld [vmem:[%s12455_s0 + $0x30] sm:$0xff]  ;;  %v9249_v24 = vld [vmem:[%s12455_s0 + $0x20] sm:$0xff] }
 0x679   :  { %8093 = vmatmul.mubr.msk.bf16.vlgmr.msra.gmra.mrb[72].mxu0 %vm69_vm0, %v2557_v18 }
 0x67e   :  { %v8506_v29 = vpop.permute.xlu0 %8505 }
 0x67f   :  { %v8508_v27 = vunpack.i.h.bf16 %v8506_v29  ;;  %v8507_v3 = vunpack.i.l.bf16 %v8506_v29 }
 0x680   :  { %v8511_v61 = vpop.permute.xlu1 %8510 }
 0x681   :  { %v2545_v38 = vsel %vm558_vm2, %v10238_v20, %v8508_v27  ;;  %v2544_v31 = vsel %vm558_vm2, %v10236_v7, %v8507_v3  ;;  %v8513_v51 = vunpack.i.h.bf16 %v8511_v61  ;;  %v8512_v13 = vunpack.i.l.bf16 %v8511_v61  ;;  %v9250_v61 = vld [vmem:[%s12455_s0 + $0x38] sm:$0xff] }
 0x682   :  { %v2558_v47 = vpack.c.bf16 %v2545_v38, %v2544_v31  ;;  %v9251_v31 = vld [vmem:[%s12455_s0 + $0x28] sm:$0xff] }
 0x683   :  { %v2547_v25 = vsel %vm558_vm2, %v10244_v52, %v8513_v51  ;;  %v2546_v35 = vsel %vm558_vm2, %v10240_v11, %v8512_v13 }
 0x684   :  { %8096 = vmatprep.mubr.msk.bf16.mxu0 %vm69_vm0, %v2558_v47  ;;  %v2559_v16 = vpack.c.bf16 %v2547_v25, %v2546_v35 }
 0x686   :  { %v8516_v54 = vpop.permute.xlu0 %8515  ;;  %8097 = vmatmul.mubr.msk.bf16.gmra.mrb[76].mxu0 %vm69_vm0, %v2559_v16 }
 0x687   :  { %v8518_v41 = vunpack.i.h.bf16 %v8516_v54  ;;  %v8517_v20 = vunpack.i.l.bf16 %v8516_v54 }
 0x688   :  { %v8521_v9 = vpop.permute.xlu1 %8520 }
 0x689   :  { %v2549_v7 = vsel %vm558_vm2, %v10246_v10, %v8518_v41  ;;  %v2548_v28 = vsel %vm558_vm2, %v10242_v5, %v8517_v20  ;;  %v8523_v37 = vunpack.i.h.bf16 %v8521_v9  ;;  %v8522_v52 = vunpack.i.l.bf16 %v8521_v9  ;;  %v9252_v20 = vld [vmem:[%s12455_s0 + $0x50] sm:$0xff] }
 0x68a   :  { %v2560_v19 = vpack.c.bf16 %v2549_v7, %v2548_v28  ;;  %v9253_v7 = vld [vmem:[%s12455_s0 + $0x40] sm:$0xff] }
 0x68b   :  { %v2551_v11 = vsel %vm558_vm2, %v10252_v12, %v8523_v37  ;;  %v2550_v6 = vsel %vm558_vm2, %v10248_v56, %v8522_v52 }
 0x68c   :  { %8100 = vmatprep.mubr.msk.bf16.mxu0 %vm69_vm0, %v2560_v19  ;;  %v2561_v21 = vpack.c.bf16 %v2551_v11, %v2550_v6  ;;  %v9254_v6 = vld [vmem:[%s12455_s0 + $0x58] sm:$0xff] }
 0x68e   :  { %v8526_v33 = vpop.permute.xlu0 %8525  ;;  %8101 = vmatmul.mubr.msk.bf16.gmra.mrb[80].mxu0 %vm69_vm0, %v2561_v21 }
 0x68f   :  { %v8528_v2 = vunpack.i.h.bf16 %v8526_v33  ;;  %v8527_v10 = vunpack.i.l.bf16 %v8526_v33  ;;  %v9255_v33 = vld [vmem:[%s12455_s0 + $0x48] sm:$0xff] }
 0x690   :  { %v8531_v49 = vpop.permute.xlu1 %8530 }
 0x691   :  { %v2553_v5 = vsel %vm558_vm2, %v10254_v43, %v8528_v2  ;;  %v2552_v39 = vsel %vm558_vm2, %v10250_v15, %v8527_v10  ;;  %v8533_v55 = vunpack.i.h.bf16 %v8531_v49  ;;  %v8532_v12 = vunpack.i.l.bf16 %v8531_v49  ;;  %v10314_v43 = vld [vmem:[%s12461_s6] ss:$0 sm:$0xff] }
 0x692   :  { %v2562_v53 = vpack.c.bf16 %v2553_v5, %v2552_v39 }
 0x693   :  { %v2555_v56 = vsel %vm558_vm2, %v10258_v32, %v8533_v55  ;;  %v2554_v8 = vsel %vm558_vm2, %v10256_v30, %v8532_v12  ;;  %v9245_v30 = vld [vmem:[%s12455_s0] sm:$0xff] }
 0x694   :  { %8104 = vmatprep.mubr.msk.bf16.mxu0 %vm69_vm0, %v2562_v53  ;;  %v2563_v46 = vpack.c.bf16 %v2555_v56, %v2554_v8  ;;  %v9256_v8 = vld [vmem:[%s12455_s0 + $0x70] sm:$0xff] }
 0x696   :  { %8105 = vmatmul.mubr.msk.bf16.gmra.mrb[84].mxu0 %vm69_vm0, %v2563_v46 }
 0x74c   :  { %v8094_v23 = vpop.f32.mrb[72].mxu0 }
 0x74d   :  { %v2638_v15 = vpop.f32.mrb[73].mxu0  ;;  %v2703_v32 = vadd.f32 %v9244_v17, %v8094_v23  ;;  %v9257_v23 = vld [vmem:[%s12455_s0 + $0x60] sm:$0xff] }
 0x74e   :  { %v2701_v26 = vadd.f32 %v9245_v30, %v2638_v15  ;;  %v8095_v44 = vpop.f32.mrb[74].mxu0 }
 0x74f   :  { %v2641_v1 = vpop.f32.mrb[75].mxu0  ;;  %v10329_v48 = vadd.f32 %v10314_v43, %v2703_v32  ;;  %v2704_v59 = vadd.f32 %v9247_v36, %v8095_v44  ;;  %v9258_v44 = vld [vmem:[%s12455_s0 + $0x78] sm:$0xff] }
 0x750   :  { %v10323_v57 = vadd.f32 %v10314_v43, %v2701_v26  ;;  %v2702_v0 = vadd.f32 %v9246_v40, %v2641_v1  ;;  %v9259_v40 = vld [vmem:[%s12455_s0 + $0x68] sm:$0xff] }
 0x751   :  { %v10342_v60 = vadd.f32 %v10314_v43, %v2704_v59  ;;  %v2750_v45 = vsel %vm69_vm0, %v10329_v48, 0.0 }
 0x752   :  { %v10335_v58 = vadd.f32 %v10314_v43, %v2702_v0  ;;  %v2744_v50 = vsel %vm69_vm0, %v10323_v57, 0.0 }
 0x753   :  { %2745 = vadd.xlane.f32.xlu0 %v2744_v50  ;;  %v2753_v34 = vsel %vm69_vm0, %v10342_v60, 0.0 }
 0x754   :  { %v2747_v63 = vsel %vm69_vm0, %v10335_v58, 0.0 }
 0x755   :  { %2748 = vadd.xlane.f32.xlu1 %v2747_v63 }
 0x757   :  { %2751 = vadd.xlane.f32.xlu0 %v2750_v45 }
 0x759   :  { %v8098_v22 = vpop.f32.mrb[76].mxu0 }
 0x75a   :  { %v2654_v42 = vpop.f32.mrb[77].mxu0  ;;  %v2707_v14 = vadd.f32 %v9248_v62, %v8098_v22 }
 0x75b   :  { %v2705_v18 = vadd.f32 %v9249_v24, %v2654_v42  ;;  %2754 = vadd.xlane.f32.xlu0 %v2753_v34  ;;  %v8099_v29 = vpop.f32.mrb[78].mxu0 }
 0x75c   :  { %v2657_v27 = vpop.f32.mrb[79].mxu0  ;;  %v2708_v38 = vadd.f32 %v9250_v61, %v8099_v29  ;;  %v10364_v13 = vadd.f32 %v10314_v43, %v2707_v14 }
 0x75d   :  { %v10355_v3 = vadd.f32 %v10314_v43, %v2705_v18  ;;  %v2706_v51 = vadd.f32 %v9251_v31, %v2657_v27 }
 0x75e   :  { %v10372_v35 = vadd.f32 %v10314_v43, %v2708_v38  ;;  %v2762_v52 = vsel %vm69_vm0, %v10364_v13, 0.0 }
 0x75f   :  { %v10367_v47 = vadd.f32 %v10314_v43, %v2706_v51  ;;  %v2756_v25 = vsel %vm69_vm0, %v10355_v3, 0.0 }
 0x760   :  { %2757 = vadd.xlane.f32.xlu0 %v2756_v25  ;;  %v2765_v10 = vsel %vm69_vm0, %v10372_v35, 0.0 }
 0x761   :  { %v8102_v16 = vpop.f32.mrb[80].mxu0  ;;  %v2759_v54 = vsel %vm69_vm0, %v10367_v47, 0.0 }
 0x762   :  { %2760 = vadd.xlane.f32.xlu1 %v2759_v54  ;;  %v2670_v41 = vpop.f32.mrb[81].mxu0  ;;  %v2711_v9 = vadd.f32 %v9252_v20, %v8102_v16 }
 0x763   :  { %v2709_v28 = vadd.f32 %v9253_v7, %v2670_v41  ;;  %v8103_v37 = vpop.f32.mrb[82].mxu0 }
 0x764   :  { %2763 = vadd.xlane.f32.xlu0 %v2762_v52  ;;  %v2673_v19 = vpop.f32.mrb[83].mxu0  ;;  %v2712_v21 = vadd.f32 %v9254_v6, %v8103_v37  ;;  %v10396_v49 = vadd.f32 %v10314_v43, %v2711_v9 }
 0x765   :  { %v10385_v11 = vadd.f32 %v10314_v43, %v2709_v28  ;;  %v2710_v2 = vadd.f32 %v9255_v33, %v2673_v19 }
 0x766   :  { %2766 = vadd.xlane.f32.xlu1 %v2765_v10  ;;  %v10404_v55 = vadd.f32 %v10314_v43, %v2712_v21  ;;  %v2774_v32 = vsel %vm69_vm0, %v10396_v49, 0.0 }
 0x767   :  { %v10399_v5 = vadd.f32 %v10314_v43, %v2710_v2  ;;  %v2768_v39 = vsel %vm69_vm0, %v10385_v11, 0.0 }
 0x768   :  { %2769 = vadd.xlane.f32.xlu0 %v2768_v39  ;;  %v2777_v36 = vsel %vm69_vm0, %v10404_v55, 0.0 }
 0x769   :  { %v8106_v12 = vpop.f32.mrb[84].mxu0  ;;  %v2771_v53 = vsel %vm69_vm0, %v10399_v5, 0.0 }
 0x76a   :  { %2772 = vadd.xlane.f32.xlu1 %v2771_v53  ;;  %v2686_v56 = vpop.f32.mrb[85].mxu0  ;;  %v2715_v46 = vadd.f32 %v9256_v8, %v8106_v12 }
 0x76b   :  { %v2713_v15 = vadd.f32 %v9257_v23, %v2686_v56  ;;  %v8107_v17 = vpop.f32.mrb[86].mxu0 }
 0x76c   :  { %2775 = vadd.xlane.f32.xlu0 %v2774_v32  ;;  %v2689_v30 = vpop.f32.mrb[87].mxu0  ;;  %v2716_v1 = vadd.f32 %v9258_v44, %v8107_v17  ;;  %v10428_v59 = vadd.f32 %v10314_v43, %v2715_v46 }
 0x76d   :  { %v10417_v26 = vadd.f32 %v10314_v43, %v2713_v15  ;;  %v2714_v0 = vadd.f32 %v9259_v40, %v2689_v30 }
 0x76e   :  { %2778 = vadd.xlane.f32.xlu1 %v2777_v36  ;;  %v10436_v45 = vadd.f32 %v10314_v43, %v2716_v1  ;;  %v2786_v42 = vsel %vm69_vm0, %v10428_v59, 0.0 }
 0x76f   :  { %v10431_v50 = vadd.f32 %v10314_v43, %v2714_v0  ;;  %v2780_v63 = vsel %vm69_vm0, %v10417_v26, 0.0 }
 0x770   :  { %2781 = vadd.xlane.f32.xlu0 %v2780_v63  ;;  %v2789_v34 = vsel %vm69_vm0, %v10436_v45, 0.0 }
 0x771   :  { %v2783_v22 = vsel %vm69_vm0, %v10431_v50, 0.0 }
 0x772   :  { %2784 = vadd.xlane.f32.xlu1 %v2783_v22 }
 0x774   :  { %2787 = vadd.xlane.f32.xlu0 %v2786_v42 }
 0x776   :  { %2790 = vadd.xlane.f32.xlu1 %v2789_v34 }
 0x7e0   :  { %v2746_v62 = vpop.xlane.xlu0 %2745 }
 0x7e1   :  { %v2792_v14 = vmul.f32 0.03125, %v2746_v62 }
 0x7e2   :  { %v2749_v24 = vpop.xlane.xlu1 %2748 }
 0x7e3   :  { %v10445_v18 = vsub.f32 %v10323_v57, %v2792_v14  ;;  %v2793_v43 = vmul.f32 0.03125, %v2749_v24 }
 0x7e4   :  { %v2752_v29 = vpop.xlane.xlu0 %2751 }
 0x7e5   :  { %v10448_v27 = vsub.f32 %v10335_v58, %v2793_v43  ;;  %v2794_v61 = vmul.f32 0.03125, %v2752_v29  ;;  %v2824_v38 = vmul.f32 %v10445_v18, %v10445_v18 }
 0x7e7   :  { %v10453_v31 = vsub.f32 %v10329_v48, %v2794_v61  ;;  %v2840_v51 = vsel %vm69_vm0, %v2824_v38, 0.0  ;;  %v2825_v25 = vmul.f32 %v10448_v27, %v10448_v27 }
 0x7e8   :  { %v2755_v16 = vpop.xlane.xlu0 %2754  ;;  %2841 = vadd.xlane.f32.xlu0 %v2840_v51 }
 0x7e9   :  { %v2795_v54 = vmul.f32 0.03125, %v2755_v16  ;;  %v2843_v41 = vsel %vm69_vm0, %v2825_v25, 0.0  ;;  %v2826_v20 = vmul.f32 %v10453_v31, %v10453_v31 }
 0x7ea   :  { %2844 = vadd.xlane.f32.xlu1 %v2843_v41 }
 0x7eb   :  { %v10462_v9 = vsub.f32 %v10342_v60, %v2795_v54  ;;  %v2846_v7 = vsel %vm69_vm0, %v2826_v20, 0.0 }
 0x7ec   :  { %2847 = vadd.xlane.f32.xlu0 %v2846_v7 }
 0x7ed   :  { %v2758_v28 = vpop.xlane.xlu0 %2757  ;;  %v2827_v37 = vmul.f32 %v10462_v9, %v10462_v9 }
 0x7ee   :  { %v2796_v52 = vmul.f32 0.03125, %v2758_v28 }
 0x7ef   :  { %v2761_v19 = vpop.xlane.xlu1 %2760  ;;  %v2849_v6 = vsel %vm69_vm0, %v2827_v37, 0.0 }
 0x7f0   :  { %v10469_v21 = vsub.f32 %v10355_v3, %v2796_v52  ;;  %v2797_v33 = vmul.f32 0.03125, %v2761_v19  ;;  %2850 = vadd.xlane.f32.xlu1 %v2849_v6 }
 0x7f1   :  { %v2764_v2 = vpop.xlane.xlu0 %2763 }
 0x7f2   :  { %v10472_v10 = vsub.f32 %v10367_v47, %v2797_v33  ;;  %v2798_v39 = vmul.f32 0.03125, %v2764_v2  ;;  %v2828_v12 = vmul.f32 %v10469_v21, %v10469_v21 }
 0x7f3   :  { %v2767_v53 = vpop.xlane.xlu1 %2766 }
 0x7f4   :  { %v10477_v56 = vsub.f32 %v10364_v13, %v2798_v39  ;;  %v2799_v8 = vmul.f32 0.03125, %v2767_v53  ;;  %v2852_v46 = vsel %vm69_vm0, %v2828_v12, 0.0  ;;  %v2829_v23 = vmul.f32 %v10472_v10, %v10472_v10 }
 0x7f5   :  { %v2770_v15 = vpop.xlane.xlu0 %2769  ;;  %2853 = vadd.xlane.f32.xlu0 %v2852_v46 }
 0x7f6   :  { %v10483_v17 = vsub.f32 %v10372_v35, %v2799_v8  ;;  %v2800_v32 = vmul.f32 0.03125, %v2770_v15  ;;  %v2855_v30 = vsel %vm69_vm0, %v2829_v23, 0.0  ;;  %v2830_v44 = vmul.f32 %v10477_v56, %v10477_v56 }
 0x7f7   :  { %v2773_v1 = vpop.xlane.xlu1 %2772  ;;  %2856 = vadd.xlane.f32.xlu1 %v2855_v30 }
 0x7f8   :  { %v10489_v40 = vsub.f32 %v10385_v11, %v2800_v32  ;;  %v2801_v0 = vmul.f32 0.03125, %v2773_v1  ;;  %v2858_v36 = vsel %vm69_vm0, %v2830_v44, 0.0  ;;  %v2831_v63 = vmul.f32 %v10483_v17, %v10483_v17 }
 0x7f9   :  { %v2776_v22 = vpop.xlane.xlu0 %2775  ;;  %2859 = vadd.xlane.f32.xlu0 %v2858_v36  ;;  %v8618_v36 = vld [vmem:[%s12462_s7] sm:$0xff]  }
 0x7fa   :  { %v10495_v42 = vsub.f32 %v10399_v5, %v2801_v0  ;;  %v2802_v34 = vmul.f32 0.03125, %v2776_v22  ;;  %v2861_v62 = vsel %vm69_vm0, %v2831_v63, 0.0  ;;  %v2832_v14 = vmul.f32 %v10489_v40, %v10489_v40  ;;  %8108 = vmatprep.subr.bf16.mxu1 %v8618_v36  ;;  %v8619_v63 = vld [vmem:[%s12462_s7 + $0x8] sm:$0xff]  }
 0x7fb   :  { %v2779_v24 = vpop.xlane.xlu1 %2778  ;;  %2862 = vadd.xlane.f32.xlu1 %v2861_v62  ;;  %8109 = vmatpush3.bf16.msra.mxu1 %v8618_v36 }
 0x7fc   :  { %v10501_v43 = vsub.f32 %v10396_v49, %v2802_v34  ;;  %v2803_v29 = vmul.f32 0.03125, %v2779_v24  ;;  %v2864_v61 = vsel %vm69_vm0, %v2832_v14, 0.0  ;;  %v2833_v38 = vmul.f32 %v10495_v42, %v10495_v42  ;;  %8110 = vmatprep.subr.bf16.mxu1 %v8619_v63 }
 0x7fd   :  { %2865 = vadd.xlane.f32.xlu0 %v2864_v61  ;;  %v2782_v51 = vpop.xlane.xlu0 %2781 }
 0x7fe   :  { %v10507_v25 = vsub.f32 %v10404_v55, %v2803_v29  ;;  %v2804_v16 = vmul.f32 0.03125, %v2782_v51  ;;  %v2867_v54 = vsel %vm69_vm0, %v2833_v38, 0.0  ;;  %v2834_v41 = vmul.f32 %v10501_v43, %v10501_v43 }
 0x7ff   :  { %2868 = vadd.xlane.f32.xlu1 %v2867_v54  ;;  %v2785_v20 = vpop.xlane.xlu1 %2784  ;;  %8111 = vmatpush3.bf16.msra.mxu1 %v8619_v63 }
 0x800   :  { %v10513_v7 = vsub.f32 %v10417_v26, %v2804_v16  ;;  %v2805_v28 = vmul.f32 0.03125, %v2785_v20  ;;  %v2870_v37 = vsel %vm69_vm0, %v2834_v41, 0.0  ;;  %v2835_v52 = vmul.f32 %v10507_v25, %v10507_v25 }
 0x801   :  { %2871 = vadd.xlane.f32.xlu0 %v2870_v37  ;;  %v2788_v19 = vpop.xlane.xlu0 %2787 }
 0x802   :  { %v10519_v6 = vsub.f32 %v10431_v50, %v2805_v28  ;;  %v2806_v33 = vmul.f32 0.03125, %v2788_v19  ;;  %v2873_v2 = vsel %vm69_vm0, %v2835_v52, 0.0  ;;  %v2836_v39 = vmul.f32 %v10513_v7, %v10513_v7  ;;  %v10549_v19 = vld [vmem:[%s12457_s1 + $0x1] ss:$0 sm:$0xff] }
 0x803   :  { %2874 = vadd.xlane.f32.xlu1 %v2873_v2  ;;  %v2791_v12 = vpop.xlane.xlu1 %2790 }
 0x804   :  { %v10525_v53 = vsub.f32 %v10428_v59, %v2806_v33  ;;  %v2807_v8 = vmul.f32 0.03125, %v2791_v12  ;;  %v2876_v46 = vsel %vm69_vm0, %v2836_v39, 0.0  ;;  %v2837_v23 = vmul.f32 %v10519_v6, %v10519_v6 }
 0x805   :  { %2877 = vadd.xlane.f32.xlu0 %v2876_v46 }
 0x806   :  { %v10531_v15 = vsub.f32 %v10436_v45, %v2807_v8  ;;  %v2879_v32 = vsel %vm69_vm0, %v2837_v23, 0.0  ;;  %v2838_v30 = vmul.f32 %v10525_v53, %v10525_v53 }
 0x807   :  { %2880 = vadd.xlane.f32.xlu1 %v2879_v32 }
 0x808   :  { %v2882_v44 = vsel %vm69_vm0, %v2838_v30, 0.0  ;;  %v2839_v1 = vmul.f32 %v10531_v15, %v10531_v15 }
 0x809   :  { %2883 = vadd.xlane.f32.xlu0 %v2882_v44 }
 0x80a   :  { %v2885_v0 = vsel %vm69_vm0, %v2839_v1, 0.0 }
 0x80b   :  { %2886 = vadd.xlane.f32.xlu1 %v2885_v0 }
 0x875   :  { %v2842_v22 = vpop.xlane.xlu0 %2841 }
 0x876   :  { %v2888_v34 = vmul.f32 0.03125, %v2842_v22 }
 0x877   :  { %v2845_v62 = vpop.xlane.xlu1 %2844 }
 0x878   :  { %v2904_v14 = vadd.f32 1e-05, %v2888_v34  ;;  %v2889_v24 = vmul.f32 0.03125, %v2845_v62 }
 0x879   :  { %v2848_v29 = vpop.xlane.xlu0 %2847 }
 0x87a   :  { %8796 = vrsqrt.f32 %v2904_v14  ;;  %v2905_v61 = vadd.f32 1e-05, %v2889_v24  ;;  %v2890_v38 = vmul.f32 0.03125, %v2848_v29 }
 0x87c   :  { %8798 = vrsqrt.f32 %v2905_v61  ;;  %v2906_v51 = vadd.f32 1e-05, %v2890_v38 }
 0x87d   :  { %v2851_v16 = vpop.xlane.xlu1 %2850 }
 0x87e   :  { %8800 = vrsqrt.f32 %v2906_v51  ;;  %v2891_v54 = vmul.f32 0.03125, %v2851_v16 }
 0x880   :  { %v2907_v41 = vadd.f32 1e-05, %v2891_v54 }
 0x882   :  { %8802 = vrsqrt.f32 %v2907_v41  ;;  %v2854_v20 = vpop.xlane.xlu0 %2853 }
 0x883   :  { %v2892_v28 = vmul.f32 0.03125, %v2854_v20 }
 0x884   :  { %v8797_v37 = vpop.eup %8796  ;;  %v2857_v52 = vpop.xlane.xlu1 %2856 }
 0x885   :  { %v2908_v33 = vadd.f32 1e-05, %v2892_v28  ;;  %v2893_v2 = vmul.f32 0.03125, %v2857_v52  ;;  %v2936_v39 = vmul.f32 %v8797_v37, %v10445_v18  ;;  %v10558_v18 = vld [vmem:[%s12458_s2 + $0x1] ss:$0 sm:$0xff] }
 0x886   :  { %v8799_v12 = vpop.eup %8798  ;;  %v2860_v8 = vpop.xlane.xlu0 %2859 }
 0x887   :  { %8804 = vrsqrt.f32 %v2908_v33  ;;  %v2909_v46 = vadd.f32 1e-05, %v2893_v2  ;;  %v2894_v23 = vmul.f32 0.03125, %v2860_v8  ;;  %v2937_v32 = vmul.f32 %v8799_v12, %v10448_v27 }
 0x888   :  { %v8801_v30 = vpop.eup %8800  ;;  %v2863_v44 = vpop.xlane.xlu1 %2862  ;;  %v2958_v1 = vmul.f32 %v10549_v19, %v2936_v39 }
 0x889   :  { %v2938_v0 = vmul.f32 %v8801_v30, %v10453_v31  ;;  %8806 = vrsqrt.f32 %v2909_v46  ;;  %v2910_v36 = vadd.f32 1e-05, %v2894_v23  ;;  %v2895_v63 = vmul.f32 0.03125, %v2863_v44 }
 0x88a   :  { %v2866_v22 = vpop.xlane.xlu0 %2865  ;;  %v2959_v34 = vmul.f32 %v10549_v19, %v2937_v32  ;;  %v2980_v31 = vadd.f32 %v10558_v18, %v2958_v1 }
 0x88b   :  { %8808 = vrsqrt.f32 %v2910_v36  ;;  %v2911_v62 = vadd.f32 1e-05, %v2895_v63  ;;  %v2896_v27 = vmul.f32 0.03125, %v2866_v22  ;;  %v2960_v24 = vmul.f32 %v10549_v19, %v2938_v0 }
 0x88c   :  { %v8803_v14 = vpop.eup %8802  ;;  %v2869_v29 = vpop.xlane.xlu1 %2868  ;;  %v2981_v61 = vadd.f32 %v10558_v18, %v2959_v34 }
 0x88d   :  { %v2939_v38 = vmul.f32 %v8803_v14, %v10462_v9  ;;  %8810 = vrsqrt.f32 %v2911_v62  ;;  %v2912_v51 = vadd.f32 1e-05, %v2896_v27  ;;  %v2897_v16 = vmul.f32 0.03125, %v2869_v29 }
 0x88e   :  { %v2872_v54 = vpop.xlane.xlu0 %2871  ;;  %v2996_v41 = vpack.c.bf16 %v2981_v61, %v2980_v31  ;;  %v2982_v33 = vadd.f32 %v10558_v18, %v2960_v24 }
 0x88f   :  { %v2961_v20 = vmul.f32 %v10549_v19, %v2939_v38  ;;  %8812 = vrsqrt.f32 %v2912_v51  ;;  %v2913_v28 = vadd.f32 1e-05, %v2897_v16  ;;  %v2898_v37 = vmul.f32 0.03125, %v2872_v54 }
 0x890   :  { %8112 = vmatprep.mubr.msk.bf16.mxu1 %vm69_vm0, %v2996_v41  ;;  %v2875_v52 = vpop.xlane.xlu1 %2874 }
 0x891   :  { %v8805_v2 = vpop.eup %8804  ;;  %8814 = vrsqrt.f32 %v2913_v28  ;;  %v2914_v39 = vadd.f32 1e-05, %v2898_v37  ;;  %v2899_v12 = vmul.f32 0.03125, %v2875_v52  ;;  %v2983_v9 = vadd.f32 %v10558_v18, %v2961_v20 }
 0x892   :  { %v2878_v8 = vpop.xlane.xlu0 %2877  ;;  %v2940_v46 = vmul.f32 %v8805_v2, %v10469_v21 }
 0x893   :  { %v8807_v23 = vpop.eup %8806  ;;  %8816 = vrsqrt.f32 %v2914_v39  ;;  %v2915_v32 = vadd.f32 1e-05, %v2899_v12  ;;  %v2900_v30 = vmul.f32 0.03125, %v2878_v8  ;;  %v2997_v44 = vpack.c.bf16 %v2983_v9, %v2982_v33 }
 0x894   :  { %v2881_v1 = vpop.xlane.xlu1 %2880  ;;  %v2941_v0 = vmul.f32 %v8807_v23, %v10472_v10  ;;  %v2962_v36 = vmul.f32 %v10549_v19, %v2940_v46 }
 0x895   :  { %v8809_v63 = vpop.eup %8808  ;;  %8818 = vrsqrt.f32 %v2915_v32  ;;  %v2916_v22 = vadd.f32 1e-05, %v2900_v30  ;;  %v2901_v34 = vmul.f32 0.03125, %v2881_v1  ;;  %8113 = vmatmul.mubr.msk.bf16.vlgmr.msra.gmra.mrb[72].mxu1 %vm69_vm0, %v2997_v44 }
 0x896   :  { %v2884_v62 = vpop.xlane.xlu0 %2883  ;;  %v2963_v27 = vmul.f32 %v10549_v19, %v2941_v0  ;;  %v2942_v21 = vmul.f32 %v8809_v63, %v10477_v56  ;;  %v2984_v10 = vadd.f32 %v10558_v18, %v2962_v36 }
 0x897   :  { %v8811_v14 = vpop.eup %8810  ;;  %8820 = vrsqrt.f32 %v2916_v22  ;;  %v2917_v24 = vadd.f32 1e-05, %v2901_v34  ;;  %v2902_v29 = vmul.f32 0.03125, %v2884_v62 }
 0x898   :  { %v2887_v31 = vpop.xlane.xlu1 %2886  ;;  %v2985_v61 = vadd.f32 %v10558_v18, %v2963_v27  ;;  %v2943_v38 = vmul.f32 %v8811_v14, %v10483_v17  ;;  %v2964_v51 = vmul.f32 %v10549_v19, %v2942_v21 }
 0x899   :  { %v8813_v16 = vpop.eup %8812  ;;  %8822 = vrsqrt.f32 %v2917_v24  ;;  %v2918_v54 = vadd.f32 1e-05, %v2902_v29  ;;  %v2903_v41 = vmul.f32 0.03125, %v2887_v31 }
 0x89a   :  { %v2998_v20 = vpack.c.bf16 %v2985_v61, %v2984_v10  ;;  %v2965_v56 = vmul.f32 %v10549_v19, %v2943_v38  ;;  %v2944_v28 = vmul.f32 %v8813_v16, %v10489_v40  ;;  %v2986_v33 = vadd.f32 %v10558_v18, %v2964_v51  ;;  %v8620_v16 = vld [vmem:[%s12463_s9] sm:$0xff]  }
 0x89b   :  { %v8815_v37 = vpop.eup %8814  ;;  %8824 = vrsqrt.f32 %v2918_v54  ;;  %v2919_v52 = vadd.f32 1e-05, %v2903_v41  ;;  %8128 = vmatprep.subr.bf16.mxu0 %v8620_v16  ;;  %v10628_v54 = vld [vmem:[%s12464_s8] ss:$0 sm:$0xff] }
 0x89c   :  { %8116 = vmatprep.mubr.msk.bf16.mxu1 %vm69_vm0, %v2998_v20  ;;  %v2987_v17 = vadd.f32 %v10558_v18, %v2965_v56  ;;  %v2945_v2 = vmul.f32 %v8815_v37, %v10495_v42  ;;  %v2966_v39 = vmul.f32 %v10549_v19, %v2944_v28  ;;  %8129 = vmatpush3.bf16.msra.mxu0 %v8620_v16 }
 0x89d   :  { %v8817_v12 = vpop.eup %8816  ;;  %8826 = vrsqrt.f32 %v2919_v52 }
 0x89e   :  { %v2999_v9 = vpack.c.bf16 %v2987_v17, %v2986_v33  ;;  %v2967_v8 = vmul.f32 %v10549_v19, %v2945_v2  ;;  %v2946_v40 = vmul.f32 %v8817_v12, %v10501_v43  ;;  %v2988_v23 = vadd.f32 %v10558_v18, %v2966_v39 }
 0x89f   :  { %v8819_v46 = vpop.eup %8818 }
 0x8a0   :  { %8117 = vmatmul.mubr.msk.bf16.gmra.mrb[76].mxu1 %vm69_vm0, %v2999_v9  ;;  %v2989_v32 = vadd.f32 %v10558_v18, %v2967_v8  ;;  %v2947_v30 = vmul.f32 %v8819_v46, %v10507_v25  ;;  %v2968_v42 = vmul.f32 %v10549_v19, %v2946_v40 }
 0x8a1   :  { %v8821_v44 = vpop.eup %8820 }
 0x8a2   :  { %v3000_v1 = vpack.c.bf16 %v2989_v32, %v2988_v23  ;;  %v2969_v0 = vmul.f32 %v10549_v19, %v2947_v30  ;;  %v2948_v36 = vmul.f32 %v8821_v44, %v10513_v7  ;;  %v2990_v43 = vadd.f32 %v10558_v18, %v2968_v42 }
 0x8a3   :  { %v8823_v63 = vpop.eup %8822 }
 0x8a4   :  { %8120 = vmatprep.mubr.msk.bf16.mxu1 %vm69_vm0, %v3000_v1  ;;  %v2991_v22 = vadd.f32 %v10558_v18, %v2969_v0  ;;  %v2949_v34 = vmul.f32 %v8823_v63, %v10519_v6  ;;  %v2970_v62 = vmul.f32 %v10549_v19, %v2948_v36 }
 0x8a5   :  { %v8825_v25 = vpop.eup %8824 }
 0x8a6   :  { %v3001_v27 = vpack.c.bf16 %v2991_v22, %v2990_v43  ;;  %v2971_v21 = vmul.f32 %v10549_v19, %v2949_v34  ;;  %v2950_v14 = vmul.f32 %v8825_v25, %v10525_v53  ;;  %v2992_v7 = vadd.f32 %v10558_v18, %v2970_v62 }
 0x8a7   :  { %v8827_v24 = vpop.eup %8826 }
 0x8a8   :  { %8121 = vmatmul.mubr.msk.bf16.gmra.mrb[80].mxu1 %vm69_vm0, %v3001_v27  ;;  %v2993_v29 = vadd.f32 %v10558_v18, %v2971_v21  ;;  %v2951_v31 = vmul.f32 %v8827_v24, %v10531_v15  ;;  %v2972_v10 = vmul.f32 %v10549_v19, %v2950_v14  ;;  %v8621_v15 = vld [vmem:[%s12463_s9 + $0x8] sm:$0xff]  }
 0x8a9   :  { %8130 = vmatprep.subr.bf16.mxu0 %v8621_v15 }
 0x8aa   :  { %v3002_v6 = vpack.c.bf16 %v2993_v29, %v2992_v7  ;;  %v2973_v61 = vmul.f32 %v10549_v19, %v2951_v31  ;;  %v2994_v38 = vadd.f32 %v10558_v18, %v2972_v10  ;;  %8131 = vmatpush3.bf16.msra.mxu0 %v8621_v15  ;;  %v8622_v19 = vld [vmem:[%s12463_s9 + $0x10] sm:$0xff]  }
 0x8ab   :  { %8132 = vmatprep.subr.bf16.mxu0 %v8622_v19 }
 0x8ac   :  { %8124 = vmatprep.mubr.msk.bf16.mxu1 %vm69_vm0, %v3002_v6  ;;  %v2995_v53 = vadd.f32 %v10558_v18, %v2973_v61  ;;  %v8623_v18 = vld [vmem:[%s12463_s9 + $0x18] sm:$0xff]  }
 0x8ae   :  { %v3003_v51 = vpack.c.bf16 %v2995_v53, %v2994_v38  ;;  %8133 = vmatpush3.bf16.msra.mxu0 %v8622_v19 }
 0x8af   :  { %8134 = vmatprep.subr.bf16.mxu0 %v8623_v18 }
 0x8b0   :  { %8125 = vmatmul.mubr.msk.bf16.gmra.mrb[84].mxu1 %vm69_vm0, %v3003_v51 }
 0x8b2   :  { %8135 = vmatpush3.bf16.msra.mxu0 %v8623_v18 }
 0x8b3   :  { %8172 = vmatprep.subr.bf16.mxu0 %v12471_v4 }
 0x968   :  { %v8114_v41 = vpop.f32.mrb[72].mxu1 }
 0x969   :  { %v10631_v20 = vadd.f32 %v8114_v41, %v10628_v54  ;;  %v3085_v56 = vpop.f32.mrb[73].mxu1 }
 0x96a   :  { %v10634_v28 = vadd.f32 %v10628_v54, %v3085_v56  ;;  %v8115_v37 = vpop.f32.mrb[74].mxu1 }
 0x96b   :  { %v7472_v52 = vmul.f32 -1.442695, %v10631_v20  ;;  %v10638_v33 = vadd.f32 %v8115_v37, %v10628_v54  ;;  %v3088_v17 = vpop.f32.mrb[75].mxu1 }
 0x96c   :  { %v7470_v2 = vmul.f32 -1.442695, %v10634_v28  ;;  %v10642_v39 = vadd.f32 %v10628_v54, %v3088_v17 }
 0x96d   :  { %8828 = vpow2.f32 %v7472_v52  ;;  %v7473_v12 = vmul.f32 -1.442695, %v10638_v33 }
 0x96e   :  { %8830 = vpow2.f32 %v7470_v2  ;;  %v7471_v9 = vmul.f32 -1.442695, %v10642_v39 }
 0x96f   :  { %8832 = vpow2.f32 %v7473_v12 }
 0x970   :  { %8834 = vpow2.f32 %v7471_v9 }
 0x973   :  { %v8118_v8 = vpop.f32.mrb[76].mxu1 }
 0x974   :  { %v10647_v40 = vadd.f32 %v8118_v8, %v10628_v54  ;;  %v3101_v46 = vpop.f32.mrb[77].mxu1 }
 0x975   :  { %v10650_v23 = vadd.f32 %v10628_v54, %v3101_v46  ;;  %v8119_v32 = vpop.f32.mrb[78].mxu1 }
 0x976   :  { %v7476_v30 = vmul.f32 -1.442695, %v10647_v40  ;;  %v10654_v42 = vadd.f32 %v8119_v32, %v10628_v54  ;;  %v3104_v44 = vpop.f32.mrb[79].mxu1 }
 0x977   :  { %v8829_v1 = vpop.eup %8828  ;;  %v7474_v0 = vmul.f32 -1.442695, %v10650_v23  ;;  %v10658_v36 = vadd.f32 %v10628_v54, %v3104_v44 }
 0x978   :  { %v8831_v63 = vpop.eup %8830  ;;  %v3198_v43 = vadd.f32 1.0, %v8829_v1  ;;  %8836 = vpow2.f32 %v7476_v30  ;;  %v7477_v27 = vmul.f32 -1.442695, %v10654_v42 }
 0x979   :  { %v8833_v22 = vpop.eup %8832  ;;  %v3196_v34 = vadd.f32 1.0, %v8831_v63  ;;  %8838 = vpow2.f32 %v7474_v0  ;;  %v7475_v14 = vmul.f32 -1.442695, %v10658_v36 }
 0x97a   :  { %v8835_v62 = vpop.eup %8834  ;;  %8840 = vrcp.f32 %v3198_v43  ;;  %v3199_v25 = vadd.f32 1.0, %v8833_v22 }
 0x97b   :  { %8842 = vrcp.f32 %v3196_v34  ;;  %v3197_v21 = vadd.f32 1.0, %v8835_v62  ;;  %v8122_v24 = vpop.f32.mrb[80].mxu1 }
 0x97c   :  { %8844 = vrcp.f32 %v3199_v25  ;;  %v10663_v7 = vadd.f32 %v8122_v24, %v10628_v54  ;;  %v3117_v29 = vpop.f32.mrb[81].mxu1 }
 0x97d   :  { %8846 = vrcp.f32 %v3197_v21  ;;  %v10666_v31 = vadd.f32 %v10628_v54, %v3117_v29  ;;  %v8123_v10 = vpop.f32.mrb[82].mxu1 }
 0x97e   :  { %8848 = vpow2.f32 %v7477_v27  ;;  %v7480_v6 = vmul.f32 -1.442695, %v10663_v7  ;;  %v10670_v61 = vadd.f32 %v8123_v10, %v10628_v54  ;;  %v3120_v38 = vpop.f32.mrb[83].mxu1 }
 0x97f   :  { %8850 = vpow2.f32 %v7475_v14  ;;  %v7478_v53 = vmul.f32 -1.442695, %v10666_v31  ;;  %v10674_v51 = vadd.f32 %v10628_v54, %v3120_v38 }
 0x980   :  { %8852 = vpow2.f32 %v7480_v6  ;;  %v7481_v16 = vmul.f32 -1.442695, %v10670_v61 }
 0x981   :  { %8854 = vpow2.f32 %v7478_v53  ;;  %v7479_v15 = vmul.f32 -1.442695, %v10674_v51 }
 0x982   :  { %v8837_v19 = vpop.eup %8836  ;;  %8856 = vpow2.f32 %v7481_v16 }
 0x983   :  { %v8839_v18 = vpop.eup %8838  ;;  %v3202_v41 = vadd.f32 1.0, %v8837_v19  ;;  %8858 = vpow2.f32 %v7479_v15  ;;  %v8126_v56 = vpop.f32.mrb[84].mxu1 }
 0x984   :  { %v8841_v37 = vpop.eup %8840  ;;  %v3200_v52 = vadd.f32 1.0, %v8839_v18  ;;  %v10679_v17 = vadd.f32 %v8126_v56, %v10628_v54  ;;  %v3133_v2 = vpop.f32.mrb[85].mxu1 }
 0x985   :  { %v8843_v12 = vpop.eup %8842  ;;  %v10682_v9 = vadd.f32 %v10628_v54, %v3133_v2  ;;  %v8127_v8 = vpop.f32.mrb[86].mxu1  ;;  %8860 = vrcp.f32 %v3202_v41  ;;  %v3246_v0 = vmul.f32 %v8841_v37, %v10631_v20 }
 0x986   :  { %v8845_v46 = vpop.eup %8844  ;;  %v7484_v32 = vmul.f32 -1.442695, %v10679_v17  ;;  %v10686_v30 = vadd.f32 %v8127_v8, %v10628_v54  ;;  %v3136_v44 = vpop.f32.mrb[87].mxu1  ;;  %8862 = vrcp.f32 %v3200_v52  ;;  %v3244_v34 = vmul.f32 %v8843_v12, %v10634_v28 }
 0x987   :  { %v8847_v1 = vpop.eup %8846  ;;  %v3247_v63 = vmul.f32 %v8845_v46, %v10638_v33  ;;  %v7482_v43 = vmul.f32 -1.442695, %v10682_v9  ;;  %v10695_v24 = vadd.f32 %v10628_v54, %v3136_v44 }
 0x988   :  { %v8849_v22 = vpop.eup %8848  ;;  %v3245_v62 = vmul.f32 %v8847_v1, %v10642_v39  ;;  %8864 = vpow2.f32 %v7484_v32  ;;  %v7485_v25 = vmul.f32 -1.442695, %v10686_v30 }
 0x989   :  { %v8851_v27 = vpop.eup %8850  ;;  %v3261_v21 = vpack.c.bf16 %v3247_v63, %v3246_v0  ;;  %v3203_v14 = vadd.f32 1.0, %v8849_v22  ;;  %8866 = vpow2.f32 %v7482_v43  ;;  %v7483_v16 = vmul.f32 -1.442695, %v10695_v24 }
 0x98a   :  { %v8853_v20 = vpop.eup %8852  ;;  %v3260_v33 = vpack.c.bf16 %v3245_v62, %v3244_v34  ;;  %v3201_v29 = vadd.f32 1.0, %v8851_v27  ;;  %8868 = vpow2.f32 %v7485_v25 }
 0x98b   :  { %v8855_v10 = vpop.eup %8854  ;;  %8870 = vrcp.f32 %v3203_v14  ;;  %v3206_v6 = vadd.f32 1.0, %v8853_v20 }
 0x98c   :  { %v8857_v28 = vpop.eup %8856  ;;  %8872 = vrcp.f32 %v3201_v29  ;;  %v3204_v39 = vadd.f32 1.0, %v8855_v10  ;;  %8136 = vmatprep.mubr.msk.bf16.mxu0 %vm3300_vm3, %v3260_v33 }
 0x98d   :  { %v8859_v38 = vpop.eup %8858  ;;  %8874 = vrcp.f32 %v3206_v6  ;;  %v3207_v53 = vadd.f32 1.0, %v8857_v28  ;;  %8137 = vmatmul.mubr.msk.bf16.vlgmr.msra.gmra.mrb[88].mxu0 %vm3300_vm3, %v3261_v21 }
 0x98e   :  { %8876 = vrcp.f32 %v3204_v39  ;;  %v3205_v54 = vadd.f32 1.0, %v8859_v38 }
 0x98f   :  { %8878 = vrcp.f32 %v3207_v53  ;;  %v8861_v15 = vpop.eup %8860 }
 0x990   :  { %8880 = vrcp.f32 %v3205_v54  ;;  %v8863_v19 = vpop.eup %8862  ;;  %v3250_v8 = vmul.f32 %v8861_v15, %v10647_v40 }
 0x991   :  { %8882 = vpow2.f32 %v7483_v16  ;;  %v3248_v44 = vmul.f32 %v8863_v19, %v10650_v23 }
 0x992   :  { %v8865_v18 = vpop.eup %8864 }
 0x993   :  { %v8867_v41 = vpop.eup %8866  ;;  %v3210_v56 = vadd.f32 1.0, %v8865_v18 }
 0x994   :  { %v8869_v37 = vpop.eup %8868  ;;  %v3208_v43 = vadd.f32 1.0, %v8867_v41 }
 0x995   :  { %v8871_v52 = vpop.eup %8870  ;;  %8884 = vrcp.f32 %v3210_v56  ;;  %v3211_v2 = vadd.f32 1.0, %v8869_v37 }
 0x996   :  { %v8873_v12 = vpop.eup %8872  ;;  %v3251_v46 = vmul.f32 %v8871_v52, %v10654_v42 }
 0x997   :  { %v8875_v32 = vpop.eup %8874  ;;  %v3249_v1 = vmul.f32 %v8873_v12, %v10658_v36  ;;  %8886 = vrcp.f32 %v3211_v2 }
 0x998   :  { %v8877_v0 = vpop.eup %8876  ;;  %v3263_v63 = vpack.c.bf16 %v3251_v46, %v3250_v8  ;;  %v3254_v25 = vmul.f32 %v8875_v32, %v10663_v7  ;;  %8888 = vrcp.f32 %v3208_v43 }
 0x999   :  { %v8879_v22 = vpop.eup %8878  ;;  %v3262_v34 = vpack.c.bf16 %v3249_v1, %v3248_v44  ;;  %v3252_v40 = vmul.f32 %v8877_v0, %v10666_v31 }
 0x99a   :  { %v8881_v62 = vpop.eup %8880  ;;  %v3255_v27 = vmul.f32 %v8879_v22, %v10670_v61 }
 0x99b   :  { %v8883_v21 = vpop.eup %8882  ;;  %v3253_v42 = vmul.f32 %v8881_v62, %v10674_v51  ;;  %8140 = vmatprep.mubr.msk.bf16.mxu0 %vm3300_vm3, %v3262_v34 }
 0x99c   :  { %v3265_v23 = vpack.c.bf16 %v3255_v27, %v3254_v25  ;;  %v3209_v36 = vadd.f32 1.0, %v8883_v21  ;;  %8141 = vmatmul.mubr.msk.bf16.gmra.mrb[92].mxu0 %vm3300_vm3, %v3263_v63 }
 0x99d   :  { %v3264_v14 = vpack.c.bf16 %v3253_v42, %v3252_v40 }
 0x99e   :  { %8890 = vrcp.f32 %v3209_v36 }
 0x99f   :  { %v8885_v20 = vpop.eup %8884  ;;  %8144 = vmatprep.mubr.msk.bf16.mxu0 %vm3300_vm3, %v3264_v14 }
 0x9a0   :  { %v3258_v61 = vmul.f32 %v8885_v20, %v10679_v17 }
 0x9a1   :  { %v8887_v7 = vpop.eup %8886 }
 0x9a2   :  { %v3259_v33 = vmul.f32 %v8887_v7, %v10686_v30  ;;  %v8889_v51 = vpop.eup %8888  ;;  %v10723_v30 = vld [vmem:[%s12465_s10] ss:$0 sm:$0xff] }
 0x9a3   :  { %v3256_v10 = vmul.f32 %v8889_v51, %v10682_v9 }
 0x9a4   :  { %v3267_v31 = vpack.c.bf16 %v3259_v33, %v3258_v61  ;;  %8145 = vmatmul.mubr.msk.bf16.gmra.mrb[96].mxu0 %vm3300_vm3, %v3265_v23 }
 0x9a8   :  { %v8891_v29 = vpop.eup %8890 }
 0x9a9   :  { %v3257_v6 = vmul.f32 %v8891_v29, %v10695_v24 }
 0x9ab   :  { %v3266_v28 = vpack.c.bf16 %v3257_v6, %v3256_v10 }
 0x9ad   :  { %8148 = vmatprep.mubr.msk.bf16.mxu0 %vm3300_vm3, %v3266_v28 }
 0x9ae   :  { %8149 = vmatmul.mubr.msk.bf16.gmra.mrb[100].mxu0 %vm3300_vm3, %v3267_v31 }
 0x9af   :  { %8174 = vmatprep.mubr.msk.bf16.mxu0 %vm9261_vm1, %v12471_v4 }
 0xa60   :  { %v8138_v17 = vpop.f32.mrb[88].mxu0 }
 0xa61   :  { %v3359_v39 = vpop.f32.mrb[89].mxu0  ;;  %v3424_v38 = vadd.f32 %v8138_v17, %v10329_v48 }
 0xa62   :  { %v3422_v9 = vadd.f32 %v3359_v39, %v10323_v57  ;;  %v8139_v24 = vpop.f32.mrb[90].mxu0 }
 0xa63   :  { %v3362_v53 = vpop.f32.mrb[91].mxu0  ;;  %v3425_v54 = vadd.f32 %v8139_v24, %v10342_v60  ;;  %v10733_v19 = vadd.f32 %v10723_v30, %v3424_v38 }
 0xa64   :  { %v10728_v16 = vadd.f32 %v10723_v30, %v3422_v9  ;;  %v3423_v15 = vadd.f32 %v3362_v53, %v10335_v58 }
 0xa65   :  { %v10741_v57 = vadd.f32 %v10723_v30, %v3425_v54  ;;  %v3471_v58 = vsel %vm69_vm0, %v10733_v19, 0.0 }
 0xa66   :  { %12488 = vst [vmem:[#allocation2_spill] sm:$0xff] %v10728_v16  ;;  %v10736_v18 = vadd.f32 %v10723_v30, %v3423_v15  ;;  %v3465_v48 = vsel %vm69_vm0, %v10728_v16, 0.0 }
 0xa67   :  { %3466 = vadd.xlane.f32.xlu0 %v3465_v48  ;;  %12490 = vst [vmem:[#allocation4_spill] sm:$0xff] %v10741_v57  ;;  %v3474_v60 = vsel %vm69_vm0, %v10741_v57, 0.0 }
 0xa68   :  { %12489 = vst [vmem:[#allocation3_spill] sm:$0xff] %v10736_v18  ;;  %v3468_v41 = vsel %vm69_vm0, %v10736_v18, 0.0 }
 0xa69   :  { %3469 = vadd.xlane.f32.xlu1 %v3468_v41 }
 0xa6b   :  { %3472 = vadd.xlane.f32.xlu0 %v3471_v58 }
 0xa6d   :  { %3475 = vadd.xlane.f32.xlu1 %v3474_v60 }
 0xa6f   :  { %v8142_v56 = vpop.f32.mrb[92].mxu0 }
 0xa70   :  { %v3375_v37 = vpop.f32.mrb[93].mxu0  ;;  %v3428_v52 = vadd.f32 %v8142_v56, %v10364_v13 }
 0xa71   :  { %v3426_v2 = vadd.f32 %v3375_v37, %v10355_v3  ;;  %v8143_v12 = vpop.f32.mrb[94].mxu0 }
 0xa72   :  { %v3378_v8 = vpop.f32.mrb[95].mxu0  ;;  %v3429_v32 = vadd.f32 %v8143_v12, %v10372_v35  ;;  %v10757_v1 = vadd.f32 %v10723_v30, %v3428_v52 }
 0xa73   :  { %v10752_v46 = vadd.f32 %v10723_v30, %v3426_v2  ;;  %v3427_v44 = vadd.f32 %v3378_v8, %v10367_v47 }
 0xa74   :  { %12492 = vst [vmem:[#allocation6_spill] sm:$0xff] %v10757_v1  ;;  %v10765_v3 = vadd.f32 %v10723_v30, %v3429_v32  ;;  %v3483_v62 = vsel %vm69_vm0, %v10757_v1, 0.0 }
 0xa75   :  { %12491 = vst [vmem:[#allocation5_spill] sm:$0xff] %v10752_v46  ;;  %v10760_v0 = vadd.f32 %v10723_v30, %v3427_v44  ;;  %v3477_v13 = vsel %vm69_vm0, %v10752_v46, 0.0 }
 0xa76   :  { %3478 = vadd.xlane.f32.xlu0 %v3477_v13  ;;  %12494 = vst [vmem:[#allocation8_spill] sm:$0xff] %v10765_v3  ;;  %v3486_v42 = vsel %vm69_vm0, %v10765_v3, 0.0 }
 0xa77   :  { %12493 = vst [vmem:[#allocation7_spill] sm:$0xff] %v10760_v0  ;;  %v8146_v63 = vpop.f32.mrb[96].mxu0  ;;  %v3480_v43 = vsel %vm69_vm0, %v10760_v0, 0.0 }
 0xa78   :  { %3481 = vadd.xlane.f32.xlu1 %v3480_v43  ;;  %v3391_v35 = vpop.f32.mrb[97].mxu0  ;;  %v3432_v47 = vadd.f32 %v8146_v63, %v10396_v49 }
 0xa79   :  { %v3430_v22 = vadd.f32 %v3391_v35, %v10385_v11  ;;  %v8147_v34 = vpop.f32.mrb[98].mxu0 }
 0xa7a   :  { %3484 = vadd.xlane.f32.xlu0 %v3483_v62  ;;  %v3394_v25 = vpop.f32.mrb[99].mxu0  ;;  %v3433_v21 = vadd.f32 %v8147_v34, %v10404_v55  ;;  %v10781_v49 = vadd.f32 %v10723_v30, %v3432_v47 }
 0xa7b   :  { %v10774_v27 = vadd.f32 %v10723_v30, %v3430_v22  ;;  %v3431_v40 = vadd.f32 %v3394_v25, %v10399_v5 }
 0xa7c   :  { %3487 = vadd.xlane.f32.xlu1 %v3486_v42  ;;  %12496 = vst [vmem:[#allocation10_spill] sm:$0xff] %v10781_v49  ;;  %v10789_v36 = vadd.f32 %v10723_v30, %v3433_v21  ;;  %v3495_v14 = vsel %vm69_vm0, %v10781_v49, 0.0 }
 0xa7d   :  { %12495 = vst [vmem:[#allocation9_spill] sm:$0xff] %v10774_v27  ;;  %v10784_v11 = vadd.f32 %v10723_v30, %v3431_v40  ;;  %v3489_v23 = vsel %vm69_vm0, %v10774_v27, 0.0 }
 0xa7e   :  { %3490 = vadd.xlane.f32.xlu0 %v3489_v23  ;;  %12498 = vst [vmem:[#allocation12_spill] sm:$0xff] %v10789_v36  ;;  %v3498_v31 = vsel %vm69_vm0, %v10789_v36, 0.0 }
 0xa7f   :  { %12497 = vst [vmem:[#allocation11_spill] sm:$0xff] %v10784_v11  ;;  %v3492_v5 = vsel %vm69_vm0, %v10784_v11, 0.0 }
 0xa80   :  { %3493 = vadd.xlane.f32.xlu1 %v3492_v5 }
 0xa81   :  { %v8150_v55 = vpop.f32.mrb[100].mxu0 }
 0xa82   :  { %v3407_v20 = vpop.f32.mrb[101].mxu0  ;;  %3496 = vadd.xlane.f32.xlu0 %v3495_v14  ;;  %v3436_v7 = vadd.f32 %v8150_v55, %v10428_v59 }
 0xa83   :  { %v3434_v61 = vadd.f32 %v3407_v20, %v10417_v26  ;;  %v8151_v33 = vpop.f32.mrb[102].mxu0 }
 0xa84   :  { %v3410_v51 = vpop.f32.mrb[103].mxu0  ;;  %3499 = vadd.xlane.f32.xlu1 %v3498_v31  ;;  %v3437_v10 = vadd.f32 %v8151_v33, %v10436_v45  ;;  %v10805_v28 = vadd.f32 %v10723_v30, %v3436_v7 }
 0xa85   :  { %v10800_v29 = vadd.f32 %v10723_v30, %v3434_v61  ;;  %v3435_v6 = vadd.f32 %v3410_v51, %v10431_v50 }
 0xa86   :  { %12500 = vst [vmem:[#allocation14_spill] sm:$0xff] %v10805_v28  ;;  %v10813_v17 = vadd.f32 %v10723_v30, %v3437_v10  ;;  %v3507_v50 = vsel %vm69_vm0, %v10805_v28, 0.0 }
 0xa87   :  { %12499 = vst [vmem:[#allocation13_spill] sm:$0xff] %v10800_v29  ;;  %v10808_v59 = vadd.f32 %v10723_v30, %v3435_v6  ;;  %v3501_v26 = vsel %vm69_vm0, %v10800_v29, 0.0 }
 0xa88   :  { %3502 = vadd.xlane.f32.xlu0 %v3501_v26  ;;  %12502 = vst [vmem:[#allocation16_spill] sm:$0xff] %v10813_v17  ;;  %v3510_v45 = vsel %vm69_vm0, %v10813_v17, 0.0 }
 0xa89   :  { %12501 = vst [vmem:[#allocation15_spill] sm:$0xff] %v10808_v59  ;;  %v3504_v39 = vsel %vm69_vm0, %v10808_v59, 0.0 }
 0xa8a   :  { %3505 = vadd.xlane.f32.xlu1 %v3504_v39  ;;  %v8624_v39 = vld [vmem:[%s12456_s3 + $0x10] sm:$0xff]  }
 0xa8b   :  { %8152 = vmatprep.subr.bf16.mxu1 %v8624_v39 }
 0xa8c   :  { %3508 = vadd.xlane.f32.xlu0 %v3507_v50  ;;  %8153 = vmatpush3.bf16.msra.mxu1 %v8624_v39 }
 0xa8e   :  { %3511 = vadd.xlane.f32.xlu1 %v3510_v45 }
 0xaf4   :  { %v3467_v38 = vpop.xlane.xlu0 %3466 }
 0xaf5   :  { %v3513_v9 = vmul.f32 0.03125, %v3467_v38 }
 0xaf6   :  { %v3470_v24 = vpop.xlane.xlu1 %3469 }
 0xaf7   :  { %v10822_v53 = vsub.f32 %v10728_v16, %v3513_v9  ;;  %v3514_v30 = vmul.f32 0.03125, %v3470_v24 }
 0xaf8   :  { %v3473_v54 = vpop.xlane.xlu0 %3472 }
 0xaf9   :  { %v10825_v15 = vsub.f32 %v10736_v18, %v3514_v30  ;;  %v3515_v48 = vmul.f32 0.03125, %v3473_v54  ;;  %v3545_v41 = vmul.f32 %v10822_v53, %v10822_v53 }
 0xafa   :  { %v3476_v58 = vpop.xlane.xlu1 %3475 }
 0xafb   :  { %v10830_v60 = vsub.f32 %v10733_v19, %v3515_v48  ;;  %v3516_v56 = vmul.f32 0.03125, %v3476_v58  ;;  %v3561_v37 = vsel %vm69_vm0, %v3545_v41, 0.0  ;;  %v3546_v52 = vmul.f32 %v10825_v15, %v10825_v15 }
 0xafc   :  { %3562 = vadd.xlane.f32.xlu0 %v3561_v37 }
 0xafd   :  { %v10836_v2 = vsub.f32 %v10741_v57, %v3516_v56  ;;  %v3564_v12 = vsel %vm69_vm0, %v3546_v52, 0.0  ;;  %v3547_v8 = vmul.f32 %v10830_v60, %v10830_v60 }
 0xafe   :  { %3565 = vadd.xlane.f32.xlu1 %v3564_v12 }
 0xaff   :  { %v3567_v32 = vsel %vm69_vm0, %v3547_v8, 0.0  ;;  %v3548_v44 = vmul.f32 %v10836_v2, %v10836_v2 }
 0xb00   :  { %3568 = vadd.xlane.f32.xlu0 %v3567_v32 }
 0xb01   :  { %v3570_v13 = vsel %vm69_vm0, %v3548_v44, 0.0 }
 0xb02   :  { %3571 = vadd.xlane.f32.xlu1 %v3570_v13 }
 0xb03   :  { %v3479_v63 = vpop.xlane.xlu0 %3478 }
 0xb04   :  { %v3517_v43 = vmul.f32 0.03125, %v3479_v63 }
 0xb05   :  { %v3482_v35 = vpop.xlane.xlu1 %3481 }
 0xb06   :  { %v10846_v47 = vsub.f32 %v10752_v46, %v3517_v43  ;;  %v3518_v22 = vmul.f32 0.03125, %v3482_v35 }
 0xb07   :  { %v3485_v34 = vpop.xlane.xlu0 %3484 }
 0xb08   :  { %v10849_v62 = vsub.f32 %v10760_v0, %v3518_v22  ;;  %v3519_v25 = vmul.f32 0.03125, %v3485_v34  ;;  %v3549_v21 = vmul.f32 %v10846_v47, %v10846_v47 }
 0xb09   :  { %v3488_v40 = vpop.xlane.xlu1 %3487 }
 0xb0a   :  { %v10854_v42 = vsub.f32 %v10757_v1, %v3519_v25  ;;  %v3520_v23 = vmul.f32 0.03125, %v3488_v40  ;;  %v3573_v5 = vsel %vm69_vm0, %v3549_v21, 0.0  ;;  %v3550_v55 = vmul.f32 %v10849_v62, %v10849_v62 }
 0xb0b   :  { %v3491_v14 = vpop.xlane.xlu0 %3490  ;;  %3574 = vadd.xlane.f32.xlu0 %v3573_v5 }
 0xb0c   :  { %v10860_v20 = vsub.f32 %v10765_v3, %v3520_v23  ;;  %v3521_v7 = vmul.f32 0.03125, %v3491_v14  ;;  %v3576_v61 = vsel %vm69_vm0, %v3550_v55, 0.0  ;;  %v3551_v33 = vmul.f32 %v10854_v42, %v10854_v42 }
 0xb0d   :  { %3577 = vadd.xlane.f32.xlu1 %v3576_v61  ;;  %v3494_v31 = vpop.xlane.xlu1 %3493 }
 0xb0e   :  { %v10866_v51 = vsub.f32 %v10774_v27, %v3521_v7  ;;  %v3522_v10 = vmul.f32 0.03125, %v3494_v31  ;;  %v3579_v6 = vsel %vm69_vm0, %v3551_v33, 0.0  ;;  %v3552_v26 = vmul.f32 %v10860_v20, %v10860_v20 }
 0xb0f   :  { %v3497_v50 = vpop.xlane.xlu0 %3496  ;;  %3580 = vadd.xlane.f32.xlu0 %v3579_v6 }
 0xb10   :  { %v10875_v45 = vsub.f32 %v10784_v11, %v3522_v10  ;;  %v3523_v38 = vmul.f32 0.03125, %v3497_v50  ;;  %v3582_v9 = vsel %vm69_vm0, %v3552_v26, 0.0  ;;  %v3553_v24 = vmul.f32 %v10866_v51, %v10866_v51  ;;  %v8625_v26 = vld [vmem:[%s12456_s3 + $0x18] sm:$0xff]  }
 0xb11   :  { %3583 = vadd.xlane.f32.xlu1 %v3582_v9  ;;  %v3500_v30 = vpop.xlane.xlu1 %3499  ;;  %8154 = vmatprep.subr.bf16.mxu1 %v8625_v26 }
 0xb12   :  { %v10881_v54 = vsub.f32 %v10781_v49, %v3523_v38  ;;  %v3524_v48 = vmul.f32 0.03125, %v3500_v30  ;;  %v3585_v41 = vsel %vm69_vm0, %v3553_v24, 0.0  ;;  %v3554_v58 = vmul.f32 %v10875_v45, %v10875_v45  ;;  %8155 = vmatpush3.bf16.msra.mxu1 %v8625_v26 }
 0xb13   :  { %3586 = vadd.xlane.f32.xlu0 %v3585_v41  ;;  %8178 = vmatprep.subr.bf16.mxu1 %v12471_v4 }
 0xb14   :  { %v10887_v56 = vsub.f32 %v10789_v36, %v3524_v48  ;;  %v3588_v37 = vsel %vm69_vm0, %v3554_v58, 0.0  ;;  %v3555_v52 = vmul.f32 %v10881_v54, %v10881_v54 }
 0xb15   :  { %v3503_v12 = vpop.xlane.xlu0 %3502  ;;  %3589 = vadd.xlane.f32.xlu1 %v3588_v37 }
 0xb16   :  { %v3525_v8 = vmul.f32 0.03125, %v3503_v12  ;;  %v3591_v32 = vsel %vm69_vm0, %v3555_v52, 0.0  ;;  %v3556_v44 = vmul.f32 %v10887_v56, %v10887_v56 }
 0xb17   :  { %v3506_v13 = vpop.xlane.xlu1 %3505  ;;  %3592 = vadd.xlane.f32.xlu0 %v3591_v32 }
 0xb18   :  { %v10896_v63 = vsub.f32 %v10800_v29, %v3525_v8  ;;  %v3526_v43 = vmul.f32 0.03125, %v3506_v13  ;;  %v3594_v35 = vsel %vm69_vm0, %v3556_v44, 0.0  ;;  %v10927_v44 = vld [vmem:[%s12457_s1 + $0x2] ss:$0 sm:$0xff] }
 0xb19   :  { %v3509_v22 = vpop.xlane.xlu0 %3508  ;;  %3595 = vadd.xlane.f32.xlu1 %v3594_v35 }
 0xb1a   :  { %v10900_v34 = vsub.f32 %v10808_v59, %v3526_v43  ;;  %v3527_v25 = vmul.f32 0.03125, %v3509_v22  ;;  %v3557_v21 = vmul.f32 %v10896_v63, %v10896_v63 }
 0xb1b   :  { %v3512_v40 = vpop.xlane.xlu1 %3511 }
 0xb1c   :  { %v10905_v23 = vsub.f32 %v10805_v28, %v3527_v25  ;;  %v3528_v5 = vmul.f32 0.03125, %v3512_v40  ;;  %v3597_v55 = vsel %vm69_vm0, %v3557_v21, 0.0  ;;  %v3558_v14 = vmul.f32 %v10900_v34, %v10900_v34 }
 0xb1d   :  { %3598 = vadd.xlane.f32.xlu0 %v3597_v55 }
 0xb1e   :  { %v10911_v7 = vsub.f32 %v10813_v17, %v3528_v5  ;;  %v3600_v61 = vsel %vm69_vm0, %v3558_v14, 0.0  ;;  %v3559_v33 = vmul.f32 %v10905_v23, %v10905_v23 }
 0xb1f   :  { %3601 = vadd.xlane.f32.xlu1 %v3600_v61  ;;  %v10935_v61 = vld [vmem:[%s12458_s2 + $0x2] ss:$0 sm:$0xff] }
 0xb20   :  { %v3603_v31 = vsel %vm69_vm0, %v3559_v33, 0.0  ;;  %v3560_v10 = vmul.f32 %v10911_v7, %v10911_v7 }
 0xb21   :  { %3604 = vadd.xlane.f32.xlu0 %v3603_v31 }
 0xb22   :  { %v3606_v6 = vsel %vm69_vm0, %v3560_v10, 0.0 }
 0xb23   :  { %3607 = vadd.xlane.f32.xlu1 %v3606_v6 }
 0xb89   :  { %v3563_v39 = vpop.xlane.xlu0 %3562 }
 0xb8a   :  { %v3609_v50 = vmul.f32 0.03125, %v3563_v39 }
 0xb8b   :  { %v3566_v38 = vpop.xlane.xlu1 %3565 }
 0xb8c   :  { %v3625_v9 = vadd.f32 1e-05, %v3609_v50  ;;  %v3610_v24 = vmul.f32 0.03125, %v3566_v38 }
 0xb8d   :  { %v3569_v30 = vpop.xlane.xlu0 %3568 }
 0xb8e   :  { %8892 = vrsqrt.f32 %v3625_v9  ;;  %v3626_v48 = vadd.f32 1e-05, %v3610_v24  ;;  %v3611_v41 = vmul.f32 0.03125, %v3569_v30 }
 0xb8f   :  { %v3572_v58 = vpop.xlane.xlu1 %3571 }
 0xb90   :  { %8894 = vrsqrt.f32 %v3626_v48  ;;  %v3627_v37 = vadd.f32 1e-05, %v3611_v41  ;;  %v3612_v52 = vmul.f32 0.03125, %v3572_v58 }
 0xb92   :  { %8896 = vrsqrt.f32 %v3627_v37  ;;  %v3628_v12 = vadd.f32 1e-05, %v3612_v52 }
 0xb94   :  { %8898 = vrsqrt.f32 %v3628_v12 }
 0xb98   :  { %v8893_v8 = vpop.eup %8892  ;;  %v3575_v32 = vpop.xlane.xlu0 %3574 }
 0xb99   :  { %v3613_v13 = vmul.f32 0.03125, %v3575_v32  ;;  %v3657_v43 = vmul.f32 %v8893_v8, %v10822_v53 }
 0xb9a   :  { %v8895_v35 = vpop.eup %8894  ;;  %v3578_v22 = vpop.xlane.xlu1 %3577 }
 0xb9b   :  { %v3629_v25 = vadd.f32 1e-05, %v3613_v13  ;;  %v3614_v21 = vmul.f32 0.03125, %v3578_v22  ;;  %v3658_v40 = vmul.f32 %v8895_v35, %v10825_v15  ;;  %v3679_v14 = vmul.f32 %v10927_v44, %v3657_v43 }
 0xb9c   :  { %v8897_v5 = vpop.eup %8896  ;;  %v3581_v55 = vpop.xlane.xlu0 %3580 }
 0xb9d   :  { %v3659_v33 = vmul.f32 %v8897_v5, %v10830_v60  ;;  %8900 = vrsqrt.f32 %v3629_v25  ;;  %v3630_v31 = vadd.f32 1e-05, %v3614_v21  ;;  %v3615_v53 = vmul.f32 0.03125, %v3581_v55 }
 0xb9e   :  { %v8899_v10 = vpop.eup %8898  ;;  %v3584_v6 = vpop.xlane.xlu1 %3583  ;;  %v3680_v26 = vmul.f32 %v10927_v44, %v3658_v40  ;;  %v3701_v24 = vadd.f32 %v10935_v61, %v3679_v14 }
 0xb9f   :  { %v3681_v15 = vmul.f32 %v10927_v44, %v3659_v33  ;;  %v3660_v39 = vmul.f32 %v8899_v10, %v10836_v2  ;;  %8902 = vrsqrt.f32 %v3630_v31  ;;  %v3631_v50 = vadd.f32 1e-05, %v3615_v53 }
 0xba0   :  { %v3616_v38 = vmul.f32 0.03125, %v3584_v6  ;;  %v3587_v9 = vpop.xlane.xlu0 %3586  ;;  %v3702_v30 = vadd.f32 %v10935_v61, %v3680_v26 }
 0xba1   :  { %v3682_v60 = vmul.f32 %v10927_v44, %v3660_v39  ;;  %8904 = vrsqrt.f32 %v3631_v50  ;;  %v3617_v48 = vmul.f32 0.03125, %v3587_v9  ;;  %v3703_v52 = vadd.f32 %v10935_v61, %v3681_v15 }
 0xba2   :  { %v3632_v41 = vadd.f32 1e-05, %v3616_v38  ;;  %v3590_v58 = vpop.xlane.xlu1 %3589  ;;  %v3717_v37 = vpack.c.bf16 %v3702_v30, %v3701_v24 }
 0xba3   :  { %v3704_v12 = vadd.f32 %v10935_v61, %v3682_v60  ;;  %v3633_v2 = vadd.f32 1e-05, %v3617_v48  ;;  %v3618_v8 = vmul.f32 0.03125, %v3590_v58 }
 0xba4   :  { %8906 = vrsqrt.f32 %v3632_v41  ;;  %v3593_v32 = vpop.xlane.xlu0 %3592  ;;  %8156 = vmatprep.mubr.msk.bf16.mxu1 %vm69_vm0, %v3717_v37 }
 0xba5   :  { %8908 = vrsqrt.f32 %v3633_v2  ;;  %v3634_v13 = vadd.f32 1e-05, %v3618_v8  ;;  %v3619_v43 = vmul.f32 0.03125, %v3593_v32  ;;  %v3718_v35 = vpack.c.bf16 %v3704_v12, %v3703_v52 }
 0xba6   :  { %v3596_v22 = vpop.xlane.xlu1 %3595 }
 0xba7   :  { %v8901_v25 = vpop.eup %8900  ;;  %8910 = vrsqrt.f32 %v3634_v13  ;;  %v3635_v21 = vadd.f32 1e-05, %v3619_v43  ;;  %v3620_v40 = vmul.f32 0.03125, %v3596_v22  ;;  %8157 = vmatmul.mubr.msk.bf16.vlgmr.msra.gmra.mrb[88].mxu1 %vm69_vm0, %v3718_v35 }
 0xba8   :  { %v3661_v5 = vmul.f32 %v8901_v25, %v10846_v47 }
 0xba9   :  { %v8903_v55 = vpop.eup %8902  ;;  %8912 = vrsqrt.f32 %v3635_v21  ;;  %v3636_v14 = vadd.f32 1e-05, %v3620_v40 }
 0xbaa   :  { %v3599_v33 = vpop.xlane.xlu0 %3598  ;;  %v3662_v31 = vmul.f32 %v8903_v55, %v10849_v62  ;;  %v3683_v53 = vmul.f32 %v10927_v44, %v3661_v5 }
 0xbab   :  { %v8905_v10 = vpop.eup %8904  ;;  %8914 = vrsqrt.f32 %v3636_v14  ;;  %v3621_v6 = vmul.f32 0.03125, %v3599_v33 }
 0xbac   :  { %v3602_v26 = vpop.xlane.xlu1 %3601  ;;  %v3684_v15 = vmul.f32 %v10927_v44, %v3662_v31  ;;  %v3663_v39 = vmul.f32 %v8905_v10, %v10854_v42  ;;  %v3705_v24 = vadd.f32 %v10935_v61, %v3683_v53 }
 0xbad   :  { %v3637_v50 = vadd.f32 1e-05, %v3621_v6  ;;  %v3622_v38 = vmul.f32 0.03125, %v3602_v26 }
 0xbae   :  { %v8907_v9 = vpop.eup %8906  ;;  %v3605_v47 = vpop.xlane.xlu0 %3604  ;;  %v3706_v30 = vadd.f32 %v10935_v61, %v3684_v15  ;;  %v3685_v62 = vmul.f32 %v10927_v44, %v3663_v39 }
 0xbaf   :  { %v8909_v60 = vpop.eup %8908  ;;  %8916 = vrsqrt.f32 %v3637_v50  ;;  %v3638_v48 = vadd.f32 1e-05, %v3622_v38  ;;  %v3623_v41 = vmul.f32 0.03125, %v3605_v47  ;;  %v3664_v58 = vmul.f32 %v8907_v9, %v10860_v20 }
 0xbb0   :  { %v3608_v37 = vpop.xlane.xlu1 %3607  ;;  %v3719_v52 = vpack.c.bf16 %v3706_v30, %v3705_v24  ;;  %v3665_v42 = vmul.f32 %v8909_v60, %v10866_v51  ;;  %v3707_v20 = vadd.f32 %v10935_v61, %v3685_v62 }
 0xbb1   :  { %v8911_v12 = vpop.eup %8910  ;;  %8918 = vrsqrt.f32 %v3638_v48  ;;  %v3639_v2 = vadd.f32 1e-05, %v3623_v41  ;;  %v3624_v8 = vmul.f32 0.03125, %v3608_v37  ;;  %v3686_v32 = vmul.f32 %v10927_v44, %v3664_v58 }
 0xbb2   :  { %8160 = vmatprep.mubr.msk.bf16.mxu1 %vm69_vm0, %v3719_v52  ;;  %v3666_v13 = vmul.f32 %v8911_v12, %v10875_v45  ;;  %v3687_v43 = vmul.f32 %v10927_v44, %v3665_v42 }
 0xbb3   :  { %v8913_v35 = vpop.eup %8912  ;;  %8920 = vrsqrt.f32 %v3639_v2  ;;  %v3640_v22 = vadd.f32 1e-05, %v3624_v8  ;;  %v3708_v25 = vadd.f32 %v10935_v61, %v3686_v32 }
 0xbb4   :  { %v3688_v51 = vmul.f32 %v10927_v44, %v3666_v13  ;;  %v3667_v21 = vmul.f32 %v8913_v35, %v10881_v54  ;;  %v3709_v55 = vadd.f32 %v10935_v61, %v3687_v43 }
 0xbb5   :  { %v8915_v40 = vpop.eup %8914  ;;  %8922 = vrsqrt.f32 %v3640_v22  ;;  %v3720_v5 = vpack.c.bf16 %v3708_v25, %v3707_v20 }
 0xbb6   :  { %v3710_v45 = vadd.f32 %v10935_v61, %v3688_v51  ;;  %v3668_v14 = vmul.f32 %v8915_v40, %v10887_v56  ;;  %v3689_v33 = vmul.f32 %v10927_v44, %v3667_v21 }
 0xbb7   :  { %8161 = vmatmul.mubr.msk.bf16.gmra.mrb[92].mxu1 %vm69_vm0, %v3720_v5 }
 0xbb8   :  { %v3721_v31 = vpack.c.bf16 %v3710_v45, %v3709_v55  ;;  %v3690_v53 = vmul.f32 %v10927_v44, %v3668_v14  ;;  %v3711_v54 = vadd.f32 %v10935_v61, %v3689_v33 }
 0xbb9   :  { %v8917_v10 = vpop.eup %8916 }
 0xbba   :  { %8164 = vmatprep.mubr.msk.bf16.mxu1 %vm69_vm0, %v3721_v31  ;;  %v3712_v6 = vadd.f32 %v10935_v61, %v3690_v53  ;;  %v3669_v26 = vmul.f32 %v8917_v10, %v10896_v63 }
 0xbbb   :  { %v8919_v15 = vpop.eup %8918 }
 0xbbc   :  { %v3722_v39 = vpack.c.bf16 %v3712_v6, %v3711_v54  ;;  %v3670_v56 = vmul.f32 %v8919_v15, %v10900_v34  ;;  %v3691_v50 = vmul.f32 %v10927_v44, %v3669_v26 }
 0xbbd   :  { %v8921_v38 = vpop.eup %8920 }
 0xbbe   :  { %v3692_v9 = vmul.f32 %v10927_v44, %v3670_v56  ;;  %v3671_v47 = vmul.f32 %v8921_v38, %v10905_v23  ;;  %v3713_v30 = vadd.f32 %v10935_v61, %v3691_v50 }
 0xbbf   :  { %v8923_v24 = vpop.eup %8922  ;;  %8165 = vmatmul.mubr.msk.bf16.gmra.mrb[96].mxu1 %vm69_vm0, %v3722_v39 }
 0xbc0   :  { %v3714_v62 = vadd.f32 %v10935_v61, %v3692_v9  ;;  %v3672_v63 = vmul.f32 %v8923_v24, %v10911_v7  ;;  %v3693_v60 = vmul.f32 %v10927_v44, %v3671_v47  ;;  %v7508_v7 = vld [vmem:[%s12459_s4 + $0x1] ss:$0 sm:$0xff] }
 0xbc2   :  { %v3723_v48 = vpack.c.bf16 %v3714_v62, %v3713_v30  ;;  %v3694_v34 = vmul.f32 %v10927_v44, %v3672_v63  ;;  %v3715_v41 = vadd.f32 %v10935_v61, %v3693_v60 }
 0xbc4   :  { %8168 = vmatprep.mubr.msk.bf16.mxu1 %vm69_vm0, %v3723_v48  ;;  %v3716_v23 = vadd.f32 %v10935_v61, %v3694_v34 }
 0xbc6   :  { %v3724_v58 = vpack.c.bf16 %v3716_v23, %v3715_v41 }
 0xbc8   :  { %8169 = vmatmul.mubr.msk.bf16.gmra.mrb[100].mxu1 %vm69_vm0, %v3724_v58 }
 0xbc9   :  { %8180 = vmatprep.mubr.msk.bf16.mxu1 %vm9261_vm1, %v12471_v4 }
 0xc7a   :  { %v8158_v37 = vpop.f32.mrb[88].mxu1 }
 0xc7b   :  { %v3808_v52 = vpop.f32.mrb[89].mxu1  ;;  %v3817_v44 = vadd.f32 %v8158_v37, %v7508_v7 }
 0xc7c   :  { %v8159_v42 = vpop.f32.mrb[90].mxu1  ;;  %v3809_v8 = vadd.f32 %v7508_v7, %v3808_v52 }
 0xc7d   :  { %v3820_v12 = vadd.f32 %v8159_v42, %v7508_v7  ;;  %v3811_v2 = vpop.f32.mrb[91].mxu1 }
 0xc7e   :  { %v3812_v32 = vadd.f32 %v7508_v7, %v3811_v2 }
 0xc7f   :  { %v8539_v13 = vpack.i.bf16 %v3820_v12, %v3817_v44  ;;  %v10995_v61 = vpack.c.bf16 %v3820_v12, %v3817_v44 }
 0xc80   :  { %v8534_v43 = vpack.i.bf16 %v3812_v32, %v3809_v8  ;;  %v10997_v35 = vpack.c.bf16 %v3812_v32, %v3809_v8 }
 0xc81   :  { %8540 = vrot.lane.b32.xlu1 %v8539_v13, %s9262_s30 }
 0xc82   :  { %8535 = vrot.lane.b32.xlu0 %v8534_v43, %s9262_s30 }
 0xc8a   :  { %v8162_v22 = vpop.f32.mrb[92].mxu1 }
 0xc8b   :  { %v3824_v20 = vpop.f32.mrb[93].mxu1  ;;  %v3833_v51 = vadd.f32 %v8162_v22, %v7508_v7 }
 0xc8c   :  { %v8163_v25 = vpop.f32.mrb[94].mxu1  ;;  %v3825_v5 = vadd.f32 %v7508_v7, %v3824_v20 }
 0xc8d   :  { %v3836_v21 = vadd.f32 %v8163_v25, %v7508_v7  ;;  %v3827_v40 = vpop.f32.mrb[95].mxu1 }
 0xc8e   :  { %v3828_v55 = vadd.f32 %v7508_v7, %v3827_v40 }
 0xc8f   :  { %v8549_v45 = vpack.i.bf16 %v3836_v21, %v3833_v51  ;;  %v11001_v14 = vpack.c.bf16 %v3836_v21, %v3833_v51 }
 0xc90   :  { %v8544_v33 = vpack.i.bf16 %v3828_v55, %v3825_v5  ;;  %v11003_v31 = vpack.c.bf16 %v3828_v55, %v3825_v5 }
 0xc92   :  { %8545 = vrot.lane.b32.xlu1 %v8544_v33, %s9262_s30  ;;  %v8166_v53 = vpop.f32.mrb[96].mxu1 }
 0xc93   :  { %v3840_v10 = vpop.f32.mrb[97].mxu1  ;;  %v3849_v6 = vadd.f32 %v8166_v53, %v7508_v7 }
 0xc94   :  { %v8167_v54 = vpop.f32.mrb[98].mxu1  ;;  %v3841_v39 = vadd.f32 %v7508_v7, %v3840_v10 }
 0xc95   :  { %v3852_v26 = vadd.f32 %v8167_v54, %v7508_v7  ;;  %v3843_v15 = vpop.f32.mrb[99].mxu1 }
 0xc96   :  { %v3844_v56 = vadd.f32 %v7508_v7, %v3843_v15  ;;  %8550 = vrot.lane.b32.xlu1 %v8549_v45, %s9262_s30 }
 0xc97   :  { %v8559_v50 = vpack.i.bf16 %v3852_v26, %v3849_v6  ;;  %v11007_v38 = vpack.c.bf16 %v3852_v26, %v3849_v6 }
 0xc98   :  { %v8554_v9 = vpack.i.bf16 %v3844_v56, %v3841_v39  ;;  %v11009_v47 = vpack.c.bf16 %v3844_v56, %v3841_v39 }
 0xc9a   :  { %8560 = vrot.lane.b32.xlu1 %v8559_v50, %s9262_s30  ;;  %8555 = vrot.lane.b32.xlu0 %v8554_v9, %s9262_s30 }
 0xc9b   :  { %v8170_v24 = vpop.f32.mrb[100].mxu1 }
 0xc9c   :  { %v3856_v30 = vpop.f32.mrb[101].mxu1  ;;  %v3865_v63 = vadd.f32 %v8170_v24, %v7508_v7 }
 0xc9d   :  { %v8171_v62 = vpop.f32.mrb[102].mxu1  ;;  %v3857_v34 = vadd.f32 %v7508_v7, %v3856_v30 }
 0xc9e   :  { %v3868_v60 = vadd.f32 %v8171_v62, %v7508_v7  ;;  %v3859_v48 = vpop.f32.mrb[103].mxu1 }
 0xc9f   :  { %v3860_v41 = vadd.f32 %v7508_v7, %v3859_v48 }
 0xca0   :  { %v8564_v23 = vpack.i.bf16 %v3868_v60, %v3865_v63  ;;  %v11013_v58 = vpack.c.bf16 %v3868_v60, %v3865_v63 }
 0xca1   :  { %v8569_v37 = vpack.i.bf16 %v3860_v41, %v3857_v34  ;;  %v11015_v52 = vpack.c.bf16 %v3860_v41, %v3857_v34 }
 0xca2   :  { %8565 = vrot.lane.b32.xlu1 %v8564_v23, %s9262_s30 }
 0xca3   :  { %8570 = vrot.lane.b32.xlu0 %v8569_v37, %s9262_s30 }
 0xca6   :  { %4002 = vrot.lane.b32.xlu1 %v10995_v61, %s9263_s16 }
 0xca7   :  { %3952 = vrot.lane.b32.xlu0 %v10997_v35, %s9263_s16 }
 0xcaa   :  { %4102 = vrot.lane.b32.xlu1 %v11001_v14, %s9263_s16 }
 0xcab   :  { %4052 = vrot.lane.b32.xlu0 %v11003_v31, %s9263_s16 }
 0xcae   :  { %4202 = vrot.lane.b32.xlu1 %v11007_v38, %s9263_s16 }
 0xcaf   :  { %4152 = vrot.lane.b32.xlu0 %v11009_v47, %s9263_s16 }
 0xcb2   :  { %4302 = vrot.lane.b32.xlu1 %v11013_v58, %s9263_s16 }
 0xcb3   :  { %4252 = vrot.lane.b32.xlu0 %v11015_v52, %s9263_s16 }
 0xcf3   :  { %v8541_v7 = vpop.permute.xlu1 %8540 }
 0xcf4   :  { %v8543_v42 = vunpack.i.h.bf16 %v8541_v7  ;;  %v8542_v44 = vunpack.i.l.bf16 %v8541_v7  ;;  %v8536_v12 = vpop.permute.xlu0 %8535 }
 0xcf5   :  { %v8538_v2 = vunpack.i.h.bf16 %v8536_v12  ;;  %v8537_v8 = vunpack.i.l.bf16 %v8536_v12 }
 0xcf6   :  { %v11035_v32 = vpack.c.bf16 %v8543_v42, %v8542_v44 }
 0xcf7   :  { %v11037_v13 = vpack.c.bf16 %v8538_v2, %v8537_v8 }
 0xcf8   :  { %4402 = vrot.lane.b32.xlu1 %v11035_v32, %s9263_s16 }
 0xcf9   :  { %4352 = vrot.lane.b32.xlu0 %v11037_v13, %s9263_s16 }
 0xd04   :  { %v8546_v43 = vpop.permute.xlu1 %8545 }
 0xd05   :  { %v8548_v22 = vunpack.i.h.bf16 %v8546_v43  ;;  %v8547_v20 = vunpack.i.l.bf16 %v8546_v43 }
 0xd07   :  { %v11043_v25 = vpack.c.bf16 %v8548_v22, %v8547_v20 }
 0xd08   :  { %v8551_v51 = vpop.permute.xlu1 %8550 }
 0xd09   :  { %v8553_v21 = vunpack.i.h.bf16 %v8551_v51  ;;  %v8552_v40 = vunpack.i.l.bf16 %v8551_v51  ;;  %4452 = vrot.lane.b32.xlu0 %v11043_v25, %s9263_s16 }
 0xd0b   :  { %v11047_v5 = vpack.c.bf16 %v8553_v21, %v8552_v40 }
 0xd0c   :  { %v8556_v55 = vpop.permute.xlu0 %8555  ;;  %v8561_v45 = vpop.permute.xlu1 %8560 }
 0xd0d   :  { %v8558_v33 = vunpack.i.h.bf16 %v8556_v55  ;;  %v8557_v53 = vunpack.i.l.bf16 %v8556_v55  ;;  %v8563_v10 = vunpack.i.h.bf16 %v8561_v45  ;;  %v8562_v54 = vunpack.i.l.bf16 %v8561_v45  ;;  %4502 = vrot.lane.b32.xlu1 %v11047_v5, %s9263_s16 }
 0xd0f   :  { %v11051_v6 = vpack.c.bf16 %v8558_v33, %v8557_v53  ;;  %v11053_v26 = vpack.c.bf16 %v8563_v10, %v8562_v54 }
 0xd11   :  { %4552 = vrot.lane.b32.xlu0 %v11051_v6, %s9263_s16  ;;  %4602 = vrot.lane.b32.xlu1 %v11053_v26, %s9263_s16 }
 0xd14   :  { %v8566_v15 = vpop.permute.xlu1 %8565 }
 0xd15   :  { %v8568_v39 = vunpack.i.h.bf16 %v8566_v15  ;;  %v8567_v56 = vunpack.i.l.bf16 %v8566_v15  ;;  %v8571_v50 = vpop.permute.xlu0 %8570 }
 0xd16   :  { %v8573_v9 = vunpack.i.h.bf16 %v8571_v50  ;;  %v8572_v24 = vunpack.i.l.bf16 %v8571_v50 }
 0xd17   :  { %v11059_v30 = vpack.c.bf16 %v8568_v39, %v8567_v56 }
 0xd18   :  { %v11061_v62 = vpack.c.bf16 %v8573_v9, %v8572_v24  ;;  %v4003_v63 = vpop.permute.xlu1 %4002 }
 0xd19   :  { %v4008_v60 = vsel %vm558_vm2, %v4003_v63, 0  ;;  %v3953_v48 = vpop.permute.xlu0 %3952  ;;  %4702 = vrot.lane.b32.xlu1 %v11059_v30, %s9263_s16 }
 0xd1a   :  { %v3958_v34 = vsel %vm558_vm2, %v3953_v48, 0  ;;  %8179 = vmatpush3.bf16.xpose.msra.mxu1 %v4008_v60  ;;  %4652 = vrot.lane.b32.xlu0 %v11061_v62, %s9263_s16 }
 0xd1b   :  { %8173 = vmatpush3.bf16.xpose.msra.mxu0 %v3958_v34  ;;  %8190 = vmatprep.subr.bf16.mxu1 %v12471_v4 }
 0xd1c   :  { %8184 = vmatprep.subr.bf16.mxu0 %v12471_v4  ;;  %v4103_v41 = vpop.permute.xlu1 %4102 }
 0xd1d   :  { %5166 = vrot.lane.b32.xlu1 %v10995_v61, %s9264_s17  ;;  %v4053_v23 = vpop.permute.xlu0 %4052  ;;  %v4108_v37 = vsel %vm558_vm2, %v4103_v41, 0 }
 0xd1e   :  { %5119 = vrot.lane.b32.xlu0 %v10997_v35, %s9264_s17  ;;  %v4058_v7 = vsel %vm558_vm2, %v4053_v23, 0 }
 0xd21   :  { %8181 = vmatmul.mubr.msk.bf16.vlgmr.msra.gmra.mrb[104].mxu1 %vm558_vm2, %v10995_v61  ;;  %5260 = vrot.lane.b32.xlu1 %v11001_v14, %s9264_s17  ;;  %v4203_v61 = vpop.permute.xlu1 %4202 }
 0xd22   :  { %8175 = vmatmul.mubr.msk.bf16.vlgmr.msra.gmra.mrb[104].mxu0 %vm558_vm2, %v10997_v35  ;;  %8191 = vmatpush3.bf16.xpose.msra.mxu1 %v4108_v37  ;;  %v4153_v35 = vpop.permute.xlu0 %4152  ;;  %v4208_v42 = vsel %vm558_vm2, %v4203_v61, 0 }
 0xd23   :  { %5213 = vrot.lane.b32.xlu0 %v11003_v31, %s9264_s17  ;;  %8185 = vmatpush3.bf16.xpose.msra.mxu0 %v4058_v7  ;;  %v4158_v44 = vsel %vm558_vm2, %v4153_v35, 0 }
 0xd24   :  { %8192 = vmatprep.mubr.msk.bf16.mxu1 %vm9261_vm1, %v12471_v4  ;;  %8186 = vmatprep.mubr.msk.bf16.mxu0 %vm9261_vm1, %v12471_v4 }
 0xd25   :  { %5354 = vrot.lane.b32.xlu1 %v11007_v38, %s9264_s17  ;;  %8202 = vmatprep.subr.bf16.mxu1 %v12471_v4 }
 0xd26   :  { %8196 = vmatprep.subr.bf16.mxu0 %v12471_v4 }
 0xd27   :  { %5307 = vrot.lane.b32.xlu0 %v11009_v47, %s9264_s17 }
 0xd29   :  { %8193 = vmatmul.mubr.msk.bf16.vlgmr.msra.gmra.mrb[108].mxu1 %vm558_vm2, %v11001_v14  ;;  %5448 = vrot.lane.b32.xlu1 %v11013_v58, %s9264_s17  ;;  %v4303_v14 = vpop.permute.xlu1 %4302 }
 0xd2a   :  { %8187 = vmatmul.mubr.msk.bf16.vlgmr.msra.gmra.mrb[108].mxu0 %vm558_vm2, %v11003_v31  ;;  %8203 = vmatpush3.bf16.xpose.msra.mxu1 %v4208_v42  ;;  %v4253_v31 = vpop.permute.xlu0 %4252  ;;  %v4308_v12 = vsel %vm558_vm2, %v4303_v14, 0 }
 0xd2b   :  { %5401 = vrot.lane.b32.xlu0 %v11015_v52, %s9264_s17  ;;  %8197 = vmatpush3.bf16.xpose.msra.mxu0 %v4158_v44  ;;  %v4258_v2 = vsel %vm558_vm2, %v4253_v31, 0 }
 0xd2c   :  { %8204 = vmatprep.mubr.msk.bf16.mxu1 %vm9261_vm1, %v12471_v4  ;;  %8198 = vmatprep.mubr.msk.bf16.mxu0 %vm9261_vm1, %v12471_v4 }
 0xd2d   :  { %5542 = vrot.lane.b32.xlu1 %v11035_v32, %s9264_s17  ;;  %8214 = vmatprep.subr.bf16.mxu1 %v12471_v4 }
 0xd2e   :  { %8208 = vmatprep.subr.bf16.mxu0 %v12471_v4 }
 0xd2f   :  { %5495 = vrot.lane.b32.xlu0 %v11037_v13, %s9264_s17 }
 0xd31   :  { %8205 = vmatmul.mubr.msk.bf16.vlgmr.msra.gmra.mrb[112].mxu1 %vm558_vm2, %v11007_v38  ;;  %5589 = vrot.lane.b32.xlu1 %v11043_v25, %s9264_s17 }
 0xd32   :  { %8199 = vmatmul.mubr.msk.bf16.vlgmr.msra.gmra.mrb[112].mxu0 %vm558_vm2, %v11009_v47  ;;  %8215 = vmatpush3.bf16.xpose.msra.mxu1 %v4308_v12 }
 0xd33   :  { %8209 = vmatpush3.bf16.xpose.msra.mxu0 %v4258_v2  ;;  %8216 = vmatprep.mubr.msk.bf16.mxu1 %vm9261_vm1, %v12471_v4 }
 0xd34   :  { %8210 = vmatprep.mubr.msk.bf16.mxu0 %vm9261_vm1, %v12471_v4  ;;  %8226 = vmatprep.subr.bf16.mxu1 %v12471_v4 }
 0xd35   :  { %5636 = vrot.lane.b32.xlu1 %v11047_v5, %s9264_s17  ;;  %8220 = vmatprep.subr.bf16.mxu0 %v12471_v4 }
 0xd39   :  { %8217 = vmatmul.mubr.msk.bf16.vlgmr.msra.gmra.mrb[116].mxu1 %vm558_vm2, %v11013_v58 }
 0xd3a   :  { %8211 = vmatmul.mubr.msk.bf16.vlgmr.msra.gmra.mrb[116].mxu0 %vm558_vm2, %v11015_v52  ;;  %8228 = vmatprep.mubr.msk.bf16.mxu1 %vm9261_vm1, %v12471_v4 }
 0xd3b   :  { %8222 = vmatprep.mubr.msk.bf16.mxu0 %vm9261_vm1, %v12471_v4 }
 0xd6a   :  { %v4403_v38 = vpop.permute.xlu1 %4402 }
 0xd6b   :  { %v4408_v47 = vsel %vm558_vm2, %v4403_v38, 0  ;;  %v4353_v8 = vpop.permute.xlu0 %4352 }
 0xd6c   :  { %v4358_v43 = vsel %vm558_vm2, %v4353_v8, 0  ;;  %8227 = vmatpush3.bf16.xpose.msra.mxu1 %v4408_v47 }
 0xd6d   :  { %8221 = vmatpush3.bf16.xpose.msra.mxu0 %v4358_v43  ;;  %8238 = vmatprep.subr.bf16.mxu1 %v12471_v4 }
 0xd6e   :  { %8232 = vmatprep.subr.bf16.mxu0 %v12471_v4 }
 0xd73   :  { %8229 = vmatmul.mubr.msk.bf16.vlgmr.msra.gmra.mrb[120].mxu1 %vm558_vm2, %v11035_v32 }
 0xd74   :  { %8223 = vmatmul.mubr.msk.bf16.vlgmr.msra.gmra.mrb[120].mxu0 %vm558_vm2, %v11037_v13  ;;  %8240 = vmatprep.mubr.msk.bf16.mxu1 %vm9261_vm1, %v12471_v4 }
 0xd75   :  { %8234 = vmatprep.mubr.msk.bf16.mxu0 %vm9261_vm1, %v12471_v4 }
 0xd7b   :  { %v4453_v58 = vpop.permute.xlu0 %4452 }
 0xd7c   :  { %v4458_v52 = vsel %vm558_vm2, %v4453_v58, 0 }
 0xd7d   :  { %8233 = vmatpush3.bf16.xpose.msra.mxu0 %v4458_v52 }
 0xd7e   :  { %8244 = vmatprep.subr.bf16.mxu0 %v12471_v4 }
 0xd7f   :  { %v4503_v22 = vpop.permute.xlu1 %4502 }
 0xd80   :  { %v4508_v20 = vsel %vm558_vm2, %v4503_v22, 0 }
 0xd81   :  { %8239 = vmatpush3.bf16.xpose.msra.mxu1 %v4508_v20 }
 0xd82   :  { %8250 = vmatprep.subr.bf16.mxu1 %v12471_v4 }
 0xd83   :  { %v4553_v32 = vpop.permute.xlu0 %4552  ;;  %v4603_v51 = vpop.permute.xlu1 %4602 }
 0xd84   :  { %v4558_v13 = vsel %vm558_vm2, %v4553_v32, 0  ;;  %8235 = vmatmul.mubr.msk.bf16.vlgmr.msra.gmra.mrb[124].mxu0 %vm558_vm2, %v11043_v25  ;;  %v4608_v21 = vsel %vm558_vm2, %v4603_v51, 0 }
 0xd85   :  { %8245 = vmatpush3.bf16.xpose.msra.mxu0 %v4558_v13  ;;  %8246 = vmatprep.mubr.msk.bf16.mxu0 %vm9261_vm1, %v12471_v4 }
 0xd86   :  { %8256 = vmatprep.subr.bf16.mxu0 %v12471_v4 }
 0xd88   :  { %8241 = vmatmul.mubr.msk.bf16.vlgmr.msra.gmra.mrb[124].mxu1 %vm558_vm2, %v11047_v5 }
 0xd89   :  { %8251 = vmatpush3.bf16.xpose.msra.mxu1 %v4608_v21  ;;  %8252 = vmatprep.mubr.msk.bf16.mxu1 %vm9261_vm1, %v12471_v4 }
 0xd8a   :  { %8262 = vmatprep.subr.bf16.mxu1 %v12471_v4 }
 0xd8b   :  { %v4703_v25 = vpop.permute.xlu1 %4702 }
 0xd8c   :  { %v4653_v40 = vpop.permute.xlu0 %4652  ;;  %8247 = vmatmul.mubr.msk.bf16.vlgmr.msra.gmra.mrb[128].mxu0 %vm558_vm2, %v11051_v6  ;;  %v4708_v5 = vsel %vm558_vm2, %v4703_v25, 0 }
 0xd8d   :  { %v4658_v55 = vsel %vm558_vm2, %v4653_v40, 0  ;;  %8258 = vmatprep.mubr.msk.bf16.mxu0 %vm9261_vm1, %v12471_v4 }
 0xd8e   :  { %8257 = vmatpush3.bf16.xpose.msra.mxu0 %v4658_v55 }
 0xd8f   :  { %8268 = vmatprep.subr.bf16.mxu0 %v12471_v4  ;;  %v5167_v33 = vpop.permute.xlu1 %5166 }
 0xd90   :  { %8253 = vmatmul.mubr.msk.bf16.vlgmr.msra.gmra.mrb[128].mxu1 %vm558_vm2, %v11053_v26  ;;  %v5120_v45 = vpop.permute.xlu0 %5119 }
 0xd91   :  { %8263 = vmatpush3.bf16.xpose.msra.mxu1 %v4708_v5  ;;  %8264 = vmatprep.mubr.msk.bf16.mxu1 %vm9261_vm1, %v12471_v4 }
 0xd92   :  { %8274 = vmatprep.subr.bf16.mxu1 %v12471_v4 }
 0xd95   :  { %8259 = vmatmul.mubr.msk.bf16.vlgmr.msra.gmra.mrb[132].mxu0 %vm558_vm2, %v11061_v62 }
 0xd96   :  { %8269 = vmatpush3.bf16.msra.mxu0 %v5120_v45  ;;  %8270 = vmatprep.mubr.msk.bf16.mxu0 %vm9261_vm1, %v12471_v4 }
 0xd97   :  { %8280 = vmatprep.subr.bf16.mxu0 %v12471_v4 }
 0xd98   :  { %8265 = vmatmul.mubr.msk.bf16.vlgmr.msra.gmra.mrb[132].mxu1 %vm558_vm2, %v11059_v30 }
 0xd99   :  { %8275 = vmatpush3.bf16.msra.mxu1 %v5167_v33  ;;  %8276 = vmatprep.mubr.msk.bf16.mxu1 %vm9261_vm1, %v12471_v4 }
 0xd9a   :  { %8286 = vmatprep.subr.bf16.mxu1 %v12471_v4 }
 0xdf4   :  { %v11189_v53 = vpop.f32.mrb[104].mxu1 }
 0xdf5   :  { %v11191_v10 = vpop.f32.mrb[104].mxu0  ;;  %v8182_v54 = vpop.f32.mrb[105].mxu1  ;;  %v4757_v15 = vsel %vm558_vm2, %v11189_v53, -inf }
 0xdf6   :  { %v8176_v39 = vpop.f32.mrb[105].mxu0  ;;  %v11195_v56 = vpop.f32.mrb[106].mxu1  ;;  %4758 = vmax.xlane.f32.xlu0 %v4757_v15  ;;  %v4751_v60 = vsel %vm558_vm2, %v11191_v10, -inf }
 0xdf7   :  { %v11197_v50 = vpop.f32.mrb[106].mxu0  ;;  %v8183_v9 = vpop.f32.mrb[107].mxu1  ;;  %v4760_v23 = vsel %vm558_vm2, %v11195_v56, -inf }
 0xdf8   :  { %v8177_v24 = vpop.f32.mrb[107].mxu0  ;;  %v4754_v63 = vsel %vm558_vm2, %v11197_v50, -inf }
 0xdf9   :  { %4755 = vmax.xlane.f32.xlu1 %v4754_v63 }
 0xdfa   :  { %4752 = vmax.xlane.f32.xlu0 %v4751_v60 }
 0xdfc   :  { %v11203_v48 = vpop.f32.mrb[108].mxu1 }
 0xdfd   :  { %v11205_v34 = vpop.f32.mrb[108].mxu0  ;;  %v8194_v41 = vpop.f32.mrb[109].mxu1  ;;  %v4769_v14 = vsel %vm558_vm2, %v11203_v48, -inf }
 0xdfe   :  { %v8188_v37 = vpop.f32.mrb[109].mxu0  ;;  %v11209_v7 = vpop.f32.mrb[110].mxu1  ;;  %4761 = vmax.xlane.f32.xlu0 %v4760_v23  ;;  %v4763_v47 = vsel %vm558_vm2, %v11205_v34, -inf }
 0xdff   :  { %v11211_v61 = vpop.f32.mrb[110].mxu0  ;;  %v8195_v35 = vpop.f32.mrb[111].mxu1  ;;  %v4772_v42 = vsel %vm558_vm2, %v11209_v7, -inf }
 0xe00   :  { %v8189_v44 = vpop.f32.mrb[111].mxu0  ;;  %4773 = vmax.xlane.f32.xlu1 %v4772_v42  ;;  %v4766_v31 = vsel %vm558_vm2, %v11211_v61, -inf }
 0xe02   :  { %4770 = vmax.xlane.f32.xlu0 %v4769_v14 }
 0xe04   :  { %v11219_v12 = vpop.f32.mrb[112].mxu1  ;;  %4767 = vmax.xlane.f32.xlu1 %v4766_v31 }
 0xe05   :  { %v11221_v2 = vpop.f32.mrb[112].mxu0  ;;  %v8206_v38 = vpop.f32.mrb[113].mxu1  ;;  %v4781_v32 = vsel %vm558_vm2, %v11219_v12, -inf }
 0xe06   :  { %v8200_v8 = vpop.f32.mrb[113].mxu0  ;;  %v11225_v43 = vpop.f32.mrb[114].mxu1  ;;  %4764 = vmax.xlane.f32.xlu0 %v4763_v47  ;;  %v4775_v25 = vsel %vm558_vm2, %v11221_v2, -inf }
 0xe07   :  { %v11227_v58 = vpop.f32.mrb[114].mxu0  ;;  %v8207_v52 = vpop.f32.mrb[115].mxu1  ;;  %v4784_v22 = vsel %vm558_vm2, %v11225_v43, -inf }
 0xe08   :  { %v8201_v20 = vpop.f32.mrb[115].mxu0  ;;  %4785 = vmax.xlane.f32.xlu1 %v4784_v22  ;;  %v4778_v13 = vsel %vm558_vm2, %v11227_v58, -inf }
 0xe0a   :  { %4782 = vmax.xlane.f32.xlu0 %v4781_v32 }
 0xe0c   :  { %v11235_v51 = vpop.f32.mrb[116].mxu1  ;;  %4779 = vmax.xlane.f32.xlu1 %v4778_v13 }
 0xe0d   :  { %v11237_v21 = vpop.f32.mrb[116].mxu0  ;;  %v8218_v40 = vpop.f32.mrb[117].mxu1  ;;  %v4793_v39 = vsel %vm558_vm2, %v11235_v51, -inf }
 0xe0e   :  { %v8212_v55 = vpop.f32.mrb[117].mxu0  ;;  %v11241_v5 = vpop.f32.mrb[118].mxu1  ;;  %4776 = vmax.xlane.f32.xlu0 %v4775_v25  ;;  %v4787_v24 = vsel %vm558_vm2, %v11237_v21, -inf }
 0xe0f   :  { %v11243_v45 = vpop.f32.mrb[118].mxu0  ;;  %v8219_v33 = vpop.f32.mrb[119].mxu1  ;;  %v4796_v54 = vsel %vm558_vm2, %v11241_v5, -inf }
 0xe10   :  { %v8213_v15 = vpop.f32.mrb[119].mxu0  ;;  %4797 = vmax.xlane.f32.xlu1 %v4796_v54  ;;  %v4790_v9 = vsel %vm558_vm2, %v11243_v45, -inf }
 0xe12   :  { %4794 = vmax.xlane.f32.xlu0 %v4793_v39 }
 0xe14   :  { %4791 = vmax.xlane.f32.xlu1 %v4790_v9 }
 0xe16   :  { %4788 = vmax.xlane.f32.xlu0 %v4787_v24 }
 0xe46   :  { %v11253_v63 = vpop.f32.mrb[120].mxu1 }
 0xe47   :  { %v11255_v60 = vpop.f32.mrb[120].mxu0  ;;  %v8230_v41 = vpop.f32.mrb[121].mxu1  ;;  %v4805_v23 = vsel %vm558_vm2, %v11253_v63, -inf }
 0xe48   :  { %v8224_v37 = vpop.f32.mrb[121].mxu0  ;;  %4806 = vmax.xlane.f32.xlu0 %v4805_v23  ;;  %v11259_v35 = vpop.f32.mrb[122].mxu1  ;;  %v4799_v38 = vsel %vm558_vm2, %v11255_v60, -inf }
 0xe49   :  { %v11261_v42 = vpop.f32.mrb[122].mxu0  ;;  %v8231_v44 = vpop.f32.mrb[123].mxu1  ;;  %v4808_v14 = vsel %vm558_vm2, %v11259_v35, -inf }
 0xe4a   :  { %v8225_v31 = vpop.f32.mrb[123].mxu0  ;;  %4809 = vmax.xlane.f32.xlu1 %v4808_v14  ;;  %v4802_v47 = vsel %vm558_vm2, %v11261_v42, -inf }
 0xe4c   :  { %4800 = vmax.xlane.f32.xlu0 %v4799_v38 }
 0xe4e   :  { %4803 = vmax.xlane.f32.xlu1 %v4802_v47  ;;  %v11297_v47 = vpop.permute.xlu1 %5260 }
 0xe57   :  { %v11269_v8 = vpop.f32.mrb[124].mxu0 }
 0xe58   :  { %v8236_v52 = vpop.f32.mrb[125].mxu0  ;;  %v4811_v39 = vsel %vm558_vm2, %v11269_v8, -inf }
 0xe59   :  { %v11271_v22 = vpop.f32.mrb[126].mxu0 }
 0xe5a   :  { %v8237_v20 = vpop.f32.mrb[127].mxu0  ;;  %v4814_v41 = vsel %vm558_vm2, %v11271_v22, -inf }
 0xe5b   :  { %v11273_v32 = vpop.f32.mrb[124].mxu1 }
 0xe5c   :  { %v8242_v13 = vpop.f32.mrb[125].mxu1  ;;  %v4817_v40 = vsel %vm558_vm2, %v11273_v32, -inf }
 0xe5d   :  { %4818 = vmax.xlane.f32.xlu0 %v4817_v40  ;;  %v11277_v25 = vpop.f32.mrb[126].mxu1 }
 0xe5e   :  { %v8243_v55 = vpop.f32.mrb[127].mxu1  ;;  %v4820_v33 = vsel %vm558_vm2, %v11277_v25, -inf }
 0xe5f   :  { %v11281_v54 = vpop.f32.mrb[128].mxu0  ;;  %4821 = vmax.xlane.f32.xlu1 %v4820_v33 }
 0xe60   :  { %v8248_v15 = vpop.f32.mrb[129].mxu0  ;;  %v4823_v20 = vsel %vm558_vm2, %v11281_v54, -inf }
 0xe61   :  { %v11285_v9 = vpop.f32.mrb[130].mxu0  ;;  %4812 = vmax.xlane.f32.xlu0 %v4811_v39  ;;  %v11309_v39 = vpop.permute.xlu0 %5213 }
 0xe62   :  { %v8249_v24 = vpop.f32.mrb[131].mxu0  ;;  %v4826_v55 = vsel %vm558_vm2, %v11285_v9, -inf }
 0xe63   :  { %4815 = vmax.xlane.f32.xlu1 %v4814_v41  ;;  %v11289_v23 = vpop.f32.mrb[128].mxu1 }
 0xe64   :  { %v8254_v37 = vpop.f32.mrb[129].mxu1  ;;  %v4829_v44 = vsel %vm558_vm2, %v11289_v23, -inf }
 0xe65   :  { %4830 = vmax.xlane.f32.xlu0 %v4829_v44  ;;  %v11293_v14 = vpop.f32.mrb[130].mxu1  ;;  %v11313_v37 = vpop.permute.xlu1 %5354 }
 0xe66   :  { %v8255_v31 = vpop.f32.mrb[131].mxu1  ;;  %v4832_v38 = vsel %vm558_vm2, %v11293_v14, -inf }
 0xe67   :  { %4833 = vmax.xlane.f32.xlu1 %v4832_v38 }
 0xe68   :  { %v11299_v52 = vpop.f32.mrb[132].mxu0 }
 0xe69   :  { %v8260_v13 = vpop.f32.mrb[133].mxu0  ;;  %4824 = vmax.xlane.f32.xlu0 %v4823_v20  ;;  %v4835_v20 = vsel %vm558_vm2, %v11299_v52, -inf }
 0xe6a   :  { %v11303_v40 = vpop.f32.mrb[134].mxu0 }
 0xe6b   :  { %v8261_v33 = vpop.f32.mrb[135].mxu0  ;;  %4827 = vmax.xlane.f32.xlu1 %v4826_v55  ;;  %v11307_v15 = vpop.f32.mrb[132].mxu1  ;;  %v4838_v13 = vsel %vm558_vm2, %v11303_v40, -inf }
 0xe6c   :  { %v8266_v24 = vpop.f32.mrb[133].mxu1  ;;  %v4841_v41 = vsel %vm558_vm2, %v11307_v15, -inf  ;;  %v11323_v55 = vpop.permute.xlu0 %5307 }
 0xe6d   :  { %4842 = vmax.xlane.f32.xlu0 %v4841_v41  ;;  %v11315_v44 = vpop.f32.mrb[134].mxu1  ;;  %v11325_v33 = vpop.permute.xlu1 %5448 }
 0xe6e   :  { %v8267_v31 = vpop.f32.mrb[135].mxu1  ;;  %v4844_v38 = vsel %vm558_vm2, %v11315_v44, -inf }
 0xe6f   :  { %4845 = vmax.xlane.f32.xlu1 %v4844_v38 }
 0xe70   :  { %v11327_v24 = vpop.permute.xlu0 %5401 }
 0xe71   :  { %4836 = vmax.xlane.f32.xlu0 %v4835_v20  ;;  %v11329_v41 = vpop.permute.xlu1 %5542 }
 0xe73   :  { %4839 = vmax.xlane.f32.xlu1 %v4838_v13 }
 0xe74   :  { %v11331_v31 = vpop.permute.xlu0 %5495 }
 0xe75   :  { %v11333_v4 = vpop.permute.xlu1 %5589 }
 0xe79   :  { %v11337_v20 = vpop.permute.xlu1 %5636 }
 0xe83   :  { %v4759_v38 = vpop.xlane.xlu0 %4758 }
 0xe84   :  { %5730 = vrot.lane.b32.xlu1 %v11053_v26, %s9264_s17  ;;  %v4849_v11 = vsub.f32 %v11189_v53, %v4759_v38 }
 0xe86   :  { %v4756_v17 = vpop.xlane.xlu1 %4755  ;;  %v4883_v0 = vmul.f32 1.442695, %v4849_v11 }
 0xe87   :  { %v4753_v59 = vpop.xlane.xlu0 %4752  ;;  %5683 = vrot.lane.b32.xlu0 %v11051_v6, %s9264_s17  ;;  %v4848_v26 = vsub.f32 %v11197_v50, %v4756_v17 }
 0xe88   :  { %v4847_v3 = vsub.f32 %v11191_v10, %v4753_v59  ;;  %8924 = vpow2.f32 %v4883_v0 }
 0xe89   :  { %v4881_v16 = vmul.f32 1.442695, %v4848_v26 }
 0xe8a   :  { %v4879_v57 = vmul.f32 1.442695, %v4847_v3 }
 0xe8b   :  { %v4762_v13 = vpop.xlane.xlu0 %4761 }
 0xe8c   :  { %v4850_v36 = vsub.f32 %v11195_v56, %v4762_v13 }
 0xe8d   :  { %v4774_v29 = vpop.xlane.xlu1 %4773 }
 0xe8e   :  { %v4885_v46 = vmul.f32 1.442695, %v4850_v36  ;;  %v4854_v53 = vsub.f32 %v11209_v7, %v4774_v29 }
 0xe8f   :  { %v4771_v28 = vpop.xlane.xlu0 %4770 }
 0xe90   :  { %v4853_v6 = vsub.f32 %v11203_v48, %v4771_v28  ;;  %8926 = vpow2.f32 %v4885_v46  ;;  %v4893_v59 = vmul.f32 1.442695, %v4854_v53 }
 0xe91   :  { %v4768_v27 = vpop.xlane.xlu1 %4767  ;;  %8928 = vpow2.f32 %v4879_v57 }
 0xe92   :  { %v4891_v56 = vmul.f32 1.442695, %v4853_v6  ;;  %8930 = vpow2.f32 %v4881_v16  ;;  %v4852_v17 = vsub.f32 %v11211_v61, %v4768_v27  ;;  %v11350_v28 = vpop.eup %8924 }
 0xe93   :  { %v4765_v49 = vpop.xlane.xlu0 %4764  ;;  %v4949_v27 = vsel %vm558_vm2, %v11350_v28, 0.0 }
 0xe94   :  { %v4851_v38 = vsub.f32 %v11205_v34, %v4765_v49  ;;  %8932 = vpow2.f32 %v4891_v56  ;;  %v4889_v46 = vmul.f32 1.442695, %v4852_v17 }
 0xe95   :  { %v4786_v18 = vpop.xlane.xlu1 %4785  ;;  %8934 = vpow2.f32 %v4893_v59 }
 0xe96   :  { %v4887_v0 = vmul.f32 1.442695, %v4851_v38  ;;  %v4858_v29 = vsub.f32 %v11225_v43, %v4786_v18 }
 0xe97   :  { %v4783_v1 = vpop.xlane.xlu0 %4782 }
 0xe98   :  { %v4857_v3 = vsub.f32 %v11219_v12, %v4783_v1  ;;  %8936 = vpow2.f32 %v4887_v0  ;;  %v4901_v1 = vmul.f32 1.442695, %v4858_v29 }
 0xe99   :  { %v4780_v36 = vpop.xlane.xlu1 %4779  ;;  %8938 = vpow2.f32 %v4889_v46 }
 0xe9a   :  { %v11353_v10 = vpop.eup %8926  ;;  %v4899_v49 = vmul.f32 1.442695, %v4857_v3  ;;  %v4856_v34 = vsub.f32 %v11227_v58, %v4780_v36 }
 0xe9b   :  { %v4777_v11 = vpop.xlane.xlu0 %4776  ;;  %v11358_v48 = vpop.eup %8928  ;;  %v4952_v18 = vsel %vm558_vm2, %v11353_v10, 0.0 }
 0xe9c   :  { %v4855_v16 = vsub.f32 %v11221_v2, %v4777_v11  ;;  %v11363_v7 = vpop.eup %8930  ;;  %8940 = vpow2.f32 %v4899_v49  ;;  %v4943_v43 = vsel %vm558_vm2, %v11358_v48, 0.0  ;;  %v4897_v26 = vmul.f32 1.442695, %v4856_v34 }
 0xe9d   :  { %v4798_v50 = vpop.xlane.xlu1 %4797  ;;  %8942 = vpow2.f32 %v4901_v1  ;;  %v4946_v53 = vsel %vm558_vm2, %v11363_v7, 0.0 }
 0xe9e   :  { %v4895_v61 = vmul.f32 1.442695, %v4855_v16  ;;  %v11368_v13 = vpop.eup %8932  ;;  %v4862_v58 = vsub.f32 %v11241_v5, %v4798_v50 }
 0xe9f   :  { %v4795_v57 = vpop.xlane.xlu0 %4794  ;;  %v11373_v56 = vpop.eup %8934  ;;  %v4961_v11 = vsel %vm558_vm2, %v11368_v13, 0.0 }
 0xea0   :  { %v4861_v12 = vsub.f32 %v11235_v51, %v4795_v57  ;;  %8944 = vpow2.f32 %v4895_v61  ;;  %v4909_v17 = vmul.f32 1.442695, %v4862_v58  ;;  %v4964_v36 = vsel %vm558_vm2, %v11373_v56, 0.0 }
 0xea1   :  { %v4792_v6 = vpop.xlane.xlu1 %4791  ;;  %8946 = vpow2.f32 %v4897_v26 }
 0xea2   :  { %v4907_v51 = vmul.f32 1.442695, %v4861_v12  ;;  %v11378_v59 = vpop.eup %8936  ;;  %v4860_v5 = vsub.f32 %v11243_v45, %v4792_v6 }
 0xea3   :  { %v4789_v2 = vpop.xlane.xlu0 %4788  ;;  %v11383_v0 = vpop.eup %8938 }
 0xea4   :  { %v4859_v38 = vsub.f32 %v11237_v21, %v4789_v2  ;;  %8948 = vpow2.f32 %v4907_v51  ;;  %v4955_v21 = vsel %vm558_vm2, %v11378_v59, 0.0  ;;  %v4905_v29 = vmul.f32 1.442695, %v4860_v5 }
 0xea5   :  { %8950 = vpow2.f32 %v4909_v17  ;;  %v4958_v45 = vsel %vm558_vm2, %v11383_v0, 0.0 }
 0xea6   :  { %4950 = vadd.xlane.f32.xlu0 %v4949_v27  ;;  %v4903_v3 = vmul.f32 1.442695, %v4859_v38  ;;  %v11387_v46 = vpop.eup %8940 }
 0xea7   :  { %v11391_v57 = vpop.eup %8942  ;;  %v4973_v49 = vsel %vm558_vm2, %v11387_v46, 0.0 }
 0xea8   :  { %4953 = vadd.xlane.f32.xlu1 %v4952_v18  ;;  %8952 = vpow2.f32 %v4903_v3  ;;  %v4976_v50 = vsel %vm558_vm2, %v11391_v57, 0.0 }
 0xea9   :  { %8954 = vpow2.f32 %v4905_v29 }
 0xeaa   :  { %4944 = vadd.xlane.f32.xlu0 %v4943_v43  ;;  %v11395_v16 = vpop.eup %8944 }
 0xeab   :  { %v11399_v27 = vpop.eup %8946  ;;  %v4967_v1 = vsel %vm558_vm2, %v11395_v16, 0.0 }
 0xeac   :  { %4947 = vadd.xlane.f32.xlu1 %v4946_v53  ;;  %v4970_v18 = vsel %vm558_vm2, %v11399_v27, 0.0 }
 0xeae   :  { %4962 = vadd.xlane.f32.xlu0 %v4961_v11  ;;  %v11403_v34 = vpop.eup %8948 }
 0xeaf   :  { %v11407_v61 = vpop.eup %8950  ;;  %v4985_v12 = vsel %vm558_vm2, %v11403_v34, 0.0 }
 0xeb0   :  { %4965 = vadd.xlane.f32.xlu1 %v4964_v36  ;;  %v4988_v43 = vsel %vm558_vm2, %v11407_v61, 0.0 }
 0xeb2   :  { %4956 = vadd.xlane.f32.xlu0 %v4955_v21  ;;  %v11411_v2 = vpop.eup %8952 }
 0xeb3   :  { %v11415_v26 = vpop.eup %8954  ;;  %v4979_v58 = vsel %vm558_vm2, %v11411_v2, 0.0 }
 0xeb4   :  { %4959 = vadd.xlane.f32.xlu1 %v4958_v45  ;;  %v4982_v6 = vsel %vm558_vm2, %v11415_v26, 0.0 }
 0xeb6   :  { %4974 = vadd.xlane.f32.xlu0 %v4973_v49 }
 0xeb8   :  { %4977 = vadd.xlane.f32.xlu1 %v4976_v50 }
 0xeba   :  { %4968 = vadd.xlane.f32.xlu0 %v4967_v1 }
 0xebc   :  { %4971 = vadd.xlane.f32.xlu1 %v4970_v18 }
 0xebe   :  { %4986 = vadd.xlane.f32.xlu0 %v4985_v12 }
 0xec0   :  { %4989 = vadd.xlane.f32.xlu1 %v4988_v43 }
 0xec2   :  { %4980 = vadd.xlane.f32.xlu0 %v4979_v58 }
 0xec4   :  { %4983 = vadd.xlane.f32.xlu1 %v4982_v6 }
 0xed5   :  { %v4807_v53 = vpop.xlane.xlu0 %4806 }
 0xed6   :  { %v4865_v51 = vsub.f32 %v11253_v63, %v4807_v53 }
 0xed7   :  { %v4810_v38 = vpop.xlane.xlu1 %4809 }
 0xed8   :  { %v4915_v11 = vmul.f32 1.442695, %v4865_v51  ;;  %v4866_v17 = vsub.f32 %v11259_v35, %v4810_v38 }
 0xed9   :  { %v4801_v5 = vpop.xlane.xlu0 %4800 }
 0xeda   :  { %8956 = vpow2.f32 %v4915_v11  ;;  %v4863_v36 = vsub.f32 %v11255_v60, %v4801_v5  ;;  %v4917_v3 = vmul.f32 1.442695, %v4866_v17 }
 0xedb   :  { %v4804_v21 = vpop.xlane.xlu1 %4803 }
 0xedc   :  { %v4911_v29 = vmul.f32 1.442695, %v4863_v36  ;;  %v4864_v45 = vsub.f32 %v11261_v42, %v4804_v21 }
 0xede   :  { %8958 = vpow2.f32 %v4911_v29  ;;  %v4913_v49 = vmul.f32 1.442695, %v4864_v45 }
 0xedf   :  { %8960 = vpow2.f32 %v4917_v3 }
 0xee0   :  { %8962 = vpow2.f32 %v4913_v49 }
 0xee4   :  { %v11425_v50 = vpop.eup %8956 }
 0xee5   :  { %v4997_v63 = vsel %vm558_vm2, %v11425_v50, 0.0 }
 0xee6   :  { %4998 = vadd.xlane.f32.xlu0 %v4997_v63 }
 0xee8   :  { %v11429_v35 = vpop.eup %8958 }
 0xee9   :  { %v11431_v1 = vpop.eup %8960  ;;  %v4991_v60 = vsel %vm558_vm2, %v11429_v35, 0.0 }
 0xeea   :  { %v11435_v18 = vpop.eup %8962  ;;  %v4819_v42 = vpop.xlane.xlu0 %4818  ;;  %4992 = vadd.xlane.f32.xlu1 %v4991_v60  ;;  %v5000_v51 = vsel %vm558_vm2, %v11431_v1, 0.0 }
 0xeeb   :  { %v4869_v12 = vsub.f32 %v11273_v32, %v4819_v42  ;;  %v4994_v43 = vsel %vm558_vm2, %v11435_v18, 0.0 }
 0xeec   :  { %v4822_v58 = vpop.xlane.xlu1 %4821  ;;  %4995 = vadd.xlane.f32.xlu0 %v4994_v43 }
 0xeed   :  { %v4923_v6 = vmul.f32 1.442695, %v4869_v12  ;;  %v4870_v53 = vsub.f32 %v11277_v25, %v4822_v58 }
 0xeee   :  { %v4813_v38 = vpop.xlane.xlu0 %4812  ;;  %5001 = vadd.xlane.f32.xlu1 %v5000_v51 }
 0xeef   :  { %8964 = vpow2.f32 %v4923_v6  ;;  %v4867_v11 = vsub.f32 %v11269_v8, %v4813_v38  ;;  %v4925_v17 = vmul.f32 1.442695, %v4870_v53 }
 0xef0   :  { %v4816_v5 = vpop.xlane.xlu1 %4815 }
 0xef1   :  { %v4919_v36 = vmul.f32 1.442695, %v4867_v11  ;;  %v4868_v32 = vsub.f32 %v11271_v22, %v4816_v5 }
 0xef2   :  { %v4831_v3 = vpop.xlane.xlu0 %4830 }
 0xef3   :  { %8966 = vpow2.f32 %v4919_v36  ;;  %v4921_v21 = vmul.f32 1.442695, %v4868_v32  ;;  %v4873_v29 = vsub.f32 %v11289_v23, %v4831_v3 }
 0xef4   :  { %8968 = vpow2.f32 %v4925_v17  ;;  %v4834_v25 = vpop.xlane.xlu1 %4833 }
 0xef5   :  { %8970 = vpow2.f32 %v4921_v21  ;;  %v4931_v45 = vmul.f32 1.442695, %v4873_v29  ;;  %v4874_v49 = vsub.f32 %v11293_v14, %v4834_v25 }
 0xef6   :  { %v4825_v63 = vpop.xlane.xlu0 %4824 }
 0xef7   :  { %8972 = vpow2.f32 %v4931_v45  ;;  %v4871_v8 = vsub.f32 %v11281_v54, %v4825_v63  ;;  %v4933_v60 = vmul.f32 1.442695, %v4874_v49 }
 0xef8   :  { %v4828_v42 = vpop.xlane.xlu1 %4827 }
 0xef9   :  { %v11448_v12 = vpop.eup %8964  ;;  %v4927_v22 = vmul.f32 1.442695, %v4871_v8  ;;  %v4872_v43 = vsub.f32 %v11285_v9, %v4828_v42 }
 0xefa   :  { %v4843_v58 = vpop.xlane.xlu0 %4842  ;;  %v5009_v23 = vsel %vm558_vm2, %v11448_v12, 0.0 }
 0xefb   :  { %8974 = vpow2.f32 %v4927_v22  ;;  %v4929_v6 = vmul.f32 1.442695, %v4872_v43  ;;  %v4877_v53 = vsub.f32 %v11307_v15, %v4843_v58  ;;  %5010 = vadd.xlane.f32.xlu0 %v5009_v23 }
 0xefc   :  { %8976 = vpow2.f32 %v4933_v60  ;;  %v4846_v14 = vpop.xlane.xlu1 %4845 }
 0xefd   :  { %v11454_v51 = vpop.eup %8966  ;;  %8978 = vpow2.f32 %v4929_v6  ;;  %v4939_v54 = vmul.f32 1.442695, %v4877_v53  ;;  %v4878_v38 = vsub.f32 %v11315_v44, %v4846_v14 }
 0xefe   :  { %v11457_v11 = vpop.eup %8968  ;;  %v4837_v9 = vpop.xlane.xlu0 %4836  ;;  %v5003_v17 = vsel %vm558_vm2, %v11454_v51, 0.0 }
 0xeff   :  { %v11461_v5 = vpop.eup %8970  ;;  %8980 = vpow2.f32 %v4939_v54  ;;  %v4875_v15 = vsub.f32 %v11299_v52, %v4837_v9  ;;  %5004 = vadd.xlane.f32.xlu1 %v5003_v17  ;;  %v4941_v36 = vmul.f32 1.442695, %v4878_v38  ;;  %v5012_v25 = vsel %vm558_vm2, %v11457_v11, 0.0 }
 0xf00   :  { %v4840_v32 = vpop.xlane.xlu1 %4839  ;;  %v5006_v3 = vsel %vm558_vm2, %v11461_v5, 0.0 }
 0xf01   :  { %v11466_v21 = vpop.eup %8972  ;;  %v4935_v44 = vmul.f32 1.442695, %v4875_v15  ;;  %v4876_v29 = vsub.f32 %v11303_v40, %v4840_v32  ;;  %5007 = vadd.xlane.f32.xlu0 %v5006_v3 }
 0xf02   :  { %v5021_v52 = vsel %vm558_vm2, %v11466_v21, 0.0  ;;  %v11505_v38 = vpop.permute.xlu0 %5683 }
 0xf03   :  { %8982 = vpow2.f32 %v4935_v44  ;;  %v4937_v45 = vmul.f32 1.442695, %v4876_v29  ;;  %5013 = vadd.xlane.f32.xlu1 %v5012_v25 }
 0xf04   :  { %8984 = vpow2.f32 %v4941_v36  ;;  %v11507_v9 = vpop.permute.xlu1 %5730 }
 0xf05   :  { %v11473_v49 = vpop.eup %8974  ;;  %8986 = vpow2.f32 %v4937_v45  ;;  %5022 = vadd.xlane.f32.xlu0 %v5021_v52 }
 0xf06   :  { %v11475_v63 = vpop.eup %8976  ;;  %v5015_v40 = vsel %vm558_vm2, %v11473_v49, 0.0 }
 0xf07   :  { %v11479_v8 = vpop.eup %8978  ;;  %5016 = vadd.xlane.f32.xlu1 %v5015_v40  ;;  %v5024_v22 = vsel %vm558_vm2, %v11475_v63, 0.0 }
 0xf08   :  { %v5018_v60 = vsel %vm558_vm2, %v11479_v8, 0.0 }
 0xf09   :  { %v11483_v42 = vpop.eup %8980  ;;  %5019 = vadd.xlane.f32.xlu0 %v5018_v60 }
 0xf0a   :  { %v5033_v43 = vsel %vm558_vm2, %v11483_v42, 0.0 }
 0xf0b   :  { %5025 = vadd.xlane.f32.xlu1 %v5024_v22 }
 0xf0d   :  { %v11489_v58 = vpop.eup %8982  ;;  %5034 = vadd.xlane.f32.xlu0 %v5033_v43 }
 0xf0e   :  { %v11491_v23 = vpop.eup %8984  ;;  %v5027_v6 = vsel %vm558_vm2, %v11489_v58, 0.0 }
 0xf0f   :  { %v11495_v53 = vpop.eup %8986  ;;  %5028 = vadd.xlane.f32.xlu1 %v5027_v6  ;;  %v5036_v54 = vsel %vm558_vm2, %v11491_v23, 0.0 }
 0xf10   :  { %v5030_v14 = vsel %vm558_vm2, %v11495_v53, 0.0 }
 0xf11   :  { %5031 = vadd.xlane.f32.xlu0 %v5030_v14 }
 0xf13   :  { %5037 = vadd.xlane.f32.xlu1 %v5036_v54 }
 0xf24   :  { %5824 = vrot.lane.b32.xlu1 %v11059_v30, %s9264_s17 }
 0xf27   :  { %5777 = vrot.lane.b32.xlu0 %v11061_v62, %s9264_s17 }
 0xf33   :  { %v4951_v17 = vpop.xlane.xlu0 %4950 }
 0xf34   :  { %8988 = vrcp.f32 %v4951_v17 }
 0xf35   :  { %v4954_v15 = vpop.xlane.xlu1 %4953 }
 0xf36   :  { %8990 = vrcp.f32 %v4954_v15 }
 0xf37   :  { %v4945_v36 = vpop.xlane.xlu0 %4944 }
 0xf38   :  { %8992 = vrcp.f32 %v4945_v36 }
 0xf39   :  { %v4948_v32 = vpop.xlane.xlu1 %4947 }
 0xf3a   :  { %8994 = vrcp.f32 %v4948_v32 }
 0xf3b   :  { %v4963_v3 = vpop.xlane.xlu0 %4962 }
 0xf3c   :  { %8996 = vrcp.f32 %v4963_v3 }
 0xf3d   :  { %v4966_v44 = vpop.xlane.xlu1 %4965 }
 0xf3e   :  { %v8989_v29 = vpop.eup %8988  ;;  %8998 = vrcp.f32 %v4966_v44 }
 0xf3f   :  { %v4957_v30 = vpop.xlane.xlu0 %4956  ;;  %v5073_v62 = vmul.f32 %v8989_v29, %v11350_v28  ;;  %v12503_v28 = vmov 0.0  }
 0xf40   :  { %v8991_v25 = vpop.eup %8990  ;;  %9000 = vrcp.f32 %v4957_v30 }
 0xf41   :  { %v5074_v45 = vmul.f32 %v8991_v25, %v11353_v10  ;;  %v4960_v52 = vpop.xlane.xlu1 %4959 }
 0xf42   :  { %v8993_v40 = vpop.eup %8992  ;;  %9002 = vrcp.f32 %v4960_v52 }
 0xf43   :  { %v4975_v60 = vpop.xlane.xlu0 %4974  ;;  %v5104_v22 = vpack.c.bf16 %v5074_v45, %v5073_v62  ;;  %v5071_v6 = vmul.f32 %v8993_v40, %v11358_v48 }
 0xf44   :  { %v8995_v43 = vpop.eup %8994  ;;  %9004 = vrcp.f32 %v4975_v60 }
 0xf45   :  { %v5072_v14 = vmul.f32 %v8995_v43, %v11363_v7  ;;  %8277 = vmatmul.mubr.msk.bf16.vlgmr.msra.gmra.mrb[136].mxu1 %vm558_vm2, %v5104_v22  ;;  %v4978_v54 = vpop.xlane.xlu1 %4977 }
 0xf46   :  { %v8997_v17 = vpop.eup %8996  ;;  %8287 = vmatpush3.bf16.msra.mxu1 %v11297_v47  ;;  %9006 = vrcp.f32 %v4978_v54  ;;  %8288 = vmatprep.mubr.msk.bf16.mxu1 %vm9261_vm1, %v12503_v28 }
 0xf47   :  { %v4969_v10 = vpop.xlane.xlu0 %4968  ;;  %v5103_v15 = vpack.c.bf16 %v5072_v14, %v5071_v6  ;;  %8298 = vmatprep.subr.bf16.mxu1 %v12503_v28  ;;  %v5077_v48 = vmul.f32 %v8997_v17, %v11368_v13 }
 0xf48   :  { %v8999_v36 = vpop.eup %8998  ;;  %9008 = vrcp.f32 %v4969_v10 }
 0xf49   :  { %v5078_v7 = vmul.f32 %v8999_v36, %v11373_v56  ;;  %8271 = vmatmul.mubr.msk.bf16.vlgmr.msra.gmra.mrb[136].mxu0 %vm558_vm2, %v5103_v15  ;;  %v4972_v32 = vpop.xlane.xlu1 %4971 }
 0xf4a   :  { %v9001_v3 = vpop.eup %9000  ;;  %8281 = vmatpush3.bf16.msra.mxu0 %v11309_v39  ;;  %9010 = vrcp.f32 %v4972_v32  ;;  %8282 = vmatprep.mubr.msk.bf16.mxu0 %vm9261_vm1, %v12503_v28 }
 0xf4b   :  { %v4987_v47 = vpop.xlane.xlu0 %4986  ;;  %v5106_v44 = vpack.c.bf16 %v5078_v7, %v5077_v48  ;;  %8292 = vmatprep.subr.bf16.mxu0 %v12503_v28  ;;  %v5075_v13 = vmul.f32 %v9001_v3, %v11378_v59 }
 0xf4c   :  { %v9003_v29 = vpop.eup %9002  ;;  %9012 = vrcp.f32 %v4987_v47 }
 0xf4d   :  { %v5076_v56 = vmul.f32 %v9003_v29, %v11383_v0  ;;  %8289 = vmatmul.mubr.msk.bf16.vlgmr.msra.gmra.mrb[140].mxu1 %vm558_vm2, %v5106_v44  ;;  %v4990_v30 = vpop.xlane.xlu1 %4989 }
 0xf4e   :  { %v9005_v25 = vpop.eup %9004  ;;  %8299 = vmatpush3.bf16.msra.mxu1 %v11313_v37  ;;  %9014 = vrcp.f32 %v4990_v30  ;;  %8300 = vmatprep.mubr.msk.bf16.mxu1 %vm9261_vm1, %v12503_v28 }
 0xf4f   :  { %v4981_v39 = vpop.xlane.xlu0 %4980  ;;  %v5105_v62 = vpack.c.bf16 %v5076_v56, %v5075_v13  ;;  %8310 = vmatprep.subr.bf16.mxu1 %v12503_v28  ;;  %v5081_v59 = vmul.f32 %v9005_v25, %v11387_v46 }
 0xf50   :  { %v9007_v45 = vpop.eup %9006  ;;  %9016 = vrcp.f32 %v4981_v39 }
 0xf51   :  { %v5082_v0 = vmul.f32 %v9007_v45, %v11391_v57  ;;  %8283 = vmatmul.mubr.msk.bf16.vlgmr.msra.gmra.mrb[140].mxu0 %vm558_vm2, %v5105_v62  ;;  %v4984_v52 = vpop.xlane.xlu1 %4983 }
 0xf52   :  { %v9009_v40 = vpop.eup %9008  ;;  %8293 = vmatpush3.bf16.msra.mxu0 %v11323_v55  ;;  %9018 = vrcp.f32 %v4984_v52  ;;  %8294 = vmatprep.mubr.msk.bf16.mxu0 %vm9261_vm1, %v12503_v28 }
 0xf53   :  { %v5108_v37 = vpack.c.bf16 %v5082_v0, %v5081_v59  ;;  %8304 = vmatprep.subr.bf16.mxu0 %v12503_v28  ;;  %v5079_v22 = vmul.f32 %v9009_v40, %v11395_v16 }
 0xf54   :  { %v9011_v60 = vpop.eup %9010 }
 0xf55   :  { %v5080_v46 = vmul.f32 %v9011_v60, %v11399_v27  ;;  %8301 = vmatmul.mubr.msk.bf16.vlgmr.msra.gmra.mrb[144].mxu1 %vm558_vm2, %v5108_v37 }
 0xf56   :  { %v9013_v57 = vpop.eup %9012  ;;  %8311 = vmatpush3.bf16.msra.mxu1 %v11325_v33  ;;  %8312 = vmatprep.mubr.msk.bf16.mxu1 %vm9261_vm1, %v12503_v28 }
 0xf57   :  { %v5107_v55 = vpack.c.bf16 %v5080_v46, %v5079_v22  ;;  %8322 = vmatprep.subr.bf16.mxu1 %v12503_v28  ;;  %v5085_v6 = vmul.f32 %v9013_v57, %v11403_v34 }
 0xf58   :  { %v9015_v43 = vpop.eup %9014 }
 0xf59   :  { %v5086_v14 = vmul.f32 %v9015_v43, %v11407_v61  ;;  %8295 = vmatmul.mubr.msk.bf16.vlgmr.msra.gmra.mrb[144].mxu0 %vm558_vm2, %v5107_v55 }
 0xf5a   :  { %v9017_v16 = vpop.eup %9016  ;;  %8305 = vmatpush3.bf16.msra.mxu0 %v11327_v24  ;;  %8306 = vmatprep.mubr.msk.bf16.mxu0 %vm9261_vm1, %v12503_v28 }
 0xf5b   :  { %v5110_v33 = vpack.c.bf16 %v5086_v14, %v5085_v6  ;;  %8316 = vmatprep.subr.bf16.mxu0 %v12503_v28  ;;  %v5083_v54 = vmul.f32 %v9017_v16, %v11411_v2 }
 0xf5c   :  { %v9019_v27 = vpop.eup %9018 }
 0xf5d   :  { %v5084_v17 = vmul.f32 %v9019_v27, %v11415_v26  ;;  %8313 = vmatmul.mubr.msk.bf16.vlgmr.msra.gmra.mrb[148].mxu1 %vm558_vm2, %v5110_v33 }
 0xf5e   :  { %8323 = vmatpush3.bf16.msra.mxu1 %v11329_v41  ;;  %8324 = vmatprep.mubr.msk.bf16.mxu1 %vm9261_vm1, %v12503_v28 }
 0xf5f   :  { %v5109_v34 = vpack.c.bf16 %v5084_v17, %v5083_v54  ;;  %8334 = vmatprep.subr.bf16.mxu1 %v12503_v28 }
 0xf61   :  { %8307 = vmatmul.mubr.msk.bf16.vlgmr.msra.gmra.mrb[148].mxu0 %vm558_vm2, %v5109_v34 }
 0xf62   :  { %8317 = vmatpush3.bf16.msra.mxu0 %v11331_v31  ;;  %8318 = vmatprep.mubr.msk.bf16.mxu0 %vm9261_vm1, %v12503_v28 }
 0xf63   :  { %8328 = vmatprep.subr.bf16.mxu0 %v12503_v28 }
 0xf73   :  { %v4999_v24 = vpop.xlane.xlu0 %4998 }
 0xf77   :  { %v4993_v61 = vpop.xlane.xlu1 %4992 }
 0xf78   :  { %9020 = vrcp.f32 %v4993_v61 }
 0xf79   :  { %9022 = vrcp.f32 %v4999_v24  ;;  %v4996_v41 = vpop.xlane.xlu0 %4995 }
 0xf7a   :  { %9024 = vrcp.f32 %v4996_v41 }
 0xf7b   :  { %v5002_v2 = vpop.xlane.xlu1 %5001 }
 0xf7c   :  { %9026 = vrcp.f32 %v5002_v2 }
 0xf82   :  { %v9021_v26 = vpop.eup %9020 }
 0xf83   :  { %v9023_v10 = vpop.eup %9022  ;;  %v5087_v36 = vmul.f32 %v9021_v26, %v11429_v35 }
 0xf84   :  { %v9025_v15 = vpop.eup %9024  ;;  %v5089_v7 = vmul.f32 %v9023_v10, %v11425_v50 }
 0xf85   :  { %v5088_v31 = vmul.f32 %v9025_v15, %v11435_v18 }
 0xf86   :  { %v9027_v48 = vpop.eup %9026 }
 0xf87   :  { %v5090_v32 = vmul.f32 %v9027_v48, %v11431_v1  ;;  %v5111_v3 = vpack.c.bf16 %v5088_v31, %v5087_v36 }
 0xf88   :  { %v5011_v44 = vpop.xlane.xlu0 %5010 }
 0xf89   :  { %8319 = vmatmul.mubr.msk.bf16.vlgmr.msra.gmra.mrb[152].mxu0 %vm558_vm2, %v5111_v3  ;;  %v5112_v47 = vpack.c.bf16 %v5090_v32, %v5089_v7 }
 0xf8a   :  { %8329 = vmatpush3.bf16.msra.mxu0 %v11333_v4  ;;  %8330 = vmatprep.mubr.msk.bf16.mxu0 %vm9261_vm1, %v12503_v28 }
 0xf8b   :  { %8325 = vmatmul.mubr.msk.bf16.vlgmr.msra.gmra.mrb[152].mxu1 %vm558_vm2, %v5112_v47  ;;  %8340 = vmatprep.subr.bf16.mxu0 %v12503_v28 }
 0xf8c   :  { %v5005_v35 = vpop.xlane.xlu1 %5004  ;;  %8335 = vmatpush3.bf16.msra.mxu1 %v11337_v20  ;;  %8336 = vmatprep.mubr.msk.bf16.mxu1 %vm9261_vm1, %v12503_v28 }
 0xf8d   :  { %9028 = vrcp.f32 %v5005_v35  ;;  %8346 = vmatprep.subr.bf16.mxu1 %v12503_v28 }
 0xf8e   :  { %9030 = vrcp.f32 %v5011_v44  ;;  %v5008_v50 = vpop.xlane.xlu0 %5007 }
 0xf8f   :  { %9032 = vrcp.f32 %v5008_v50 }
 0xf90   :  { %v5014_v4 = vpop.xlane.xlu1 %5013 }
 0xf91   :  { %9034 = vrcp.f32 %v5014_v4 }
 0xf92   :  { %v5023_v1 = vpop.xlane.xlu0 %5022 }
 0xf94   :  { %v5017_v18 = vpop.xlane.xlu1 %5016 }
 0xf95   :  { %9036 = vrcp.f32 %v5017_v18 }
 0xf96   :  { %9038 = vrcp.f32 %v5023_v1  ;;  %v5020_v29 = vpop.xlane.xlu0 %5019 }
 0xf97   :  { %v9029_v13 = vpop.eup %9028  ;;  %9040 = vrcp.f32 %v5020_v29 }
 0xf98   :  { %v9031_v56 = vpop.eup %9030  ;;  %v5026_v20 = vpop.xlane.xlu1 %5025  ;;  %v5091_v25 = vmul.f32 %v9029_v13, %v11454_v51 }
 0xf99   :  { %v9033_v30 = vpop.eup %9032  ;;  %9042 = vrcp.f32 %v5026_v20  ;;  %v5093_v59 = vmul.f32 %v9031_v56, %v11448_v12 }
 0xf9a   :  { %v5092_v39 = vmul.f32 %v9033_v30, %v11461_v5  ;;  %v5035_v62 = vpop.xlane.xlu0 %5034 }
 0xf9b   :  { %v9035_v45 = vpop.eup %9034 }
 0xf9c   :  { %v5094_v0 = vmul.f32 %v9035_v45, %v11457_v11  ;;  %v5029_v52 = vpop.xlane.xlu1 %5028  ;;  %v5113_v40 = vpack.c.bf16 %v5092_v39, %v5091_v25  ;;  %v8627_v45 = vld [vmem:[%s12460_s5 + $0x18] sm:$0xff]  }
 0xf9d   :  { %9044 = vrcp.f32 %v5029_v52 }
 0xf9e   :  { %9046 = vrcp.f32 %v5035_v62  ;;  %v5032_v37 = vpop.xlane.xlu0 %5031  ;;  %8331 = vmatmul.mubr.msk.bf16.vlgmr.msra.gmra.mrb[156].mxu0 %vm558_vm2, %v5113_v40  ;;  %v5114_v60 = vpack.c.bf16 %v5094_v0, %v5093_v59  ;;  %v8626_v62 = vld [vmem:[%s12460_s5 + $0x10] sm:$0xff]  }
 0xf9f   :  { %v9037_v22 = vpop.eup %9036  ;;  %9048 = vrcp.f32 %v5032_v37  ;;  %8341 = vmatpush3.bf16.msra.mxu0 %v11505_v38  ;;  %8342 = vmatprep.mubr.msk.bf16.mxu0 %vm9261_vm1, %v12503_v28 }
 0xfa0   :  { %v9039_v51 = vpop.eup %9038  ;;  %8337 = vmatmul.mubr.msk.bf16.vlgmr.msra.gmra.mrb[156].mxu1 %vm558_vm2, %v5114_v60  ;;  %v5038_v12 = vpop.xlane.xlu1 %5037  ;;  %8352 = vmatprep.subr.bf16.mxu0 %v12503_v28  ;;  %v5095_v5 = vmul.f32 %v9037_v22, %v11473_v49 }
 0xfa1   :  { %v9041_v11 = vpop.eup %9040  ;;  %8347 = vmatpush3.bf16.msra.mxu1 %v11507_v9  ;;  %9050 = vrcp.f32 %v5038_v12  ;;  %8348 = vmatprep.mubr.msk.bf16.mxu1 %vm9261_vm1, %v12503_v28  ;;  %v5097_v57 = vmul.f32 %v9039_v51, %v11466_v21 }
 0xfa2   :  { %v5096_v38 = vmul.f32 %v9041_v11, %v11479_v8  ;;  %8358 = vmatprep.subr.bf16.mxu1 %v12503_v28  ;;  %v5778_v6 = vpop.permute.xlu0 %5777 }
 0xfa3   :  { %v9043_v46 = vpop.eup %9042 }
 0xfa4   :  { %v5098_v55 = vmul.f32 %v9043_v46, %v11475_v63  ;;  %v5115_v43 = vpack.c.bf16 %v5096_v38, %v5095_v5  ;;  %v5825_v16 = vpop.permute.xlu1 %5824 }
 0xfa6   :  { %8343 = vmatmul.mubr.msk.bf16.vlgmr.msra.gmra.mrb[160].mxu0 %vm558_vm2, %v5115_v43  ;;  %v5116_v9 = vpack.c.bf16 %v5098_v55, %v5097_v57 }
 0xfa7   :  { %v9045_v14 = vpop.eup %9044  ;;  %8353 = vmatpush3.bf16.msra.mxu0 %v5778_v6  ;;  %8354 = vmatprep.mubr.msk.bf16.mxu0 %vm9261_vm1, %v12503_v28 }
 0xfa8   :  { %v9047_v49 = vpop.eup %9046  ;;  %8349 = vmatmul.mubr.msk.bf16.vlgmr.msra.gmra.mrb[160].mxu1 %vm558_vm2, %v5116_v9  ;;  %v5099_v21 = vmul.f32 %v9045_v14, %v11489_v58  ;;  %8364 = vmatprep.subr.bf16.mxu0 %v8626_v62 }
 0xfa9   :  { %v9049_v8 = vpop.eup %9048  ;;  %8359 = vmatpush3.bf16.msra.mxu1 %v5825_v16  ;;  %8360 = vmatprep.mubr.msk.bf16.mxu1 %vm9261_vm1, %v12503_v28  ;;  %v5101_v27 = vmul.f32 %v9047_v49, %v11483_v42 }
 0xfaa   :  { %v5100_v63 = vmul.f32 %v9049_v8, %v11495_v53 }
 0xfab   :  { %v9051_v33 = vpop.eup %9050 }
 0xfac   :  { %v5102_v54 = vmul.f32 %v9051_v33, %v11491_v23  ;;  %v5117_v17 = vpack.c.bf16 %v5100_v63, %v5099_v21 }
 0xfae   :  { %8355 = vmatmul.mubr.msk.bf16.vlgmr.msra.gmra.mrb[164].mxu0 %vm558_vm2, %v5117_v17  ;;  %v5118_v34 = vpack.c.bf16 %v5102_v54, %v5101_v27 }
 0xfaf   :  { %8365 = vmatpush3.bf16.msra.mxu0 %v8626_v62 }
 0xfb0   :  { %8361 = vmatmul.mubr.msk.bf16.vlgmr.msra.gmra.mrb[164].mxu1 %vm558_vm2, %v5118_v34  ;;  %8366 = vmatprep.subr.bf16.mxu0 %v8627_v45 }
 0xfb3   :  { %8367 = vmatpush3.bf16.msra.mxu0 %v8627_v45 }
0x1018   :  { %v11609_v24 = vpop.f32.mrb[136].mxu1 }
0x1019   :  { %v8278_v61 = vpop.f32.mrb[137].mxu1 }
0x101a   :  { %v11611_v41 = vpop.f32.mrb[138].mxu1 }
0x101b   :  { %v8279_v28 = vpop.f32.mrb[139].mxu1 }
0x101c   :  { %v11613_v58 = vpop.f32.mrb[136].mxu0 }
0x101d   :  { %v8272_v53 = vpop.f32.mrb[137].mxu0 }
0x101e   :  { %v11615_v2 = vpop.f32.mrb[138].mxu0 }
0x101f   :  { %v8273_v42 = vpop.f32.mrb[139].mxu0 }
0x1020   :  { %v11617_v26 = vpop.f32.mrb[140].mxu1 }
0x1021   :  { %v8290_v23 = vpop.f32.mrb[141].mxu1 }
0x1022   :  { %v11619_v10 = vpop.f32.mrb[142].mxu1 }
0x1023   :  { %v8291_v15 = vpop.f32.mrb[143].mxu1 }
0x1024   :  { %v11621_v36 = vpop.f32.mrb[140].mxu0 }
0x1025   :  { %v8284_v31 = vpop.f32.mrb[141].mxu0 }
0x1026   :  { %v11623_v48 = vpop.f32.mrb[142].mxu0 }
0x1027   :  { %v8285_v7 = vpop.f32.mrb[143].mxu0 }
0x1028   :  { %v11625_v32 = vpop.f32.mrb[144].mxu1 }
0x1029   :  { %v8302_v3 = vpop.f32.mrb[145].mxu1 }
0x102a   :  { %v11627_v47 = vpop.f32.mrb[146].mxu1 }
0x102b   :  { %v8303_v44 = vpop.f32.mrb[147].mxu1 }
0x102c   :  { %v11629_v35 = vpop.f32.mrb[144].mxu0 }
0x102d   :  { %v8296_v50 = vpop.f32.mrb[145].mxu0 }
0x102e   :  { %v11631_v4 = vpop.f32.mrb[146].mxu0 }
0x102f   :  { %v8297_v1 = vpop.f32.mrb[147].mxu0 }
0x1030   :  { %v11633_v18 = vpop.f32.mrb[148].mxu1 }
0x1031   :  { %v8314_v29 = vpop.f32.mrb[149].mxu1 }
0x1032   :  { %v11635_v13 = vpop.f32.mrb[150].mxu1 }
0x1033   :  { %v8315_v56 = vpop.f32.mrb[151].mxu1 }
0x1034   :  { %v11637_v20 = vpop.f32.mrb[148].mxu0 }
0x1035   :  { %v8308_v30 = vpop.f32.mrb[149].mxu0 }
0x1036   :  { %v11639_v25 = vpop.f32.mrb[150].mxu0 }
0x1037   :  { %v8309_v39 = vpop.f32.mrb[151].mxu0 }
0x105c   :  { %v5535_v59 = vpop.f32.mrb[152].mxu0 }
0x105d   :  { %v8320_v0 = vpop.f32.mrb[153].mxu0 }
0x105e   :  { %v5538_v52 = vpop.f32.mrb[154].mxu0  ;;  %v5582_v40 = vpop.f32.mrb[152].mxu1 }
0x105f   :  { %v8574_v37 = vpack.i.bf16 %v5538_v52, %v5535_v59  ;;  %v8321_v60 = vpop.f32.mrb[155].mxu0  ;;  %v8326_v22 = vpop.f32.mrb[153].mxu1 }
0x1060   :  { %v5585_v51 = vpop.f32.mrb[154].mxu1 }
0x1061   :  { %v8579_v12 = vpack.i.bf16 %v5585_v51, %v5582_v40  ;;  %8575 = vrot.lane.b32.xlu0 %v8574_v37, %s9265_s22  ;;  %v8327_v11 = vpop.f32.mrb[155].mxu1 }
0x1063   :  { %8580 = vrot.lane.b32.xlu1 %v8579_v12, %s9265_s22 }
0x1071   :  { %v5629_v5 = vpop.f32.mrb[156].mxu0 }
0x1072   :  { %v8332_v38 = vpop.f32.mrb[157].mxu0 }
0x1073   :  { %v5632_v46 = vpop.f32.mrb[158].mxu0  ;;  %v5676_v57 = vpop.f32.mrb[156].mxu1 }
0x1074   :  { %v8584_v55 = vpack.i.bf16 %v5632_v46, %v5629_v5  ;;  %v8333_v43 = vpop.f32.mrb[159].mxu0  ;;  %v8338_v6 = vpop.f32.mrb[157].mxu1 }
0x1075   :  { %v5679_v9 = vpop.f32.mrb[158].mxu1 }
0x1076   :  { %v8589_v14 = vpack.i.bf16 %v5679_v9, %v5676_v57  ;;  %8585 = vrot.lane.b32.xlu0 %v8584_v55, %s9265_s22  ;;  %v8339_v49 = vpop.f32.mrb[159].mxu1 }
0x1078   :  { %8590 = vrot.lane.b32.xlu1 %v8589_v14, %s9265_s22 }
0x1079   :  { %v5723_v16 = vpop.f32.mrb[160].mxu0 }
0x107a   :  { %v8344_v8 = vpop.f32.mrb[161].mxu0 }
0x107b   :  { %v5726_v21 = vpop.f32.mrb[162].mxu0  ;;  %v5770_v63 = vpop.f32.mrb[160].mxu1 }
0x107c   :  { %v8594_v33 = vpack.i.bf16 %v5726_v21, %v5723_v16  ;;  %v8345_v27 = vpop.f32.mrb[163].mxu0  ;;  %v8350_v54 = vpop.f32.mrb[161].mxu1 }
0x107d   :  { %v5773_v17 = vpop.f32.mrb[162].mxu1 }
0x107e   :  { %v8599_v34 = vpack.i.bf16 %v5773_v17, %v5770_v63  ;;  %8595 = vrot.lane.b32.xlu0 %v8594_v33, %s9265_s22  ;;  %v8351_v61 = vpop.f32.mrb[163].mxu1 }
0x1080   :  { %8600 = vrot.lane.b32.xlu1 %v8599_v34, %s9265_s22 }
0x1081   :  { %v5817_v28 = vpop.f32.mrb[164].mxu0 }
0x1082   :  { %v8356_v53 = vpop.f32.mrb[165].mxu0 }
0x1083   :  { %v5820_v42 = vpop.f32.mrb[166].mxu0  ;;  %v5864_v23 = vpop.f32.mrb[164].mxu1  ;;  %v12504_v53 = vld [vmem:[#allocation2_spill] sm:$0xff] }
0x1084   :  { %v8604_v15 = vpack.i.bf16 %v5820_v42, %v5817_v28  ;;  %v8357_v31 = vpop.f32.mrb[167].mxu0  ;;  %v8362_v7 = vpop.f32.mrb[165].mxu1 }
0x1085   :  { %v5867_v3 = vpop.f32.mrb[166].mxu1 }
0x1086   :  { %v8609_v44 = vpack.i.bf16 %v5867_v3, %v5864_v23  ;;  %8605 = vrot.lane.b32.xlu0 %v8604_v15, %s9265_s22  ;;  %v8363_v50 = vpop.f32.mrb[167].mxu1  ;;  %v12505_v15 = vld [vmem:[#allocation3_spill] sm:$0xff]  ;;  %v12506_v3 = vld [vmem:[#allocation4_spill] sm:$0xff] }
0x1088   :  { %8610 = vrot.lane.b32.xlu1 %v8609_v44, %s9265_s22 }
0x10d3   :  { %v8576_v1 = vpop.permute.xlu0 %8575 }
0x10d4   :  { %v8578_v29 = vunpack.i.h.bf16 %v8576_v1  ;;  %v8577_v56 = vunpack.i.l.bf16 %v8576_v1 }
0x10d5   :  { %v8581_v30 = vpop.permute.xlu1 %8580 }
0x10d6   :  { %v5936_v39 = vsel %vm558_vm2, %v11615_v2, %v8578_v29  ;;  %v5935_v62 = vsel %vm558_vm2, %v11613_v58, %v8577_v56  ;;  %v8583_v45 = vunpack.i.h.bf16 %v8581_v30  ;;  %v8582_v59 = vunpack.i.l.bf16 %v8581_v30 }
0x10d7   :  { %v5951_v0 = vpack.c.bf16 %v5936_v39, %v5935_v62 }
0x10d8   :  { %v5938_v52 = vsel %vm558_vm2, %v11611_v41, %v8583_v45  ;;  %v5937_v40 = vsel %vm558_vm2, %v11609_v24, %v8582_v59  ;;  %v12507_v45 = vld [vmem:[#allocation6_spill] sm:$0xff] }
0x10d9   :  { %v5952_v37 = vpack.c.bf16 %v5938_v52, %v5937_v40  ;;  %8368 = vmatprep.mubr.msk.bf16.mxu0 %vm69_vm0, %v5951_v0  ;;  %v12508_v0 = vld [vmem:[#allocation5_spill] sm:$0xff] }
0x10db   :  { %8369 = vmatmul.mubr.msk.bf16.vlgmr.msra.gmra.mrb[168].mxu0 %vm69_vm0, %v5952_v37 }
0x10e8   :  { %v8586_v60 = vpop.permute.xlu0 %8585 }
0x10e9   :  { %v8588_v22 = vunpack.i.h.bf16 %v8586_v60  ;;  %v8587_v2 = vunpack.i.l.bf16 %v8586_v60 }
0x10ea   :  { %v8591_v51 = vpop.permute.xlu1 %8590 }
0x10eb   :  { %v5940_v58 = vsel %vm558_vm2, %v11623_v48, %v8588_v22  ;;  %v5939_v12 = vsel %vm558_vm2, %v11621_v36, %v8587_v2  ;;  %v8593_v11 = vunpack.i.h.bf16 %v8591_v51  ;;  %v8592_v41 = vunpack.i.l.bf16 %v8591_v51  ;;  %v12509_v22 = vld [vmem:[#allocation8_spill] sm:$0xff]  ;;  %v12510_v51 = vld [vmem:[#allocation7_spill] sm:$0xff] }
0x10ec   :  { %v5953_v5 = vpack.c.bf16 %v5940_v58, %v5939_v12 }
0x10ed   :  { %v5942_v24 = vsel %vm558_vm2, %v11619_v10, %v8593_v11  ;;  %v5941_v38 = vsel %vm558_vm2, %v11617_v26, %v8592_v41 }
0x10ee   :  { %v5954_v46 = vpack.c.bf16 %v5942_v24, %v5941_v38  ;;  %8372 = vmatprep.mubr.msk.bf16.mxu0 %vm69_vm0, %v5953_v5 }
0x10f0   :  { %v8596_v57 = vpop.permute.xlu0 %8595  ;;  %8373 = vmatmul.mubr.msk.bf16.gmra.mrb[172].mxu0 %vm69_vm0, %v5954_v46 }
0x10f1   :  { %v8598_v55 = vunpack.i.h.bf16 %v8596_v57  ;;  %v8597_v48 = vunpack.i.l.bf16 %v8596_v57  ;;  %v12511_v57 = vld [vmem:[#allocation10_spill] sm:$0xff] }
0x10f2   :  { %v8601_v43 = vpop.permute.xlu1 %8600 }
0x10f3   :  { %v5944_v36 = vsel %vm558_vm2, %v11631_v4, %v8598_v55  ;;  %v5943_v6 = vsel %vm558_vm2, %v11629_v35, %v8597_v48  ;;  %v8603_v9 = vunpack.i.h.bf16 %v8601_v43  ;;  %v8602_v10 = vunpack.i.l.bf16 %v8601_v43  ;;  %v12512_v48 = vld [vmem:[#allocation9_spill] sm:$0xff] }
0x10f4   :  { %v5955_v14 = vpack.c.bf16 %v5944_v36, %v5943_v6 }
0x10f5   :  { %v5946_v26 = vsel %vm558_vm2, %v11627_v47, %v8603_v9  ;;  %v5945_v49 = vsel %vm558_vm2, %v11625_v32, %v8602_v10 }
0x10f6   :  { %v5956_v16 = vpack.c.bf16 %v5946_v26, %v5945_v49  ;;  %8376 = vmatprep.mubr.msk.bf16.mxu0 %vm69_vm0, %v5955_v14  ;;  %v12513_v14 = vld [vmem:[#allocation12_spill] sm:$0xff]  ;;  %v12514_v49 = vld [vmem:[#allocation11_spill] sm:$0xff] }
0x10f8   :  { %v8606_v8 = vpop.permute.xlu0 %8605  ;;  %8377 = vmatmul.mubr.msk.bf16.gmra.mrb[176].mxu0 %vm69_vm0, %v5956_v16 }
0x10f9   :  { %v8608_v21 = vunpack.i.h.bf16 %v8606_v8  ;;  %v8607_v4 = vunpack.i.l.bf16 %v8606_v8 }
0x10fa   :  { %v8611_v63 = vpop.permute.xlu1 %8610 }
0x10fb   :  { %v5948_v35 = vsel %vm558_vm2, %v11639_v25, %v8608_v21  ;;  %v5947_v33 = vsel %vm558_vm2, %v11637_v20, %v8607_v4  ;;  %v8613_v27 = vunpack.i.h.bf16 %v8611_v63  ;;  %v8612_v47 = vunpack.i.l.bf16 %v8611_v63  ;;  %v11698_v25 = vld [vmem:[%s12461_s6 + $0x1] ss:$0 sm:$0xff] }
0x10fc   :  { %v5957_v54 = vpack.c.bf16 %v5948_v35, %v5947_v33 }
0x10fd   :  { %v5950_v32 = vsel %vm558_vm2, %v11635_v13, %v8613_v27  ;;  %v5949_v17 = vsel %vm558_vm2, %v11633_v18, %v8612_v47 }
0x10fe   :  { %v5958_v34 = vpack.c.bf16 %v5950_v32, %v5949_v17  ;;  %8380 = vmatprep.mubr.msk.bf16.mxu0 %vm69_vm0, %v5957_v54  ;;  %v12515_v54 = vld [vmem:[#allocation14_spill] sm:$0xff]  ;;  %v12516_v17 = vld [vmem:[#allocation13_spill] sm:$0xff] }
0x1100   :  { %8381 = vmatmul.mubr.msk.bf16.gmra.mrb[180].mxu0 %vm69_vm0, %v5958_v34 }
0x11ae   :  { %v8370_v61 = vpop.f32.mrb[168].mxu0 }
0x11af   :  { %v6034_v20 = vpop.f32.mrb[169].mxu0  ;;  %v6099_v28 = vadd.f32 %v8370_v61, %v10733_v19 }
0x11b0   :  { %v6097_v42 = vadd.f32 %v6034_v20, %v12504_v53  ;;  %v8371_v13 = vpop.f32.mrb[170].mxu0 }
0x11b1   :  { %v6037_v23 = vpop.f32.mrb[171].mxu0  ;;  %v11707_v7 = vadd.f32 %v11698_v25, %v6099_v28  ;;  %v6100_v44 = vadd.f32 %v8371_v13, %v12506_v3 }
0x11b2   :  { %v11703_v18 = vadd.f32 %v11698_v25, %v6097_v42  ;;  %v6098_v31 = vadd.f32 %v6037_v23, %v12505_v15  ;;  %v12517_v42 = vld [vmem:[#allocation16_spill] sm:$0xff]  ;;  %v12518_v23 = vld [vmem:[#allocation15_spill] sm:$0xff] }
0x11b3   :  { %v11718_v29 = vadd.f32 %v11698_v25, %v6100_v44  ;;  %v6147_v56 = vsel %vm69_vm0, %v11707_v7, 0.0 }
0x11b4   :  { %v11711_v50 = vadd.f32 %v11698_v25, %v6098_v31  ;;  %v6141_v19 = vsel %vm69_vm0, %v11703_v18, 0.0 }
0x11b5   :  { %6142 = vadd.xlane.f32.xlu0 %v6141_v19  ;;  %v6150_v30 = vsel %vm69_vm0, %v11718_v29, 0.0 }
0x11b6   :  { %v6144_v1 = vsel %vm69_vm0, %v11711_v50, 0.0 }
0x11b7   :  { %6145 = vadd.xlane.f32.xlu1 %v6144_v1 }
0x11b9   :  { %6148 = vadd.xlane.f32.xlu0 %v6147_v56 }
0x11bd   :  { %6151 = vadd.xlane.f32.xlu0 %v6150_v30 }
0x11c3   :  { %v8374_v39 = vpop.f32.mrb[172].mxu0 }
0x11c4   :  { %v6050_v62 = vpop.f32.mrb[173].mxu0  ;;  %v6103_v59 = vadd.f32 %v8374_v39, %v12507_v45 }
0x11c5   :  { %v6101_v52 = vadd.f32 %v6050_v62, %v12508_v0  ;;  %v8375_v40 = vpop.f32.mrb[174].mxu0 }
0x11c6   :  { %v6053_v37 = vpop.f32.mrb[175].mxu0  ;;  %v6104_v2 = vadd.f32 %v8375_v40, %v12509_v22  ;;  %v11732_v12 = vadd.f32 %v11698_v25, %v6103_v59 }
0x11c7   :  { %v11727_v60 = vadd.f32 %v11698_v25, %v6101_v52  ;;  %v6102_v58 = vadd.f32 %v6053_v37, %v12510_v51 }
0x11c8   :  { %v11740_v5 = vadd.f32 %v11698_v25, %v6104_v2  ;;  %v6159_v6 = vsel %vm69_vm0, %v11732_v12, 0.0 }
0x11c9   :  { %v11735_v11 = vadd.f32 %v11698_v25, %v6102_v58  ;;  %v6153_v41 = vsel %vm69_vm0, %v11727_v60, 0.0 }
0x11ca   :  { %6154 = vadd.xlane.f32.xlu0 %v6153_v41  ;;  %v6162_v8 = vsel %vm69_vm0, %v11740_v5, 0.0 }
0x11cb   :  { %v8378_v24 = vpop.f32.mrb[176].mxu0  ;;  %v6156_v38 = vsel %vm69_vm0, %v11735_v11, 0.0 }
0x11cc   :  { %6157 = vadd.xlane.f32.xlu1 %v6156_v38  ;;  %v6066_v46 = vpop.f32.mrb[177].mxu0  ;;  %v6107_v55 = vadd.f32 %v8378_v24, %v12511_v57 }
0x11cd   :  { %v6105_v43 = vadd.f32 %v6066_v46, %v12512_v48  ;;  %v8379_v36 = vpop.f32.mrb[178].mxu0 }
0x11ce   :  { %6160 = vadd.xlane.f32.xlu0 %v6159_v6  ;;  %v6069_v9 = vpop.f32.mrb[179].mxu0  ;;  %v6108_v26 = vadd.f32 %v8379_v36, %v12513_v14  ;;  %v11756_v21 = vadd.f32 %v11698_v25, %v6107_v55 }
0x11cf   :  { %v11749_v10 = vadd.f32 %v11698_v25, %v6105_v43  ;;  %v6106_v16 = vadd.f32 %v6069_v9, %v12514_v49 }
0x11d0   :  { %6163 = vadd.xlane.f32.xlu1 %v6162_v8  ;;  %v11764_v35 = vadd.f32 %v11698_v25, %v6108_v26  ;;  %v6171_v20 = vsel %vm69_vm0, %v11756_v21, 0.0 }
0x11d1   :  { %v11759_v4 = vadd.f32 %v11698_v25, %v6106_v16  ;;  %v6165_v63 = vsel %vm69_vm0, %v11749_v10, 0.0 }
0x11d2   :  { %6166 = vadd.xlane.f32.xlu0 %v6165_v63  ;;  %v6174_v31 = vsel %vm69_vm0, %v11764_v35, 0.0 }
0x11d3   :  { %v8382_v33 = vpop.f32.mrb[180].mxu0  ;;  %v6168_v27 = vsel %vm69_vm0, %v11759_v4, 0.0 }
0x11d4   :  { %6169 = vadd.xlane.f32.xlu1 %v6168_v27  ;;  %v6082_v47 = vpop.f32.mrb[181].mxu0  ;;  %v6111_v32 = vadd.f32 %v8382_v33, %v12515_v54 }
0x11d5   :  { %v6109_v34 = vadd.f32 %v6082_v47, %v12516_v17  ;;  %v8383_v61 = vpop.f32.mrb[182].mxu0 }
0x11d6   :  { %6172 = vadd.xlane.f32.xlu0 %v6171_v20  ;;  %v6085_v28 = vpop.f32.mrb[183].mxu0  ;;  %v6112_v13 = vadd.f32 %v8383_v61, %v12517_v42  ;;  %v11780_v3 = vadd.f32 %v11698_v25, %v6111_v32 }
0x11d7   :  { %v11773_v53 = vadd.f32 %v11698_v25, %v6109_v34  ;;  %v6110_v15 = vadd.f32 %v6085_v28, %v12518_v23 }
0x11d8   :  { %6175 = vadd.xlane.f32.xlu1 %v6174_v31  ;;  %v11788_v1 = vadd.f32 %v11698_v25, %v6112_v13  ;;  %v6183_v30 = vsel %vm69_vm0, %v11780_v3, 0.0 }
0x11d9   :  { %v11783_v44 = vadd.f32 %v11698_v25, %v6110_v15  ;;  %v6177_v19 = vsel %vm69_vm0, %v11773_v53, 0.0 }
0x11da   :  { %6178 = vadd.xlane.f32.xlu0 %v6177_v19  ;;  %v6186_v39 = vsel %vm69_vm0, %v11788_v1, 0.0 }
0x11db   :  { %v6180_v56 = vsel %vm69_vm0, %v11783_v44, 0.0 }
0x11dc   :  { %6181 = vadd.xlane.f32.xlu1 %v6180_v56 }
0x11de   :  { %6184 = vadd.xlane.f32.xlu0 %v6183_v30 }
0x11e0   :  { %6187 = vadd.xlane.f32.xlu1 %v6186_v39 }
0x1242   :  { %v6143_v62 = vpop.xlane.xlu0 %6142 }
0x1243   :  { %v6189_v45 = vmul.f32 0.03125, %v6143_v62 }
0x1244   :  { %v6146_v59 = vpop.xlane.xlu1 %6145 }
0x1245   :  { %v11797_v0 = vsub.f32 %v11703_v18, %v6189_v45  ;;  %v6190_v25 = vmul.f32 0.03125, %v6146_v59 }
0x1246   :  { %v6149_v52 = vpop.xlane.xlu0 %6148 }
0x1247   :  { %v11800_v40 = vsub.f32 %v11711_v50, %v6190_v25  ;;  %v6191_v37 = vmul.f32 0.03125, %v6149_v52  ;;  %v6221_v22 = vmul.f32 %v11797_v0, %v11797_v0 }
0x1249   :  { %v11805_v2 = vsub.f32 %v11707_v7, %v6191_v37  ;;  %v6237_v51 = vsel %vm69_vm0, %v6221_v22, 0.0  ;;  %v6222_v58 = vmul.f32 %v11800_v40, %v11800_v40 }
0x124a   :  { %v6152_v41 = vpop.xlane.xlu0 %6151  ;;  %6238 = vadd.xlane.f32.xlu0 %v6237_v51 }
0x124b   :  { %v6192_v24 = vmul.f32 0.03125, %v6152_v41  ;;  %v6240_v38 = vsel %vm69_vm0, %v6222_v58, 0.0  ;;  %v6223_v46 = vmul.f32 %v11805_v2, %v11805_v2 }
0x124c   :  { %6241 = vadd.xlane.f32.xlu1 %v6240_v38 }
0x124d   :  { %v11814_v57 = vsub.f32 %v11718_v29, %v6192_v24  ;;  %v6243_v55 = vsel %vm69_vm0, %v6223_v46, 0.0 }
0x124e   :  { %6244 = vadd.xlane.f32.xlu0 %v6243_v55 }
0x124f   :  { %v6224_v48 = vmul.f32 %v11814_v57, %v11814_v57 }
0x1251   :  { %v6246_v43 = vsel %vm69_vm0, %v6224_v48, 0.0 }
0x1252   :  { %6247 = vadd.xlane.f32.xlu1 %v6246_v43 }
0x1257   :  { %v6155_v36 = vpop.xlane.xlu0 %6154 }
0x1258   :  { %v6193_v6 = vmul.f32 0.03125, %v6155_v36 }
0x1259   :  { %v6158_v9 = vpop.xlane.xlu1 %6157 }
0x125a   :  { %v11821_v14 = vsub.f32 %v11727_v60, %v6193_v6  ;;  %v6194_v26 = vmul.f32 0.03125, %v6158_v9 }
0x125b   :  { %v6161_v49 = vpop.xlane.xlu0 %6160 }
0x125c   :  { %v11824_v16 = vsub.f32 %v11735_v11, %v6194_v26  ;;  %v6195_v8 = vmul.f32 0.03125, %v6161_v49  ;;  %v6225_v63 = vmul.f32 %v11821_v14, %v11821_v14 }
0x125d   :  { %v6164_v33 = vpop.xlane.xlu1 %6163 }
0x125e   :  { %v11829_v27 = vsub.f32 %v11732_v12, %v6195_v8  ;;  %v6196_v47 = vmul.f32 0.03125, %v6164_v33  ;;  %v6249_v54 = vsel %vm69_vm0, %v6225_v63, 0.0  ;;  %v6226_v32 = vmul.f32 %v11824_v16, %v11824_v16 }
0x125f   :  { %v6167_v17 = vpop.xlane.xlu0 %6166  ;;  %6250 = vadd.xlane.f32.xlu0 %v6249_v54 }
0x1260   :  { %v11835_v34 = vsub.f32 %v11740_v5, %v6196_v47  ;;  %v6197_v61 = vmul.f32 0.03125, %v6167_v17  ;;  %v6252_v20 = vsel %vm69_vm0, %v6226_v32, 0.0  ;;  %v6227_v28 = vmul.f32 %v11829_v27, %v11829_v27 }
0x1261   :  { %v6170_v42 = vpop.xlane.xlu1 %6169  ;;  %6253 = vadd.xlane.f32.xlu1 %v6252_v20 }
0x1262   :  { %v11841_v13 = vsub.f32 %v11749_v10, %v6197_v61  ;;  %v6198_v23 = vmul.f32 0.03125, %v6170_v42  ;;  %v6255_v15 = vsel %vm69_vm0, %v6227_v28, 0.0  ;;  %v6228_v31 = vmul.f32 %v11835_v34, %v11835_v34 }
0x1263   :  { %v6173_v19 = vpop.xlane.xlu0 %6172  ;;  %6256 = vadd.xlane.f32.xlu0 %v6255_v15  ;;  %v8629_v15 = vld [vmem:[%s12462_s7 + $0x18] sm:$0xff]  }
0x1264   :  { %v11847_v56 = vsub.f32 %v11759_v4, %v6198_v23  ;;  %v6199_v30 = vmul.f32 0.03125, %v6173_v19  ;;  %v6258_v39 = vsel %vm69_vm0, %v6228_v31, 0.0  ;;  %v6229_v62 = vmul.f32 %v11841_v13, %v11841_v13  ;;  %v8628_v23 = vld [vmem:[%s12462_s7 + $0x10] sm:$0xff]  }
0x1265   :  { %v6176_v45 = vpop.xlane.xlu1 %6175  ;;  %6259 = vadd.xlane.f32.xlu1 %v6258_v39  ;;  %8384 = vmatprep.subr.bf16.mxu1 %v8628_v23 }
0x1266   :  { %v11853_v59 = vsub.f32 %v11756_v21, %v6199_v30  ;;  %v6200_v25 = vmul.f32 0.03125, %v6176_v45  ;;  %v6261_v52 = vsel %vm69_vm0, %v6229_v62, 0.0  ;;  %v6230_v37 = vmul.f32 %v11847_v56, %v11847_v56  ;;  %8385 = vmatpush3.bf16.msra.mxu1 %v8628_v23 }
0x1267   :  { %6262 = vadd.xlane.f32.xlu0 %v6261_v52  ;;  %v6179_v22 = vpop.xlane.xlu0 %6178  ;;  %8386 = vmatprep.subr.bf16.mxu1 %v8629_v15 }
0x1268   :  { %v11859_v51 = vsub.f32 %v11764_v35, %v6200_v25  ;;  %v6201_v58 = vmul.f32 0.03125, %v6179_v22  ;;  %v6264_v41 = vsel %vm69_vm0, %v6230_v37, 0.0  ;;  %v6231_v24 = vmul.f32 %v11853_v59, %v11853_v59 }
0x1269   :  { %6265 = vadd.xlane.f32.xlu1 %v6264_v41  ;;  %v6182_v38 = vpop.xlane.xlu1 %6181 }
0x126a   :  { %v11865_v46 = vsub.f32 %v11773_v53, %v6201_v58  ;;  %v6202_v55 = vmul.f32 0.03125, %v6182_v38  ;;  %v6267_v48 = vsel %vm69_vm0, %v6231_v24, 0.0  ;;  %v6232_v43 = vmul.f32 %v11859_v51, %v11859_v51  ;;  %8387 = vmatpush3.bf16.msra.mxu1 %v8629_v15  ;;  %v11901_v38 = vld [vmem:[%s12457_s1 + $0x3] ss:$0 sm:$0xff] }
0x126b   :  { %6268 = vadd.xlane.f32.xlu0 %v6267_v48  ;;  %v6185_v36 = vpop.xlane.xlu0 %6184 }
0x126c   :  { %v11871_v6 = vsub.f32 %v11783_v44, %v6202_v55  ;;  %v6203_v9 = vmul.f32 0.03125, %v6185_v36  ;;  %v6270_v26 = vsel %vm69_vm0, %v6232_v43, 0.0  ;;  %v6233_v49 = vmul.f32 %v11865_v46, %v11865_v46 }
0x126d   :  { %6271 = vadd.xlane.f32.xlu1 %v6270_v26  ;;  %v6188_v8 = vpop.xlane.xlu1 %6187  ;;  %v11909_v26 = vld [vmem:[%s12458_s2 + $0x3] ss:$0 sm:$0xff] }
0x126e   :  { %v11877_v63 = vsub.f32 %v11780_v3, %v6203_v9  ;;  %v6204_v33 = vmul.f32 0.03125, %v6188_v8  ;;  %v6273_v47 = vsel %vm69_vm0, %v6233_v49, 0.0  ;;  %v6234_v54 = vmul.f32 %v11871_v6, %v11871_v6 }
0x126f   :  { %6274 = vadd.xlane.f32.xlu0 %v6273_v47 }
0x1270   :  { %v11883_v32 = vsub.f32 %v11788_v1, %v6204_v33  ;;  %v6276_v17 = vsel %vm69_vm0, %v6234_v54, 0.0  ;;  %v6235_v61 = vmul.f32 %v11877_v63, %v11877_v63 }
0x1271   :  { %6277 = vadd.xlane.f32.xlu1 %v6276_v17 }
0x1272   :  { %v6279_v20 = vsel %vm69_vm0, %v6235_v61, 0.0  ;;  %v6236_v28 = vmul.f32 %v11883_v32, %v11883_v32 }
0x1273   :  { %6280 = vadd.xlane.f32.xlu0 %v6279_v20 }
0x1274   :  { %v6282_v42 = vsel %vm69_vm0, %v6236_v28, 0.0 }
0x1275   :  { %6283 = vadd.xlane.f32.xlu1 %v6282_v42 }
0x12d7   :  { %v6239_v31 = vpop.xlane.xlu0 %6238 }
0x12d8   :  { %v6285_v19 = vmul.f32 0.03125, %v6239_v31 }
0x12d9   :  { %v6242_v30 = vpop.xlane.xlu1 %6241 }
0x12da   :  { %v6301_v39 = vadd.f32 1e-05, %v6285_v19  ;;  %v6286_v62 = vmul.f32 0.03125, %v6242_v30 }
0x12db   :  { %v6245_v45 = vpop.xlane.xlu0 %6244 }
0x12dc   :  { %9052 = vrsqrt.f32 %v6301_v39  ;;  %v6302_v25 = vadd.f32 1e-05, %v6286_v62  ;;  %v6287_v52 = vmul.f32 0.03125, %v6245_v45 }
0x12de   :  { %9054 = vrsqrt.f32 %v6302_v25  ;;  %v6303_v37 = vadd.f32 1e-05, %v6287_v52 }
0x12df   :  { %v6248_v22 = vpop.xlane.xlu1 %6247 }
0x12e0   :  { %9056 = vrsqrt.f32 %v6303_v37  ;;  %v6288_v58 = vmul.f32 0.03125, %v6248_v22 }
0x12e2   :  { %v6304_v41 = vadd.f32 1e-05, %v6288_v58 }
0x12e4   :  { %9058 = vrsqrt.f32 %v6304_v41 }
0x12e6   :  { %v9053_v24 = vpop.eup %9052 }
0x12e7   :  { %v6333_v55 = vmul.f32 %v9053_v24, %v11797_v0 }
0x12e8   :  { %v9055_v48 = vpop.eup %9054 }
0x12e9   :  { %v6334_v43 = vmul.f32 %v9055_v48, %v11800_v40  ;;  %v6355_v36 = vmul.f32 %v11901_v38, %v6333_v55 }
0x12ea   :  { %v9057_v9 = vpop.eup %9056 }
0x12eb   :  { %v6335_v49 = vmul.f32 %v9057_v9, %v11805_v2  ;;  %v6356_v8 = vmul.f32 %v11901_v38, %v6334_v43  ;;  %v6377_v54 = vadd.f32 %v11909_v26, %v6355_v36 }
0x12ec   :  { %v6251_v33 = vpop.xlane.xlu0 %6250 }
0x12ed   :  { %v6289_v47 = vmul.f32 0.03125, %v6251_v33  ;;  %v6378_v0 = vadd.f32 %v11909_v26, %v6356_v8  ;;  %v6357_v40 = vmul.f32 %v11901_v38, %v6335_v49 }
0x12ee   :  { %v9059_v17 = vpop.eup %9058  ;;  %v6254_v61 = vpop.xlane.xlu1 %6253 }
0x12ef   :  { %v6336_v20 = vmul.f32 %v9059_v17, %v11814_v57  ;;  %v6305_v28 = vadd.f32 1e-05, %v6289_v47  ;;  %v6290_v42 = vmul.f32 0.03125, %v6254_v61  ;;  %v6393_v23 = vpack.c.bf16 %v6378_v0, %v6377_v54 }
0x12f0   :  { %v6257_v15 = vpop.xlane.xlu0 %6256  ;;  %v6379_v39 = vadd.f32 %v11909_v26, %v6357_v40 }
0x12f1   :  { %v6358_v2 = vmul.f32 %v11901_v38, %v6336_v20  ;;  %9060 = vrsqrt.f32 %v6305_v28  ;;  %v6306_v31 = vadd.f32 1e-05, %v6290_v42  ;;  %v6291_v19 = vmul.f32 0.03125, %v6257_v15  ;;  %8388 = vmatprep.mubr.msk.bf16.mxu1 %vm69_vm0, %v6393_v23 }
0x12f2   :  { %v6260_v30 = vpop.xlane.xlu1 %6259 }
0x12f3   :  { %9062 = vrsqrt.f32 %v6306_v31  ;;  %v6307_v62 = vadd.f32 1e-05, %v6291_v19  ;;  %v6292_v45 = vmul.f32 0.03125, %v6260_v30  ;;  %v6380_v25 = vadd.f32 %v11909_v26, %v6358_v2 }
0x12f4   :  { %v6263_v57 = vpop.xlane.xlu0 %6262 }
0x12f5   :  { %9064 = vrsqrt.f32 %v6307_v62  ;;  %v6308_v52 = vadd.f32 1e-05, %v6292_v45  ;;  %v6293_v37 = vmul.f32 0.03125, %v6263_v57  ;;  %v6394_v22 = vpack.c.bf16 %v6380_v25, %v6379_v39 }
0x12f6   :  { %v6266_v58 = vpop.xlane.xlu1 %6265 }
0x12f7   :  { %9066 = vrsqrt.f32 %v6308_v52  ;;  %v6309_v41 = vadd.f32 1e-05, %v6293_v37  ;;  %v6294_v24 = vmul.f32 0.03125, %v6266_v58  ;;  %8389 = vmatmul.mubr.msk.bf16.vlgmr.msra.gmra.mrb[168].mxu1 %vm69_vm0, %v6394_v22 }
0x12f8   :  { %v6269_v55 = vpop.xlane.xlu0 %6268 }
0x12f9   :  { %9068 = vrsqrt.f32 %v6309_v41  ;;  %v6310_v48 = vadd.f32 1e-05, %v6294_v24  ;;  %v6295_v43 = vmul.f32 0.03125, %v6269_v55 }
0x12fa   :  { %v6272_v36 = vpop.xlane.xlu1 %6271 }
0x12fb   :  { %v9061_v9 = vpop.eup %9060  ;;  %9070 = vrsqrt.f32 %v6310_v48  ;;  %v6311_v49 = vadd.f32 1e-05, %v6295_v43  ;;  %v6296_v8 = vmul.f32 0.03125, %v6272_v36 }
0x12fc   :  { %v6337_v33 = vmul.f32 %v9061_v9, %v11821_v14  ;;  %v6275_v47 = vpop.xlane.xlu0 %6274 }
0x12fd   :  { %v9063_v54 = vpop.eup %9062  ;;  %9072 = vrsqrt.f32 %v6311_v49  ;;  %v6312_v0 = vadd.f32 1e-05, %v6296_v8  ;;  %v6297_v17 = vmul.f32 0.03125, %v6275_v47 }
0x12fe   :  { %v6338_v40 = vmul.f32 %v9063_v54, %v11824_v16  ;;  %v6278_v61 = vpop.xlane.xlu1 %6277  ;;  %v6359_v20 = vmul.f32 %v11901_v38, %v6337_v33 }
0x12ff   :  { %v9065_v28 = vpop.eup %9064  ;;  %9074 = vrsqrt.f32 %v6312_v0  ;;  %v6313_v42 = vadd.f32 1e-05, %v6297_v17  ;;  %v6298_v23 = vmul.f32 0.03125, %v6278_v61 }
0x1300   :  { %v6339_v15 = vmul.f32 %v9065_v28, %v11829_v27  ;;  %v6281_v2 = vpop.xlane.xlu0 %6280  ;;  %v6360_v31 = vmul.f32 %v11901_v38, %v6338_v40  ;;  %v6381_v16 = vadd.f32 %v11909_v26, %v6359_v20 }
0x1301   :  { %v9067_v14 = vpop.eup %9066  ;;  %9076 = vrsqrt.f32 %v6313_v42  ;;  %v6314_v19 = vadd.f32 1e-05, %v6298_v23  ;;  %v6299_v30 = vmul.f32 0.03125, %v6281_v2 }
0x1302   :  { %v6340_v39 = vmul.f32 %v9067_v14, %v11835_v34  ;;  %v6284_v62 = vpop.xlane.xlu1 %6283  ;;  %v6382_v45 = vadd.f32 %v11909_v26, %v6360_v31  ;;  %v6361_v25 = vmul.f32 %v11901_v38, %v6339_v15 }
0x1303   :  { %v9069_v57 = vpop.eup %9068  ;;  %9078 = vrsqrt.f32 %v6314_v19  ;;  %v6315_v52 = vadd.f32 1e-05, %v6299_v30  ;;  %v6300_v27 = vmul.f32 0.03125, %v6284_v62 }
0x1304   :  { %v6341_v37 = vmul.f32 %v9069_v57, %v11841_v13  ;;  %v6395_v22 = vpack.c.bf16 %v6382_v45, %v6381_v16  ;;  %v6362_v58 = vmul.f32 %v11901_v38, %v6340_v39  ;;  %v6383_v55 = vadd.f32 %v11909_v26, %v6361_v25  ;;  %v8631_v25 = vld [vmem:[%s12463_s9 + $0x28] sm:$0xff]   ;;  %v11979_v57 = vld [vmem:[%s12464_s8 + $0x1] ss:$0 sm:$0xff] }
0x1305   :  { %v9071_v41 = vpop.eup %9070  ;;  %9080 = vrsqrt.f32 %v6315_v52  ;;  %v6316_v24 = vadd.f32 1e-05, %v6300_v27 }
0x1306   :  { %v6342_v34 = vmul.f32 %v9071_v41, %v11847_v56  ;;  %8392 = vmatprep.mubr.msk.bf16.mxu1 %vm69_vm0, %v6395_v22  ;;  %v6384_v48 = vadd.f32 %v11909_v26, %v6362_v58  ;;  %v6363_v43 = vmul.f32 %v11901_v38, %v6341_v37 }
0x1307   :  { %v9073_v36 = vpop.eup %9072  ;;  %9082 = vrsqrt.f32 %v6316_v24 }
0x1308   :  { %v6343_v13 = vmul.f32 %v9073_v36, %v11853_v59  ;;  %v6396_v9 = vpack.c.bf16 %v6384_v48, %v6383_v55  ;;  %v6364_v49 = vmul.f32 %v11901_v38, %v6342_v34  ;;  %v6385_v56 = vadd.f32 %v11909_v26, %v6363_v43 }
0x1309   :  { %v9075_v8 = vpop.eup %9074 }
0x130a   :  { %v6344_v33 = vmul.f32 %v9075_v8, %v11859_v51  ;;  %8393 = vmatmul.mubr.msk.bf16.gmra.mrb[172].mxu1 %vm69_vm0, %v6396_v9  ;;  %v6386_v47 = vadd.f32 %v11909_v26, %v6364_v49  ;;  %v6365_v54 = vmul.f32 %v11901_v38, %v6343_v13 }
0x130b   :  { %v9077_v0 = vpop.eup %9076 }
0x130c   :  { %v6345_v17 = vmul.f32 %v9077_v0, %v11865_v46  ;;  %v6397_v40 = vpack.c.bf16 %v6386_v47, %v6385_v56  ;;  %v6366_v59 = vmul.f32 %v11901_v38, %v6344_v33  ;;  %v6387_v51 = vadd.f32 %v11909_v26, %v6365_v54 }
0x130d   :  { %v9079_v61 = vpop.eup %9078 }
0x130e   :  { %v6346_v20 = vmul.f32 %v9079_v61, %v11871_v6  ;;  %8396 = vmatprep.mubr.msk.bf16.mxu1 %vm69_vm0, %v6397_v40  ;;  %v6388_v28 = vadd.f32 %v11909_v26, %v6366_v59  ;;  %v6367_v42 = vmul.f32 %v11901_v38, %v6345_v17 }
0x130f   :  { %v9081_v23 = vpop.eup %9080 }
0x1310   :  { %v6347_v15 = vmul.f32 %v9081_v23, %v11877_v63  ;;  %v6398_v2 = vpack.c.bf16 %v6388_v28, %v6387_v51  ;;  %v6368_v46 = vmul.f32 %v11901_v38, %v6346_v20  ;;  %v6389_v6 = vadd.f32 %v11909_v26, %v6367_v42 }
0x1311   :  { %v9083_v31 = vpop.eup %9082 }
0x1312   :  { %v6348_v14 = vmul.f32 %v9083_v31, %v11883_v32  ;;  %8397 = vmatmul.mubr.msk.bf16.gmra.mrb[176].mxu1 %vm69_vm0, %v6398_v2  ;;  %v6390_v19 = vadd.f32 %v11909_v26, %v6368_v46  ;;  %v6369_v30 = vmul.f32 %v11901_v38, %v6347_v15  ;;  %v8630_v32 = vld [vmem:[%s12463_s9 + $0x20] sm:$0xff]  }
0x1313   :  { %8404 = vmatprep.subr.bf16.mxu0 %v8630_v32 }
0x1314   :  { %v6399_v39 = vpack.c.bf16 %v6390_v19, %v6389_v6  ;;  %v6370_v62 = vmul.f32 %v11901_v38, %v6348_v14  ;;  %v6391_v63 = vadd.f32 %v11909_v26, %v6369_v30  ;;  %8405 = vmatpush3.bf16.msra.mxu0 %v8630_v32  ;;  %v8632_v38 = vld [vmem:[%s12463_s9 + $0x30] sm:$0xff]  }
0x1315   :  { %8406 = vmatprep.subr.bf16.mxu0 %v8631_v25 }
0x1316   :  { %8400 = vmatprep.mubr.msk.bf16.mxu1 %vm69_vm0, %v6399_v39  ;;  %v6392_v16 = vadd.f32 %v11909_v26, %v6370_v62  ;;  %v8633_v26 = vld [vmem:[%s12463_s9 + $0x38] sm:$0xff]  }
0x1318   :  { %v6400_v45 = vpack.c.bf16 %v6392_v16, %v6391_v63  ;;  %8407 = vmatpush3.bf16.msra.mxu0 %v8631_v25 }
0x1319   :  { %8408 = vmatprep.subr.bf16.mxu0 %v8632_v38 }
0x131a   :  { %8401 = vmatmul.mubr.msk.bf16.gmra.mrb[180].mxu1 %vm69_vm0, %v6400_v45 }
0x131c   :  { %8409 = vmatpush3.bf16.msra.mxu0 %v8632_v38 }
0x131d   :  { %8410 = vmatprep.subr.bf16.mxu0 %v8633_v26 }
0x1320   :  { %8411 = vmatpush3.bf16.msra.mxu0 %v8633_v26 }
0x13ca   :  { %v8390_v52 = vpop.f32.mrb[168].mxu1 }
0x13cb   :  { %v6493_v27 = vadd.f32 %v8390_v52, %v11979_v57  ;;  %v6484_v37 = vpop.f32.mrb[169].mxu1 }
0x13cc   :  { %v6485_v22 = vadd.f32 %v11979_v57, %v6484_v37  ;;  %v8391_v58 = vpop.f32.mrb[170].mxu1 }
0x13cd   :  { %v7589_v41 = vmul.f32 -1.442695, %v6493_v27  ;;  %v6496_v24 = vadd.f32 %v8391_v58, %v11979_v57  ;;  %v6487_v34 = vpop.f32.mrb[171].mxu1 }
0x13ce   :  { %v7587_v55 = vmul.f32 -1.442695, %v6485_v22  ;;  %v6488_v48 = vadd.f32 %v11979_v57, %v6487_v34 }
0x13cf   :  { %9084 = vpow2.f32 %v7589_v41  ;;  %v7590_v43 = vmul.f32 -1.442695, %v6496_v24 }
0x13d0   :  { %9086 = vpow2.f32 %v7587_v55  ;;  %v7588_v36 = vmul.f32 -1.442695, %v6488_v48 }
0x13d1   :  { %9088 = vpow2.f32 %v7590_v43 }
0x13d2   :  { %9090 = vpow2.f32 %v7588_v36 }
0x13d9   :  { %v9085_v13 = vpop.eup %9084 }
0x13da   :  { %v9087_v9 = vpop.eup %9086  ;;  %v6597_v49 = vadd.f32 1.0, %v9085_v13 }
0x13db   :  { %v9089_v8 = vpop.eup %9088  ;;  %v6595_v33 = vadd.f32 1.0, %v9087_v9 }
0x13dc   :  { %v9091_v56 = vpop.eup %9090  ;;  %9092 = vrcp.f32 %v6597_v49  ;;  %v6598_v47 = vadd.f32 1.0, %v9089_v8 }
0x13dd   :  { %9094 = vrcp.f32 %v6595_v33  ;;  %v6596_v54 = vadd.f32 1.0, %v9091_v56  ;;  %v8394_v0 = vpop.f32.mrb[172].mxu1 }
0x13de   :  { %9096 = vrcp.f32 %v6598_v47  ;;  %v11986_v17 = vadd.f32 %v8394_v0, %v11979_v57  ;;  %v6500_v40 = vpop.f32.mrb[173].mxu1 }
0x13df   :  { %9098 = vrcp.f32 %v6596_v54  ;;  %v11989_v59 = vadd.f32 %v11979_v57, %v6500_v40  ;;  %v8395_v61 = vpop.f32.mrb[174].mxu1 }
0x13e0   :  { %v7593_v20 = vmul.f32 -1.442695, %v11986_v17  ;;  %v11993_v51 = vadd.f32 %v8395_v61, %v11979_v57  ;;  %v6503_v28 = vpop.f32.mrb[175].mxu1 }
0x13e1   :  { %v7591_v42 = vmul.f32 -1.442695, %v11989_v59  ;;  %v11997_v23 = vadd.f32 %v11979_v57, %v6503_v28 }
0x13e2   :  { %9100 = vpow2.f32 %v7593_v20  ;;  %v7594_v15 = vmul.f32 -1.442695, %v11993_v51 }
0x13e3   :  { %9102 = vpow2.f32 %v7591_v42  ;;  %v7592_v2 = vmul.f32 -1.442695, %v11997_v23 }
0x13e4   :  { %9104 = vpow2.f32 %v7594_v15 }
0x13e5   :  { %9106 = vpow2.f32 %v7592_v2  ;;  %v8398_v46 = vpop.f32.mrb[176].mxu1 }
0x13e6   :  { %v9093_v31 = vpop.eup %9092  ;;  %v12002_v14 = vadd.f32 %v8398_v46, %v11979_v57  ;;  %v6516_v6 = vpop.f32.mrb[177].mxu1 }
0x13e7   :  { %v9095_v19 = vpop.eup %9094  ;;  %v12005_v30 = vadd.f32 %v11979_v57, %v6516_v6  ;;  %v8399_v39 = vpop.f32.mrb[178].mxu1  ;;  %v6645_v25 = vmul.f32 %v9093_v31, %v6493_v27 }
0x13e8   :  { %v9097_v62 = vpop.eup %9096  ;;  %v7597_v63 = vmul.f32 -1.442695, %v12002_v14  ;;  %v12009_v16 = vadd.f32 %v8399_v39, %v11979_v57  ;;  %v6519_v45 = vpop.f32.mrb[179].mxu1  ;;  %v6643_v37 = vmul.f32 %v9095_v19, %v6485_v22 }
0x13e9   :  { %v9099_v32 = vpop.eup %9098  ;;  %v6646_v38 = vmul.f32 %v9097_v62, %v6496_v24  ;;  %v7595_v26 = vmul.f32 -1.442695, %v12005_v30  ;;  %v12013_v52 = vadd.f32 %v11979_v57, %v6519_v45 }
0x13ea   :  { %v6644_v58 = vmul.f32 %v9099_v32, %v6488_v48  ;;  %9108 = vpow2.f32 %v7597_v63  ;;  %v7598_v41 = vmul.f32 -1.442695, %v12009_v16 }
0x13eb   :  { %v6660_v34 = vpack.c.bf16 %v6646_v38, %v6645_v25  ;;  %9110 = vpow2.f32 %v7595_v26  ;;  %v7596_v55 = vmul.f32 -1.442695, %v12013_v52 }
0x13ec   :  { %v9101_v43 = vpop.eup %9100  ;;  %v6659_v36 = vpack.c.bf16 %v6644_v58, %v6643_v37  ;;  %9112 = vpow2.f32 %v7598_v41 }
0x13ed   :  { %v9103_v13 = vpop.eup %9102  ;;  %v6601_v27 = vadd.f32 1.0, %v9101_v43  ;;  %9114 = vpow2.f32 %v7596_v55  ;;  %v8402_v24 = vpop.f32.mrb[180].mxu1 }
0x13ee   :  { %v9105_v9 = vpop.eup %9104  ;;  %v6599_v49 = vadd.f32 1.0, %v9103_v13  ;;  %v12018_v8 = vadd.f32 %v8402_v24, %v11979_v57  ;;  %v6532_v22 = vpop.f32.mrb[181].mxu1  ;;  %8412 = vmatprep.mubr.msk.bf16.mxu0 %vm3300_vm3, %v6659_v36 }
0x13ef   :  { %v9107_v48 = vpop.eup %9106  ;;  %9116 = vrcp.f32 %v6601_v27  ;;  %v6602_v33 = vadd.f32 1.0, %v9105_v9  ;;  %v12022_v56 = vadd.f32 %v11979_v57, %v6532_v22  ;;  %v8403_v47 = vpop.f32.mrb[182].mxu1  ;;  %8413 = vmatmul.mubr.msk.bf16.vlgmr.msra.gmra.mrb[184].mxu0 %vm3300_vm3, %v6660_v34 }
0x13f0   :  { %9118 = vrcp.f32 %v6599_v49  ;;  %v6600_v54 = vadd.f32 1.0, %v9107_v48  ;;  %v7601_v0 = vmul.f32 -1.442695, %v12018_v8  ;;  %v12027_v40 = vadd.f32 %v8403_v47, %v11979_v57  ;;  %v6535_v61 = vpop.f32.mrb[183].mxu1 }
0x13f1   :  { %9120 = vrcp.f32 %v6602_v33  ;;  %v7599_v20 = vmul.f32 -1.442695, %v12022_v56  ;;  %v12031_v28 = vadd.f32 %v11979_v57, %v6535_v61 }
0x13f2   :  { %9122 = vrcp.f32 %v6600_v54  ;;  %v7602_v42 = vmul.f32 -1.442695, %v12027_v40 }
0x13f3   :  { %9124 = vpow2.f32 %v7601_v0  ;;  %v7600_v15 = vmul.f32 -1.442695, %v12031_v28 }
0x13f4   :  { %v9109_v2 = vpop.eup %9108  ;;  %9126 = vpow2.f32 %v7599_v20 }
0x13f5   :  { %v9111_v46 = vpop.eup %9110  ;;  %v6605_v31 = vadd.f32 1.0, %v9109_v2  ;;  %9128 = vpow2.f32 %v7602_v42 }
0x13f6   :  { %v9113_v6 = vpop.eup %9112  ;;  %v6603_v19 = vadd.f32 1.0, %v9111_v46  ;;  %9130 = vpow2.f32 %v7600_v15 }
0x13f7   :  { %v9115_v39 = vpop.eup %9114  ;;  %9132 = vrcp.f32 %v6605_v31  ;;  %v6606_v62 = vadd.f32 1.0, %v9113_v6  ;;  %v12056_v6 = vld [vmem:[%s12465_s10 + $0x1] ss:$0 sm:$0xff] }
0x13f8   :  { %9134 = vrcp.f32 %v6603_v19  ;;  %v6604_v57 = vadd.f32 1.0, %v9115_v39 }
0x13f9   :  { %v9117_v63 = vpop.eup %9116  ;;  %9136 = vrcp.f32 %v6606_v62 }
0x13fa   :  { %v9119_v45 = vpop.eup %9118  ;;  %9138 = vrcp.f32 %v6604_v57  ;;  %v6649_v38 = vmul.f32 %v9117_v63, %v11986_v17 }
0x13fb   :  { %v9121_v32 = vpop.eup %9120  ;;  %v6647_v58 = vmul.f32 %v9119_v45, %v11989_v59 }
0x13fc   :  { %v9123_v25 = vpop.eup %9122  ;;  %v6650_v26 = vmul.f32 %v9121_v32, %v11993_v51 }
0x13fd   :  { %v9125_v37 = vpop.eup %9124  ;;  %v6648_v41 = vmul.f32 %v9123_v25, %v11997_v23 }
0x13fe   :  { %v9127_v34 = vpop.eup %9126  ;;  %v6662_v55 = vpack.c.bf16 %v6650_v26, %v6649_v38  ;;  %v6609_v43 = vadd.f32 1.0, %v9125_v37 }
0x13ff   :  { %v9129_v36 = vpop.eup %9128  ;;  %v6661_v13 = vpack.c.bf16 %v6648_v41, %v6647_v58  ;;  %v6607_v27 = vadd.f32 1.0, %v9127_v34 }
0x1400   :  { %v9131_v24 = vpop.eup %9130  ;;  %9140 = vrcp.f32 %v6609_v43  ;;  %v6610_v9 = vadd.f32 1.0, %v9129_v36 }
0x1401   :  { %v9133_v49 = vpop.eup %9132  ;;  %9142 = vrcp.f32 %v6607_v27  ;;  %v6608_v22 = vadd.f32 1.0, %v9131_v24  ;;  %8416 = vmatprep.mubr.msk.bf16.mxu0 %vm3300_vm3, %v6661_v13 }
0x1402   :  { %v9135_v17 = vpop.eup %9134  ;;  %9144 = vrcp.f32 %v6610_v9  ;;  %8417 = vmatmul.mubr.msk.bf16.gmra.mrb[188].mxu0 %vm3300_vm3, %v6662_v55  ;;  %v6653_v23 = vmul.f32 %v9133_v49, %v12002_v14 }
0x1403   :  { %v9137_v59 = vpop.eup %9136  ;;  %9146 = vrcp.f32 %v6608_v22  ;;  %v6651_v33 = vmul.f32 %v9135_v17, %v12005_v30 }
0x1404   :  { %v9139_v51 = vpop.eup %9138  ;;  %v6654_v48 = vmul.f32 %v9137_v59, %v12009_v16 }
0x1405   :  { %v6652_v47 = vmul.f32 %v9139_v51, %v12013_v52 }
0x1406   :  { %v6664_v54 = vpack.c.bf16 %v6654_v48, %v6653_v23 }
0x1407   :  { %v6663_v0 = vpack.c.bf16 %v6652_v47, %v6651_v33 }
0x1409   :  { %8420 = vmatprep.mubr.msk.bf16.mxu0 %vm3300_vm3, %v6663_v0 }
0x140a   :  { %v9141_v61 = vpop.eup %9140  ;;  %8421 = vmatmul.mubr.msk.bf16.gmra.mrb[192].mxu0 %vm3300_vm3, %v6664_v54 }
0x140b   :  { %v9143_v20 = vpop.eup %9142  ;;  %v6657_v2 = vmul.f32 %v9141_v61, %v12018_v8 }
0x140c   :  { %v9145_v42 = vpop.eup %9144  ;;  %v6655_v16 = vmul.f32 %v9143_v20, %v12022_v56 }
0x140d   :  { %v9147_v15 = vpop.eup %9146  ;;  %v6658_v14 = vmul.f32 %v9145_v42, %v12027_v40 }
0x140e   :  { %v6656_v30 = vmul.f32 %v9147_v15, %v12031_v28 }
0x140f   :  { %v6666_v46 = vpack.c.bf16 %v6658_v14, %v6657_v2 }
0x1410   :  { %v6665_v52 = vpack.c.bf16 %v6656_v30, %v6655_v16 }
0x1412   :  { %8424 = vmatprep.mubr.msk.bf16.mxu0 %vm3300_vm3, %v6665_v52 }
0x1413   :  { %8425 = vmatmul.mubr.msk.bf16.gmra.mrb[196].mxu0 %vm3300_vm3, %v6666_v46 }
0x14c2   :  { %v8414_v31 = vpop.f32.mrb[184].mxu0 }
0x14c3   :  { %v6758_v19 = vpop.f32.mrb[185].mxu0  ;;  %v6823_v8 = vadd.f32 %v8414_v31, %v11707_v7 }
0x14c4   :  { %v6821_v40 = vadd.f32 %v6758_v19, %v11703_v18  ;;  %v8415_v56 = vpop.f32.mrb[186].mxu0 }
0x14c5   :  { %v6761_v39 = vpop.f32.mrb[187].mxu0  ;;  %v6824_v62 = vadd.f32 %v8415_v56, %v11718_v29  ;;  %v12066_v63 = vadd.f32 %v12056_v6, %v6823_v8 }
0x14c6   :  { %v12061_v28 = vadd.f32 %v12056_v6, %v6821_v40  ;;  %v6822_v57 = vadd.f32 %v6761_v39, %v11711_v50 }
0x14c7   :  { %v12074_v18 = vadd.f32 %v12056_v6, %v6824_v62  ;;  %v6869_v50 = vsel %vm69_vm0, %v12066_v63, 0.0 }
0x14c8   :  { %v12069_v45 = vadd.f32 %v12056_v6, %v6822_v57  ;;  %v6863_v7 = vsel %vm69_vm0, %v12061_v28, 0.0 }
0x14c9   :  { %6864 = vadd.xlane.f32.xlu0 %v6863_v7  ;;  %v6872_v29 = vsel %vm69_vm0, %v12074_v18, 0.0 }
0x14ca   :  { %v6866_v32 = vsel %vm69_vm0, %v12069_v45, 0.0 }
0x14cb   :  { %6867 = vadd.xlane.f32.xlu1 %v6866_v32 }
0x14cd   :  { %6870 = vadd.xlane.f32.xlu0 %v6869_v50 }
0x14cf   :  { %6873 = vadd.xlane.f32.xlu1 %v6872_v29 }
0x14d5   :  { %v8418_v25 = vpop.f32.mrb[188].mxu0 }
0x14d6   :  { %v6774_v38 = vpop.f32.mrb[189].mxu0  ;;  %v6827_v26 = vadd.f32 %v8418_v25, %v11732_v12 }
0x14d7   :  { %v6825_v37 = vadd.f32 %v6774_v38, %v11727_v60  ;;  %v8419_v58 = vpop.f32.mrb[190].mxu0 }
0x14d8   :  { %v6777_v41 = vpop.f32.mrb[191].mxu0  ;;  %v6828_v55 = vadd.f32 %v8419_v58, %v11740_v5  ;;  %v12090_v36 = vadd.f32 %v12056_v6, %v6827_v26 }
0x14d9   :  { %v12085_v34 = vadd.f32 %v12056_v6, %v6825_v37  ;;  %v6826_v43 = vadd.f32 %v6777_v41, %v11735_v11 }
0x14da   :  { %v12098_v60 = vadd.f32 %v12056_v6, %v6828_v55  ;;  %v6881_v22 = vsel %vm69_vm0, %v12090_v36, 0.0 }
0x14db   :  { %v12093_v13 = vadd.f32 %v12056_v6, %v6826_v43  ;;  %v6875_v12 = vsel %vm69_vm0, %v12085_v34, 0.0 }
0x14dc   :  { %6876 = vadd.xlane.f32.xlu0 %v6875_v12  ;;  %v6884_v48 = vsel %vm69_vm0, %v12098_v60, 0.0 }
0x14dd   :  { %v8422_v27 = vpop.f32.mrb[192].mxu0  ;;  %v6878_v24 = vsel %vm69_vm0, %v12093_v13, 0.0 }
0x14de   :  { %6879 = vadd.xlane.f32.xlu1 %v6878_v24  ;;  %v6790_v5 = vpop.f32.mrb[193].mxu0  ;;  %v6831_v11 = vadd.f32 %v8422_v27, %v11756_v21 }
0x14df   :  { %v6829_v9 = vadd.f32 %v6790_v5, %v11749_v10  ;;  %v8423_v49 = vpop.f32.mrb[194].mxu0 }
0x14e0   :  { %6882 = vadd.xlane.f32.xlu0 %v6881_v22  ;;  %v6793_v17 = vpop.f32.mrb[195].mxu0  ;;  %v6832_v51 = vadd.f32 %v8423_v49, %v11764_v35  ;;  %v12114_v21 = vadd.f32 %v12056_v6, %v6831_v11 }
0x14e1   :  { %v12107_v59 = vadd.f32 %v12056_v6, %v6829_v9  ;;  %v6830_v23 = vadd.f32 %v6793_v17, %v11759_v4 }
0x14e2   :  { %6885 = vadd.xlane.f32.xlu1 %v6884_v48  ;;  %v12122_v47 = vadd.f32 %v12056_v6, %v6832_v51  ;;  %v6893_v0 = vsel %vm69_vm0, %v12114_v21, 0.0 }
0x14e3   :  { %v12117_v10 = vadd.f32 %v12056_v6, %v6830_v23  ;;  %v6887_v33 = vsel %vm69_vm0, %v12107_v59, 0.0 }
0x14e4   :  { %6888 = vadd.xlane.f32.xlu0 %v6887_v33  ;;  %v6896_v2 = vsel %vm69_vm0, %v12122_v47, 0.0 }
0x14e5   :  { %v6890_v4 = vsel %vm69_vm0, %v12117_v10, 0.0 }
0x14e6   :  { %v8426_v35 = vpop.f32.mrb[196].mxu0  ;;  %6891 = vadd.xlane.f32.xlu1 %v6890_v4 }
0x14e7   :  { %v6806_v54 = vpop.f32.mrb[197].mxu0  ;;  %v6835_v61 = vadd.f32 %v8426_v35, %v11780_v3 }
0x14e8   :  { %v6833_v20 = vadd.f32 %v6806_v54, %v11773_v53  ;;  %v8427_v42 = vpop.f32.mrb[198].mxu0  ;;  %6894 = vadd.xlane.f32.xlu0 %v6893_v0 }
0x14e9   :  { %v6809_v15 = vpop.f32.mrb[199].mxu0  ;;  %v6836_v16 = vadd.f32 %v8427_v42, %v11788_v1  ;;  %v12138_v46 = vadd.f32 %v12056_v6, %v6835_v61 }
0x14ea   :  { %v12133_v14 = vadd.f32 %v12056_v6, %v6833_v20  ;;  %v6834_v30 = vadd.f32 %v6809_v15, %v11783_v44  ;;  %6897 = vadd.xlane.f32.xlu1 %v6896_v2 }
0x14eb   :  { %v12146_v52 = vadd.f32 %v12056_v6, %v6836_v16  ;;  %v6905_v44 = vsel %vm69_vm0, %v12138_v46, 0.0 }
0x14ec   :  { %v12141_v3 = vadd.f32 %v12056_v6, %v6834_v30  ;;  %v6899_v53 = vsel %vm69_vm0, %v12133_v14, 0.0 }
0x14ed   :  { %6900 = vadd.xlane.f32.xlu0 %v6899_v53  ;;  %v6908_v1 = vsel %vm69_vm0, %v12146_v52, 0.0 }
0x14ee   :  { %v6902_v31 = vsel %vm69_vm0, %v12141_v3, 0.0 }
0x14ef   :  { %6903 = vadd.xlane.f32.xlu1 %v6902_v31 }
0x14f1   :  { %6906 = vadd.xlane.f32.xlu0 %v6905_v44 }
0x14f3   :  { %6909 = vadd.xlane.f32.xlu1 %v6908_v1 }
0x1556   :  { %v6865_v19 = vpop.xlane.xlu0 %6864 }
0x1557   :  { %v6911_v8 = vmul.f32 0.03125, %v6865_v19 }
0x1558   :  { %v6868_v40 = vpop.xlane.xlu1 %6867 }
0x1559   :  { %v12155_v56 = vsub.f32 %v12061_v28, %v6911_v8  ;;  %v6912_v6 = vmul.f32 0.03125, %v6868_v40 }
0x155a   :  { %v6871_v39 = vpop.xlane.xlu0 %6870 }
0x155b   :  { %v12158_v62 = vsub.f32 %v12069_v45, %v6912_v6  ;;  %v6913_v57 = vmul.f32 0.03125, %v6871_v39  ;;  %v6943_v7 = vmul.f32 %v12155_v56, %v12155_v56 }
0x155c   :  { %v6874_v32 = vpop.xlane.xlu1 %6873 }
0x155d   :  { %v12163_v50 = vsub.f32 %v12066_v63, %v6913_v57  ;;  %v6914_v29 = vmul.f32 0.03125, %v6874_v32  ;;  %v6959_v25 = vsel %vm69_vm0, %v6943_v7, 0.0  ;;  %v6944_v28 = vmul.f32 %v12158_v62, %v12158_v62  ;;  %v8634_v7 = vld [vmem:[%s12466_s13] sm:$0xff]  }
0x155e   :  { %6960 = vadd.xlane.f32.xlu0 %v6959_v25  ;;  %8428 = vmatprep.subr.bf16.mxu1 %v8634_v7 }
0x155f   :  { %v12169_v38 = vsub.f32 %v12074_v18, %v6914_v29  ;;  %v6962_v45 = vsel %vm69_vm0, %v6944_v28, 0.0  ;;  %v6945_v26 = vmul.f32 %v12163_v50, %v12163_v50  ;;  %8429 = vmatpush3.bf16.msra.mxu1 %v8634_v7 }
0x1560   :  { %6963 = vadd.xlane.f32.xlu1 %v6962_v45 }
0x1561   :  { %v6965_v37 = vsel %vm69_vm0, %v6945_v26, 0.0  ;;  %v6946_v63 = vmul.f32 %v12169_v38, %v12169_v38 }
0x1562   :  { %6966 = vadd.xlane.f32.xlu0 %v6965_v37 }
0x1563   :  { %v6968_v58 = vsel %vm69_vm0, %v6946_v63, 0.0 }
0x1564   :  { %6969 = vadd.xlane.f32.xlu1 %v6968_v58 }
0x1569   :  { %v6877_v41 = vpop.xlane.xlu0 %6876 }
0x156a   :  { %v6915_v55 = vmul.f32 0.03125, %v6877_v41 }
0x156b   :  { %v6880_v43 = vpop.xlane.xlu1 %6879 }
0x156c   :  { %v12179_v18 = vsub.f32 %v12085_v34, %v6915_v55  ;;  %v6916_v12 = vmul.f32 0.03125, %v6880_v43 }
0x156d   :  { %v6883_v27 = vpop.xlane.xlu0 %6882 }
0x156e   :  { %v12182_v24 = vsub.f32 %v12093_v13, %v6916_v12  ;;  %v6917_v5 = vmul.f32 0.03125, %v6883_v27  ;;  %v6947_v11 = vmul.f32 %v12179_v18, %v12179_v18 }
0x156f   :  { %v6886_v9 = vpop.xlane.xlu1 %6885 }
0x1570   :  { %v12187_v49 = vsub.f32 %v12090_v36, %v6917_v5  ;;  %v6918_v22 = vmul.f32 0.03125, %v6886_v9  ;;  %v6971_v17 = vsel %vm69_vm0, %v6947_v11, 0.0  ;;  %v6948_v34 = vmul.f32 %v12182_v24, %v12182_v24 }
0x1571   :  { %v6889_v51 = vpop.xlane.xlu0 %6888  ;;  %6972 = vadd.xlane.f32.xlu0 %v6971_v17 }
0x1572   :  { %v12193_v23 = vsub.f32 %v12098_v60, %v6918_v22  ;;  %v6919_v13 = vmul.f32 0.03125, %v6889_v51  ;;  %v6974_v48 = vsel %vm69_vm0, %v6948_v34, 0.0  ;;  %v6949_v33 = vmul.f32 %v12187_v49, %v12187_v49 }
0x1573   :  { %6975 = vadd.xlane.f32.xlu1 %v6974_v48  ;;  %v6892_v36 = vpop.xlane.xlu1 %6891 }
0x1574   :  { %v12199_v4 = vsub.f32 %v12107_v59, %v6919_v13  ;;  %v6920_v35 = vmul.f32 0.03125, %v6892_v36  ;;  %v6977_v54 = vsel %vm69_vm0, %v6949_v33, 0.0  ;;  %v6950_v0 = vmul.f32 %v12193_v23, %v12193_v23 }
0x1575   :  { %v6895_v61 = vpop.xlane.xlu0 %6894  ;;  %6978 = vadd.xlane.f32.xlu0 %v6977_v54 }
0x1576   :  { %v12205_v60 = vsub.f32 %v12117_v10, %v6920_v35  ;;  %v6921_v20 = vmul.f32 0.03125, %v6895_v61  ;;  %v6980_v42 = vsel %vm69_vm0, %v6950_v0, 0.0  ;;  %v6951_v15 = vmul.f32 %v12199_v4, %v12199_v4  ;;  %v12260_v35 = vld [vmem:[%s12467_s11] ss:$0 sm:$0xff] }
0x1577   :  { %6981 = vadd.xlane.f32.xlu1 %v6980_v42  ;;  %v6898_v59 = vpop.xlane.xlu1 %6897 }
0x1578   :  { %v12211_v2 = vsub.f32 %v12114_v21, %v6921_v20  ;;  %v6922_v16 = vmul.f32 0.03125, %v6898_v59  ;;  %v6983_v30 = vsel %vm69_vm0, %v6951_v15, 0.0  ;;  %v6952_v53 = vmul.f32 %v12205_v60, %v12205_v60  ;;  %v12267_v15 = vld [vmem:[%s12468_s12] ss:$0 sm:$0xff] }
0x1579   :  { %6984 = vadd.xlane.f32.xlu0 %v6983_v30 }
0x157a   :  { %v12217_v10 = vsub.f32 %v12122_v47, %v6922_v16  ;;  %v6901_v31 = vpop.xlane.xlu0 %6900  ;;  %v6986_v44 = vsel %vm69_vm0, %v6952_v53, 0.0  ;;  %v6953_v1 = vmul.f32 %v12211_v2, %v12211_v2 }
0x157b   :  { %v6923_v19 = vmul.f32 0.03125, %v6901_v31  ;;  %6987 = vadd.xlane.f32.xlu1 %v6986_v44 }
0x157c   :  { %v6904_v21 = vpop.xlane.xlu1 %6903  ;;  %v6989_v8 = vsel %vm69_vm0, %v6953_v1, 0.0  ;;  %v6954_v40 = vmul.f32 %v12217_v10, %v12217_v10 }
0x157d   :  { %v12226_v6 = vsub.f32 %v12133_v14, %v6923_v19  ;;  %v6924_v39 = vmul.f32 0.03125, %v6904_v21  ;;  %6990 = vadd.xlane.f32.xlu0 %v6989_v8 }
0x157e   :  { %v6907_v47 = vpop.xlane.xlu0 %6906  ;;  %v6992_v57 = vsel %vm69_vm0, %v6954_v40, 0.0 }
0x157f   :  { %v12233_v32 = vsub.f32 %v12141_v3, %v6924_v39  ;;  %v6925_v29 = vmul.f32 0.03125, %v6907_v47  ;;  %6993 = vadd.xlane.f32.xlu1 %v6992_v57  ;;  %v6955_v25 = vmul.f32 %v12226_v6, %v12226_v6 }
0x1580   :  { %v6910_v28 = vpop.xlane.xlu1 %6909 }
0x1581   :  { %v12238_v14 = vsub.f32 %v12138_v46, %v6925_v29  ;;  %v6926_v45 = vmul.f32 0.03125, %v6910_v28  ;;  %v6995_v26 = vsel %vm69_vm0, %v6955_v25, 0.0  ;;  %v6956_v37 = vmul.f32 %v12233_v32, %v12233_v32 }
0x1582   :  { %6996 = vadd.xlane.f32.xlu0 %v6995_v26 }
0x1583   :  { %v12244_v3 = vsub.f32 %v12146_v52, %v6926_v45  ;;  %v6998_v63 = vsel %vm69_vm0, %v6956_v37, 0.0  ;;  %v6957_v58 = vmul.f32 %v12238_v14, %v12238_v14  ;;  %v8635_v52 = vld [vmem:[%s12466_s13 + $0x8] sm:$0xff]  }
0x1584   :  { %6999 = vadd.xlane.f32.xlu1 %v6998_v63  ;;  %8430 = vmatprep.subr.bf16.mxu1 %v8635_v52 }
0x1585   :  { %v7001_v46 = vsel %vm69_vm0, %v6957_v58, 0.0  ;;  %v6958_v41 = vmul.f32 %v12244_v3, %v12244_v3  ;;  %8431 = vmatpush3.bf16.msra.mxu1 %v8635_v52 }
0x1586   :  { %7002 = vadd.xlane.f32.xlu0 %v7001_v46 }
0x1587   :  { %v7004_v55 = vsel %vm69_vm0, %v6958_v41, 0.0 }
0x1588   :  { %7005 = vadd.xlane.f32.xlu1 %v7004_v55 }
0x15eb   :  { %v6961_v43 = vpop.xlane.xlu0 %6960 }
0x15ec   :  { %v7007_v12 = vmul.f32 0.03125, %v6961_v43 }
0x15ed   :  { %v6964_v27 = vpop.xlane.xlu1 %6963 }
0x15ee   :  { %v7023_v5 = vadd.f32 1e-05, %v7007_v12  ;;  %v7008_v11 = vmul.f32 0.03125, %v6964_v27 }
0x15ef   :  { %v6967_v9 = vpop.xlane.xlu0 %6966 }
0x15f0   :  { %9148 = vrsqrt.f32 %v7023_v5  ;;  %v7024_v22 = vadd.f32 1e-05, %v7008_v11  ;;  %v7009_v17 = vmul.f32 0.03125, %v6967_v9 }
0x15f1   :  { %v6970_v34 = vpop.xlane.xlu1 %6969 }
0x15f2   :  { %9150 = vrsqrt.f32 %v7024_v22  ;;  %v7025_v51 = vadd.f32 1e-05, %v7009_v17  ;;  %v7010_v13 = vmul.f32 0.03125, %v6970_v34 }
0x15f4   :  { %9152 = vrsqrt.f32 %v7025_v51  ;;  %v7026_v48 = vadd.f32 1e-05, %v7010_v13 }
0x15f6   :  { %9154 = vrsqrt.f32 %v7026_v48 }
0x15fa   :  { %v9149_v33 = vpop.eup %9148 }
0x15fb   :  { %v7055_v36 = vmul.f32 %v9149_v33, %v12155_v56 }
0x15fc   :  { %v9151_v54 = vpop.eup %9150 }
0x15fd   :  { %v7056_v0 = vmul.f32 %v9151_v54, %v12158_v62  ;;  %v7077_v42 = vmul.f32 %v12260_v35, %v7055_v36 }
0x15fe   :  { %v9153_v61 = vpop.eup %9152  ;;  %v6973_v20 = vpop.xlane.xlu0 %6972 }
0x15ff   :  { %v7057_v59 = vmul.f32 %v9153_v61, %v12163_v50  ;;  %v7011_v56 = vmul.f32 0.03125, %v6973_v20  ;;  %v7078_v16 = vmul.f32 %v12260_v35, %v7056_v0  ;;  %v7099_v21 = vadd.f32 %v12267_v15, %v7077_v42 }
0x1600   :  { %v9155_v30 = vpop.eup %9154  ;;  %v6976_v53 = vpop.xlane.xlu1 %6975 }
0x1601   :  { %v7079_v31 = vmul.f32 %v12260_v35, %v7057_v59  ;;  %v7058_v62 = vmul.f32 %v9155_v30, %v12169_v38  ;;  %v7027_v44 = vadd.f32 1e-05, %v7011_v56  ;;  %v7012_v1 = vmul.f32 0.03125, %v6976_v53 }
0x1602   :  { %v6979_v19 = vpop.xlane.xlu0 %6978  ;;  %v7100_v8 = vadd.f32 %v12267_v15, %v7078_v16 }
0x1603   :  { %v7080_v40 = vmul.f32 %v12260_v35, %v7058_v62  ;;  %9156 = vrsqrt.f32 %v7027_v44  ;;  %v7028_v50 = vadd.f32 1e-05, %v7012_v1  ;;  %v7013_v39 = vmul.f32 0.03125, %v6979_v19 }
0x1604   :  { %v6982_v47 = vpop.xlane.xlu1 %6981  ;;  %v7115_v57 = vpack.c.bf16 %v7100_v8, %v7099_v21  ;;  %v7101_v7 = vadd.f32 %v12267_v15, %v7079_v31 }
0x1605   :  { %v7102_v29 = vadd.f32 %v12267_v15, %v7080_v40  ;;  %9158 = vrsqrt.f32 %v7028_v50  ;;  %v7014_v38 = vmul.f32 0.03125, %v6982_v47  ;;  %v7029_v25 = vadd.f32 1e-05, %v7013_v39 }
0x1606   :  { %v6985_v28 = vpop.xlane.xlu0 %6984  ;;  %8432 = vmatprep.mubr.msk.bf16.mxu1 %vm69_vm0, %v7115_v57 }
0x1607   :  { %v7030_v45 = vadd.f32 1e-05, %v7014_v38  ;;  %v7015_v26 = vmul.f32 0.03125, %v6985_v28  ;;  %v7116_v37 = vpack.c.bf16 %v7102_v29, %v7101_v7  ;;  %9160 = vrsqrt.f32 %v7029_v25 }
0x1608   :  { %v6988_v63 = vpop.xlane.xlu1 %6987 }
0x1609   :  { %9162 = vrsqrt.f32 %v7030_v45  ;;  %v7031_v58 = vadd.f32 1e-05, %v7015_v26  ;;  %v7016_v46 = vmul.f32 0.03125, %v6988_v63  ;;  %8433 = vmatmul.mubr.msk.bf16.vlgmr.msra.gmra.mrb[184].mxu1 %vm69_vm0, %v7116_v37 }
0x160a   :  { %v6991_v41 = vpop.xlane.xlu0 %6990 }
0x160b   :  { %9164 = vrsqrt.f32 %v7031_v58  ;;  %v7032_v55 = vadd.f32 1e-05, %v7016_v46  ;;  %v7017_v52 = vmul.f32 0.03125, %v6991_v41 }
0x160c   :  { %v6994_v43 = vpop.xlane.xlu1 %6993 }
0x160d   :  { %v9157_v12 = vpop.eup %9156  ;;  %9166 = vrsqrt.f32 %v7032_v55  ;;  %v7033_v27 = vadd.f32 1e-05, %v7017_v52  ;;  %v7018_v5 = vmul.f32 0.03125, %v6994_v43 }
0x160e   :  { %v7059_v11 = vmul.f32 %v9157_v12, %v12179_v18 }
0x160f   :  { %v9159_v9 = vpop.eup %9158  ;;  %9168 = vrsqrt.f32 %v7033_v27  ;;  %v7034_v22 = vadd.f32 1e-05, %v7018_v5  ;;  %v6997_v17 = vpop.xlane.xlu0 %6996 }
0x1610   :  { %v7060_v34 = vmul.f32 %v9159_v9, %v12182_v24  ;;  %v7019_v51 = vmul.f32 0.03125, %v6997_v17  ;;  %v7081_v48 = vmul.f32 %v12260_v35, %v7059_v11 }
0x1611   :  { %9170 = vrsqrt.f32 %v7034_v22  ;;  %v7000_v13 = vpop.xlane.xlu1 %6999  ;;  %v9161_v33 = vpop.eup %9160 }
0x1612   :  { %v7035_v36 = vadd.f32 1e-05, %v7019_v51  ;;  %v7020_v54 = vmul.f32 0.03125, %v7000_v13  ;;  %v7082_v0 = vmul.f32 %v12260_v35, %v7060_v34  ;;  %v7061_v20 = vmul.f32 %v9161_v33, %v12187_v49 }
0x1613   :  { %v9163_v61 = vpop.eup %9162  ;;  %v7003_v18 = vpop.xlane.xlu0 %7002  ;;  %v7103_v30 = vadd.f32 %v12267_v15, %v7081_v48 }
0x1614   :  { %v7062_v42 = vmul.f32 %v9163_v61, %v12193_v23  ;;  %9172 = vrsqrt.f32 %v7035_v36  ;;  %v7036_v59 = vadd.f32 1e-05, %v7020_v54  ;;  %v7021_v56 = vmul.f32 0.03125, %v7003_v18 }
0x1615   :  { %v9165_v24 = vpop.eup %9164  ;;  %v7006_v16 = vpop.xlane.xlu1 %7005  ;;  %v7104_v53 = vadd.f32 %v12267_v15, %v7082_v0  ;;  %v7083_v31 = vmul.f32 %v12260_v35, %v7061_v20 }
0x1616   :  { %v7063_v62 = vmul.f32 %v9165_v24, %v12199_v4  ;;  %9174 = vrsqrt.f32 %v7036_v59  ;;  %v7037_v44 = vadd.f32 1e-05, %v7021_v56  ;;  %v7022_v1 = vmul.f32 0.03125, %v7006_v16 }
0x1617   :  { %v9167_v49 = vpop.eup %9166  ;;  %v7117_v19 = vpack.c.bf16 %v7104_v53, %v7103_v30  ;;  %v7084_v23 = vmul.f32 %v12260_v35, %v7062_v42  ;;  %v7105_v39 = vadd.f32 %v12267_v15, %v7083_v31 }
0x1618   :  { %v7064_v21 = vmul.f32 %v9167_v49, %v12205_v60  ;;  %9176 = vrsqrt.f32 %v7037_v44  ;;  %v7038_v8 = vadd.f32 1e-05, %v7022_v1  ;;  %v7085_v40 = vmul.f32 %v12260_v35, %v7063_v62 }
0x1619   :  { %v9169_v50 = vpop.eup %9168  ;;  %8436 = vmatprep.mubr.msk.bf16.mxu1 %vm69_vm0, %v7117_v19  ;;  %v7106_v4 = vadd.f32 %v12267_v15, %v7084_v23 }
0x161a   :  { %v7065_v47 = vmul.f32 %v9169_v50, %v12211_v2  ;;  %9178 = vrsqrt.f32 %v7038_v8  ;;  %v7086_v57 = vmul.f32 %v12260_v35, %v7064_v21  ;;  %v7107_v38 = vadd.f32 %v12267_v15, %v7085_v40 }
0x161b   :  { %v9171_v7 = vpop.eup %9170  ;;  %v7118_v29 = vpack.c.bf16 %v7106_v4, %v7105_v39 }
0x161c   :  { %v7066_v60 = vmul.f32 %v9171_v7, %v12217_v10  ;;  %v7108_v25 = vadd.f32 %v12267_v15, %v7086_v57  ;;  %v7087_v28 = vmul.f32 %v12260_v35, %v7065_v47 }
0x161d   :  { %8437 = vmatmul.mubr.msk.bf16.gmra.mrb[188].mxu1 %vm69_vm0, %v7118_v29 }
0x161e   :  { %v9173_v45 = vpop.eup %9172  ;;  %v7119_v26 = vpack.c.bf16 %v7108_v25, %v7107_v38  ;;  %v7088_v37 = vmul.f32 %v12260_v35, %v7066_v60  ;;  %v7109_v58 = vadd.f32 %v12267_v15, %v7087_v28 }
0x161f   :  { %v7067_v2 = vmul.f32 %v9173_v45, %v12226_v6 }
0x1620   :  { %v9175_v63 = vpop.eup %9174  ;;  %8440 = vmatprep.mubr.msk.bf16.mxu1 %vm69_vm0, %v7119_v26  ;;  %v7110_v10 = vadd.f32 %v12267_v15, %v7088_v37 }
0x1621   :  { %v7068_v46 = vmul.f32 %v9175_v63, %v12233_v32  ;;  %v7089_v41 = vmul.f32 %v12260_v35, %v7067_v2 }
0x1622   :  { %v9177_v55 = vpop.eup %9176  ;;  %v7120_v52 = vpack.c.bf16 %v7110_v10, %v7109_v58 }
0x1623   :  { %v7069_v43 = vmul.f32 %v9177_v55, %v12238_v14  ;;  %v7090_v12 = vmul.f32 %v12260_v35, %v7068_v46  ;;  %v7111_v5 = vadd.f32 %v12267_v15, %v7089_v41 }
0x1624   :  { %v9179_v27 = vpop.eup %9178 }
0x1625   :  { %v7070_v6 = vmul.f32 %v9179_v27, %v12244_v3  ;;  %8441 = vmatmul.mubr.msk.bf16.gmra.mrb[192].mxu1 %vm69_vm0, %v7120_v52  ;;  %v7112_v11 = vadd.f32 %v12267_v15, %v7090_v12  ;;  %v7091_v9 = vmul.f32 %v12260_v35, %v7069_v43  ;;  %v12325_v3 = vld [vmem:[%s12469_s14] ss:$0 sm:$0xff] }
0x1627   :  { %v7121_v32 = vpack.c.bf16 %v7112_v11, %v7111_v5  ;;  %v7092_v22 = vmul.f32 %v12260_v35, %v7070_v6  ;;  %v7113_v14 = vadd.f32 %v12267_v15, %v7091_v9 }
0x1629   :  { %8444 = vmatprep.mubr.msk.bf16.mxu1 %vm69_vm0, %v7121_v32  ;;  %v7114_v17 = vadd.f32 %v12267_v15, %v7092_v22 }
0x162b   :  { %v7122_v34 = vpack.c.bf16 %v7114_v17, %v7113_v14 }
0x162d   :  { %8445 = vmatmul.mubr.msk.bf16.gmra.mrb[196].mxu1 %vm69_vm0, %v7122_v34 }
0x16dc   :  { %v8434_v51 = vpop.f32.mrb[184].mxu1 }
0x16dd   :  { %v7213_v13 = vadd.f32 %v8434_v51, %v12325_v3  ;;  %v7204_v48 = vpop.f32.mrb[185].mxu1 }
0x16de   :  { %v7205_v35 = vadd.f32 %v12325_v3, %v7204_v48  ;;  %v8435_v33 = vpop.f32.mrb[186].mxu1 }
0x16df   :  { %v7640_v36 = vmul.f32 -1.442695, %v7213_v13  ;;  %v7216_v54 = vadd.f32 %v8435_v33, %v12325_v3  ;;  %v7207_v0 = vpop.f32.mrb[187].mxu1 }
0x16e0   :  { %v7638_v15 = vmul.f32 -1.442695, %v7205_v35  ;;  %v7208_v61 = vadd.f32 %v12325_v3, %v7207_v0 }
0x16e1   :  { %9180 = vpow2.f32 %v7640_v36  ;;  %v7641_v20 = vmul.f32 -1.442695, %v7216_v54 }
0x16e2   :  { %9182 = vpow2.f32 %v7638_v15  ;;  %v7639_v18 = vmul.f32 -1.442695, %v7208_v61 }
0x16e3   :  { %9184 = vpow2.f32 %v7641_v20 }
0x16e4   :  { %9186 = vpow2.f32 %v7639_v18 }
0x16eb   :  { %v9181_v42 = vpop.eup %9180 }
0x16ec   :  { %v9183_v59 = vpop.eup %9182  ;;  %v7317_v56 = vadd.f32 1.0, %v9181_v42 }
0x16ed   :  { %v9185_v24 = vpop.eup %9184  ;;  %v7315_v16 = vadd.f32 1.0, %v9183_v59 }
0x16ee   :  { %v9187_v30 = vpop.eup %9186  ;;  %9188 = vrcp.f32 %v7317_v56  ;;  %v7318_v53 = vadd.f32 1.0, %v9185_v24 }
0x16ef   :  { %9190 = vrcp.f32 %v7315_v16  ;;  %v7316_v31 = vadd.f32 1.0, %v9187_v30 }
0x16f0   :  { %9192 = vrcp.f32 %v7318_v53  ;;  %v8438_v62 = vpop.f32.mrb[188].mxu1 }
0x16f1   :  { %9194 = vrcp.f32 %v7316_v31  ;;  %v12332_v44 = vadd.f32 %v8438_v62, %v12325_v3  ;;  %v7220_v1 = vpop.f32.mrb[189].mxu1 }
0x16f2   :  { %v12335_v49 = vadd.f32 %v12325_v3, %v7220_v1  ;;  %v8439_v19 = vpop.f32.mrb[190].mxu1 }
0x16f3   :  { %v7644_v23 = vmul.f32 -1.442695, %v12332_v44  ;;  %v12339_v21 = vadd.f32 %v8439_v19, %v12325_v3  ;;  %v7223_v8 = vpop.f32.mrb[191].mxu1 }
0x16f4   :  { %v7642_v40 = vmul.f32 -1.442695, %v12335_v49  ;;  %v12343_v50 = vadd.f32 %v12325_v3, %v7223_v8 }
0x16f5   :  { %9196 = vpow2.f32 %v7644_v23  ;;  %v7645_v39 = vmul.f32 -1.442695, %v12339_v21 }
0x16f6   :  { %9198 = vpow2.f32 %v7642_v40  ;;  %v7643_v4 = vmul.f32 -1.442695, %v12343_v50 }
0x16f7   :  { %9200 = vpow2.f32 %v7645_v39 }
0x16f8   :  { %v9189_v47 = vpop.eup %9188  ;;  %9202 = vpow2.f32 %v7643_v4  ;;  %v8442_v57 = vpop.f32.mrb[192].mxu1 }
0x16f9   :  { %v9191_v7 = vpop.eup %9190  ;;  %v7365_v29 = vmul.f32 %v9189_v47, %v7213_v13  ;;  %v12348_v60 = vadd.f32 %v8442_v57, %v12325_v3  ;;  %v7236_v38 = vpop.f32.mrb[193].mxu1 }
0x16fa   :  { %v9193_v25 = vpop.eup %9192  ;;  %v7363_v28 = vmul.f32 %v9191_v7, %v7205_v35  ;;  %v12351_v45 = vadd.f32 %v12325_v3, %v7236_v38  ;;  %v8443_v26 = vpop.f32.mrb[194].mxu1 }
0x16fb   :  { %v9195_v37 = vpop.eup %9194  ;;  %7381 = vst.msk [vmem:[%s12470_s15 + $0x10] sm:$0xff] %vm558_vm2, %v7365_v29  ;;  %v7366_v2 = vmul.f32 %v9193_v25, %v7216_v54  ;;  %v7648_v63 = vmul.f32 -1.442695, %v12348_v60  ;;  %v12359_v58 = vadd.f32 %v8443_v26, %v12325_v3  ;;  %v7239_v10 = vpop.f32.mrb[195].mxu1 }
0x16fc   :  { %7379 = vst.msk [vmem:[%s12470_s15] sm:$0xff] %vm558_vm2, %v7363_v28  ;;  %v7364_v46 = vmul.f32 %v9195_v37, %v7208_v61  ;;  %v7646_v41 = vmul.f32 -1.442695, %v12351_v45  ;;  %v12367_v55 = vadd.f32 %v12325_v3, %v7239_v10 }
0x16fd   :  { %7382 = vst.msk [vmem:[%s12470_s15 + $0x18] sm:$0xff] %vm558_vm2, %v7366_v2  ;;  %9204 = vpow2.f32 %v7648_v63  ;;  %v7649_v52 = vmul.f32 -1.442695, %v12359_v58 }
0x16fe   :  { %7380 = vst.msk [vmem:[%s12470_s15 + $0x8] sm:$0xff] %vm558_vm2, %v7364_v46  ;;  %9206 = vpow2.f32 %v7646_v41  ;;  %v7647_v43 = vmul.f32 -1.442695, %v12367_v55 }
0x16ff   :  { %v9197_v12 = vpop.eup %9196  ;;  %9208 = vpow2.f32 %v7649_v52 }
0x1700   :  { %v9199_v27 = vpop.eup %9198  ;;  %v7321_v6 = vadd.f32 1.0, %v9197_v12  ;;  %9210 = vpow2.f32 %v7647_v43  ;;  %v8446_v5 = vpop.f32.mrb[196].mxu1 }
0x1701   :  { %v9201_v11 = vpop.eup %9200  ;;  %v7319_v9 = vadd.f32 1.0, %v9199_v27  ;;  %v12380_v32 = vadd.f32 %v8446_v5, %v12325_v3  ;;  %v7252_v22 = vpop.f32.mrb[197].mxu1 }
0x1702   :  { %v9203_v14 = vpop.eup %9202  ;;  %9212 = vrcp.f32 %v7321_v6  ;;  %v7322_v17 = vadd.f32 1.0, %v9201_v11  ;;  %v12383_v34 = vadd.f32 %v12325_v3, %v7252_v22  ;;  %v8447_v51 = vpop.f32.mrb[198].mxu1 }
0x1703   :  { %9214 = vrcp.f32 %v7319_v9  ;;  %v7320_v13 = vadd.f32 1.0, %v9203_v14  ;;  %v7652_v48 = vmul.f32 -1.442695, %v12380_v32  ;;  %v12387_v35 = vadd.f32 %v8447_v51, %v12325_v3  ;;  %v7255_v33 = vpop.f32.mrb[199].mxu1 }
0x1704   :  { %9216 = vrcp.f32 %v7322_v17  ;;  %v7650_v36 = vmul.f32 -1.442695, %v12383_v34  ;;  %v12391_v54 = vadd.f32 %v12325_v3, %v7255_v33 }
0x1705   :  { %9218 = vrcp.f32 %v7320_v13  ;;  %v7653_v0 = vmul.f32 -1.442695, %v12387_v35 }
0x1706   :  { %9220 = vpow2.f32 %v7652_v48  ;;  %v7651_v15 = vmul.f32 -1.442695, %v12391_v54 }
0x1707   :  { %v9205_v61 = vpop.eup %9204  ;;  %9222 = vpow2.f32 %v7650_v36 }
0x1708   :  { %v9207_v20 = vpop.eup %9206  ;;  %v7325_v18 = vadd.f32 1.0, %v9205_v61  ;;  %9224 = vpow2.f32 %v7653_v0 }
0x1709   :  { %v9209_v42 = vpop.eup %9208  ;;  %v7323_v59 = vadd.f32 1.0, %v9207_v20  ;;  %9226 = vpow2.f32 %v7651_v15 }
0x170a   :  { %v9211_v56 = vpop.eup %9210  ;;  %9228 = vrcp.f32 %v7325_v18  ;;  %v7326_v24 = vadd.f32 1.0, %v9209_v42 }
0x170b   :  { %9230 = vrcp.f32 %v7323_v59  ;;  %v7324_v3 = vadd.f32 1.0, %v9211_v56 }
0x170c   :  { %v9213_v16 = vpop.eup %9212  ;;  %9232 = vrcp.f32 %v7326_v24 }
0x170d   :  { %v9215_v30 = vpop.eup %9214  ;;  %v7369_v53 = vmul.f32 %v9213_v16, %v12332_v44  ;;  %9234 = vrcp.f32 %v7324_v3 }
0x170e   :  { %v9217_v31 = vpop.eup %9216  ;;  %v7367_v62 = vmul.f32 %v9215_v30, %v12335_v49 }
0x170f   :  { %v9219_v1 = vpop.eup %9218  ;;  %7385 = vst.msk [vmem:[%s12470_s15 + $0x30] sm:$0xff] %vm558_vm2, %v7369_v53  ;;  %v7370_v19 = vmul.f32 %v9217_v31, %v12339_v21 }
0x1710   :  { %v9221_v23 = vpop.eup %9220  ;;  %7383 = vst.msk [vmem:[%s12470_s15 + $0x20] sm:$0xff] %vm558_vm2, %v7367_v62  ;;  %v7368_v44 = vmul.f32 %v9219_v1, %v12343_v50 }
0x1711   :  { %v9223_v8 = vpop.eup %9222  ;;  %7386 = vst.msk [vmem:[%s12470_s15 + $0x38] sm:$0xff] %vm558_vm2, %v7370_v19  ;;  %v7329_v49 = vadd.f32 1.0, %v9221_v23 }
0x1712   :  { %v9225_v40 = vpop.eup %9224  ;;  %7384 = vst.msk [vmem:[%s12470_s15 + $0x28] sm:$0xff] %vm558_vm2, %v7368_v44  ;;  %v7327_v21 = vadd.f32 1.0, %v9223_v8 }
0x1713   :  { %v9227_v39 = vpop.eup %9226  ;;  %9236 = vrcp.f32 %v7329_v49  ;;  %v7330_v4 = vadd.f32 1.0, %v9225_v40 }
0x1714   :  { %v9229_v47 = vpop.eup %9228  ;;  %9238 = vrcp.f32 %v7327_v21  ;;  %v7328_v50 = vadd.f32 1.0, %v9227_v39 }
0x1715   :  { %v9231_v57 = vpop.eup %9230  ;;  %v7373_v7 = vmul.f32 %v9229_v47, %v12348_v60  ;;  %9240 = vrcp.f32 %v7330_v4 }
0x1716   :  { %v9233_v29 = vpop.eup %9232  ;;  %v7371_v38 = vmul.f32 %v9231_v57, %v12351_v45  ;;  %9242 = vrcp.f32 %v7328_v50 }
0x1717   :  { %v9235_v25 = vpop.eup %9234  ;;  %7389 = vst.msk [vmem:[%s12470_s15 + $0x50] sm:$0xff] %vm558_vm2, %v7373_v7  ;;  %v7374_v28 = vmul.f32 %v9233_v29, %v12359_v58 }
0x1718   :  { %7387 = vst.msk [vmem:[%s12470_s15 + $0x40] sm:$0xff] %vm558_vm2, %v7371_v38  ;;  %v7372_v60 = vmul.f32 %v9235_v25, %v12367_v55 }
0x1719   :  { %7390 = vst.msk [vmem:[%s12470_s15 + $0x58] sm:$0xff] %vm558_vm2, %v7374_v28 }
0x171a   :  { %7388 = vst.msk [vmem:[%s12470_s15 + $0x48] sm:$0xff] %vm558_vm2, %v7372_v60 }
0x171d   :  { %v9237_v45 = vpop.eup %9236 }
0x171e   :  { %v9239_v26 = vpop.eup %9238  ;;  %v7377_v37 = vmul.f32 %v9237_v45, %v12380_v32 }
0x171f   :  { %v9241_v2 = vpop.eup %9240  ;;  %v7375_v63 = vmul.f32 %v9239_v26, %v12383_v34 }
0x1720   :  { %v9243_v58 = vpop.eup %9242  ;;  %7393 = vst.msk [vmem:[%s12470_s15 + $0x70] sm:$0xff] %vm558_vm2, %v7377_v37  ;;  %v7378_v10 = vmul.f32 %v9241_v2, %v12387_v35 }
0x1721   :  { %7391 = vst.msk [vmem:[%s12470_s15 + $0x60] sm:$0xff] %vm558_vm2, %v7375_v63  ;;  %v7376_v46 = vmul.f32 %v9243_v58, %v12391_v54 }
0x1722   :  { %7394 = vst.msk [vmem:[%s12470_s15 + $0x78] sm:$0xff] %vm558_vm2, %v7378_v10 }
0x1723   :  { %7392 = vst.msk [vmem:[%s12470_s15 + $0x68] sm:$0xff] %vm558_vm2, %v7376_v46 }

</bundles_post_ra>
